<compile_context>
chip_gen: v7x
topology: tpu7x:2x2x1
jax: 0.10.0
libtpu: 0.0.40
codegen_flags: <defaults>
</compile_context>

<pallas_src>
import functools

import jax
import jax.numpy as jnp
from jax import lax
from jax.experimental import pallas as pl
from jax.experimental.pallas import tpu as pltpu


# -----------------------------------------------------------------------------
# Fused whole-model kernel
# -----------------------------------------------------------------------------
def _bilstm_fused_kernel(ids_ref, table_ref,
                         wih0f_ref, wih0b_ref, whh0_ref, b0_ref,
                         m1s_ref, m1w_ref, whh1_ref, b1_ref,
                         emoji_ref, wfch_ref, wfce_ref, bfc_ref,
                         out_ref,
                         xA_ref, xR_ref, seqA_ref, seqR_ref, xg_ref, dsem,
                         *, B, Bp, T, Hp):
    """Fused BiLSTM sentiment forward.

    ids_ref:   (T*Bp,)      int32 token ids in SMEM, row = t*Bp + b (b >= B -> 0)
    table_ref: (V, E)       f32 embedding table, left in HBM (gathered by DMA)
    wih0f/b:   (E, 8Hp)     layer-0 input->gate weights, fwd-only / bwd-only cols
    whh0/1:    (2Hp, 8Hp)   block-diagonal hidden->gate weights
    b0/b1:     (1, 8Hp)     b_ih + b_hh, interleaved [i_f,i_b,f_f,f_b,g_f,g_b,o_f,o_b]
    m1s/m1w:   (2Hp, 8Hp)   layer-1 "same"/"swap" split input->gate weights
    emoji_ref: (Bp, 8)      emoji features zero-padded
    wfch/wfce/bfc:          FC head operating on [h_fwd | h_bwd] and emoji
    out_ref:   (Bp, O)      logits (rows >= B are garbage, sliced off by caller)
    """
    E = xA_ref.shape[1]

    # ---- 1. Embedding row gather: HBM table -> VMEM, only the needed rows ----
    # xA row (t*Bp + b) = emb(token[b, t]);  xR row (t*Bp + b) = emb(token[b, T-1-t])
    copies = []
    k = 0
    for t in range(T):
        for b in range(B):
            r = t * Bp + b
            rr = (T - 1 - t) * Bp + b
            tok = ids_ref[r]                                  # SMEM scalar read
            cA = pltpu.make_async_copy(table_ref.at[pl.ds(tok, 1)],
                                       xA_ref.at[pl.ds(r, 1)], dsem.at[0, k])
            cR = pltpu.make_async_copy(table_ref.at[pl.ds(tok, 1)],
                                       xR_ref.at[pl.ds(rr, 1)], dsem.at[1, k])
            cA.start()
            cR.start()
            copies += [cA, cR]
            k += 1
    # Zero the (disjoint) padded-batch rows while the gather DMAs are in flight.
    if Bp > B:
        zrow = jnp.zeros((Bp - B, E), jnp.float32)
        for t in range(T):
            xA_ref[pl.ds(t * Bp + B, Bp - B), :] = zrow
            xR_ref[pl.ds(t * Bp + B, Bp - B), :] = zrow
    for c in copies:
        c.wait()

    # ---- 2. fused fwd+bwd recurrence (one MXU matmul per step) ----
    def fused_recurrence(whh_ref, write_seq):
        h2 = jnp.zeros((Bp, 2 * Hp), jnp.float32)        # [h_fwd | h_bwd]
        c2 = jnp.zeros((Bp, 2 * Hp), jnp.float32)
        for s in range(T):                               # static -> fully unrolled
            gates = xg_ref[pl.ds(s * Bp, Bp), :] + jnp.dot(
                h2, whh_ref[...], preferred_element_type=jnp.float32)  # (Bp, 8Hp)
            # 128-lane-aligned (whole-vreg) gate slices: i | f | g | o
            i_g = jax.nn.sigmoid(gates[:, 0 * Hp:2 * Hp])
            f_g = jax.nn.sigmoid(gates[:, 2 * Hp:4 * Hp])
            g_g = jnp.tanh(gates[:, 4 * Hp:6 * Hp])
            o_g = jax.nn.sigmoid(gates[:, 6 * Hp:8 * Hp])
            c2 = f_g * c2 + i_g * g_g
            h2 = o_g * jnp.tanh(c2)
            if write_seq:                                # aligned (8,128) stores
                seqA_ref[pl.ds(s * Bp, Bp), :] = h2
                seqR_ref[pl.ds((T - 1 - s) * Bp, Bp), :] = h2
        return h2

    # ---- 3. layer 0: hoisted, time-ALIGNED x-gate projection + recurrence ----
    # fwd gate columns get x(t), bwd gate columns get x(T-1-t): no per-step
    # selects, reversed copies or concatenates in the serial loop.
    xg_ref[...] = (
        jnp.dot(xA_ref[...], wih0f_ref[...], preferred_element_type=jnp.float32)
        + jnp.dot(xR_ref[...], wih0b_ref[...], preferred_element_type=jnp.float32)
        + b0_ref[...])
    fused_recurrence(whh0_ref, write_seq=True)

    # ---- 4. layer 1: aligned x-gates straight from seqA/seqR scratches ----
    xg_ref[...] = (
        jnp.dot(seqA_ref[...], m1s_ref[...], preferred_element_type=jnp.float32)
        + jnp.dot(seqR_ref[...], m1w_ref[...], preferred_element_type=jnp.float32)
        + b1_ref[...])
    h2_final = fused_recurrence(whh1_ref, write_seq=False)

    # ---- 5. FC head: cat([h_fwd_final, h_bwd_final, emoji]) @ W_fc.T + b ----
    out_ref[...] = (
        jnp.dot(h2_final, wfch_ref[...], preferred_element_type=jnp.float32)
        + jnp.dot(emoji_ref[...], wfce_ref[...], preferred_element_type=jnp.float32)
        + bfc_ref[...])


# -----------------------------------------------------------------------------
# Host-side weight packing (PyTorch layout -> fused-kernel layout, Hp-padded)
# Gate-direction column layout (width 8Hp): for gate k in {i,f,g,o} and
# direction d in {fwd,bwd}, columns [(2k+d)*Hp, (2k+d)*Hp + H) hold real values.
# -----------------------------------------------------------------------------
def _pack_layer0(pf, pb, H, Hp):
    E = pf["w_ih"].shape[1]
    wih_f = jnp.zeros((E, 8 * Hp), jnp.float32)
    wih_b = jnp.zeros((E, 8 * Hp), jnp.float32)
    whh = jnp.zeros((2 * Hp, 8 * Hp), jnp.float32)
    bias = jnp.zeros((1, 8 * Hp), jnp.float32)
    for k in range(4):                                   # PyTorch gate order i,f,g,o
        rows = slice(k * H, (k + 1) * H)
        cf, cb = 2 * k * Hp, (2 * k + 1) * Hp
        wih_f = wih_f.at[:, cf:cf + H].set(pf["w_ih"][rows, :].T.astype(jnp.float32))
        wih_b = wih_b.at[:, cb:cb + H].set(pb["w_ih"][rows, :].T.astype(jnp.float32))
        whh = whh.at[0:H, cf:cf + H].set(pf["w_hh"][rows, :].T.astype(jnp.float32))
        whh = whh.at[Hp:Hp + H, cb:cb + H].set(pb["w_hh"][rows, :].T.astype(jnp.float32))
        bias = bias.at[0, cf:cf + H].set(
            (pf["b_ih"] + pf["b_hh"])[rows].astype(jnp.float32))
        bias = bias.at[0, cb:cb + H].set(
            (pb["b_ih"] + pb["b_hh"])[rows].astype(jnp.float32))
    return wih_f, wih_b, whh, bias


def _pack_layer1(pf, pb, H, Hp):
    # seqA[s] = [h_f(s) | h_b(T-1-s)],  seqR[s] = [h_f(T-1-s) | h_b(s)]
    # aligned x-gates(s) = seqA[s] @ m_same + seqR[s] @ m_swap + bias
    m_same = jnp.zeros((2 * Hp, 8 * Hp), jnp.float32)
    m_swap = jnp.zeros((2 * Hp, 8 * Hp), jnp.float32)
    whh = jnp.zeros((2 * Hp, 8 * Hp), jnp.float32)
    bias = jnp.zeros((1, 8 * Hp), jnp.float32)
    for k in range(4):
        rows = slice(k * H, (k + 1) * H)
        cf, cb = 2 * k * Hp, (2 * k + 1) * Hp
        # fwd gate cols: h_f(s) (seqA top) and h_b(s) (seqR bottom)
        m_same = m_same.at[0:H, cf:cf + H].set(
            pf["w_ih"][rows, 0:H].T.astype(jnp.float32))
        m_swap = m_swap.at[Hp:Hp + H, cf:cf + H].set(
            pf["w_ih"][rows, H:2 * H].T.astype(jnp.float32))
        # bwd gate cols: h_f(T-1-s) (seqR top) and h_b(T-1-s) (seqA bottom)
        m_swap = m_swap.at[0:H, cb:cb + H].set(
            pb["w_ih"][rows, 0:H].T.astype(jnp.float32))
        m_same = m_same.at[Hp:Hp + H, cb:cb + H].set(
            pb["w_ih"][rows, H:2 * H].T.astype(jnp.float32))
        whh = whh.at[0:H, cf:cf + H].set(pf["w_hh"][rows, :].T.astype(jnp.float32))
        whh = whh.at[Hp:Hp + H, cb:cb + H].set(pb["w_hh"][rows, :].T.astype(jnp.float32))
        bias = bias.at[0, cf:cf + H].set(
            (pf["b_ih"] + pf["b_hh"])[rows].astype(jnp.float32))
        bias = bias.at[0, cb:cb + H].set(
            (pb["b_ih"] + pb["b_hh"])[rows].astype(jnp.float32))
    return m_same, m_swap, whh, bias


# -----------------------------------------------------------------------------
# Full forward pass (matches BiLSTMSentimentModel.forward in eval mode)
# -----------------------------------------------------------------------------
def bilstm_sentiment_forward(params, text, emoji_feature):
    # text: (B, T) int token ids ; emoji_feature: (B, 3) float32
    B, T = text.shape
    V, E = params["embedding"].shape
    H = params["lstm"][0]["fwd"]["w_hh"].shape[1]
    O = params["fc_w"].shape[0]
    assert len(params["lstm"]) == 2, "kernel is specialized for n_layers=2"

    Bp = max(8, ((B + 7) // 8) * 8)        # batch padded to a sublane tile
    Hp = max(64, ((H + 63) // 64) * 64)    # hidden padded so 2*Hp = one 128-lane vreg

    # token ids, time-major (row = t*Bp + b), zero for padded batch rows
    ids = jnp.zeros((T, Bp), jnp.int32).at[:, :B].set(
        text.astype(jnp.int32).T).reshape(T * Bp)

    table = params["embedding"].astype(jnp.float32)        # stays in HBM

    l0, l1 = params["lstm"]
    wih0f, wih0b, whh0, b0 = _pack_layer0(l0["fwd"], l0["bwd"], H, Hp)
    m1s, m1w, whh1, b1 = _pack_layer1(l1["fwd"], l1["bwd"], H, Hp)

    emoji_pad = jnp.zeros((Bp, 8), jnp.float32).at[:B, :3].set(
        emoji_feature.astype(jnp.float32))
    fc_w = params["fc_w"].astype(jnp.float32)
    wfch = jnp.zeros((2 * Hp, O), jnp.float32)
    wfch = wfch.at[0:H, :].set(fc_w[:, 0:H].T)
    wfch = wfch.at[Hp:Hp + H, :].set(fc_w[:, H:2 * H].T)
    wfce = jnp.zeros((8, O), jnp.float32).at[0:3, :].set(fc_w[:, 2 * H:].T)
    bfc = params["fc_b"].astype(jnp.float32)[None, :]

    kernel = functools.partial(_bilstm_fused_kernel, B=B, Bp=Bp, T=T, Hp=Hp)
    vmem = pl.BlockSpec(memory_space=pltpu.MemorySpace.VMEM)

    out = pl.pallas_call(
        kernel,
        out_shape=jax.ShapeDtypeStruct((Bp, O), jnp.float32),
        in_specs=[
            pl.BlockSpec(memory_space=pltpu.MemorySpace.SMEM),  # ids (scalar path)
            pl.BlockSpec(memory_space=pl.ANY),                  # table stays in HBM
            vmem, vmem, vmem, vmem,                             # layer-0 weights
            vmem, vmem, vmem, vmem,                             # layer-1 weights
            vmem, vmem, vmem, vmem,                             # emoji + FC head
        ],
        out_specs=vmem,
        scratch_shapes=[
            pltpu.VMEM((T * Bp, E), jnp.float32),        # xA: gathered emb, fwd time
            pltpu.VMEM((T * Bp, E), jnp.float32),        # xR: gathered emb, rev time
            pltpu.VMEM((T * Bp, 2 * Hp), jnp.float32),   # seqA: layer-0 outputs
            pltpu.VMEM((T * Bp, 2 * Hp), jnp.float32),   # seqR: reversed row blocks
            pltpu.VMEM((T * Bp, 8 * Hp), jnp.float32),   # xg: hoisted aligned x-gates
            pltpu.SemaphoreType.DMA((2, T * B)),         # gather DMA semaphores
        ],
        cost_estimate=pl.CostEstimate(flops=40_000_000, transcendentals=120_000,
                                      bytes_accessed=2_000_000),
    )(ids, table, wih0f, wih0b, whh0, b0, m1s, m1w, whh1, b1,
      emoji_pad, wfch, wfce, bfc)
    return out[:B]


# -----------------------------------------------------------------------------
# Pure-JAX reference (same math, PyTorch layout) for a built-in self-check
# -----------------------------------------------------------------------------
def _reference_forward(params, text, emoji_feature):
    H = params["lstm"][0]["fwd"]["w_hh"].shape[1]
    emb = jnp.take(params["embedding"], text, axis=0)            # (B, T, E)
    x = jnp.transpose(emb, (1, 0, 2))                            # (T, B, E)

    def run_dir(x_tbe, p):
        b = p["b_ih"] + p["b_hh"]

        def step(carry, x_t):
            h, c = carry
            g = x_t @ p["w_ih"].T + h @ p["w_hh"].T + b
            i = jax.nn.sigmoid(g[:, 0 * H:1 * H])
            f = jax.nn.sigmoid(g[:, 1 * H:2 * H])
            gg = jnp.tanh(g[:, 2 * H:3 * H])
            o = jax.nn.sigmoid(g[:, 3 * H:4 * H])
            c = f * c + i * gg
            h = o * jnp.tanh(c)
            return (h, c), h

        Bb = x_tbe.shape[1]
        z = jnp.zeros((Bb, H), jnp.float32)
        (hT, _), hs = lax.scan(step, (z, z), x_tbe)
        return hs, hT

    h_f = h_b = None
    for layer_p in params["lstm"]:
        out_f, h_f = run_dir(x, layer_p["fwd"])
        out_b_rev, h_b = run_dir(x[::-1], layer_p["bwd"])
        x = jnp.concatenate([out_f, out_b_rev[::-1]], axis=-1)
    hidden = jnp.concatenate([h_f, h_b], axis=1)
    combined = jnp.concatenate([hidden, emoji_feature], axis=1)
    return combined @ params["fc_w"].T + params["fc_b"]


# -----------------------------------------------------------------------------
# Parameters (deterministic synthetic init, PyTorch shapes)
# -----------------------------------------------------------------------------
def init_params(key, vocab_size, embedding_dim, hidden_dim, output_dim,
                n_layers=2):
    def u(k, shape, bound):
        return jax.random.uniform(k, shape, jnp.float32, -bound, bound)

    keys = iter(jax.random.split(key, 64))
    params = {}

    emb = jax.random.normal(next(keys), (vocab_size, embedding_dim), jnp.float32)
    emb = emb.at[0].set(0.0)                 # padding_idx=0 row is zeros
    params["embedding"] = emb

    H = hidden_dim
    bound = float(1.0 / (H ** 0.5))
    params["lstm"] = []
    for layer in range(n_layers):
        in_dim = embedding_dim if layer == 0 else 2 * hidden_dim
        layer_p = {}
        for direction in ("fwd", "bwd"):     # bidirectional=True
            layer_p[direction] = dict(
                w_ih=u(next(keys), (4 * H, in_dim), bound),
                w_hh=u(next(keys), (4 * H, H), bound),
                b_ih=u(next(keys), (4 * H,), bound),
                b_hh=u(next(keys), (4 * H,), bound),
            )
        params["lstm"].append(layer_p)

    fc_in = 2 * hidden_dim + 3
    fb = float(1.0 / (fc_in ** 0.5))
    params["fc_w"] = u(next(keys), (output_dim, fc_in), fb)
    params["fc_b"] = u(next(keys), (output_dim,), fb)
    return params


# -----------------------------------------------------------------------------
if __name__ == "__main__":
    vocab_size, embedding_dim, hidden_dim, output_dim = 50, 32, 32, 3
    B, T = 2, 8

    key = jax.random.PRNGKey(0)
    kp, kt, ke = jax.random.split(key, 3)
    params = init_params(kp, vocab_size, embedding_dim, hidden_dim, output_dim)

    text = jax.random.randint(kt, (B, T), 1, vocab_size, dtype=jnp.int32)
    text = text.at[:, -2:].set(0)                            # a few padding tokens
    emoji_feature = jax.random.uniform(ke, (B, 3), dtype=jnp.float32)

    # TODO(synk): dropout layers are identity here (eval-mode inference kernel).
    logits = jax.jit(bilstm_sentiment_forward)(params, text, emoji_feature)
    jax.block_until_ready(logits)
    assert logits.shape == (B, output_dim) and logits.dtype == jnp.float32

    ref = _reference_forward(params, text, emoji_feature)
    assert bool(jnp.all(jnp.isfinite(logits)))
    assert jnp.allclose(logits, ref, atol=2e-4, rtol=2e-3), (logits, ref)
    print("KERNEL_OK")
</pallas_src>

<mosaic_0001>
module attributes {stable_mosaic.version = 11 : i64} {
  func.func @_bilstm_fused_kernel(%arg0: memref<64xi32, #tpu.memory_space<smem>>, %arg1: memref<50x32xf32, #tpu.memory_space<any>>, %arg2: memref<32x512xf32, #tpu.memory_space<vmem>>, %arg3: memref<32x512xf32, #tpu.memory_space<vmem>>, %arg4: memref<128x512xf32, #tpu.memory_space<vmem>>, %arg5: memref<1x512xf32, #tpu.memory_space<vmem>>, %arg6: memref<128x512xf32, #tpu.memory_space<vmem>>, %arg7: memref<128x512xf32, #tpu.memory_space<vmem>>, %arg8: memref<128x512xf32, #tpu.memory_space<vmem>>, %arg9: memref<1x512xf32, #tpu.memory_space<vmem>>, %arg10: memref<8x8xf32, #tpu.memory_space<vmem>>, %arg11: memref<128x3xf32, #tpu.memory_space<vmem>>, %arg12: memref<8x3xf32, #tpu.memory_space<vmem>>, %arg13: memref<1x3xf32, #tpu.memory_space<vmem>>, %arg14: memref<8x3xf32, #tpu.memory_space<vmem>>, %arg15: memref<64x32xf32, #tpu.memory_space<vmem>>, %arg16: memref<64x32xf32, #tpu.memory_space<vmem>>, %arg17: memref<64x128xf32, #tpu.memory_space<vmem>>, %arg18: memref<64x128xf32, #tpu.memory_space<vmem>>, %arg19: memref<64x512xf32, #tpu.memory_space<vmem>>, %arg20: memref<2x16x!tpu.dma_semaphore, #tpu.memory_space<semaphore_mem>>) attributes {dimension_semantics = [], scalar_prefetch = 0 : i64, scratch_operands = 6 : i64, tpu.core_type = #tpu.core_type<tc>} {
    %c0 = arith.constant 0 : index
    %0 = memref.load %arg0[%c0] : memref<64xi32, #tpu.memory_space<smem>>
    %c0_i32 = arith.constant 0 : i32
    %c0_i32_0 = arith.constant 0 : i32
    %c0_i32_1 = arith.constant 0 : i32
    %1 = tpu.memref_slice %arg1[%0, %c0_i32_1] : memref<50x32xf32, #tpu.memory_space<any>> -> memref<1x32xf32, #tpu.memory_space<any>>
    %c0_i32_2 = arith.constant 0 : i32
    %c0_i32_3 = arith.constant 0 : i32
    %2 = tpu.memref_slice %arg15[%c0_i32_2, %c0_i32_3] : memref<64x32xf32, #tpu.memory_space<vmem>> -> memref<1x32xf32, #tpu.memory_space<vmem>>
    %3 = tpu.memref_slice %arg20[%c0_i32, %c0_i32_0] : memref<2x16x!tpu.dma_semaphore, #tpu.memory_space<semaphore_mem>> -> memref<1x1x!tpu.dma_semaphore, #tpu.memory_space<semaphore_mem>>
    %4 = tpu.memref_squeeze %3 : memref<1x1x!tpu.dma_semaphore, #tpu.memory_space<semaphore_mem>> -> memref<!tpu.dma_semaphore, #tpu.memory_space<semaphore_mem>>
    tpu.enqueue_dma source(%1 : memref<1x32xf32, #tpu.memory_space<any>>) target(%2 : memref<1x32xf32, #tpu.memory_space<vmem>>) target_semaphore(%4 : memref<!tpu.dma_semaphore, #tpu.memory_space<semaphore_mem>>)
    %c1_i32 = arith.constant 1 : i32
    %c0_i32_4 = arith.constant 0 : i32
    %c0_i32_5 = arith.constant 0 : i32
    %5 = tpu.memref_slice %arg1[%0, %c0_i32_5] : memref<50x32xf32, #tpu.memory_space<any>> -> memref<1x32xf32, #tpu.memory_space<any>>
    %c56_i32 = arith.constant 56 : i32
    %c0_i32_6 = arith.constant 0 : i32
    %6 = tpu.memref_slice %arg16[%c56_i32, %c0_i32_6] : memref<64x32xf32, #tpu.memory_space<vmem>> -> memref<1x32xf32, #tpu.memory_space<vmem>>
    %7 = tpu.memref_slice %arg20[%c1_i32, %c0_i32_4] : memref<2x16x!tpu.dma_semaphore, #tpu.memory_space<semaphore_mem>> -> memref<1x1x!tpu.dma_semaphore, #tpu.memory_space<semaphore_mem>>
    %8 = tpu.memref_squeeze %7 : memref<1x1x!tpu.dma_semaphore, #tpu.memory_space<semaphore_mem>> -> memref<!tpu.dma_semaphore, #tpu.memory_space<semaphore_mem>>
    tpu.enqueue_dma source(%5 : memref<1x32xf32, #tpu.memory_space<any>>) target(%6 : memref<1x32xf32, #tpu.memory_space<vmem>>) target_semaphore(%8 : memref<!tpu.dma_semaphore, #tpu.memory_space<semaphore_mem>>)
    %c1 = arith.constant 1 : index
    %9 = memref.load %arg0[%c1] : memref<64xi32, #tpu.memory_space<smem>>
    %c0_i32_7 = arith.constant 0 : i32
    %c1_i32_8 = arith.constant 1 : i32
    %c0_i32_9 = arith.constant 0 : i32
    %10 = tpu.memref_slice %arg1[%9, %c0_i32_9] : memref<50x32xf32, #tpu.memory_space<any>> -> memref<1x32xf32, #tpu.memory_space<any>>
    %c1_i32_10 = arith.constant 1 : i32
    %c0_i32_11 = arith.constant 0 : i32
    %11 = tpu.memref_slice %arg15[%c1_i32_10, %c0_i32_11] : memref<64x32xf32, #tpu.memory_space<vmem>> -> memref<1x32xf32, #tpu.memory_space<vmem>>
    %12 = tpu.memref_slice %arg20[%c0_i32_7, %c1_i32_8] : memref<2x16x!tpu.dma_semaphore, #tpu.memory_space<semaphore_mem>> -> memref<1x1x!tpu.dma_semaphore, #tpu.memory_space<semaphore_mem>>
    %13 = tpu.memref_squeeze %12 : memref<1x1x!tpu.dma_semaphore, #tpu.memory_space<semaphore_mem>> -> memref<!tpu.dma_semaphore, #tpu.memory_space<semaphore_mem>>
    tpu.enqueue_dma source(%10 : memref<1x32xf32, #tpu.memory_space<any>>) target(%11 : memref<1x32xf32, #tpu.memory_space<vmem>>) target_semaphore(%13 : memref<!tpu.dma_semaphore, #tpu.memory_space<semaphore_mem>>)
    %c1_i32_12 = arith.constant 1 : i32
    %c1_i32_13 = arith.constant 1 : i32
    %c0_i32_14 = arith.constant 0 : i32
    %14 = tpu.memref_slice %arg1[%9, %c0_i32_14] : memref<50x32xf32, #tpu.memory_space<any>> -> memref<1x32xf32, #tpu.memory_space<any>>
    %c57_i32 = arith.constant 57 : i32
    %c0_i32_15 = arith.constant 0 : i32
    %15 = tpu.memref_slice %arg16[%c57_i32, %c0_i32_15] : memref<64x32xf32, #tpu.memory_space<vmem>> -> memref<1x32xf32, #tpu.memory_space<vmem>>
    %16 = tpu.memref_slice %arg20[%c1_i32_12, %c1_i32_13] : memref<2x16x!tpu.dma_semaphore, #tpu.memory_space<semaphore_mem>> -> memref<1x1x!tpu.dma_semaphore, #tpu.memory_space<semaphore_mem>>
    %17 = tpu.memref_squeeze %16 : memref<1x1x!tpu.dma_semaphore, #tpu.memory_space<semaphore_mem>> -> memref<!tpu.dma_semaphore, #tpu.memory_space<semaphore_mem>>
    tpu.enqueue_dma source(%14 : memref<1x32xf32, #tpu.memory_space<any>>) target(%15 : memref<1x32xf32, #tpu.memory_space<vmem>>) target_semaphore(%17 : memref<!tpu.dma_semaphore, #tpu.memory_space<semaphore_mem>>)
    %c8 = arith.constant 8 : index
    %18 = memref.load %arg0[%c8] : memref<64xi32, #tpu.memory_space<smem>>
    %c0_i32_16 = arith.constant 0 : i32
    %c2_i32 = arith.constant 2 : i32
    %c0_i32_17 = arith.constant 0 : i32
    %19 = tpu.memref_slice %arg1[%18, %c0_i32_17] : memref<50x32xf32, #tpu.memory_space<any>> -> memref<1x32xf32, #tpu.memory_space<any>>
    %c8_i32 = arith.constant 8 : i32
    %c0_i32_18 = arith.constant 0 : i32
    %20 = tpu.memref_slice %arg15[%c8_i32, %c0_i32_18] : memref<64x32xf32, #tpu.memory_space<vmem>> -> memref<1x32xf32, #tpu.memory_space<vmem>>
    %21 = tpu.memref_slice %arg20[%c0_i32_16, %c2_i32] : memref<2x16x!tpu.dma_semaphore, #tpu.memory_space<semaphore_mem>> -> memref<1x1x!tpu.dma_semaphore, #tpu.memory_space<semaphore_mem>>
    %22 = tpu.memref_squeeze %21 : memref<1x1x!tpu.dma_semaphore, #tpu.memory_space<semaphore_mem>> -> memref<!tpu.dma_semaphore, #tpu.memory_space<semaphore_mem>>
    tpu.enqueue_dma source(%19 : memref<1x32xf32, #tpu.memory_space<any>>) target(%20 : memref<1x32xf32, #tpu.memory_space<vmem>>) target_semaphore(%22 : memref<!tpu.dma_semaphore, #tpu.memory_space<semaphore_mem>>)
    %c1_i32_19 = arith.constant 1 : i32
    %c2_i32_20 = arith.constant 2 : i32
    %c0_i32_21 = arith.constant 0 : i32
    %23 = tpu.memref_slice %arg1[%18, %c0_i32_21] : memref<50x32xf32, #tpu.memory_space<any>> -> memref<1x32xf32, #tpu.memory_space<any>>
    %c48_i32 = arith.constant 48 : i32
    %c0_i32_22 = arith.constant 0 : i32
    %24 = tpu.memref_slice %arg16[%c48_i32, %c0_i32_22] : memref<64x32xf32, #tpu.memory_space<vmem>> -> memref<1x32xf32, #tpu.memory_space<vmem>>
    %25 = tpu.memref_slice %arg20[%c1_i32_19, %c2_i32_20] : memref<2x16x!tpu.dma_semaphore, #tpu.memory_space<semaphore_mem>> -> memref<1x1x!tpu.dma_semaphore, #tpu.memory_space<semaphore_mem>>
    %26 = tpu.memref_squeeze %25 : memref<1x1x!tpu.dma_semaphore, #tpu.memory_space<semaphore_mem>> -> memref<!tpu.dma_semaphore, #tpu.memory_space<semaphore_mem>>
    tpu.enqueue_dma source(%23 : memref<1x32xf32, #tpu.memory_space<any>>) target(%24 : memref<1x32xf32, #tpu.memory_space<vmem>>) target_semaphore(%26 : memref<!tpu.dma_semaphore, #tpu.memory_space<semaphore_mem>>)
    %c9 = arith.constant 9 : index
    %27 = memref.load %arg0[%c9] : memref<64xi32, #tpu.memory_space<smem>>
    %c0_i32_23 = arith.constant 0 : i32
    %c3_i32 = arith.constant 3 : i32
    %c0_i32_24 = arith.constant 0 : i32
    %28 = tpu.memref_slice %arg1[%27, %c0_i32_24] : memref<50x32xf32, #tpu.memory_space<any>> -> memref<1x32xf32, #tpu.memory_space<any>>
    %c9_i32 = arith.constant 9 : i32
    %c0_i32_25 = arith.constant 0 : i32
    %29 = tpu.memref_slice %arg15[%c9_i32, %c0_i32_25] : memref<64x32xf32, #tpu.memory_space<vmem>> -> memref<1x32xf32, #tpu.memory_space<vmem>>
    %30 = tpu.memref_slice %arg20[%c0_i32_23, %c3_i32] : memref<2x16x!tpu.dma_semaphore, #tpu.memory_space<semaphore_mem>> -> memref<1x1x!tpu.dma_semaphore, #tpu.memory_space<semaphore_mem>>
    %31 = tpu.memref_squeeze %30 : memref<1x1x!tpu.dma_semaphore, #tpu.memory_space<semaphore_mem>> -> memref<!tpu.dma_semaphore, #tpu.memory_space<semaphore_mem>>
    tpu.enqueue_dma source(%28 : memref<1x32xf32, #tpu.memory_space<any>>) target(%29 : memref<1x32xf32, #tpu.memory_space<vmem>>) target_semaphore(%31 : memref<!tpu.dma_semaphore, #tpu.memory_space<semaphore_mem>>)
    %c1_i32_26 = arith.constant 1 : i32
    %c3_i32_27 = arith.constant 3 : i32
    %c0_i32_28 = arith.constant 0 : i32
    %32 = tpu.memref_slice %arg1[%27, %c0_i32_28] : memref<50x32xf32, #tpu.memory_space<any>> -> memref<1x32xf32, #tpu.memory_space<any>>
    %c49_i32 = arith.constant 49 : i32
    %c0_i32_29 = arith.constant 0 : i32
    %33 = tpu.memref_slice %arg16[%c49_i32, %c0_i32_29] : memref<64x32xf32, #tpu.memory_space<vmem>> -> memref<1x32xf32, #tpu.memory_space<vmem>>
    %34 = tpu.memref_slice %arg20[%c1_i32_26, %c3_i32_27] : memref<2x16x!tpu.dma_semaphore, #tpu.memory_space<semaphore_mem>> -> memref<1x1x!tpu.dma_semaphore, #tpu.memory_space<semaphore_mem>>
    %35 = tpu.memref_squeeze %34 : memref<1x1x!tpu.dma_semaphore, #tpu.memory_space<semaphore_mem>> -> memref<!tpu.dma_semaphore, #tpu.memory_space<semaphore_mem>>
    tpu.enqueue_dma source(%32 : memref<1x32xf32, #tpu.memory_space<any>>) target(%33 : memref<1x32xf32, #tpu.memory_space<vmem>>) target_semaphore(%35 : memref<!tpu.dma_semaphore, #tpu.memory_space<semaphore_mem>>)
    %c16 = arith.constant 16 : index
    %36 = memref.load %arg0[%c16] : memref<64xi32, #tpu.memory_space<smem>>
    %c0_i32_30 = arith.constant 0 : i32
    %c4_i32 = arith.constant 4 : i32
    %c0_i32_31 = arith.constant 0 : i32
    %37 = tpu.memref_slice %arg1[%36, %c0_i32_31] : memref<50x32xf32, #tpu.memory_space<any>> -> memref<1x32xf32, #tpu.memory_space<any>>
    %c16_i32 = arith.constant 16 : i32
    %c0_i32_32 = arith.constant 0 : i32
    %38 = tpu.memref_slice %arg15[%c16_i32, %c0_i32_32] : memref<64x32xf32, #tpu.memory_space<vmem>> -> memref<1x32xf32, #tpu.memory_space<vmem>>
    %39 = tpu.memref_slice %arg20[%c0_i32_30, %c4_i32] : memref<2x16x!tpu.dma_semaphore, #tpu.memory_space<semaphore_mem>> -> memref<1x1x!tpu.dma_semaphore, #tpu.memory_space<semaphore_mem>>
    %40 = tpu.memref_squeeze %39 : memref<1x1x!tpu.dma_semaphore, #tpu.memory_space<semaphore_mem>> -> memref<!tpu.dma_semaphore, #tpu.memory_space<semaphore_mem>>
    tpu.enqueue_dma source(%37 : memref<1x32xf32, #tpu.memory_space<any>>) target(%38 : memref<1x32xf32, #tpu.memory_space<vmem>>) target_semaphore(%40 : memref<!tpu.dma_semaphore, #tpu.memory_space<semaphore_mem>>)
    %c1_i32_33 = arith.constant 1 : i32
    %c4_i32_34 = arith.constant 4 : i32
    %c0_i32_35 = arith.constant 0 : i32
    %41 = tpu.memref_slice %arg1[%36, %c0_i32_35] : memref<50x32xf32, #tpu.memory_space<any>> -> memref<1x32xf32, #tpu.memory_space<any>>
    %c40_i32 = arith.constant 40 : i32
    %c0_i32_36 = arith.constant 0 : i32
    %42 = tpu.memref_slice %arg16[%c40_i32, %c0_i32_36] : memref<64x32xf32, #tpu.memory_space<vmem>> -> memref<1x32xf32, #tpu.memory_space<vmem>>
    %43 = tpu.memref_slice %arg20[%c1_i32_33, %c4_i32_34] : memref<2x16x!tpu.dma_semaphore, #tpu.memory_space<semaphore_mem>> -> memref<1x1x!tpu.dma_semaphore, #tpu.memory_space<semaphore_mem>>
    %44 = tpu.memref_squeeze %43 : memref<1x1x!tpu.dma_semaphore, #tpu.memory_space<semaphore_mem>> -> memref<!tpu.dma_semaphore, #tpu.memory_space<semaphore_mem>>
    tpu.enqueue_dma source(%41 : memref<1x32xf32, #tpu.memory_space<any>>) target(%42 : memref<1x32xf32, #tpu.memory_space<vmem>>) target_semaphore(%44 : memref<!tpu.dma_semaphore, #tpu.memory_space<semaphore_mem>>)
    %c17 = arith.constant 17 : index
    %45 = memref.load %arg0[%c17] : memref<64xi32, #tpu.memory_space<smem>>
    %c0_i32_37 = arith.constant 0 : i32
    %c5_i32 = arith.constant 5 : i32
    %c0_i32_38 = arith.constant 0 : i32
    %46 = tpu.memref_slice %arg1[%45, %c0_i32_38] : memref<50x32xf32, #tpu.memory_space<any>> -> memref<1x32xf32, #tpu.memory_space<any>>
    %c17_i32 = arith.constant 17 : i32
    %c0_i32_39 = arith.constant 0 : i32
    %47 = tpu.memref_slice %arg15[%c17_i32, %c0_i32_39] : memref<64x32xf32, #tpu.memory_space<vmem>> -> memref<1x32xf32, #tpu.memory_space<vmem>>
    %48 = tpu.memref_slice %arg20[%c0_i32_37, %c5_i32] : memref<2x16x!tpu.dma_semaphore, #tpu.memory_space<semaphore_mem>> -> memref<1x1x!tpu.dma_semaphore, #tpu.memory_space<semaphore_mem>>
    %49 = tpu.memref_squeeze %48 : memref<1x1x!tpu.dma_semaphore, #tpu.memory_space<semaphore_mem>> -> memref<!tpu.dma_semaphore, #tpu.memory_space<semaphore_mem>>
    tpu.enqueue_dma source(%46 : memref<1x32xf32, #tpu.memory_space<any>>) target(%47 : memref<1x32xf32, #tpu.memory_space<vmem>>) target_semaphore(%49 : memref<!tpu.dma_semaphore, #tpu.memory_space<semaphore_mem>>)
    %c1_i32_40 = arith.constant 1 : i32
    %c5_i32_41 = arith.constant 5 : i32
    %c0_i32_42 = arith.constant 0 : i32
    %50 = tpu.memref_slice %arg1[%45, %c0_i32_42] : memref<50x32xf32, #tpu.memory_space<any>> -> memref<1x32xf32, #tpu.memory_space<any>>
    %c41_i32 = arith.constant 41 : i32
    %c0_i32_43 = arith.constant 0 : i32
    %51 = tpu.memref_slice %arg16[%c41_i32, %c0_i32_43] : memref<64x32xf32, #tpu.memory_space<vmem>> -> memref<1x32xf32, #tpu.memory_space<vmem>>
    %52 = tpu.memref_slice %arg20[%c1_i32_40, %c5_i32_41] : memref<2x16x!tpu.dma_semaphore, #tpu.memory_space<semaphore_mem>> -> memref<1x1x!tpu.dma_semaphore, #tpu.memory_space<semaphore_mem>>
    %53 = tpu.memref_squeeze %52 : memref<1x1x!tpu.dma_semaphore, #tpu.memory_space<semaphore_mem>> -> memref<!tpu.dma_semaphore, #tpu.memory_space<semaphore_mem>>
    tpu.enqueue_dma source(%50 : memref<1x32xf32, #tpu.memory_space<any>>) target(%51 : memref<1x32xf32, #tpu.memory_space<vmem>>) target_semaphore(%53 : memref<!tpu.dma_semaphore, #tpu.memory_space<semaphore_mem>>)
    %c24 = arith.constant 24 : index
    %54 = memref.load %arg0[%c24] : memref<64xi32, #tpu.memory_space<smem>>
    %c0_i32_44 = arith.constant 0 : i32
    %c6_i32 = arith.constant 6 : i32
    %c0_i32_45 = arith.constant 0 : i32
    %55 = tpu.memref_slice %arg1[%54, %c0_i32_45] : memref<50x32xf32, #tpu.memory_space<any>> -> memref<1x32xf32, #tpu.memory_space<any>>
    %c24_i32 = arith.constant 24 : i32
    %c0_i32_46 = arith.constant 0 : i32
    %56 = tpu.memref_slice %arg15[%c24_i32, %c0_i32_46] : memref<64x32xf32, #tpu.memory_space<vmem>> -> memref<1x32xf32, #tpu.memory_space<vmem>>
    %57 = tpu.memref_slice %arg20[%c0_i32_44, %c6_i32] : memref<2x16x!tpu.dma_semaphore, #tpu.memory_space<semaphore_mem>> -> memref<1x1x!tpu.dma_semaphore, #tpu.memory_space<semaphore_mem>>
    %58 = tpu.memref_squeeze %57 : memref<1x1x!tpu.dma_semaphore, #tpu.memory_space<semaphore_mem>> -> memref<!tpu.dma_semaphore, #tpu.memory_space<semaphore_mem>>
    tpu.enqueue_dma source(%55 : memref<1x32xf32, #tpu.memory_space<any>>) target(%56 : memref<1x32xf32, #tpu.memory_space<vmem>>) target_semaphore(%58 : memref<!tpu.dma_semaphore, #tpu.memory_space<semaphore_mem>>)
    %c1_i32_47 = arith.constant 1 : i32
    %c6_i32_48 = arith.constant 6 : i32
    %c0_i32_49 = arith.constant 0 : i32
    %59 = tpu.memref_slice %arg1[%54, %c0_i32_49] : memref<50x32xf32, #tpu.memory_space<any>> -> memref<1x32xf32, #tpu.memory_space<any>>
    %c32_i32 = arith.constant 32 : i32
    %c0_i32_50 = arith.constant 0 : i32
    %60 = tpu.memref_slice %arg16[%c32_i32, %c0_i32_50] : memref<64x32xf32, #tpu.memory_space<vmem>> -> memref<1x32xf32, #tpu.memory_space<vmem>>
    %61 = tpu.memref_slice %arg20[%c1_i32_47, %c6_i32_48] : memref<2x16x!tpu.dma_semaphore, #tpu.memory_space<semaphore_mem>> -> memref<1x1x!tpu.dma_semaphore, #tpu.memory_space<semaphore_mem>>
    %62 = tpu.memref_squeeze %61 : memref<1x1x!tpu.dma_semaphore, #tpu.memory_space<semaphore_mem>> -> memref<!tpu.dma_semaphore, #tpu.memory_space<semaphore_mem>>
    tpu.enqueue_dma source(%59 : memref<1x32xf32, #tpu.memory_space<any>>) target(%60 : memref<1x32xf32, #tpu.memory_space<vmem>>) target_semaphore(%62 : memref<!tpu.dma_semaphore, #tpu.memory_space<semaphore_mem>>)
    %c25 = arith.constant 25 : index
    %63 = memref.load %arg0[%c25] : memref<64xi32, #tpu.memory_space<smem>>
    %c0_i32_51 = arith.constant 0 : i32
    %c7_i32 = arith.constant 7 : i32
    %c0_i32_52 = arith.constant 0 : i32
    %64 = tpu.memref_slice %arg1[%63, %c0_i32_52] : memref<50x32xf32, #tpu.memory_space<any>> -> memref<1x32xf32, #tpu.memory_space<any>>
    %c25_i32 = arith.constant 25 : i32
    %c0_i32_53 = arith.constant 0 : i32
    %65 = tpu.memref_slice %arg15[%c25_i32, %c0_i32_53] : memref<64x32xf32, #tpu.memory_space<vmem>> -> memref<1x32xf32, #tpu.memory_space<vmem>>
    %66 = tpu.memref_slice %arg20[%c0_i32_51, %c7_i32] : memref<2x16x!tpu.dma_semaphore, #tpu.memory_space<semaphore_mem>> -> memref<1x1x!tpu.dma_semaphore, #tpu.memory_space<semaphore_mem>>
    %67 = tpu.memref_squeeze %66 : memref<1x1x!tpu.dma_semaphore, #tpu.memory_space<semaphore_mem>> -> memref<!tpu.dma_semaphore, #tpu.memory_space<semaphore_mem>>
    tpu.enqueue_dma source(%64 : memref<1x32xf32, #tpu.memory_space<any>>) target(%65 : memref<1x32xf32, #tpu.memory_space<vmem>>) target_semaphore(%67 : memref<!tpu.dma_semaphore, #tpu.memory_space<semaphore_mem>>)
    %c1_i32_54 = arith.constant 1 : i32
    %c7_i32_55 = arith.constant 7 : i32
    %c0_i32_56 = arith.constant 0 : i32
    %68 = tpu.memref_slice %arg1[%63, %c0_i32_56] : memref<50x32xf32, #tpu.memory_space<any>> -> memref<1x32xf32, #tpu.memory_space<any>>
    %c33_i32 = arith.constant 33 : i32
    %c0_i32_57 = arith.constant 0 : i32
    %69 = tpu.memref_slice %arg16[%c33_i32, %c0_i32_57] : memref<64x32xf32, #tpu.memory_space<vmem>> -> memref<1x32xf32, #tpu.memory_space<vmem>>
    %70 = tpu.memref_slice %arg20[%c1_i32_54, %c7_i32_55] : memref<2x16x!tpu.dma_semaphore, #tpu.memory_space<semaphore_mem>> -> memref<1x1x!tpu.dma_semaphore, #tpu.memory_space<semaphore_mem>>
    %71 = tpu.memref_squeeze %70 : memref<1x1x!tpu.dma_semaphore, #tpu.memory_space<semaphore_mem>> -> memref<!tpu.dma_semaphore, #tpu.memory_space<semaphore_mem>>
    tpu.enqueue_dma source(%68 : memref<1x32xf32, #tpu.memory_space<any>>) target(%69 : memref<1x32xf32, #tpu.memory_space<vmem>>) target_semaphore(%71 : memref<!tpu.dma_semaphore, #tpu.memory_space<semaphore_mem>>)
    %c32 = arith.constant 32 : index
    %72 = memref.load %arg0[%c32] : memref<64xi32, #tpu.memory_space<smem>>
    %c0_i32_58 = arith.constant 0 : i32
    %c8_i32_59 = arith.constant 8 : i32
    %c0_i32_60 = arith.constant 0 : i32
    %73 = tpu.memref_slice %arg1[%72, %c0_i32_60] : memref<50x32xf32, #tpu.memory_space<any>> -> memref<1x32xf32, #tpu.memory_space<any>>
    %c32_i32_61 = arith.constant 32 : i32
    %c0_i32_62 = arith.constant 0 : i32
    %74 = tpu.memref_slice %arg15[%c32_i32_61, %c0_i32_62] : memref<64x32xf32, #tpu.memory_space<vmem>> -> memref<1x32xf32, #tpu.memory_space<vmem>>
    %75 = tpu.memref_slice %arg20[%c0_i32_58, %c8_i32_59] : memref<2x16x!tpu.dma_semaphore, #tpu.memory_space<semaphore_mem>> -> memref<1x1x!tpu.dma_semaphore, #tpu.memory_space<semaphore_mem>>
    %76 = tpu.memref_squeeze %75 : memref<1x1x!tpu.dma_semaphore, #tpu.memory_space<semaphore_mem>> -> memref<!tpu.dma_semaphore, #tpu.memory_space<semaphore_mem>>
    tpu.enqueue_dma source(%73 : memref<1x32xf32, #tpu.memory_space<any>>) target(%74 : memref<1x32xf32, #tpu.memory_space<vmem>>) target_semaphore(%76 : memref<!tpu.dma_semaphore, #tpu.memory_space<semaphore_mem>>)
    %c1_i32_63 = arith.constant 1 : i32
    %c8_i32_64 = arith.constant 8 : i32
    %c0_i32_65 = arith.constant 0 : i32
    %77 = tpu.memref_slice %arg1[%72, %c0_i32_65] : memref<50x32xf32, #tpu.memory_space<any>> -> memref<1x32xf32, #tpu.memory_space<any>>
    %c24_i32_66 = arith.constant 24 : i32
    %c0_i32_67 = arith.constant 0 : i32
    %78 = tpu.memref_slice %arg16[%c24_i32_66, %c0_i32_67] : memref<64x32xf32, #tpu.memory_space<vmem>> -> memref<1x32xf32, #tpu.memory_space<vmem>>
    %79 = tpu.memref_slice %arg20[%c1_i32_63, %c8_i32_64] : memref<2x16x!tpu.dma_semaphore, #tpu.memory_space<semaphore_mem>> -> memref<1x1x!tpu.dma_semaphore, #tpu.memory_space<semaphore_mem>>
    %80 = tpu.memref_squeeze %79 : memref<1x1x!tpu.dma_semaphore, #tpu.memory_space<semaphore_mem>> -> memref<!tpu.dma_semaphore, #tpu.memory_space<semaphore_mem>>
    tpu.enqueue_dma source(%77 : memref<1x32xf32, #tpu.memory_space<any>>) target(%78 : memref<1x32xf32, #tpu.memory_space<vmem>>) target_semaphore(%80 : memref<!tpu.dma_semaphore, #tpu.memory_space<semaphore_mem>>)
    %c33 = arith.constant 33 : index
    %81 = memref.load %arg0[%c33] : memref<64xi32, #tpu.memory_space<smem>>
    %c0_i32_68 = arith.constant 0 : i32
    %c9_i32_69 = arith.constant 9 : i32
    %c0_i32_70 = arith.constant 0 : i32
    %82 = tpu.memref_slice %arg1[%81, %c0_i32_70] : memref<50x32xf32, #tpu.memory_space<any>> -> memref<1x32xf32, #tpu.memory_space<any>>
    %c33_i32_71 = arith.constant 33 : i32
    %c0_i32_72 = arith.constant 0 : i32
    %83 = tpu.memref_slice %arg15[%c33_i32_71, %c0_i32_72] : memref<64x32xf32, #tpu.memory_space<vmem>> -> memref<1x32xf32, #tpu.memory_space<vmem>>
    %84 = tpu.memref_slice %arg20[%c0_i32_68, %c9_i32_69] : memref<2x16x!tpu.dma_semaphore, #tpu.memory_space<semaphore_mem>> -> memref<1x1x!tpu.dma_semaphore, #tpu.memory_space<semaphore_mem>>
    %85 = tpu.memref_squeeze %84 : memref<1x1x!tpu.dma_semaphore, #tpu.memory_space<semaphore_mem>> -> memref<!tpu.dma_semaphore, #tpu.memory_space<semaphore_mem>>
    tpu.enqueue_dma source(%82 : memref<1x32xf32, #tpu.memory_space<any>>) target(%83 : memref<1x32xf32, #tpu.memory_space<vmem>>) target_semaphore(%85 : memref<!tpu.dma_semaphore, #tpu.memory_space<semaphore_mem>>)
    %c1_i32_73 = arith.constant 1 : i32
    %c9_i32_74 = arith.constant 9 : i32
    %c0_i32_75 = arith.constant 0 : i32
    %86 = tpu.memref_slice %arg1[%81, %c0_i32_75] : memref<50x32xf32, #tpu.memory_space<any>> -> memref<1x32xf32, #tpu.memory_space<any>>
    %c25_i32_76 = arith.constant 25 : i32
    %c0_i32_77 = arith.constant 0 : i32
    %87 = tpu.memref_slice %arg16[%c25_i32_76, %c0_i32_77] : memref<64x32xf32, #tpu.memory_space<vmem>> -> memref<1x32xf32, #tpu.memory_space<vmem>>
    %88 = tpu.memref_slice %arg20[%c1_i32_73, %c9_i32_74] : memref<2x16x!tpu.dma_semaphore, #tpu.memory_space<semaphore_mem>> -> memref<1x1x!tpu.dma_semaphore, #tpu.memory_space<semaphore_mem>>
    %89 = tpu.memref_squeeze %88 : memref<1x1x!tpu.dma_semaphore, #tpu.memory_space<semaphore_mem>> -> memref<!tpu.dma_semaphore, #tpu.memory_space<semaphore_mem>>
    tpu.enqueue_dma source(%86 : memref<1x32xf32, #tpu.memory_space<any>>) target(%87 : memref<1x32xf32, #tpu.memory_space<vmem>>) target_semaphore(%89 : memref<!tpu.dma_semaphore, #tpu.memory_space<semaphore_mem>>)
    %c40 = arith.constant 40 : index
    %90 = memref.load %arg0[%c40] : memref<64xi32, #tpu.memory_space<smem>>
    %c0_i32_78 = arith.constant 0 : i32
    %c10_i32 = arith.constant 10 : i32
    %c0_i32_79 = arith.constant 0 : i32
    %91 = tpu.memref_slice %arg1[%90, %c0_i32_79] : memref<50x32xf32, #tpu.memory_space<any>> -> memref<1x32xf32, #tpu.memory_space<any>>
    %c40_i32_80 = arith.constant 40 : i32
    %c0_i32_81 = arith.constant 0 : i32
    %92 = tpu.memref_slice %arg15[%c40_i32_80, %c0_i32_81] : memref<64x32xf32, #tpu.memory_space<vmem>> -> memref<1x32xf32, #tpu.memory_space<vmem>>
    %93 = tpu.memref_slice %arg20[%c0_i32_78, %c10_i32] : memref<2x16x!tpu.dma_semaphore, #tpu.memory_space<semaphore_mem>> -> memref<1x1x!tpu.dma_semaphore, #tpu.memory_space<semaphore_mem>>
    %94 = tpu.memref_squeeze %93 : memref<1x1x!tpu.dma_semaphore, #tpu.memory_space<semaphore_mem>> -> memref<!tpu.dma_semaphore, #tpu.memory_space<semaphore_mem>>
    tpu.enqueue_dma source(%91 : memref<1x32xf32, #tpu.memory_space<any>>) target(%92 : memref<1x32xf32, #tpu.memory_space<vmem>>) target_semaphore(%94 : memref<!tpu.dma_semaphore, #tpu.memory_space<semaphore_mem>>)
    %c1_i32_82 = arith.constant 1 : i32
    %c10_i32_83 = arith.constant 10 : i32
    %c0_i32_84 = arith.constant 0 : i32
    %95 = tpu.memref_slice %arg1[%90, %c0_i32_84] : memref<50x32xf32, #tpu.memory_space<any>> -> memref<1x32xf32, #tpu.memory_space<any>>
    %c16_i32_85 = arith.constant 16 : i32
    %c0_i32_86 = arith.constant 0 : i32
    %96 = tpu.memref_slice %arg16[%c16_i32_85, %c0_i32_86] : memref<64x32xf32, #tpu.memory_space<vmem>> -> memref<1x32xf32, #tpu.memory_space<vmem>>
    %97 = tpu.memref_slice %arg20[%c1_i32_82, %c10_i32_83] : memref<2x16x!tpu.dma_semaphore, #tpu.memory_space<semaphore_mem>> -> memref<1x1x!tpu.dma_semaphore, #tpu.memory_space<semaphore_mem>>
    %98 = tpu.memref_squeeze %97 : memref<1x1x!tpu.dma_semaphore, #tpu.memory_space<semaphore_mem>> -> memref<!tpu.dma_semaphore, #tpu.memory_space<semaphore_mem>>
    tpu.enqueue_dma source(%95 : memref<1x32xf32, #tpu.memory_space<any>>) target(%96 : memref<1x32xf32, #tpu.memory_space<vmem>>) target_semaphore(%98 : memref<!tpu.dma_semaphore, #tpu.memory_space<semaphore_mem>>)
    %c41 = arith.constant 41 : index
    %99 = memref.load %arg0[%c41] : memref<64xi32, #tpu.memory_space<smem>>
    %c0_i32_87 = arith.constant 0 : i32
    %c11_i32 = arith.constant 11 : i32
    %c0_i32_88 = arith.constant 0 : i32
    %100 = tpu.memref_slice %arg1[%99, %c0_i32_88] : memref<50x32xf32, #tpu.memory_space<any>> -> memref<1x32xf32, #tpu.memory_space<any>>
    %c41_i32_89 = arith.constant 41 : i32
    %c0_i32_90 = arith.constant 0 : i32
    %101 = tpu.memref_slice %arg15[%c41_i32_89, %c0_i32_90] : memref<64x32xf32, #tpu.memory_space<vmem>> -> memref<1x32xf32, #tpu.memory_space<vmem>>
    %102 = tpu.memref_slice %arg20[%c0_i32_87, %c11_i32] : memref<2x16x!tpu.dma_semaphore, #tpu.memory_space<semaphore_mem>> -> memref<1x1x!tpu.dma_semaphore, #tpu.memory_space<semaphore_mem>>
    %103 = tpu.memref_squeeze %102 : memref<1x1x!tpu.dma_semaphore, #tpu.memory_space<semaphore_mem>> -> memref<!tpu.dma_semaphore, #tpu.memory_space<semaphore_mem>>
    tpu.enqueue_dma source(%100 : memref<1x32xf32, #tpu.memory_space<any>>) target(%101 : memref<1x32xf32, #tpu.memory_space<vmem>>) target_semaphore(%103 : memref<!tpu.dma_semaphore, #tpu.memory_space<semaphore_mem>>)
    %c1_i32_91 = arith.constant 1 : i32
    %c11_i32_92 = arith.constant 11 : i32
    %c0_i32_93 = arith.constant 0 : i32
    %104 = tpu.memref_slice %arg1[%99, %c0_i32_93] : memref<50x32xf32, #tpu.memory_space<any>> -> memref<1x32xf32, #tpu.memory_space<any>>
    %c17_i32_94 = arith.constant 17 : i32
    %c0_i32_95 = arith.constant 0 : i32
    %105 = tpu.memref_slice %arg16[%c17_i32_94, %c0_i32_95] : memref<64x32xf32, #tpu.memory_space<vmem>> -> memref<1x32xf32, #tpu.memory_space<vmem>>
    %106 = tpu.memref_slice %arg20[%c1_i32_91, %c11_i32_92] : memref<2x16x!tpu.dma_semaphore, #tpu.memory_space<semaphore_mem>> -> memref<1x1x!tpu.dma_semaphore, #tpu.memory_space<semaphore_mem>>
    %107 = tpu.memref_squeeze %106 : memref<1x1x!tpu.dma_semaphore, #tpu.memory_space<semaphore_mem>> -> memref<!tpu.dma_semaphore, #tpu.memory_space<semaphore_mem>>
    tpu.enqueue_dma source(%104 : memref<1x32xf32, #tpu.memory_space<any>>) target(%105 : memref<1x32xf32, #tpu.memory_space<vmem>>) target_semaphore(%107 : memref<!tpu.dma_semaphore, #tpu.memory_space<semaphore_mem>>)
    %c48 = arith.constant 48 : index
    %108 = memref.load %arg0[%c48] : memref<64xi32, #tpu.memory_space<smem>>
    %c0_i32_96 = arith.constant 0 : i32
    %c12_i32 = arith.constant 12 : i32
    %c0_i32_97 = arith.constant 0 : i32
    %109 = tpu.memref_slice %arg1[%108, %c0_i32_97] : memref<50x32xf32, #tpu.memory_space<any>> -> memref<1x32xf32, #tpu.memory_space<any>>
    %c48_i32_98 = arith.constant 48 : i32
    %c0_i32_99 = arith.constant 0 : i32
    %110 = tpu.memref_slice %arg15[%c48_i32_98, %c0_i32_99] : memref<64x32xf32, #tpu.memory_space<vmem>> -> memref<1x32xf32, #tpu.memory_space<vmem>>
    %111 = tpu.memref_slice %arg20[%c0_i32_96, %c12_i32] : memref<2x16x!tpu.dma_semaphore, #tpu.memory_space<semaphore_mem>> -> memref<1x1x!tpu.dma_semaphore, #tpu.memory_space<semaphore_mem>>
    %112 = tpu.memref_squeeze %111 : memref<1x1x!tpu.dma_semaphore, #tpu.memory_space<semaphore_mem>> -> memref<!tpu.dma_semaphore, #tpu.memory_space<semaphore_mem>>
    tpu.enqueue_dma source(%109 : memref<1x32xf32, #tpu.memory_space<any>>) target(%110 : memref<1x32xf32, #tpu.memory_space<vmem>>) target_semaphore(%112 : memref<!tpu.dma_semaphore, #tpu.memory_space<semaphore_mem>>)
    %c1_i32_100 = arith.constant 1 : i32
    %c12_i32_101 = arith.constant 12 : i32
    %c0_i32_102 = arith.constant 0 : i32
    %113 = tpu.memref_slice %arg1[%108, %c0_i32_102] : memref<50x32xf32, #tpu.memory_space<any>> -> memref<1x32xf32, #tpu.memory_space<any>>
    %c8_i32_103 = arith.constant 8 : i32
    %c0_i32_104 = arith.constant 0 : i32
    %114 = tpu.memref_slice %arg16[%c8_i32_103, %c0_i32_104] : memref<64x32xf32, #tpu.memory_space<vmem>> -> memref<1x32xf32, #tpu.memory_space<vmem>>
    %115 = tpu.memref_slice %arg20[%c1_i32_100, %c12_i32_101] : memref<2x16x!tpu.dma_semaphore, #tpu.memory_space<semaphore_mem>> -> memref<1x1x!tpu.dma_semaphore, #tpu.memory_space<semaphore_mem>>
    %116 = tpu.memref_squeeze %115 : memref<1x1x!tpu.dma_semaphore, #tpu.memory_space<semaphore_mem>> -> memref<!tpu.dma_semaphore, #tpu.memory_space<semaphore_mem>>
    tpu.enqueue_dma source(%113 : memref<1x32xf32, #tpu.memory_space<any>>) target(%114 : memref<1x32xf32, #tpu.memory_space<vmem>>) target_semaphore(%116 : memref<!tpu.dma_semaphore, #tpu.memory_space<semaphore_mem>>)
    %c49 = arith.constant 49 : index
    %117 = memref.load %arg0[%c49] : memref<64xi32, #tpu.memory_space<smem>>
    %c0_i32_105 = arith.constant 0 : i32
    %c13_i32 = arith.constant 13 : i32
    %c0_i32_106 = arith.constant 0 : i32
    %118 = tpu.memref_slice %arg1[%117, %c0_i32_106] : memref<50x32xf32, #tpu.memory_space<any>> -> memref<1x32xf32, #tpu.memory_space<any>>
    %c49_i32_107 = arith.constant 49 : i32
    %c0_i32_108 = arith.constant 0 : i32
    %119 = tpu.memref_slice %arg15[%c49_i32_107, %c0_i32_108] : memref<64x32xf32, #tpu.memory_space<vmem>> -> memref<1x32xf32, #tpu.memory_space<vmem>>
    %120 = tpu.memref_slice %arg20[%c0_i32_105, %c13_i32] : memref<2x16x!tpu.dma_semaphore, #tpu.memory_space<semaphore_mem>> -> memref<1x1x!tpu.dma_semaphore, #tpu.memory_space<semaphore_mem>>
    %121 = tpu.memref_squeeze %120 : memref<1x1x!tpu.dma_semaphore, #tpu.memory_space<semaphore_mem>> -> memref<!tpu.dma_semaphore, #tpu.memory_space<semaphore_mem>>
    tpu.enqueue_dma source(%118 : memref<1x32xf32, #tpu.memory_space<any>>) target(%119 : memref<1x32xf32, #tpu.memory_space<vmem>>) target_semaphore(%121 : memref<!tpu.dma_semaphore, #tpu.memory_space<semaphore_mem>>)
    %c1_i32_109 = arith.constant 1 : i32
    %c13_i32_110 = arith.constant 13 : i32
    %c0_i32_111 = arith.constant 0 : i32
    %122 = tpu.memref_slice %arg1[%117, %c0_i32_111] : memref<50x32xf32, #tpu.memory_space<any>> -> memref<1x32xf32, #tpu.memory_space<any>>
    %c9_i32_112 = arith.constant 9 : i32
    %c0_i32_113 = arith.constant 0 : i32
    %123 = tpu.memref_slice %arg16[%c9_i32_112, %c0_i32_113] : memref<64x32xf32, #tpu.memory_space<vmem>> -> memref<1x32xf32, #tpu.memory_space<vmem>>
    %124 = tpu.memref_slice %arg20[%c1_i32_109, %c13_i32_110] : memref<2x16x!tpu.dma_semaphore, #tpu.memory_space<semaphore_mem>> -> memref<1x1x!tpu.dma_semaphore, #tpu.memory_space<semaphore_mem>>
    %125 = tpu.memref_squeeze %124 : memref<1x1x!tpu.dma_semaphore, #tpu.memory_space<semaphore_mem>> -> memref<!tpu.dma_semaphore, #tpu.memory_space<semaphore_mem>>
    tpu.enqueue_dma source(%122 : memref<1x32xf32, #tpu.memory_space<any>>) target(%123 : memref<1x32xf32, #tpu.memory_space<vmem>>) target_semaphore(%125 : memref<!tpu.dma_semaphore, #tpu.memory_space<semaphore_mem>>)
    %c56 = arith.constant 56 : index
    %126 = memref.load %arg0[%c56] : memref<64xi32, #tpu.memory_space<smem>>
    %c0_i32_114 = arith.constant 0 : i32
    %c14_i32 = arith.constant 14 : i32
    %c0_i32_115 = arith.constant 0 : i32
    %127 = tpu.memref_slice %arg1[%126, %c0_i32_115] : memref<50x32xf32, #tpu.memory_space<any>> -> memref<1x32xf32, #tpu.memory_space<any>>
    %c56_i32_116 = arith.constant 56 : i32
    %c0_i32_117 = arith.constant 0 : i32
    %128 = tpu.memref_slice %arg15[%c56_i32_116, %c0_i32_117] : memref<64x32xf32, #tpu.memory_space<vmem>> -> memref<1x32xf32, #tpu.memory_space<vmem>>
    %129 = tpu.memref_slice %arg20[%c0_i32_114, %c14_i32] : memref<2x16x!tpu.dma_semaphore, #tpu.memory_space<semaphore_mem>> -> memref<1x1x!tpu.dma_semaphore, #tpu.memory_space<semaphore_mem>>
    %130 = tpu.memref_squeeze %129 : memref<1x1x!tpu.dma_semaphore, #tpu.memory_space<semaphore_mem>> -> memref<!tpu.dma_semaphore, #tpu.memory_space<semaphore_mem>>
    tpu.enqueue_dma source(%127 : memref<1x32xf32, #tpu.memory_space<any>>) target(%128 : memref<1x32xf32, #tpu.memory_space<vmem>>) target_semaphore(%130 : memref<!tpu.dma_semaphore, #tpu.memory_space<semaphore_mem>>)
    %c1_i32_118 = arith.constant 1 : i32
    %c14_i32_119 = arith.constant 14 : i32
    %c0_i32_120 = arith.constant 0 : i32
    %131 = tpu.memref_slice %arg1[%126, %c0_i32_120] : memref<50x32xf32, #tpu.memory_space<any>> -> memref<1x32xf32, #tpu.memory_space<any>>
    %c0_i32_121 = arith.constant 0 : i32
    %c0_i32_122 = arith.constant 0 : i32
    %132 = tpu.memref_slice %arg16[%c0_i32_121, %c0_i32_122] : memref<64x32xf32, #tpu.memory_space<vmem>> -> memref<1x32xf32, #tpu.memory_space<vmem>>
    %133 = tpu.memref_slice %arg20[%c1_i32_118, %c14_i32_119] : memref<2x16x!tpu.dma_semaphore, #tpu.memory_space<semaphore_mem>> -> memref<1x1x!tpu.dma_semaphore, #tpu.memory_space<semaphore_mem>>
    %134 = tpu.memref_squeeze %133 : memref<1x1x!tpu.dma_semaphore, #tpu.memory_space<semaphore_mem>> -> memref<!tpu.dma_semaphore, #tpu.memory_space<semaphore_mem>>
    tpu.enqueue_dma source(%131 : memref<1x32xf32, #tpu.memory_space<any>>) target(%132 : memref<1x32xf32, #tpu.memory_space<vmem>>) target_semaphore(%134 : memref<!tpu.dma_semaphore, #tpu.memory_space<semaphore_mem>>)
    %c57 = arith.constant 57 : index
    %135 = memref.load %arg0[%c57] : memref<64xi32, #tpu.memory_space<smem>>
    %c0_i32_123 = arith.constant 0 : i32
    %c15_i32 = arith.constant 15 : i32
    %c0_i32_124 = arith.constant 0 : i32
    %136 = tpu.memref_slice %arg1[%135, %c0_i32_124] : memref<50x32xf32, #tpu.memory_space<any>> -> memref<1x32xf32, #tpu.memory_space<any>>
    %c57_i32_125 = arith.constant 57 : i32
    %c0_i32_126 = arith.constant 0 : i32
    %137 = tpu.memref_slice %arg15[%c57_i32_125, %c0_i32_126] : memref<64x32xf32, #tpu.memory_space<vmem>> -> memref<1x32xf32, #tpu.memory_space<vmem>>
    %138 = tpu.memref_slice %arg20[%c0_i32_123, %c15_i32] : memref<2x16x!tpu.dma_semaphore, #tpu.memory_space<semaphore_mem>> -> memref<1x1x!tpu.dma_semaphore, #tpu.memory_space<semaphore_mem>>
    %139 = tpu.memref_squeeze %138 : memref<1x1x!tpu.dma_semaphore, #tpu.memory_space<semaphore_mem>> -> memref<!tpu.dma_semaphore, #tpu.memory_space<semaphore_mem>>
    tpu.enqueue_dma source(%136 : memref<1x32xf32, #tpu.memory_space<any>>) target(%137 : memref<1x32xf32, #tpu.memory_space<vmem>>) target_semaphore(%139 : memref<!tpu.dma_semaphore, #tpu.memory_space<semaphore_mem>>)
    %c1_i32_127 = arith.constant 1 : i32
    %c15_i32_128 = arith.constant 15 : i32
    %c0_i32_129 = arith.constant 0 : i32
    %140 = tpu.memref_slice %arg1[%135, %c0_i32_129] : memref<50x32xf32, #tpu.memory_space<any>> -> memref<1x32xf32, #tpu.memory_space<any>>
    %c1_i32_130 = arith.constant 1 : i32
    %c0_i32_131 = arith.constant 0 : i32
    %141 = tpu.memref_slice %arg16[%c1_i32_130, %c0_i32_131] : memref<64x32xf32, #tpu.memory_space<vmem>> -> memref<1x32xf32, #tpu.memory_space<vmem>>
    %142 = tpu.memref_slice %arg20[%c1_i32_127, %c15_i32_128] : memref<2x16x!tpu.dma_semaphore, #tpu.memory_space<semaphore_mem>> -> memref<1x1x!tpu.dma_semaphore, #tpu.memory_space<semaphore_mem>>
    %143 = tpu.memref_squeeze %142 : memref<1x1x!tpu.dma_semaphore, #tpu.memory_space<semaphore_mem>> -> memref<!tpu.dma_semaphore, #tpu.memory_space<semaphore_mem>>
    tpu.enqueue_dma source(%140 : memref<1x32xf32, #tpu.memory_space<any>>) target(%141 : memref<1x32xf32, #tpu.memory_space<vmem>>) target_semaphore(%143 : memref<!tpu.dma_semaphore, #tpu.memory_space<semaphore_mem>>)
    %cst = arith.constant 0.000000e+00 : f32
    %144 = vector.broadcast %cst : f32 to vector<6x32xf32>
    %c2 = arith.constant 2 : index
    %c0_132 = arith.constant 0 : index
    %145 = vector.load %arg15[%c2, %c0_132] : memref<64x32xf32, #tpu.memory_space<vmem>>, vector<6x32xf32>
    tpu.vector_store %arg15[%c2, %c0_132], %144 {strides = array<i32>} : memref<64x32xf32, #tpu.memory_space<vmem>>, vector<6x32xf32>,
    %c2_133 = arith.constant 2 : index
    %c0_134 = arith.constant 0 : index
    %146 = vector.load %arg16[%c2_133, %c0_134] : memref<64x32xf32, #tpu.memory_space<vmem>>, vector<6x32xf32>
    tpu.vector_store %arg16[%c2_133, %c0_134], %144 {strides = array<i32>} : memref<64x32xf32, #tpu.memory_space<vmem>>, vector<6x32xf32>,
    %c10 = arith.constant 10 : index
    %c0_135 = arith.constant 0 : index
    %147 = vector.load %arg15[%c10, %c0_135] : memref<64x32xf32, #tpu.memory_space<vmem>>, vector<6x32xf32>
    tpu.vector_store %arg15[%c10, %c0_135], %144 {strides = array<i32>} : memref<64x32xf32, #tpu.memory_space<vmem>>, vector<6x32xf32>,
    %c10_136 = arith.constant 10 : index
    %c0_137 = arith.constant 0 : index
    %148 = vector.load %arg16[%c10_136, %c0_137] : memref<64x32xf32, #tpu.memory_space<vmem>>, vector<6x32xf32>
    tpu.vector_store %arg16[%c10_136, %c0_137], %144 {strides = array<i32>} : memref<64x32xf32, #tpu.memory_space<vmem>>, vector<6x32xf32>,
    %c18 = arith.constant 18 : index
    %c0_138 = arith.constant 0 : index
    %149 = vector.load %arg15[%c18, %c0_138] : memref<64x32xf32, #tpu.memory_space<vmem>>, vector<6x32xf32>
    tpu.vector_store %arg15[%c18, %c0_138], %144 {strides = array<i32>} : memref<64x32xf32, #tpu.memory_space<vmem>>, vector<6x32xf32>,
    %c18_139 = arith.constant 18 : index
    %c0_140 = arith.constant 0 : index
    %150 = vector.load %arg16[%c18_139, %c0_140] : memref<64x32xf32, #tpu.memory_space<vmem>>, vector<6x32xf32>
    tpu.vector_store %arg16[%c18_139, %c0_140], %144 {strides = array<i32>} : memref<64x32xf32, #tpu.memory_space<vmem>>, vector<6x32xf32>,
    %c26 = arith.constant 26 : index
    %c0_141 = arith.constant 0 : index
    %151 = vector.load %arg15[%c26, %c0_141] : memref<64x32xf32, #tpu.memory_space<vmem>>, vector<6x32xf32>
    tpu.vector_store %arg15[%c26, %c0_141], %144 {strides = array<i32>} : memref<64x32xf32, #tpu.memory_space<vmem>>, vector<6x32xf32>,
    %c26_142 = arith.constant 26 : index
    %c0_143 = arith.constant 0 : index
    %152 = vector.load %arg16[%c26_142, %c0_143] : memref<64x32xf32, #tpu.memory_space<vmem>>, vector<6x32xf32>
    tpu.vector_store %arg16[%c26_142, %c0_143], %144 {strides = array<i32>} : memref<64x32xf32, #tpu.memory_space<vmem>>, vector<6x32xf32>,
    %c34 = arith.constant 34 : index
    %c0_144 = arith.constant 0 : index
    %153 = vector.load %arg15[%c34, %c0_144] : memref<64x32xf32, #tpu.memory_space<vmem>>, vector<6x32xf32>
    tpu.vector_store %arg15[%c34, %c0_144], %144 {strides = array<i32>} : memref<64x32xf32, #tpu.memory_space<vmem>>, vector<6x32xf32>,
    %c34_145 = arith.constant 34 : index
    %c0_146 = arith.constant 0 : index
    %154 = vector.load %arg16[%c34_145, %c0_146] : memref<64x32xf32, #tpu.memory_space<vmem>>, vector<6x32xf32>
    tpu.vector_store %arg16[%c34_145, %c0_146], %144 {strides = array<i32>} : memref<64x32xf32, #tpu.memory_space<vmem>>, vector<6x32xf32>,
    %c42 = arith.constant 42 : index
    %c0_147 = arith.constant 0 : index
    %155 = vector.load %arg15[%c42, %c0_147] : memref<64x32xf32, #tpu.memory_space<vmem>>, vector<6x32xf32>
    tpu.vector_store %arg15[%c42, %c0_147], %144 {strides = array<i32>} : memref<64x32xf32, #tpu.memory_space<vmem>>, vector<6x32xf32>,
    %c42_148 = arith.constant 42 : index
    %c0_149 = arith.constant 0 : index
    %156 = vector.load %arg16[%c42_148, %c0_149] : memref<64x32xf32, #tpu.memory_space<vmem>>, vector<6x32xf32>
    tpu.vector_store %arg16[%c42_148, %c0_149], %144 {strides = array<i32>} : memref<64x32xf32, #tpu.memory_space<vmem>>, vector<6x32xf32>,
    %c50 = arith.constant 50 : index
    %c0_150 = arith.constant 0 : index
    %157 = vector.load %arg15[%c50, %c0_150] : memref<64x32xf32, #tpu.memory_space<vmem>>, vector<6x32xf32>
    tpu.vector_store %arg15[%c50, %c0_150], %144 {strides = array<i32>} : memref<64x32xf32, #tpu.memory_space<vmem>>, vector<6x32xf32>,
    %c50_151 = arith.constant 50 : index
    %c0_152 = arith.constant 0 : index
    %158 = vector.load %arg16[%c50_151, %c0_152] : memref<64x32xf32, #tpu.memory_space<vmem>>, vector<6x32xf32>
    tpu.vector_store %arg16[%c50_151, %c0_152], %144 {strides = array<i32>} : memref<64x32xf32, #tpu.memory_space<vmem>>, vector<6x32xf32>,
    %c58 = arith.constant 58 : index
    %c0_153 = arith.constant 0 : index
    %159 = vector.load %arg15[%c58, %c0_153] : memref<64x32xf32, #tpu.memory_space<vmem>>, vector<6x32xf32>
    tpu.vector_store %arg15[%c58, %c0_153], %144 {strides = array<i32>} : memref<64x32xf32, #tpu.memory_space<vmem>>, vector<6x32xf32>,
    %c58_154 = arith.constant 58 : index
    %c0_155 = arith.constant 0 : index
    %160 = vector.load %arg16[%c58_154, %c0_155] : memref<64x32xf32, #tpu.memory_space<vmem>>, vector<6x32xf32>
    tpu.vector_store %arg16[%c58_154, %c0_155], %144 {strides = array<i32>} : memref<64x32xf32, #tpu.memory_space<vmem>>, vector<6x32xf32>,
    %c0_i32_156 = arith.constant 0 : i32
    %c0_i32_157 = arith.constant 0 : i32
    %c0_i32_158 = arith.constant 0 : i32
    %161 = tpu.memref_slice %arg1[%0, %c0_i32_158] : memref<50x32xf32, #tpu.memory_space<any>> -> memref<1x32xf32, #tpu.memory_space<any>>
    %c0_i32_159 = arith.constant 0 : i32
    %c0_i32_160 = arith.constant 0 : i32
    %162 = tpu.memref_slice %arg15[%c0_i32_159, %c0_i32_160] : memref<64x32xf32, #tpu.memory_space<vmem>> -> memref<1x32xf32, #tpu.memory_space<vmem>>
    %163 = tpu.memref_slice %arg20[%c0_i32_156, %c0_i32_157] : memref<2x16x!tpu.dma_semaphore, #tpu.memory_space<semaphore_mem>> -> memref<1x1x!tpu.dma_semaphore, #tpu.memory_space<semaphore_mem>>
    %164 = tpu.memref_squeeze %163 : memref<1x1x!tpu.dma_semaphore, #tpu.memory_space<semaphore_mem>> -> memref<!tpu.dma_semaphore, #tpu.memory_space<semaphore_mem>>
    tpu.wait_dma2 semaphore(%164 : memref<!tpu.dma_semaphore, #tpu.memory_space<semaphore_mem>>) src(%161 : memref<1x32xf32, #tpu.memory_space<any>>) dst(%162 : memref<1x32xf32, #tpu.memory_space<vmem>>)
    %c1_i32_161 = arith.constant 1 : i32
    %c0_i32_162 = arith.constant 0 : i32
    %c0_i32_163 = arith.constant 0 : i32
    %165 = tpu.memref_slice %arg1[%0, %c0_i32_163] : memref<50x32xf32, #tpu.memory_space<any>> -> memref<1x32xf32, #tpu.memory_space<any>>
    %c56_i32_164 = arith.constant 56 : i32
    %c0_i32_165 = arith.constant 0 : i32
    %166 = tpu.memref_slice %arg16[%c56_i32_164, %c0_i32_165] : memref<64x32xf32, #tpu.memory_space<vmem>> -> memref<1x32xf32, #tpu.memory_space<vmem>>
    %167 = tpu.memref_slice %arg20[%c1_i32_161, %c0_i32_162] : memref<2x16x!tpu.dma_semaphore, #tpu.memory_space<semaphore_mem>> -> memref<1x1x!tpu.dma_semaphore, #tpu.memory_space<semaphore_mem>>
    %168 = tpu.memref_squeeze %167 : memref<1x1x!tpu.dma_semaphore, #tpu.memory_space<semaphore_mem>> -> memref<!tpu.dma_semaphore, #tpu.memory_space<semaphore_mem>>
    tpu.wait_dma2 semaphore(%168 : memref<!tpu.dma_semaphore, #tpu.memory_space<semaphore_mem>>) src(%165 : memref<1x32xf32, #tpu.memory_space<any>>) dst(%166 : memref<1x32xf32, #tpu.memory_space<vmem>>)
    %c0_i32_166 = arith.constant 0 : i32
    %c1_i32_167 = arith.constant 1 : i32
    %c0_i32_168 = arith.constant 0 : i32
    %169 = tpu.memref_slice %arg1[%9, %c0_i32_168] : memref<50x32xf32, #tpu.memory_space<any>> -> memref<1x32xf32, #tpu.memory_space<any>>
    %c1_i32_169 = arith.constant 1 : i32
    %c0_i32_170 = arith.constant 0 : i32
    %170 = tpu.memref_slice %arg15[%c1_i32_169, %c0_i32_170] : memref<64x32xf32, #tpu.memory_space<vmem>> -> memref<1x32xf32, #tpu.memory_space<vmem>>
    %171 = tpu.memref_slice %arg20[%c0_i32_166, %c1_i32_167] : memref<2x16x!tpu.dma_semaphore, #tpu.memory_space<semaphore_mem>> -> memref<1x1x!tpu.dma_semaphore, #tpu.memory_space<semaphore_mem>>
    %172 = tpu.memref_squeeze %171 : memref<1x1x!tpu.dma_semaphore, #tpu.memory_space<semaphore_mem>> -> memref<!tpu.dma_semaphore, #tpu.memory_space<semaphore_mem>>
    tpu.wait_dma2 semaphore(%172 : memref<!tpu.dma_semaphore, #tpu.memory_space<semaphore_mem>>) src(%169 : memref<1x32xf32, #tpu.memory_space<any>>) dst(%170 : memref<1x32xf32, #tpu.memory_space<vmem>>)
    %c1_i32_171 = arith.constant 1 : i32
    %c1_i32_172 = arith.constant 1 : i32
    %c0_i32_173 = arith.constant 0 : i32
    %173 = tpu.memref_slice %arg1[%9, %c0_i32_173] : memref<50x32xf32, #tpu.memory_space<any>> -> memref<1x32xf32, #tpu.memory_space<any>>
    %c57_i32_174 = arith.constant 57 : i32
    %c0_i32_175 = arith.constant 0 : i32
    %174 = tpu.memref_slice %arg16[%c57_i32_174, %c0_i32_175] : memref<64x32xf32, #tpu.memory_space<vmem>> -> memref<1x32xf32, #tpu.memory_space<vmem>>
    %175 = tpu.memref_slice %arg20[%c1_i32_171, %c1_i32_172] : memref<2x16x!tpu.dma_semaphore, #tpu.memory_space<semaphore_mem>> -> memref<1x1x!tpu.dma_semaphore, #tpu.memory_space<semaphore_mem>>
    %176 = tpu.memref_squeeze %175 : memref<1x1x!tpu.dma_semaphore, #tpu.memory_space<semaphore_mem>> -> memref<!tpu.dma_semaphore, #tpu.memory_space<semaphore_mem>>
    tpu.wait_dma2 semaphore(%176 : memref<!tpu.dma_semaphore, #tpu.memory_space<semaphore_mem>>) src(%173 : memref<1x32xf32, #tpu.memory_space<any>>) dst(%174 : memref<1x32xf32, #tpu.memory_space<vmem>>)
    %c0_i32_176 = arith.constant 0 : i32
    %c2_i32_177 = arith.constant 2 : i32
    %c0_i32_178 = arith.constant 0 : i32
    %177 = tpu.memref_slice %arg1[%18, %c0_i32_178] : memref<50x32xf32, #tpu.memory_space<any>> -> memref<1x32xf32, #tpu.memory_space<any>>
    %c8_i32_179 = arith.constant 8 : i32
    %c0_i32_180 = arith.constant 0 : i32
    %178 = tpu.memref_slice %arg15[%c8_i32_179, %c0_i32_180] : memref<64x32xf32, #tpu.memory_space<vmem>> -> memref<1x32xf32, #tpu.memory_space<vmem>>
    %179 = tpu.memref_slice %arg20[%c0_i32_176, %c2_i32_177] : memref<2x16x!tpu.dma_semaphore, #tpu.memory_space<semaphore_mem>> -> memref<1x1x!tpu.dma_semaphore, #tpu.memory_space<semaphore_mem>>
    %180 = tpu.memref_squeeze %179 : memref<1x1x!tpu.dma_semaphore, #tpu.memory_space<semaphore_mem>> -> memref<!tpu.dma_semaphore, #tpu.memory_space<semaphore_mem>>
    tpu.wait_dma2 semaphore(%180 : memref<!tpu.dma_semaphore, #tpu.memory_space<semaphore_mem>>) src(%177 : memref<1x32xf32, #tpu.memory_space<any>>) dst(%178 : memref<1x32xf32, #tpu.memory_space<vmem>>)
    %c1_i32_181 = arith.constant 1 : i32
    %c2_i32_182 = arith.constant 2 : i32
    %c0_i32_183 = arith.constant 0 : i32
    %181 = tpu.memref_slice %arg1[%18, %c0_i32_183] : memref<50x32xf32, #tpu.memory_space<any>> -> memref<1x32xf32, #tpu.memory_space<any>>
    %c48_i32_184 = arith.constant 48 : i32
    %c0_i32_185 = arith.constant 0 : i32
    %182 = tpu.memref_slice %arg16[%c48_i32_184, %c0_i32_185] : memref<64x32xf32, #tpu.memory_space<vmem>> -> memref<1x32xf32, #tpu.memory_space<vmem>>
    %183 = tpu.memref_slice %arg20[%c1_i32_181, %c2_i32_182] : memref<2x16x!tpu.dma_semaphore, #tpu.memory_space<semaphore_mem>> -> memref<1x1x!tpu.dma_semaphore, #tpu.memory_space<semaphore_mem>>
    %184 = tpu.memref_squeeze %183 : memref<1x1x!tpu.dma_semaphore, #tpu.memory_space<semaphore_mem>> -> memref<!tpu.dma_semaphore, #tpu.memory_space<semaphore_mem>>
    tpu.wait_dma2 semaphore(%184 : memref<!tpu.dma_semaphore, #tpu.memory_space<semaphore_mem>>) src(%181 : memref<1x32xf32, #tpu.memory_space<any>>) dst(%182 : memref<1x32xf32, #tpu.memory_space<vmem>>)
    %c0_i32_186 = arith.constant 0 : i32
    %c3_i32_187 = arith.constant 3 : i32
    %c0_i32_188 = arith.constant 0 : i32
    %185 = tpu.memref_slice %arg1[%27, %c0_i32_188] : memref<50x32xf32, #tpu.memory_space<any>> -> memref<1x32xf32, #tpu.memory_space<any>>
    %c9_i32_189 = arith.constant 9 : i32
    %c0_i32_190 = arith.constant 0 : i32
    %186 = tpu.memref_slice %arg15[%c9_i32_189, %c0_i32_190] : memref<64x32xf32, #tpu.memory_space<vmem>> -> memref<1x32xf32, #tpu.memory_space<vmem>>
    %187 = tpu.memref_slice %arg20[%c0_i32_186, %c3_i32_187] : memref<2x16x!tpu.dma_semaphore, #tpu.memory_space<semaphore_mem>> -> memref<1x1x!tpu.dma_semaphore, #tpu.memory_space<semaphore_mem>>
    %188 = tpu.memref_squeeze %187 : memref<1x1x!tpu.dma_semaphore, #tpu.memory_space<semaphore_mem>> -> memref<!tpu.dma_semaphore, #tpu.memory_space<semaphore_mem>>
    tpu.wait_dma2 semaphore(%188 : memref<!tpu.dma_semaphore, #tpu.memory_space<semaphore_mem>>) src(%185 : memref<1x32xf32, #tpu.memory_space<any>>) dst(%186 : memref<1x32xf32, #tpu.memory_space<vmem>>)
    %c1_i32_191 = arith.constant 1 : i32
    %c3_i32_192 = arith.constant 3 : i32
    %c0_i32_193 = arith.constant 0 : i32
    %189 = tpu.memref_slice %arg1[%27, %c0_i32_193] : memref<50x32xf32, #tpu.memory_space<any>> -> memref<1x32xf32, #tpu.memory_space<any>>
    %c49_i32_194 = arith.constant 49 : i32
    %c0_i32_195 = arith.constant 0 : i32
    %190 = tpu.memref_slice %arg16[%c49_i32_194, %c0_i32_195] : memref<64x32xf32, #tpu.memory_space<vmem>> -> memref<1x32xf32, #tpu.memory_space<vmem>>
    %191 = tpu.memref_slice %arg20[%c1_i32_191, %c3_i32_192] : memref<2x16x!tpu.dma_semaphore, #tpu.memory_space<semaphore_mem>> -> memref<1x1x!tpu.dma_semaphore, #tpu.memory_space<semaphore_mem>>
    %192 = tpu.memref_squeeze %191 : memref<1x1x!tpu.dma_semaphore, #tpu.memory_space<semaphore_mem>> -> memref<!tpu.dma_semaphore, #tpu.memory_space<semaphore_mem>>
    tpu.wait_dma2 semaphore(%192 : memref<!tpu.dma_semaphore, #tpu.memory_space<semaphore_mem>>) src(%189 : memref<1x32xf32, #tpu.memory_space<any>>) dst(%190 : memref<1x32xf32, #tpu.memory_space<vmem>>)
    %c0_i32_196 = arith.constant 0 : i32
    %c4_i32_197 = arith.constant 4 : i32
    %c0_i32_198 = arith.constant 0 : i32
    %193 = tpu.memref_slice %arg1[%36, %c0_i32_198] : memref<50x32xf32, #tpu.memory_space<any>> -> memref<1x32xf32, #tpu.memory_space<any>>
    %c16_i32_199 = arith.constant 16 : i32
    %c0_i32_200 = arith.constant 0 : i32
    %194 = tpu.memref_slice %arg15[%c16_i32_199, %c0_i32_200] : memref<64x32xf32, #tpu.memory_space<vmem>> -> memref<1x32xf32, #tpu.memory_space<vmem>>
    %195 = tpu.memref_slice %arg20[%c0_i32_196, %c4_i32_197] : memref<2x16x!tpu.dma_semaphore, #tpu.memory_space<semaphore_mem>> -> memref<1x1x!tpu.dma_semaphore, #tpu.memory_space<semaphore_mem>>
    %196 = tpu.memref_squeeze %195 : memref<1x1x!tpu.dma_semaphore, #tpu.memory_space<semaphore_mem>> -> memref<!tpu.dma_semaphore, #tpu.memory_space<semaphore_mem>>
    tpu.wait_dma2 semaphore(%196 : memref<!tpu.dma_semaphore, #tpu.memory_space<semaphore_mem>>) src(%193 : memref<1x32xf32, #tpu.memory_space<any>>) dst(%194 : memref<1x32xf32, #tpu.memory_space<vmem>>)
    %c1_i32_201 = arith.constant 1 : i32
    %c4_i32_202 = arith.constant 4 : i32
    %c0_i32_203 = arith.constant 0 : i32
    %197 = tpu.memref_slice %arg1[%36, %c0_i32_203] : memref<50x32xf32, #tpu.memory_space<any>> -> memref<1x32xf32, #tpu.memory_space<any>>
    %c40_i32_204 = arith.constant 40 : i32
    %c0_i32_205 = arith.constant 0 : i32
    %198 = tpu.memref_slice %arg16[%c40_i32_204, %c0_i32_205] : memref<64x32xf32, #tpu.memory_space<vmem>> -> memref<1x32xf32, #tpu.memory_space<vmem>>
    %199 = tpu.memref_slice %arg20[%c1_i32_201, %c4_i32_202] : memref<2x16x!tpu.dma_semaphore, #tpu.memory_space<semaphore_mem>> -> memref<1x1x!tpu.dma_semaphore, #tpu.memory_space<semaphore_mem>>
    %200 = tpu.memref_squeeze %199 : memref<1x1x!tpu.dma_semaphore, #tpu.memory_space<semaphore_mem>> -> memref<!tpu.dma_semaphore, #tpu.memory_space<semaphore_mem>>
    tpu.wait_dma2 semaphore(%200 : memref<!tpu.dma_semaphore, #tpu.memory_space<semaphore_mem>>) src(%197 : memref<1x32xf32, #tpu.memory_space<any>>) dst(%198 : memref<1x32xf32, #tpu.memory_space<vmem>>)
    %c0_i32_206 = arith.constant 0 : i32
    %c5_i32_207 = arith.constant 5 : i32
    %c0_i32_208 = arith.constant 0 : i32
    %201 = tpu.memref_slice %arg1[%45, %c0_i32_208] : memref<50x32xf32, #tpu.memory_space<any>> -> memref<1x32xf32, #tpu.memory_space<any>>
    %c17_i32_209 = arith.constant 17 : i32
    %c0_i32_210 = arith.constant 0 : i32
    %202 = tpu.memref_slice %arg15[%c17_i32_209, %c0_i32_210] : memref<64x32xf32, #tpu.memory_space<vmem>> -> memref<1x32xf32, #tpu.memory_space<vmem>>
    %203 = tpu.memref_slice %arg20[%c0_i32_206, %c5_i32_207] : memref<2x16x!tpu.dma_semaphore, #tpu.memory_space<semaphore_mem>> -> memref<1x1x!tpu.dma_semaphore, #tpu.memory_space<semaphore_mem>>
    %204 = tpu.memref_squeeze %203 : memref<1x1x!tpu.dma_semaphore, #tpu.memory_space<semaphore_mem>> -> memref<!tpu.dma_semaphore, #tpu.memory_space<semaphore_mem>>
    tpu.wait_dma2 semaphore(%204 : memref<!tpu.dma_semaphore, #tpu.memory_space<semaphore_mem>>) src(%201 : memref<1x32xf32, #tpu.memory_space<any>>) dst(%202 : memref<1x32xf32, #tpu.memory_space<vmem>>)
    %c1_i32_211 = arith.constant 1 : i32
    %c5_i32_212 = arith.constant 5 : i32
    %c0_i32_213 = arith.constant 0 : i32
    %205 = tpu.memref_slice %arg1[%45, %c0_i32_213] : memref<50x32xf32, #tpu.memory_space<any>> -> memref<1x32xf32, #tpu.memory_space<any>>
    %c41_i32_214 = arith.constant 41 : i32
    %c0_i32_215 = arith.constant 0 : i32
    %206 = tpu.memref_slice %arg16[%c41_i32_214, %c0_i32_215] : memref<64x32xf32, #tpu.memory_space<vmem>> -> memref<1x32xf32, #tpu.memory_space<vmem>>
    %207 = tpu.memref_slice %arg20[%c1_i32_211, %c5_i32_212] : memref<2x16x!tpu.dma_semaphore, #tpu.memory_space<semaphore_mem>> -> memref<1x1x!tpu.dma_semaphore, #tpu.memory_space<semaphore_mem>>
    %208 = tpu.memref_squeeze %207 : memref<1x1x!tpu.dma_semaphore, #tpu.memory_space<semaphore_mem>> -> memref<!tpu.dma_semaphore, #tpu.memory_space<semaphore_mem>>
    tpu.wait_dma2 semaphore(%208 : memref<!tpu.dma_semaphore, #tpu.memory_space<semaphore_mem>>) src(%205 : memref<1x32xf32, #tpu.memory_space<any>>) dst(%206 : memref<1x32xf32, #tpu.memory_space<vmem>>)
    %c0_i32_216 = arith.constant 0 : i32
    %c6_i32_217 = arith.constant 6 : i32
    %c0_i32_218 = arith.constant 0 : i32
    %209 = tpu.memref_slice %arg1[%54, %c0_i32_218] : memref<50x32xf32, #tpu.memory_space<any>> -> memref<1x32xf32, #tpu.memory_space<any>>
    %c24_i32_219 = arith.constant 24 : i32
    %c0_i32_220 = arith.constant 0 : i32
    %210 = tpu.memref_slice %arg15[%c24_i32_219, %c0_i32_220] : memref<64x32xf32, #tpu.memory_space<vmem>> -> memref<1x32xf32, #tpu.memory_space<vmem>>
    %211 = tpu.memref_slice %arg20[%c0_i32_216, %c6_i32_217] : memref<2x16x!tpu.dma_semaphore, #tpu.memory_space<semaphore_mem>> -> memref<1x1x!tpu.dma_semaphore, #tpu.memory_space<semaphore_mem>>
    %212 = tpu.memref_squeeze %211 : memref<1x1x!tpu.dma_semaphore, #tpu.memory_space<semaphore_mem>> -> memref<!tpu.dma_semaphore, #tpu.memory_space<semaphore_mem>>
    tpu.wait_dma2 semaphore(%212 : memref<!tpu.dma_semaphore, #tpu.memory_space<semaphore_mem>>) src(%209 : memref<1x32xf32, #tpu.memory_space<any>>) dst(%210 : memref<1x32xf32, #tpu.memory_space<vmem>>)
    %c1_i32_221 = arith.constant 1 : i32
    %c6_i32_222 = arith.constant 6 : i32
    %c0_i32_223 = arith.constant 0 : i32
    %213 = tpu.memref_slice %arg1[%54, %c0_i32_223] : memref<50x32xf32, #tpu.memory_space<any>> -> memref<1x32xf32, #tpu.memory_space<any>>
    %c32_i32_224 = arith.constant 32 : i32
    %c0_i32_225 = arith.constant 0 : i32
    %214 = tpu.memref_slice %arg16[%c32_i32_224, %c0_i32_225] : memref<64x32xf32, #tpu.memory_space<vmem>> -> memref<1x32xf32, #tpu.memory_space<vmem>>
    %215 = tpu.memref_slice %arg20[%c1_i32_221, %c6_i32_222] : memref<2x16x!tpu.dma_semaphore, #tpu.memory_space<semaphore_mem>> -> memref<1x1x!tpu.dma_semaphore, #tpu.memory_space<semaphore_mem>>
    %216 = tpu.memref_squeeze %215 : memref<1x1x!tpu.dma_semaphore, #tpu.memory_space<semaphore_mem>> -> memref<!tpu.dma_semaphore, #tpu.memory_space<semaphore_mem>>
    tpu.wait_dma2 semaphore(%216 : memref<!tpu.dma_semaphore, #tpu.memory_space<semaphore_mem>>) src(%213 : memref<1x32xf32, #tpu.memory_space<any>>) dst(%214 : memref<1x32xf32, #tpu.memory_space<vmem>>)
    %c0_i32_226 = arith.constant 0 : i32
    %c7_i32_227 = arith.constant 7 : i32
    %c0_i32_228 = arith.constant 0 : i32
    %217 = tpu.memref_slice %arg1[%63, %c0_i32_228] : memref<50x32xf32, #tpu.memory_space<any>> -> memref<1x32xf32, #tpu.memory_space<any>>
    %c25_i32_229 = arith.constant 25 : i32
    %c0_i32_230 = arith.constant 0 : i32
    %218 = tpu.memref_slice %arg15[%c25_i32_229, %c0_i32_230] : memref<64x32xf32, #tpu.memory_space<vmem>> -> memref<1x32xf32, #tpu.memory_space<vmem>>
    %219 = tpu.memref_slice %arg20[%c0_i32_226, %c7_i32_227] : memref<2x16x!tpu.dma_semaphore, #tpu.memory_space<semaphore_mem>> -> memref<1x1x!tpu.dma_semaphore, #tpu.memory_space<semaphore_mem>>
    %220 = tpu.memref_squeeze %219 : memref<1x1x!tpu.dma_semaphore, #tpu.memory_space<semaphore_mem>> -> memref<!tpu.dma_semaphore, #tpu.memory_space<semaphore_mem>>
    tpu.wait_dma2 semaphore(%220 : memref<!tpu.dma_semaphore, #tpu.memory_space<semaphore_mem>>) src(%217 : memref<1x32xf32, #tpu.memory_space<any>>) dst(%218 : memref<1x32xf32, #tpu.memory_space<vmem>>)
    %c1_i32_231 = arith.constant 1 : i32
    %c7_i32_232 = arith.constant 7 : i32
    %c0_i32_233 = arith.constant 0 : i32
    %221 = tpu.memref_slice %arg1[%63, %c0_i32_233] : memref<50x32xf32, #tpu.memory_space<any>> -> memref<1x32xf32, #tpu.memory_space<any>>
    %c33_i32_234 = arith.constant 33 : i32
    %c0_i32_235 = arith.constant 0 : i32
    %222 = tpu.memref_slice %arg16[%c33_i32_234, %c0_i32_235] : memref<64x32xf32, #tpu.memory_space<vmem>> -> memref<1x32xf32, #tpu.memory_space<vmem>>
    %223 = tpu.memref_slice %arg20[%c1_i32_231, %c7_i32_232] : memref<2x16x!tpu.dma_semaphore, #tpu.memory_space<semaphore_mem>> -> memref<1x1x!tpu.dma_semaphore, #tpu.memory_space<semaphore_mem>>
    %224 = tpu.memref_squeeze %223 : memref<1x1x!tpu.dma_semaphore, #tpu.memory_space<semaphore_mem>> -> memref<!tpu.dma_semaphore, #tpu.memory_space<semaphore_mem>>
    tpu.wait_dma2 semaphore(%224 : memref<!tpu.dma_semaphore, #tpu.memory_space<semaphore_mem>>) src(%221 : memref<1x32xf32, #tpu.memory_space<any>>) dst(%222 : memref<1x32xf32, #tpu.memory_space<vmem>>)
    %c0_i32_236 = arith.constant 0 : i32
    %c8_i32_237 = arith.constant 8 : i32
    %c0_i32_238 = arith.constant 0 : i32
    %225 = tpu.memref_slice %arg1[%72, %c0_i32_238] : memref<50x32xf32, #tpu.memory_space<any>> -> memref<1x32xf32, #tpu.memory_space<any>>
    %c32_i32_239 = arith.constant 32 : i32
    %c0_i32_240 = arith.constant 0 : i32
    %226 = tpu.memref_slice %arg15[%c32_i32_239, %c0_i32_240] : memref<64x32xf32, #tpu.memory_space<vmem>> -> memref<1x32xf32, #tpu.memory_space<vmem>>
    %227 = tpu.memref_slice %arg20[%c0_i32_236, %c8_i32_237] : memref<2x16x!tpu.dma_semaphore, #tpu.memory_space<semaphore_mem>> -> memref<1x1x!tpu.dma_semaphore, #tpu.memory_space<semaphore_mem>>
    %228 = tpu.memref_squeeze %227 : memref<1x1x!tpu.dma_semaphore, #tpu.memory_space<semaphore_mem>> -> memref<!tpu.dma_semaphore, #tpu.memory_space<semaphore_mem>>
    tpu.wait_dma2 semaphore(%228 : memref<!tpu.dma_semaphore, #tpu.memory_space<semaphore_mem>>) src(%225 : memref<1x32xf32, #tpu.memory_space<any>>) dst(%226 : memref<1x32xf32, #tpu.memory_space<vmem>>)
    %c1_i32_241 = arith.constant 1 : i32
    %c8_i32_242 = arith.constant 8 : i32
    %c0_i32_243 = arith.constant 0 : i32
    %229 = tpu.memref_slice %arg1[%72, %c0_i32_243] : memref<50x32xf32, #tpu.memory_space<any>> -> memref<1x32xf32, #tpu.memory_space<any>>
    %c24_i32_244 = arith.constant 24 : i32
    %c0_i32_245 = arith.constant 0 : i32
    %230 = tpu.memref_slice %arg16[%c24_i32_244, %c0_i32_245] : memref<64x32xf32, #tpu.memory_space<vmem>> -> memref<1x32xf32, #tpu.memory_space<vmem>>
    %231 = tpu.memref_slice %arg20[%c1_i32_241, %c8_i32_242] : memref<2x16x!tpu.dma_semaphore, #tpu.memory_space<semaphore_mem>> -> memref<1x1x!tpu.dma_semaphore, #tpu.memory_space<semaphore_mem>>
    %232 = tpu.memref_squeeze %231 : memref<1x1x!tpu.dma_semaphore, #tpu.memory_space<semaphore_mem>> -> memref<!tpu.dma_semaphore, #tpu.memory_space<semaphore_mem>>
    tpu.wait_dma2 semaphore(%232 : memref<!tpu.dma_semaphore, #tpu.memory_space<semaphore_mem>>) src(%229 : memref<1x32xf32, #tpu.memory_space<any>>) dst(%230 : memref<1x32xf32, #tpu.memory_space<vmem>>)
    %c0_i32_246 = arith.constant 0 : i32
    %c9_i32_247 = arith.constant 9 : i32
    %c0_i32_248 = arith.constant 0 : i32
    %233 = tpu.memref_slice %arg1[%81, %c0_i32_248] : memref<50x32xf32, #tpu.memory_space<any>> -> memref<1x32xf32, #tpu.memory_space<any>>
    %c33_i32_249 = arith.constant 33 : i32
    %c0_i32_250 = arith.constant 0 : i32
    %234 = tpu.memref_slice %arg15[%c33_i32_249, %c0_i32_250] : memref<64x32xf32, #tpu.memory_space<vmem>> -> memref<1x32xf32, #tpu.memory_space<vmem>>
    %235 = tpu.memref_slice %arg20[%c0_i32_246, %c9_i32_247] : memref<2x16x!tpu.dma_semaphore, #tpu.memory_space<semaphore_mem>> -> memref<1x1x!tpu.dma_semaphore, #tpu.memory_space<semaphore_mem>>
    %236 = tpu.memref_squeeze %235 : memref<1x1x!tpu.dma_semaphore, #tpu.memory_space<semaphore_mem>> -> memref<!tpu.dma_semaphore, #tpu.memory_space<semaphore_mem>>
    tpu.wait_dma2 semaphore(%236 : memref<!tpu.dma_semaphore, #tpu.memory_space<semaphore_mem>>) src(%233 : memref<1x32xf32, #tpu.memory_space<any>>) dst(%234 : memref<1x32xf32, #tpu.memory_space<vmem>>)
    %c1_i32_251 = arith.constant 1 : i32
    %c9_i32_252 = arith.constant 9 : i32
    %c0_i32_253 = arith.constant 0 : i32
    %237 = tpu.memref_slice %arg1[%81, %c0_i32_253] : memref<50x32xf32, #tpu.memory_space<any>> -> memref<1x32xf32, #tpu.memory_space<any>>
    %c25_i32_254 = arith.constant 25 : i32
    %c0_i32_255 = arith.constant 0 : i32
    %238 = tpu.memref_slice %arg16[%c25_i32_254, %c0_i32_255] : memref<64x32xf32, #tpu.memory_space<vmem>> -> memref<1x32xf32, #tpu.memory_space<vmem>>
    %239 = tpu.memref_slice %arg20[%c1_i32_251, %c9_i32_252] : memref<2x16x!tpu.dma_semaphore, #tpu.memory_space<semaphore_mem>> -> memref<1x1x!tpu.dma_semaphore, #tpu.memory_space<semaphore_mem>>
    %240 = tpu.memref_squeeze %239 : memref<1x1x!tpu.dma_semaphore, #tpu.memory_space<semaphore_mem>> -> memref<!tpu.dma_semaphore, #tpu.memory_space<semaphore_mem>>
    tpu.wait_dma2 semaphore(%240 : memref<!tpu.dma_semaphore, #tpu.memory_space<semaphore_mem>>) src(%237 : memref<1x32xf32, #tpu.memory_space<any>>) dst(%238 : memref<1x32xf32, #tpu.memory_space<vmem>>)
    %c0_i32_256 = arith.constant 0 : i32
    %c10_i32_257 = arith.constant 10 : i32
    %c0_i32_258 = arith.constant 0 : i32
    %241 = tpu.memref_slice %arg1[%90, %c0_i32_258] : memref<50x32xf32, #tpu.memory_space<any>> -> memref<1x32xf32, #tpu.memory_space<any>>
    %c40_i32_259 = arith.constant 40 : i32
    %c0_i32_260 = arith.constant 0 : i32
    %242 = tpu.memref_slice %arg15[%c40_i32_259, %c0_i32_260] : memref<64x32xf32, #tpu.memory_space<vmem>> -> memref<1x32xf32, #tpu.memory_space<vmem>>
    %243 = tpu.memref_slice %arg20[%c0_i32_256, %c10_i32_257] : memref<2x16x!tpu.dma_semaphore, #tpu.memory_space<semaphore_mem>> -> memref<1x1x!tpu.dma_semaphore, #tpu.memory_space<semaphore_mem>>
    %244 = tpu.memref_squeeze %243 : memref<1x1x!tpu.dma_semaphore, #tpu.memory_space<semaphore_mem>> -> memref<!tpu.dma_semaphore, #tpu.memory_space<semaphore_mem>>
    tpu.wait_dma2 semaphore(%244 : memref<!tpu.dma_semaphore, #tpu.memory_space<semaphore_mem>>) src(%241 : memref<1x32xf32, #tpu.memory_space<any>>) dst(%242 : memref<1x32xf32, #tpu.memory_space<vmem>>)
    %c1_i32_261 = arith.constant 1 : i32
    %c10_i32_262 = arith.constant 10 : i32
    %c0_i32_263 = arith.constant 0 : i32
    %245 = tpu.memref_slice %arg1[%90, %c0_i32_263] : memref<50x32xf32, #tpu.memory_space<any>> -> memref<1x32xf32, #tpu.memory_space<any>>
    %c16_i32_264 = arith.constant 16 : i32
    %c0_i32_265 = arith.constant 0 : i32
    %246 = tpu.memref_slice %arg16[%c16_i32_264, %c0_i32_265] : memref<64x32xf32, #tpu.memory_space<vmem>> -> memref<1x32xf32, #tpu.memory_space<vmem>>
    %247 = tpu.memref_slice %arg20[%c1_i32_261, %c10_i32_262] : memref<2x16x!tpu.dma_semaphore, #tpu.memory_space<semaphore_mem>> -> memref<1x1x!tpu.dma_semaphore, #tpu.memory_space<semaphore_mem>>
    %248 = tpu.memref_squeeze %247 : memref<1x1x!tpu.dma_semaphore, #tpu.memory_space<semaphore_mem>> -> memref<!tpu.dma_semaphore, #tpu.memory_space<semaphore_mem>>
    tpu.wait_dma2 semaphore(%248 : memref<!tpu.dma_semaphore, #tpu.memory_space<semaphore_mem>>) src(%245 : memref<1x32xf32, #tpu.memory_space<any>>) dst(%246 : memref<1x32xf32, #tpu.memory_space<vmem>>)
    %c0_i32_266 = arith.constant 0 : i32
    %c11_i32_267 = arith.constant 11 : i32
    %c0_i32_268 = arith.constant 0 : i32
    %249 = tpu.memref_slice %arg1[%99, %c0_i32_268] : memref<50x32xf32, #tpu.memory_space<any>> -> memref<1x32xf32, #tpu.memory_space<any>>
    %c41_i32_269 = arith.constant 41 : i32
    %c0_i32_270 = arith.constant 0 : i32
    %250 = tpu.memref_slice %arg15[%c41_i32_269, %c0_i32_270] : memref<64x32xf32, #tpu.memory_space<vmem>> -> memref<1x32xf32, #tpu.memory_space<vmem>>
    %251 = tpu.memref_slice %arg20[%c0_i32_266, %c11_i32_267] : memref<2x16x!tpu.dma_semaphore, #tpu.memory_space<semaphore_mem>> -> memref<1x1x!tpu.dma_semaphore, #tpu.memory_space<semaphore_mem>>
    %252 = tpu.memref_squeeze %251 : memref<1x1x!tpu.dma_semaphore, #tpu.memory_space<semaphore_mem>> -> memref<!tpu.dma_semaphore, #tpu.memory_space<semaphore_mem>>
    tpu.wait_dma2 semaphore(%252 : memref<!tpu.dma_semaphore, #tpu.memory_space<semaphore_mem>>) src(%249 : memref<1x32xf32, #tpu.memory_space<any>>) dst(%250 : memref<1x32xf32, #tpu.memory_space<vmem>>)
    %c1_i32_271 = arith.constant 1 : i32
    %c11_i32_272 = arith.constant 11 : i32
    %c0_i32_273 = arith.constant 0 : i32
    %253 = tpu.memref_slice %arg1[%99, %c0_i32_273] : memref<50x32xf32, #tpu.memory_space<any>> -> memref<1x32xf32, #tpu.memory_space<any>>
    %c17_i32_274 = arith.constant 17 : i32
    %c0_i32_275 = arith.constant 0 : i32
    %254 = tpu.memref_slice %arg16[%c17_i32_274, %c0_i32_275] : memref<64x32xf32, #tpu.memory_space<vmem>> -> memref<1x32xf32, #tpu.memory_space<vmem>>
    %255 = tpu.memref_slice %arg20[%c1_i32_271, %c11_i32_272] : memref<2x16x!tpu.dma_semaphore, #tpu.memory_space<semaphore_mem>> -> memref<1x1x!tpu.dma_semaphore, #tpu.memory_space<semaphore_mem>>
    %256 = tpu.memref_squeeze %255 : memref<1x1x!tpu.dma_semaphore, #tpu.memory_space<semaphore_mem>> -> memref<!tpu.dma_semaphore, #tpu.memory_space<semaphore_mem>>
    tpu.wait_dma2 semaphore(%256 : memref<!tpu.dma_semaphore, #tpu.memory_space<semaphore_mem>>) src(%253 : memref<1x32xf32, #tpu.memory_space<any>>) dst(%254 : memref<1x32xf32, #tpu.memory_space<vmem>>)
    %c0_i32_276 = arith.constant 0 : i32
    %c12_i32_277 = arith.constant 12 : i32
    %c0_i32_278 = arith.constant 0 : i32
    %257 = tpu.memref_slice %arg1[%108, %c0_i32_278] : memref<50x32xf32, #tpu.memory_space<any>> -> memref<1x32xf32, #tpu.memory_space<any>>
    %c48_i32_279 = arith.constant 48 : i32
    %c0_i32_280 = arith.constant 0 : i32
    %258 = tpu.memref_slice %arg15[%c48_i32_279, %c0_i32_280] : memref<64x32xf32, #tpu.memory_space<vmem>> -> memref<1x32xf32, #tpu.memory_space<vmem>>
    %259 = tpu.memref_slice %arg20[%c0_i32_276, %c12_i32_277] : memref<2x16x!tpu.dma_semaphore, #tpu.memory_space<semaphore_mem>> -> memref<1x1x!tpu.dma_semaphore, #tpu.memory_space<semaphore_mem>>
    %260 = tpu.memref_squeeze %259 : memref<1x1x!tpu.dma_semaphore, #tpu.memory_space<semaphore_mem>> -> memref<!tpu.dma_semaphore, #tpu.memory_space<semaphore_mem>>
    tpu.wait_dma2 semaphore(%260 : memref<!tpu.dma_semaphore, #tpu.memory_space<semaphore_mem>>) src(%257 : memref<1x32xf32, #tpu.memory_space<any>>) dst(%258 : memref<1x32xf32, #tpu.memory_space<vmem>>)
    %c1_i32_281 = arith.constant 1 : i32
    %c12_i32_282 = arith.constant 12 : i32
    %c0_i32_283 = arith.constant 0 : i32
    %261 = tpu.memref_slice %arg1[%108, %c0_i32_283] : memref<50x32xf32, #tpu.memory_space<any>> -> memref<1x32xf32, #tpu.memory_space<any>>
    %c8_i32_284 = arith.constant 8 : i32
    %c0_i32_285 = arith.constant 0 : i32
    %262 = tpu.memref_slice %arg16[%c8_i32_284, %c0_i32_285] : memref<64x32xf32, #tpu.memory_space<vmem>> -> memref<1x32xf32, #tpu.memory_space<vmem>>
    %263 = tpu.memref_slice %arg20[%c1_i32_281, %c12_i32_282] : memref<2x16x!tpu.dma_semaphore, #tpu.memory_space<semaphore_mem>> -> memref<1x1x!tpu.dma_semaphore, #tpu.memory_space<semaphore_mem>>
    %264 = tpu.memref_squeeze %263 : memref<1x1x!tpu.dma_semaphore, #tpu.memory_space<semaphore_mem>> -> memref<!tpu.dma_semaphore, #tpu.memory_space<semaphore_mem>>
    tpu.wait_dma2 semaphore(%264 : memref<!tpu.dma_semaphore, #tpu.memory_space<semaphore_mem>>) src(%261 : memref<1x32xf32, #tpu.memory_space<any>>) dst(%262 : memref<1x32xf32, #tpu.memory_space<vmem>>)
    %c0_i32_286 = arith.constant 0 : i32
    %c13_i32_287 = arith.constant 13 : i32
    %c0_i32_288 = arith.constant 0 : i32
    %265 = tpu.memref_slice %arg1[%117, %c0_i32_288] : memref<50x32xf32, #tpu.memory_space<any>> -> memref<1x32xf32, #tpu.memory_space<any>>
    %c49_i32_289 = arith.constant 49 : i32
    %c0_i32_290 = arith.constant 0 : i32
    %266 = tpu.memref_slice %arg15[%c49_i32_289, %c0_i32_290] : memref<64x32xf32, #tpu.memory_space<vmem>> -> memref<1x32xf32, #tpu.memory_space<vmem>>
    %267 = tpu.memref_slice %arg20[%c0_i32_286, %c13_i32_287] : memref<2x16x!tpu.dma_semaphore, #tpu.memory_space<semaphore_mem>> -> memref<1x1x!tpu.dma_semaphore, #tpu.memory_space<semaphore_mem>>
    %268 = tpu.memref_squeeze %267 : memref<1x1x!tpu.dma_semaphore, #tpu.memory_space<semaphore_mem>> -> memref<!tpu.dma_semaphore, #tpu.memory_space<semaphore_mem>>
    tpu.wait_dma2 semaphore(%268 : memref<!tpu.dma_semaphore, #tpu.memory_space<semaphore_mem>>) src(%265 : memref<1x32xf32, #tpu.memory_space<any>>) dst(%266 : memref<1x32xf32, #tpu.memory_space<vmem>>)
    %c1_i32_291 = arith.constant 1 : i32
    %c13_i32_292 = arith.constant 13 : i32
    %c0_i32_293 = arith.constant 0 : i32
    %269 = tpu.memref_slice %arg1[%117, %c0_i32_293] : memref<50x32xf32, #tpu.memory_space<any>> -> memref<1x32xf32, #tpu.memory_space<any>>
    %c9_i32_294 = arith.constant 9 : i32
    %c0_i32_295 = arith.constant 0 : i32
    %270 = tpu.memref_slice %arg16[%c9_i32_294, %c0_i32_295] : memref<64x32xf32, #tpu.memory_space<vmem>> -> memref<1x32xf32, #tpu.memory_space<vmem>>
    %271 = tpu.memref_slice %arg20[%c1_i32_291, %c13_i32_292] : memref<2x16x!tpu.dma_semaphore, #tpu.memory_space<semaphore_mem>> -> memref<1x1x!tpu.dma_semaphore, #tpu.memory_space<semaphore_mem>>
    %272 = tpu.memref_squeeze %271 : memref<1x1x!tpu.dma_semaphore, #tpu.memory_space<semaphore_mem>> -> memref<!tpu.dma_semaphore, #tpu.memory_space<semaphore_mem>>
    tpu.wait_dma2 semaphore(%272 : memref<!tpu.dma_semaphore, #tpu.memory_space<semaphore_mem>>) src(%269 : memref<1x32xf32, #tpu.memory_space<any>>) dst(%270 : memref<1x32xf32, #tpu.memory_space<vmem>>)
    %c0_i32_296 = arith.constant 0 : i32
    %c14_i32_297 = arith.constant 14 : i32
    %c0_i32_298 = arith.constant 0 : i32
    %273 = tpu.memref_slice %arg1[%126, %c0_i32_298] : memref<50x32xf32, #tpu.memory_space<any>> -> memref<1x32xf32, #tpu.memory_space<any>>
    %c56_i32_299 = arith.constant 56 : i32
    %c0_i32_300 = arith.constant 0 : i32
    %274 = tpu.memref_slice %arg15[%c56_i32_299, %c0_i32_300] : memref<64x32xf32, #tpu.memory_space<vmem>> -> memref<1x32xf32, #tpu.memory_space<vmem>>
    %275 = tpu.memref_slice %arg20[%c0_i32_296, %c14_i32_297] : memref<2x16x!tpu.dma_semaphore, #tpu.memory_space<semaphore_mem>> -> memref<1x1x!tpu.dma_semaphore, #tpu.memory_space<semaphore_mem>>
    %276 = tpu.memref_squeeze %275 : memref<1x1x!tpu.dma_semaphore, #tpu.memory_space<semaphore_mem>> -> memref<!tpu.dma_semaphore, #tpu.memory_space<semaphore_mem>>
    tpu.wait_dma2 semaphore(%276 : memref<!tpu.dma_semaphore, #tpu.memory_space<semaphore_mem>>) src(%273 : memref<1x32xf32, #tpu.memory_space<any>>) dst(%274 : memref<1x32xf32, #tpu.memory_space<vmem>>)
    %c1_i32_301 = arith.constant 1 : i32
    %c14_i32_302 = arith.constant 14 : i32
    %c0_i32_303 = arith.constant 0 : i32
    %277 = tpu.memref_slice %arg1[%126, %c0_i32_303] : memref<50x32xf32, #tpu.memory_space<any>> -> memref<1x32xf32, #tpu.memory_space<any>>
    %c0_i32_304 = arith.constant 0 : i32
    %c0_i32_305 = arith.constant 0 : i32
    %278 = tpu.memref_slice %arg16[%c0_i32_304, %c0_i32_305] : memref<64x32xf32, #tpu.memory_space<vmem>> -> memref<1x32xf32, #tpu.memory_space<vmem>>
    %279 = tpu.memref_slice %arg20[%c1_i32_301, %c14_i32_302] : memref<2x16x!tpu.dma_semaphore, #tpu.memory_space<semaphore_mem>> -> memref<1x1x!tpu.dma_semaphore, #tpu.memory_space<semaphore_mem>>
    %280 = tpu.memref_squeeze %279 : memref<1x1x!tpu.dma_semaphore, #tpu.memory_space<semaphore_mem>> -> memref<!tpu.dma_semaphore, #tpu.memory_space<semaphore_mem>>
    tpu.wait_dma2 semaphore(%280 : memref<!tpu.dma_semaphore, #tpu.memory_space<semaphore_mem>>) src(%277 : memref<1x32xf32, #tpu.memory_space<any>>) dst(%278 : memref<1x32xf32, #tpu.memory_space<vmem>>)
    %c0_i32_306 = arith.constant 0 : i32
    %c15_i32_307 = arith.constant 15 : i32
    %c0_i32_308 = arith.constant 0 : i32
    %281 = tpu.memref_slice %arg1[%135, %c0_i32_308] : memref<50x32xf32, #tpu.memory_space<any>> -> memref<1x32xf32, #tpu.memory_space<any>>
    %c57_i32_309 = arith.constant 57 : i32
    %c0_i32_310 = arith.constant 0 : i32
    %282 = tpu.memref_slice %arg15[%c57_i32_309, %c0_i32_310] : memref<64x32xf32, #tpu.memory_space<vmem>> -> memref<1x32xf32, #tpu.memory_space<vmem>>
    %283 = tpu.memref_slice %arg20[%c0_i32_306, %c15_i32_307] : memref<2x16x!tpu.dma_semaphore, #tpu.memory_space<semaphore_mem>> -> memref<1x1x!tpu.dma_semaphore, #tpu.memory_space<semaphore_mem>>
    %284 = tpu.memref_squeeze %283 : memref<1x1x!tpu.dma_semaphore, #tpu.memory_space<semaphore_mem>> -> memref<!tpu.dma_semaphore, #tpu.memory_space<semaphore_mem>>
    tpu.wait_dma2 semaphore(%284 : memref<!tpu.dma_semaphore, #tpu.memory_space<semaphore_mem>>) src(%281 : memref<1x32xf32, #tpu.memory_space<any>>) dst(%282 : memref<1x32xf32, #tpu.memory_space<vmem>>)
    %c1_i32_311 = arith.constant 1 : i32
    %c15_i32_312 = arith.constant 15 : i32
    %c0_i32_313 = arith.constant 0 : i32
    %285 = tpu.memref_slice %arg1[%135, %c0_i32_313] : memref<50x32xf32, #tpu.memory_space<any>> -> memref<1x32xf32, #tpu.memory_space<any>>
    %c1_i32_314 = arith.constant 1 : i32
    %c0_i32_315 = arith.constant 0 : i32
    %286 = tpu.memref_slice %arg16[%c1_i32_314, %c0_i32_315] : memref<64x32xf32, #tpu.memory_space<vmem>> -> memref<1x32xf32, #tpu.memory_space<vmem>>
    %287 = tpu.memref_slice %arg20[%c1_i32_311, %c15_i32_312] : memref<2x16x!tpu.dma_semaphore, #tpu.memory_space<semaphore_mem>> -> memref<1x1x!tpu.dma_semaphore, #tpu.memory_space<semaphore_mem>>
    %288 = tpu.memref_squeeze %287 : memref<1x1x!tpu.dma_semaphore, #tpu.memory_space<semaphore_mem>> -> memref<!tpu.dma_semaphore, #tpu.memory_space<semaphore_mem>>
    tpu.wait_dma2 semaphore(%288 : memref<!tpu.dma_semaphore, #tpu.memory_space<semaphore_mem>>) src(%285 : memref<1x32xf32, #tpu.memory_space<any>>) dst(%286 : memref<1x32xf32, #tpu.memory_space<vmem>>)
    %c0_316 = arith.constant 0 : index
    %c0_317 = arith.constant 0 : index
    %289 = vector.load %arg15[%c0_316, %c0_317] : memref<64x32xf32, #tpu.memory_space<vmem>>, vector<64x32xf32>
    %c0_318 = arith.constant 0 : index
    %c0_319 = arith.constant 0 : index
    %290 = vector.load %arg2[%c0_318, %c0_319] : memref<32x512xf32, #tpu.memory_space<vmem>>, vector<32x512xf32>
    %cst_320 = arith.constant dense<0.000000e+00> : vector<64x512xf32>
    %291 = tpu.matmul %289, %290, %cst_320 {dimension_numbers = #tpu.dot_dimension_numbers<[1], [0], [0], [1], [0, 0, 1, 1], [], []>} : vector<64x32xf32>, vector<32x512xf32>, vector<64x512xf32> -> vector<64x512xf32>
    %c0_321 = arith.constant 0 : index
    %c0_322 = arith.constant 0 : index
    %292 = vector.load %arg16[%c0_321, %c0_322] : memref<64x32xf32, #tpu.memory_space<vmem>>, vector<64x32xf32>
    %c0_323 = arith.constant 0 : index
    %c0_324 = arith.constant 0 : index
    %293 = vector.load %arg3[%c0_323, %c0_324] : memref<32x512xf32, #tpu.memory_space<vmem>>, vector<32x512xf32>
    %cst_325 = arith.constant dense<0.000000e+00> : vector<64x512xf32>
    %294 = tpu.matmul %292, %293, %cst_325 {dimension_numbers = #tpu.dot_dimension_numbers<[1], [0], [0], [1], [0, 0, 1, 1], [], []>} : vector<64x32xf32>, vector<32x512xf32>, vector<64x512xf32> -> vector<64x512xf32>
    %295 = arith.addf %291, %294 : vector<64x512xf32>
    %c0_326 = arith.constant 0 : index
    %c0_327 = arith.constant 0 : index
    %296 = vector.load %arg5[%c0_326, %c0_327] : memref<1x512xf32, #tpu.memory_space<vmem>>, vector<1x512xf32>
    %297 = vector.broadcast %296 : vector<1x512xf32> to vector<64x512xf32>
    %298 = arith.addf %295, %297 : vector<64x512xf32>
    %c0_328 = arith.constant 0 : index
    %c0_329 = arith.constant 0 : index
    %299 = vector.load %arg19[%c0_328, %c0_329] : memref<64x512xf32, #tpu.memory_space<vmem>>, vector<64x512xf32>
    tpu.vector_store %arg19[%c0_328, %c0_329], %298 {strides = array<i32>} : memref<64x512xf32, #tpu.memory_space<vmem>>, vector<64x512xf32>,
    %cst_330 = arith.constant 0.000000e+00 : f32
    %300 = vector.broadcast %cst_330 : f32 to vector<8x128xf32>
    %cst_331 = arith.constant 0.000000e+00 : f32
    %301 = vector.broadcast %cst_331 : f32 to vector<8x128xf32>
    %c0_332 = arith.constant 0 : index
    %c0_333 = arith.constant 0 : index
    %302 = vector.load %arg19[%c0_332, %c0_333] : memref<64x512xf32, #tpu.memory_space<vmem>>, vector<8x512xf32>
    %c0_334 = arith.constant 0 : index
    %c0_335 = arith.constant 0 : index
    %303 = vector.load %arg4[%c0_334, %c0_335] : memref<128x512xf32, #tpu.memory_space<vmem>>, vector<128x512xf32>
    %cst_336 = arith.constant dense<0.000000e+00> : vector<8x512xf32>
    %304 = tpu.matmul %300, %303, %cst_336 {dimension_numbers = #tpu.dot_dimension_numbers<[1], [0], [0], [1], [0, 0, 1, 1], [], []>} : vector<8x128xf32>, vector<128x512xf32>, vector<8x512xf32> -> vector<8x512xf32>
    %305 = arith.addf %302, %304 : vector<8x512xf32>
    %306 = vector.extract_strided_slice %305 {offsets = [0, 0], sizes = [8, 128], strides = [1, 1]} : vector<8x512xf32> to vector<8x128xf32>
    %307 = arith.negf %306 : vector<8x128xf32>
    %308 = math.exp %307 : vector<8x128xf32>
    %cst_337 = arith.constant 1.000000e+00 : f32
    %309 = vector.broadcast %cst_337 : f32 to vector<8x128xf32>
    %310 = arith.addf %309, %308 : vector<8x128xf32>
    %311 = arith.divf %309, %310 : vector<8x128xf32>
    %312 = vector.extract_strided_slice %305 {offsets = [0, 128], sizes = [8, 128], strides = [1, 1]} : vector<8x512xf32> to vector<8x128xf32>
    %313 = arith.negf %312 : vector<8x128xf32>
    %314 = math.exp %313 : vector<8x128xf32>
    %cst_338 = arith.constant 1.000000e+00 : f32
    %315 = vector.broadcast %cst_338 : f32 to vector<8x128xf32>
    %316 = arith.addf %315, %314 : vector<8x128xf32>
    %317 = arith.divf %315, %316 : vector<8x128xf32>
    %318 = vector.extract_strided_slice %305 {offsets = [0, 256], sizes = [8, 128], strides = [1, 1]} : vector<8x512xf32> to vector<8x128xf32>
    %319 = math.tanh %318 : vector<8x128xf32>
    %320 = vector.extract_strided_slice %305 {offsets = [0, 384], sizes = [8, 128], strides = [1, 1]} : vector<8x512xf32> to vector<8x128xf32>
    %321 = arith.negf %320 : vector<8x128xf32>
    %322 = math.exp %321 : vector<8x128xf32>
    %cst_339 = arith.constant 1.000000e+00 : f32
    %323 = vector.broadcast %cst_339 : f32 to vector<8x128xf32>
    %324 = arith.addf %323, %322 : vector<8x128xf32>
    %325 = arith.divf %323, %324 : vector<8x128xf32>
    %326 = arith.mulf %317, %301 : vector<8x128xf32>
    %327 = arith.mulf %311, %319 : vector<8x128xf32>
    %328 = arith.addf %326, %327 : vector<8x128xf32>
    %329 = math.tanh %328 : vector<8x128xf32>
    %330 = arith.mulf %325, %329 : vector<8x128xf32>
    %c0_340 = arith.constant 0 : index
    %c0_341 = arith.constant 0 : index
    %331 = vector.load %arg17[%c0_340, %c0_341] : memref<64x128xf32, #tpu.memory_space<vmem>>, vector<8x128xf32>
    tpu.vector_store %arg17[%c0_340, %c0_341], %330 {strides = array<i32>} : memref<64x128xf32, #tpu.memory_space<vmem>>, vector<8x128xf32>,
    %c56_342 = arith.constant 56 : index
    %c0_343 = arith.constant 0 : index
    %332 = vector.load %arg18[%c56_342, %c0_343] : memref<64x128xf32, #tpu.memory_space<vmem>>, vector<8x128xf32>
    tpu.vector_store %arg18[%c56_342, %c0_343], %330 {strides = array<i32>} : memref<64x128xf32, #tpu.memory_space<vmem>>, vector<8x128xf32>,
    %c8_344 = arith.constant 8 : index
    %c0_345 = arith.constant 0 : index
    %333 = vector.load %arg19[%c8_344, %c0_345] : memref<64x512xf32, #tpu.memory_space<vmem>>, vector<8x512xf32>
    %c0_346 = arith.constant 0 : index
    %c0_347 = arith.constant 0 : index
    %334 = vector.load %arg4[%c0_346, %c0_347] : memref<128x512xf32, #tpu.memory_space<vmem>>, vector<128x512xf32>
    %cst_348 = arith.constant dense<0.000000e+00> : vector<8x512xf32>
    %335 = tpu.matmul %330, %334, %cst_348 {dimension_numbers = #tpu.dot_dimension_numbers<[1], [0], [0], [1], [0, 0, 1, 1], [], []>} : vector<8x128xf32>, vector<128x512xf32>, vector<8x512xf32> -> vector<8x512xf32>
    %336 = arith.addf %333, %335 : vector<8x512xf32>
    %337 = vector.extract_strided_slice %336 {offsets = [0, 0], sizes = [8, 128], strides = [1, 1]} : vector<8x512xf32> to vector<8x128xf32>
    %338 = arith.negf %337 : vector<8x128xf32>
    %339 = math.exp %338 : vector<8x128xf32>
    %cst_349 = arith.constant 1.000000e+00 : f32
    %340 = vector.broadcast %cst_349 : f32 to vector<8x128xf32>
    %341 = arith.addf %340, %339 : vector<8x128xf32>
    %342 = arith.divf %340, %341 : vector<8x128xf32>
    %343 = vector.extract_strided_slice %336 {offsets = [0, 128], sizes = [8, 128], strides = [1, 1]} : vector<8x512xf32> to vector<8x128xf32>
    %344 = arith.negf %343 : vector<8x128xf32>
    %345 = math.exp %344 : vector<8x128xf32>
    %cst_350 = arith.constant 1.000000e+00 : f32
    %346 = vector.broadcast %cst_350 : f32 to vector<8x128xf32>
    %347 = arith.addf %346, %345 : vector<8x128xf32>
    %348 = arith.divf %346, %347 : vector<8x128xf32>
    %349 = vector.extract_strided_slice %336 {offsets = [0, 256], sizes = [8, 128], strides = [1, 1]} : vector<8x512xf32> to vector<8x128xf32>
    %350 = math.tanh %349 : vector<8x128xf32>
    %351 = vector.extract_strided_slice %336 {offsets = [0, 384], sizes = [8, 128], strides = [1, 1]} : vector<8x512xf32> to vector<8x128xf32>
    %352 = arith.negf %351 : vector<8x128xf32>
    %353 = math.exp %352 : vector<8x128xf32>
    %cst_351 = arith.constant 1.000000e+00 : f32
    %354 = vector.broadcast %cst_351 : f32 to vector<8x128xf32>
    %355 = arith.addf %354, %353 : vector<8x128xf32>
    %356 = arith.divf %354, %355 : vector<8x128xf32>
    %357 = arith.mulf %348, %328 : vector<8x128xf32>
    %358 = arith.mulf %342, %350 : vector<8x128xf32>
    %359 = arith.addf %357, %358 : vector<8x128xf32>
    %360 = math.tanh %359 : vector<8x128xf32>
    %361 = arith.mulf %356, %360 : vector<8x128xf32>
    %c8_352 = arith.constant 8 : index
    %c0_353 = arith.constant 0 : index
    %362 = vector.load %arg17[%c8_352, %c0_353] : memref<64x128xf32, #tpu.memory_space<vmem>>, vector<8x128xf32>
    tpu.vector_store %arg17[%c8_352, %c0_353], %361 {strides = array<i32>} : memref<64x128xf32, #tpu.memory_space<vmem>>, vector<8x128xf32>,
    %c48_354 = arith.constant 48 : index
    %c0_355 = arith.constant 0 : index
    %363 = vector.load %arg18[%c48_354, %c0_355] : memref<64x128xf32, #tpu.memory_space<vmem>>, vector<8x128xf32>
    tpu.vector_store %arg18[%c48_354, %c0_355], %361 {strides = array<i32>} : memref<64x128xf32, #tpu.memory_space<vmem>>, vector<8x128xf32>,
    %c16_356 = arith.constant 16 : index
    %c0_357 = arith.constant 0 : index
    %364 = vector.load %arg19[%c16_356, %c0_357] : memref<64x512xf32, #tpu.memory_space<vmem>>, vector<8x512xf32>
    %c0_358 = arith.constant 0 : index
    %c0_359 = arith.constant 0 : index
    %365 = vector.load %arg4[%c0_358, %c0_359] : memref<128x512xf32, #tpu.memory_space<vmem>>, vector<128x512xf32>
    %cst_360 = arith.constant dense<0.000000e+00> : vector<8x512xf32>
    %366 = tpu.matmul %361, %365, %cst_360 {dimension_numbers = #tpu.dot_dimension_numbers<[1], [0], [0], [1], [0, 0, 1, 1], [], []>} : vector<8x128xf32>, vector<128x512xf32>, vector<8x512xf32> -> vector<8x512xf32>
    %367 = arith.addf %364, %366 : vector<8x512xf32>
    %368 = vector.extract_strided_slice %367 {offsets = [0, 0], sizes = [8, 128], strides = [1, 1]} : vector<8x512xf32> to vector<8x128xf32>
    %369 = arith.negf %368 : vector<8x128xf32>
    %370 = math.exp %369 : vector<8x128xf32>
    %cst_361 = arith.constant 1.000000e+00 : f32
    %371 = vector.broadcast %cst_361 : f32 to vector<8x128xf32>
    %372 = arith.addf %371, %370 : vector<8x128xf32>
    %373 = arith.divf %371, %372 : vector<8x128xf32>
    %374 = vector.extract_strided_slice %367 {offsets = [0, 128], sizes = [8, 128], strides = [1, 1]} : vector<8x512xf32> to vector<8x128xf32>
    %375 = arith.negf %374 : vector<8x128xf32>
    %376 = math.exp %375 : vector<8x128xf32>
    %cst_362 = arith.constant 1.000000e+00 : f32
    %377 = vector.broadcast %cst_362 : f32 to vector<8x128xf32>
    %378 = arith.addf %377, %376 : vector<8x128xf32>
    %379 = arith.divf %377, %378 : vector<8x128xf32>
    %380 = vector.extract_strided_slice %367 {offsets = [0, 256], sizes = [8, 128], strides = [1, 1]} : vector<8x512xf32> to vector<8x128xf32>
    %381 = math.tanh %380 : vector<8x128xf32>
    %382 = vector.extract_strided_slice %367 {offsets = [0, 384], sizes = [8, 128], strides = [1, 1]} : vector<8x512xf32> to vector<8x128xf32>
    %383 = arith.negf %382 : vector<8x128xf32>
    %384 = math.exp %383 : vector<8x128xf32>
    %cst_363 = arith.constant 1.000000e+00 : f32
    %385 = vector.broadcast %cst_363 : f32 to vector<8x128xf32>
    %386 = arith.addf %385, %384 : vector<8x128xf32>
    %387 = arith.divf %385, %386 : vector<8x128xf32>
    %388 = arith.mulf %379, %359 : vector<8x128xf32>
    %389 = arith.mulf %373, %381 : vector<8x128xf32>
    %390 = arith.addf %388, %389 : vector<8x128xf32>
    %391 = math.tanh %390 : vector<8x128xf32>
    %392 = arith.mulf %387, %391 : vector<8x128xf32>
    %c16_364 = arith.constant 16 : index
    %c0_365 = arith.constant 0 : index
    %393 = vector.load %arg17[%c16_364, %c0_365] : memref<64x128xf32, #tpu.memory_space<vmem>>, vector<8x128xf32>
    tpu.vector_store %arg17[%c16_364, %c0_365], %392 {strides = array<i32>} : memref<64x128xf32, #tpu.memory_space<vmem>>, vector<8x128xf32>,
    %c40_366 = arith.constant 40 : index
    %c0_367 = arith.constant 0 : index
    %394 = vector.load %arg18[%c40_366, %c0_367] : memref<64x128xf32, #tpu.memory_space<vmem>>, vector<8x128xf32>
    tpu.vector_store %arg18[%c40_366, %c0_367], %392 {strides = array<i32>} : memref<64x128xf32, #tpu.memory_space<vmem>>, vector<8x128xf32>,
    %c24_368 = arith.constant 24 : index
    %c0_369 = arith.constant 0 : index
    %395 = vector.load %arg19[%c24_368, %c0_369] : memref<64x512xf32, #tpu.memory_space<vmem>>, vector<8x512xf32>
    %c0_370 = arith.constant 0 : index
    %c0_371 = arith.constant 0 : index
    %396 = vector.load %arg4[%c0_370, %c0_371] : memref<128x512xf32, #tpu.memory_space<vmem>>, vector<128x512xf32>
    %cst_372 = arith.constant dense<0.000000e+00> : vector<8x512xf32>
    %397 = tpu.matmul %392, %396, %cst_372 {dimension_numbers = #tpu.dot_dimension_numbers<[1], [0], [0], [1], [0, 0, 1, 1], [], []>} : vector<8x128xf32>, vector<128x512xf32>, vector<8x512xf32> -> vector<8x512xf32>
    %398 = arith.addf %395, %397 : vector<8x512xf32>
    %399 = vector.extract_strided_slice %398 {offsets = [0, 0], sizes = [8, 128], strides = [1, 1]} : vector<8x512xf32> to vector<8x128xf32>
    %400 = arith.negf %399 : vector<8x128xf32>
    %401 = math.exp %400 : vector<8x128xf32>
    %cst_373 = arith.constant 1.000000e+00 : f32
    %402 = vector.broadcast %cst_373 : f32 to vector<8x128xf32>
    %403 = arith.addf %402, %401 : vector<8x128xf32>
    %404 = arith.divf %402, %403 : vector<8x128xf32>
    %405 = vector.extract_strided_slice %398 {offsets = [0, 128], sizes = [8, 128], strides = [1, 1]} : vector<8x512xf32> to vector<8x128xf32>
    %406 = arith.negf %405 : vector<8x128xf32>
    %407 = math.exp %406 : vector<8x128xf32>
    %cst_374 = arith.constant 1.000000e+00 : f32
    %408 = vector.broadcast %cst_374 : f32 to vector<8x128xf32>
    %409 = arith.addf %408, %407 : vector<8x128xf32>
    %410 = arith.divf %408, %409 : vector<8x128xf32>
    %411 = vector.extract_strided_slice %398 {offsets = [0, 256], sizes = [8, 128], strides = [1, 1]} : vector<8x512xf32> to vector<8x128xf32>
    %412 = math.tanh %411 : vector<8x128xf32>
    %413 = vector.extract_strided_slice %398 {offsets = [0, 384], sizes = [8, 128], strides = [1, 1]} : vector<8x512xf32> to vector<8x128xf32>
    %414 = arith.negf %413 : vector<8x128xf32>
    %415 = math.exp %414 : vector<8x128xf32>
    %cst_375 = arith.constant 1.000000e+00 : f32
    %416 = vector.broadcast %cst_375 : f32 to vector<8x128xf32>
    %417 = arith.addf %416, %415 : vector<8x128xf32>
    %418 = arith.divf %416, %417 : vector<8x128xf32>
    %419 = arith.mulf %410, %390 : vector<8x128xf32>
    %420 = arith.mulf %404, %412 : vector<8x128xf32>
    %421 = arith.addf %419, %420 : vector<8x128xf32>
    %422 = math.tanh %421 : vector<8x128xf32>
    %423 = arith.mulf %418, %422 : vector<8x128xf32>
    %c24_376 = arith.constant 24 : index
    %c0_377 = arith.constant 0 : index
    %424 = vector.load %arg17[%c24_376, %c0_377] : memref<64x128xf32, #tpu.memory_space<vmem>>, vector<8x128xf32>
    tpu.vector_store %arg17[%c24_376, %c0_377], %423 {strides = array<i32>} : memref<64x128xf32, #tpu.memory_space<vmem>>, vector<8x128xf32>,
    %c32_378 = arith.constant 32 : index
    %c0_379 = arith.constant 0 : index
    %425 = vector.load %arg18[%c32_378, %c0_379] : memref<64x128xf32, #tpu.memory_space<vmem>>, vector<8x128xf32>
    tpu.vector_store %arg18[%c32_378, %c0_379], %423 {strides = array<i32>} : memref<64x128xf32, #tpu.memory_space<vmem>>, vector<8x128xf32>,
    %c32_380 = arith.constant 32 : index
    %c0_381 = arith.constant 0 : index
    %426 = vector.load %arg19[%c32_380, %c0_381] : memref<64x512xf32, #tpu.memory_space<vmem>>, vector<8x512xf32>
    %c0_382 = arith.constant 0 : index
    %c0_383 = arith.constant 0 : index
    %427 = vector.load %arg4[%c0_382, %c0_383] : memref<128x512xf32, #tpu.memory_space<vmem>>, vector<128x512xf32>
    %cst_384 = arith.constant dense<0.000000e+00> : vector<8x512xf32>
    %428 = tpu.matmul %423, %427, %cst_384 {dimension_numbers = #tpu.dot_dimension_numbers<[1], [0], [0], [1], [0, 0, 1, 1], [], []>} : vector<8x128xf32>, vector<128x512xf32>, vector<8x512xf32> -> vector<8x512xf32>
    %429 = arith.addf %426, %428 : vector<8x512xf32>
    %430 = vector.extract_strided_slice %429 {offsets = [0, 0], sizes = [8, 128], strides = [1, 1]} : vector<8x512xf32> to vector<8x128xf32>
    %431 = arith.negf %430 : vector<8x128xf32>
    %432 = math.exp %431 : vector<8x128xf32>
    %cst_385 = arith.constant 1.000000e+00 : f32
    %433 = vector.broadcast %cst_385 : f32 to vector<8x128xf32>
    %434 = arith.addf %433, %432 : vector<8x128xf32>
    %435 = arith.divf %433, %434 : vector<8x128xf32>
    %436 = vector.extract_strided_slice %429 {offsets = [0, 128], sizes = [8, 128], strides = [1, 1]} : vector<8x512xf32> to vector<8x128xf32>
    %437 = arith.negf %436 : vector<8x128xf32>
    %438 = math.exp %437 : vector<8x128xf32>
    %cst_386 = arith.constant 1.000000e+00 : f32
    %439 = vector.broadcast %cst_386 : f32 to vector<8x128xf32>
    %440 = arith.addf %439, %438 : vector<8x128xf32>
    %441 = arith.divf %439, %440 : vector<8x128xf32>
    %442 = vector.extract_strided_slice %429 {offsets = [0, 256], sizes = [8, 128], strides = [1, 1]} : vector<8x512xf32> to vector<8x128xf32>
    %443 = math.tanh %442 : vector<8x128xf32>
    %444 = vector.extract_strided_slice %429 {offsets = [0, 384], sizes = [8, 128], strides = [1, 1]} : vector<8x512xf32> to vector<8x128xf32>
    %445 = arith.negf %444 : vector<8x128xf32>
    %446 = math.exp %445 : vector<8x128xf32>
    %cst_387 = arith.constant 1.000000e+00 : f32
    %447 = vector.broadcast %cst_387 : f32 to vector<8x128xf32>
    %448 = arith.addf %447, %446 : vector<8x128xf32>
    %449 = arith.divf %447, %448 : vector<8x128xf32>
    %450 = arith.mulf %441, %421 : vector<8x128xf32>
    %451 = arith.mulf %435, %443 : vector<8x128xf32>
    %452 = arith.addf %450, %451 : vector<8x128xf32>
    %453 = math.tanh %452 : vector<8x128xf32>
    %454 = arith.mulf %449, %453 : vector<8x128xf32>
    %c32_388 = arith.constant 32 : index
    %c0_389 = arith.constant 0 : index
    %455 = vector.load %arg17[%c32_388, %c0_389] : memref<64x128xf32, #tpu.memory_space<vmem>>, vector<8x128xf32>
    tpu.vector_store %arg17[%c32_388, %c0_389], %454 {strides = array<i32>} : memref<64x128xf32, #tpu.memory_space<vmem>>, vector<8x128xf32>,
    %c24_390 = arith.constant 24 : index
    %c0_391 = arith.constant 0 : index
    %456 = vector.load %arg18[%c24_390, %c0_391] : memref<64x128xf32, #tpu.memory_space<vmem>>, vector<8x128xf32>
    tpu.vector_store %arg18[%c24_390, %c0_391], %454 {strides = array<i32>} : memref<64x128xf32, #tpu.memory_space<vmem>>, vector<8x128xf32>,
    %c40_392 = arith.constant 40 : index
    %c0_393 = arith.constant 0 : index
    %457 = vector.load %arg19[%c40_392, %c0_393] : memref<64x512xf32, #tpu.memory_space<vmem>>, vector<8x512xf32>
    %c0_394 = arith.constant 0 : index
    %c0_395 = arith.constant 0 : index
    %458 = vector.load %arg4[%c0_394, %c0_395] : memref<128x512xf32, #tpu.memory_space<vmem>>, vector<128x512xf32>
    %cst_396 = arith.constant dense<0.000000e+00> : vector<8x512xf32>
    %459 = tpu.matmul %454, %458, %cst_396 {dimension_numbers = #tpu.dot_dimension_numbers<[1], [0], [0], [1], [0, 0, 1, 1], [], []>} : vector<8x128xf32>, vector<128x512xf32>, vector<8x512xf32> -> vector<8x512xf32>
    %460 = arith.addf %457, %459 : vector<8x512xf32>
    %461 = vector.extract_strided_slice %460 {offsets = [0, 0], sizes = [8, 128], strides = [1, 1]} : vector<8x512xf32> to vector<8x128xf32>
    %462 = arith.negf %461 : vector<8x128xf32>
    %463 = math.exp %462 : vector<8x128xf32>
    %cst_397 = arith.constant 1.000000e+00 : f32
    %464 = vector.broadcast %cst_397 : f32 to vector<8x128xf32>
    %465 = arith.addf %464, %463 : vector<8x128xf32>
    %466 = arith.divf %464, %465 : vector<8x128xf32>
    %467 = vector.extract_strided_slice %460 {offsets = [0, 128], sizes = [8, 128], strides = [1, 1]} : vector<8x512xf32> to vector<8x128xf32>
    %468 = arith.negf %467 : vector<8x128xf32>
    %469 = math.exp %468 : vector<8x128xf32>
    %cst_398 = arith.constant 1.000000e+00 : f32
    %470 = vector.broadcast %cst_398 : f32 to vector<8x128xf32>
    %471 = arith.addf %470, %469 : vector<8x128xf32>
    %472 = arith.divf %470, %471 : vector<8x128xf32>
    %473 = vector.extract_strided_slice %460 {offsets = [0, 256], sizes = [8, 128], strides = [1, 1]} : vector<8x512xf32> to vector<8x128xf32>
    %474 = math.tanh %473 : vector<8x128xf32>
    %475 = vector.extract_strided_slice %460 {offsets = [0, 384], sizes = [8, 128], strides = [1, 1]} : vector<8x512xf32> to vector<8x128xf32>
    %476 = arith.negf %475 : vector<8x128xf32>
    %477 = math.exp %476 : vector<8x128xf32>
    %cst_399 = arith.constant 1.000000e+00 : f32
    %478 = vector.broadcast %cst_399 : f32 to vector<8x128xf32>
    %479 = arith.addf %478, %477 : vector<8x128xf32>
    %480 = arith.divf %478, %479 : vector<8x128xf32>
    %481 = arith.mulf %472, %452 : vector<8x128xf32>
    %482 = arith.mulf %466, %474 : vector<8x128xf32>
    %483 = arith.addf %481, %482 : vector<8x128xf32>
    %484 = math.tanh %483 : vector<8x128xf32>
    %485 = arith.mulf %480, %484 : vector<8x128xf32>
    %c40_400 = arith.constant 40 : index
    %c0_401 = arith.constant 0 : index
    %486 = vector.load %arg17[%c40_400, %c0_401] : memref<64x128xf32, #tpu.memory_space<vmem>>, vector<8x128xf32>
    tpu.vector_store %arg17[%c40_400, %c0_401], %485 {strides = array<i32>} : memref<64x128xf32, #tpu.memory_space<vmem>>, vector<8x128xf32>,
    %c16_402 = arith.constant 16 : index
    %c0_403 = arith.constant 0 : index
    %487 = vector.load %arg18[%c16_402, %c0_403] : memref<64x128xf32, #tpu.memory_space<vmem>>, vector<8x128xf32>
    tpu.vector_store %arg18[%c16_402, %c0_403], %485 {strides = array<i32>} : memref<64x128xf32, #tpu.memory_space<vmem>>, vector<8x128xf32>,
    %c48_404 = arith.constant 48 : index
    %c0_405 = arith.constant 0 : index
    %488 = vector.load %arg19[%c48_404, %c0_405] : memref<64x512xf32, #tpu.memory_space<vmem>>, vector<8x512xf32>
    %c0_406 = arith.constant 0 : index
    %c0_407 = arith.constant 0 : index
    %489 = vector.load %arg4[%c0_406, %c0_407] : memref<128x512xf32, #tpu.memory_space<vmem>>, vector<128x512xf32>
    %cst_408 = arith.constant dense<0.000000e+00> : vector<8x512xf32>
    %490 = tpu.matmul %485, %489, %cst_408 {dimension_numbers = #tpu.dot_dimension_numbers<[1], [0], [0], [1], [0, 0, 1, 1], [], []>} : vector<8x128xf32>, vector<128x512xf32>, vector<8x512xf32> -> vector<8x512xf32>
    %491 = arith.addf %488, %490 : vector<8x512xf32>
    %492 = vector.extract_strided_slice %491 {offsets = [0, 0], sizes = [8, 128], strides = [1, 1]} : vector<8x512xf32> to vector<8x128xf32>
    %493 = arith.negf %492 : vector<8x128xf32>
    %494 = math.exp %493 : vector<8x128xf32>
    %cst_409 = arith.constant 1.000000e+00 : f32
    %495 = vector.broadcast %cst_409 : f32 to vector<8x128xf32>
    %496 = arith.addf %495, %494 : vector<8x128xf32>
    %497 = arith.divf %495, %496 : vector<8x128xf32>
    %498 = vector.extract_strided_slice %491 {offsets = [0, 128], sizes = [8, 128], strides = [1, 1]} : vector<8x512xf32> to vector<8x128xf32>
    %499 = arith.negf %498 : vector<8x128xf32>
    %500 = math.exp %499 : vector<8x128xf32>
    %cst_410 = arith.constant 1.000000e+00 : f32
    %501 = vector.broadcast %cst_410 : f32 to vector<8x128xf32>
    %502 = arith.addf %501, %500 : vector<8x128xf32>
    %503 = arith.divf %501, %502 : vector<8x128xf32>
    %504 = vector.extract_strided_slice %491 {offsets = [0, 256], sizes = [8, 128], strides = [1, 1]} : vector<8x512xf32> to vector<8x128xf32>
    %505 = math.tanh %504 : vector<8x128xf32>
    %506 = vector.extract_strided_slice %491 {offsets = [0, 384], sizes = [8, 128], strides = [1, 1]} : vector<8x512xf32> to vector<8x128xf32>
    %507 = arith.negf %506 : vector<8x128xf32>
    %508 = math.exp %507 : vector<8x128xf32>
    %cst_411 = arith.constant 1.000000e+00 : f32
    %509 = vector.broadcast %cst_411 : f32 to vector<8x128xf32>
    %510 = arith.addf %509, %508 : vector<8x128xf32>
    %511 = arith.divf %509, %510 : vector<8x128xf32>
    %512 = arith.mulf %503, %483 : vector<8x128xf32>
    %513 = arith.mulf %497, %505 : vector<8x128xf32>
    %514 = arith.addf %512, %513 : vector<8x128xf32>
    %515 = math.tanh %514 : vector<8x128xf32>
    %516 = arith.mulf %511, %515 : vector<8x128xf32>
    %c48_412 = arith.constant 48 : index
    %c0_413 = arith.constant 0 : index
    %517 = vector.load %arg17[%c48_412, %c0_413] : memref<64x128xf32, #tpu.memory_space<vmem>>, vector<8x128xf32>
    tpu.vector_store %arg17[%c48_412, %c0_413], %516 {strides = array<i32>} : memref<64x128xf32, #tpu.memory_space<vmem>>, vector<8x128xf32>,
    %c8_414 = arith.constant 8 : index
    %c0_415 = arith.constant 0 : index
    %518 = vector.load %arg18[%c8_414, %c0_415] : memref<64x128xf32, #tpu.memory_space<vmem>>, vector<8x128xf32>
    tpu.vector_store %arg18[%c8_414, %c0_415], %516 {strides = array<i32>} : memref<64x128xf32, #tpu.memory_space<vmem>>, vector<8x128xf32>,
    %c56_416 = arith.constant 56 : index
    %c0_417 = arith.constant 0 : index
    %519 = vector.load %arg19[%c56_416, %c0_417] : memref<64x512xf32, #tpu.memory_space<vmem>>, vector<8x512xf32>
    %c0_418 = arith.constant 0 : index
    %c0_419 = arith.constant 0 : index
    %520 = vector.load %arg4[%c0_418, %c0_419] : memref<128x512xf32, #tpu.memory_space<vmem>>, vector<128x512xf32>
    %cst_420 = arith.constant dense<0.000000e+00> : vector<8x512xf32>
    %521 = tpu.matmul %516, %520, %cst_420 {dimension_numbers = #tpu.dot_dimension_numbers<[1], [0], [0], [1], [0, 0, 1, 1], [], []>} : vector<8x128xf32>, vector<128x512xf32>, vector<8x512xf32> -> vector<8x512xf32>
    %522 = arith.addf %519, %521 : vector<8x512xf32>
    %523 = vector.extract_strided_slice %522 {offsets = [0, 0], sizes = [8, 128], strides = [1, 1]} : vector<8x512xf32> to vector<8x128xf32>
    %524 = arith.negf %523 : vector<8x128xf32>
    %525 = math.exp %524 : vector<8x128xf32>
    %cst_421 = arith.constant 1.000000e+00 : f32
    %526 = vector.broadcast %cst_421 : f32 to vector<8x128xf32>
    %527 = arith.addf %526, %525 : vector<8x128xf32>
    %528 = arith.divf %526, %527 : vector<8x128xf32>
    %529 = vector.extract_strided_slice %522 {offsets = [0, 128], sizes = [8, 128], strides = [1, 1]} : vector<8x512xf32> to vector<8x128xf32>
    %530 = arith.negf %529 : vector<8x128xf32>
    %531 = math.exp %530 : vector<8x128xf32>
    %cst_422 = arith.constant 1.000000e+00 : f32
    %532 = vector.broadcast %cst_422 : f32 to vector<8x128xf32>
    %533 = arith.addf %532, %531 : vector<8x128xf32>
    %534 = arith.divf %532, %533 : vector<8x128xf32>
    %535 = vector.extract_strided_slice %522 {offsets = [0, 256], sizes = [8, 128], strides = [1, 1]} : vector<8x512xf32> to vector<8x128xf32>
    %536 = math.tanh %535 : vector<8x128xf32>
    %537 = vector.extract_strided_slice %522 {offsets = [0, 384], sizes = [8, 128], strides = [1, 1]} : vector<8x512xf32> to vector<8x128xf32>
    %538 = arith.negf %537 : vector<8x128xf32>
    %539 = math.exp %538 : vector<8x128xf32>
    %cst_423 = arith.constant 1.000000e+00 : f32
    %540 = vector.broadcast %cst_423 : f32 to vector<8x128xf32>
    %541 = arith.addf %540, %539 : vector<8x128xf32>
    %542 = arith.divf %540, %541 : vector<8x128xf32>
    %543 = arith.mulf %534, %514 : vector<8x128xf32>
    %544 = arith.mulf %528, %536 : vector<8x128xf32>
    %545 = arith.addf %543, %544 : vector<8x128xf32>
    %546 = math.tanh %545 : vector<8x128xf32>
    %547 = arith.mulf %542, %546 : vector<8x128xf32>
    %c56_424 = arith.constant 56 : index
    %c0_425 = arith.constant 0 : index
    %548 = vector.load %arg17[%c56_424, %c0_425] : memref<64x128xf32, #tpu.memory_space<vmem>>, vector<8x128xf32>
    tpu.vector_store %arg17[%c56_424, %c0_425], %547 {strides = array<i32>} : memref<64x128xf32, #tpu.memory_space<vmem>>, vector<8x128xf32>,
    %c0_426 = arith.constant 0 : index
    %c0_427 = arith.constant 0 : index
    %549 = vector.load %arg18[%c0_426, %c0_427] : memref<64x128xf32, #tpu.memory_space<vmem>>, vector<8x128xf32>
    tpu.vector_store %arg18[%c0_426, %c0_427], %547 {strides = array<i32>} : memref<64x128xf32, #tpu.memory_space<vmem>>, vector<8x128xf32>,
    %c0_428 = arith.constant 0 : index
    %c0_429 = arith.constant 0 : index
    %550 = vector.load %arg17[%c0_428, %c0_429] : memref<64x128xf32, #tpu.memory_space<vmem>>, vector<64x128xf32>
    %c0_430 = arith.constant 0 : index
    %c0_431 = arith.constant 0 : index
    %551 = vector.load %arg6[%c0_430, %c0_431] : memref<128x512xf32, #tpu.memory_space<vmem>>, vector<128x512xf32>
    %cst_432 = arith.constant dense<0.000000e+00> : vector<64x512xf32>
    %552 = tpu.matmul %550, %551, %cst_432 {dimension_numbers = #tpu.dot_dimension_numbers<[1], [0], [0], [1], [0, 0, 1, 1], [], []>} : vector<64x128xf32>, vector<128x512xf32>, vector<64x512xf32> -> vector<64x512xf32>
    %c0_433 = arith.constant 0 : index
    %c0_434 = arith.constant 0 : index
    %553 = vector.load %arg18[%c0_433, %c0_434] : memref<64x128xf32, #tpu.memory_space<vmem>>, vector<64x128xf32>
    %c0_435 = arith.constant 0 : index
    %c0_436 = arith.constant 0 : index
    %554 = vector.load %arg7[%c0_435, %c0_436] : memref<128x512xf32, #tpu.memory_space<vmem>>, vector<128x512xf32>
    %cst_437 = arith.constant dense<0.000000e+00> : vector<64x512xf32>
    %555 = tpu.matmul %553, %554, %cst_437 {dimension_numbers = #tpu.dot_dimension_numbers<[1], [0], [0], [1], [0, 0, 1, 1], [], []>} : vector<64x128xf32>, vector<128x512xf32>, vector<64x512xf32> -> vector<64x512xf32>
    %556 = arith.addf %552, %555 : vector<64x512xf32>
    %c0_438 = arith.constant 0 : index
    %c0_439 = arith.constant 0 : index
    %557 = vector.load %arg9[%c0_438, %c0_439] : memref<1x512xf32, #tpu.memory_space<vmem>>, vector<1x512xf32>
    %558 = vector.broadcast %557 : vector<1x512xf32> to vector<64x512xf32>
    %559 = arith.addf %556, %558 : vector<64x512xf32>
    %c0_440 = arith.constant 0 : index
    %c0_441 = arith.constant 0 : index
    %560 = vector.load %arg19[%c0_440, %c0_441] : memref<64x512xf32, #tpu.memory_space<vmem>>, vector<64x512xf32>
    tpu.vector_store %arg19[%c0_440, %c0_441], %559 {strides = array<i32>} : memref<64x512xf32, #tpu.memory_space<vmem>>, vector<64x512xf32>,
    %cst_442 = arith.constant 0.000000e+00 : f32
    %561 = vector.broadcast %cst_442 : f32 to vector<8x128xf32>
    %cst_443 = arith.constant 0.000000e+00 : f32
    %562 = vector.broadcast %cst_443 : f32 to vector<8x128xf32>
    %c0_444 = arith.constant 0 : index
    %c0_445 = arith.constant 0 : index
    %563 = vector.load %arg19[%c0_444, %c0_445] : memref<64x512xf32, #tpu.memory_space<vmem>>, vector<8x512xf32>
    %c0_446 = arith.constant 0 : index
    %c0_447 = arith.constant 0 : index
    %564 = vector.load %arg8[%c0_446, %c0_447] : memref<128x512xf32, #tpu.memory_space<vmem>>, vector<128x512xf32>
    %cst_448 = arith.constant dense<0.000000e+00> : vector<8x512xf32>
    %565 = tpu.matmul %561, %564, %cst_448 {dimension_numbers = #tpu.dot_dimension_numbers<[1], [0], [0], [1], [0, 0, 1, 1], [], []>} : vector<8x128xf32>, vector<128x512xf32>, vector<8x512xf32> -> vector<8x512xf32>
    %566 = arith.addf %563, %565 : vector<8x512xf32>
    %567 = vector.extract_strided_slice %566 {offsets = [0, 0], sizes = [8, 128], strides = [1, 1]} : vector<8x512xf32> to vector<8x128xf32>
    %568 = arith.negf %567 : vector<8x128xf32>
    %569 = math.exp %568 : vector<8x128xf32>
    %cst_449 = arith.constant 1.000000e+00 : f32
    %570 = vector.broadcast %cst_449 : f32 to vector<8x128xf32>
    %571 = arith.addf %570, %569 : vector<8x128xf32>
    %572 = arith.divf %570, %571 : vector<8x128xf32>
    %573 = vector.extract_strided_slice %566 {offsets = [0, 128], sizes = [8, 128], strides = [1, 1]} : vector<8x512xf32> to vector<8x128xf32>
    %574 = arith.negf %573 : vector<8x128xf32>
    %575 = math.exp %574 : vector<8x128xf32>
    %cst_450 = arith.constant 1.000000e+00 : f32
    %576 = vector.broadcast %cst_450 : f32 to vector<8x128xf32>
    %577 = arith.addf %576, %575 : vector<8x128xf32>
    %578 = arith.divf %576, %577 : vector<8x128xf32>
    %579 = vector.extract_strided_slice %566 {offsets = [0, 256], sizes = [8, 128], strides = [1, 1]} : vector<8x512xf32> to vector<8x128xf32>
    %580 = math.tanh %579 : vector<8x128xf32>
    %581 = vector.extract_strided_slice %566 {offsets = [0, 384], sizes = [8, 128], strides = [1, 1]} : vector<8x512xf32> to vector<8x128xf32>
    %582 = arith.negf %581 : vector<8x128xf32>
    %583 = math.exp %582 : vector<8x128xf32>
    %cst_451 = arith.constant 1.000000e+00 : f32
    %584 = vector.broadcast %cst_451 : f32 to vector<8x128xf32>
    %585 = arith.addf %584, %583 : vector<8x128xf32>
    %586 = arith.divf %584, %585 : vector<8x128xf32>
    %587 = arith.mulf %578, %562 : vector<8x128xf32>
    %588 = arith.mulf %572, %580 : vector<8x128xf32>
    %589 = arith.addf %587, %588 : vector<8x128xf32>
    %590 = math.tanh %589 : vector<8x128xf32>
    %591 = arith.mulf %586, %590 : vector<8x128xf32>
    %c8_452 = arith.constant 8 : index
    %c0_453 = arith.constant 0 : index
    %592 = vector.load %arg19[%c8_452, %c0_453] : memref<64x512xf32, #tpu.memory_space<vmem>>, vector<8x512xf32>
    %c0_454 = arith.constant 0 : index
    %c0_455 = arith.constant 0 : index
    %593 = vector.load %arg8[%c0_454, %c0_455] : memref<128x512xf32, #tpu.memory_space<vmem>>, vector<128x512xf32>
    %cst_456 = arith.constant dense<0.000000e+00> : vector<8x512xf32>
    %594 = tpu.matmul %591, %593, %cst_456 {dimension_numbers = #tpu.dot_dimension_numbers<[1], [0], [0], [1], [0, 0, 1, 1], [], []>} : vector<8x128xf32>, vector<128x512xf32>, vector<8x512xf32> -> vector<8x512xf32>
    %595 = arith.addf %592, %594 : vector<8x512xf32>
    %596 = vector.extract_strided_slice %595 {offsets = [0, 0], sizes = [8, 128], strides = [1, 1]} : vector<8x512xf32> to vector<8x128xf32>
    %597 = arith.negf %596 : vector<8x128xf32>
    %598 = math.exp %597 : vector<8x128xf32>
    %cst_457 = arith.constant 1.000000e+00 : f32
    %599 = vector.broadcast %cst_457 : f32 to vector<8x128xf32>
    %600 = arith.addf %599, %598 : vector<8x128xf32>
    %601 = arith.divf %599, %600 : vector<8x128xf32>
    %602 = vector.extract_strided_slice %595 {offsets = [0, 128], sizes = [8, 128], strides = [1, 1]} : vector<8x512xf32> to vector<8x128xf32>
    %603 = arith.negf %602 : vector<8x128xf32>
    %604 = math.exp %603 : vector<8x128xf32>
    %cst_458 = arith.constant 1.000000e+00 : f32
    %605 = vector.broadcast %cst_458 : f32 to vector<8x128xf32>
    %606 = arith.addf %605, %604 : vector<8x128xf32>
    %607 = arith.divf %605, %606 : vector<8x128xf32>
    %608 = vector.extract_strided_slice %595 {offsets = [0, 256], sizes = [8, 128], strides = [1, 1]} : vector<8x512xf32> to vector<8x128xf32>
    %609 = math.tanh %608 : vector<8x128xf32>
    %610 = vector.extract_strided_slice %595 {offsets = [0, 384], sizes = [8, 128], strides = [1, 1]} : vector<8x512xf32> to vector<8x128xf32>
    %611 = arith.negf %610 : vector<8x128xf32>
    %612 = math.exp %611 : vector<8x128xf32>
    %cst_459 = arith.constant 1.000000e+00 : f32
    %613 = vector.broadcast %cst_459 : f32 to vector<8x128xf32>
    %614 = arith.addf %613, %612 : vector<8x128xf32>
    %615 = arith.divf %613, %614 : vector<8x128xf32>
    %616 = arith.mulf %607, %589 : vector<8x128xf32>
    %617 = arith.mulf %601, %609 : vector<8x128xf32>
    %618 = arith.addf %616, %617 : vector<8x128xf32>
    %619 = math.tanh %618 : vector<8x128xf32>
    %620 = arith.mulf %615, %619 : vector<8x128xf32>
    %c16_460 = arith.constant 16 : index
    %c0_461 = arith.constant 0 : index
    %621 = vector.load %arg19[%c16_460, %c0_461] : memref<64x512xf32, #tpu.memory_space<vmem>>, vector<8x512xf32>
    %c0_462 = arith.constant 0 : index
    %c0_463 = arith.constant 0 : index
    %622 = vector.load %arg8[%c0_462, %c0_463] : memref<128x512xf32, #tpu.memory_space<vmem>>, vector<128x512xf32>
    %cst_464 = arith.constant dense<0.000000e+00> : vector<8x512xf32>
    %623 = tpu.matmul %620, %622, %cst_464 {dimension_numbers = #tpu.dot_dimension_numbers<[1], [0], [0], [1], [0, 0, 1, 1], [], []>} : vector<8x128xf32>, vector<128x512xf32>, vector<8x512xf32> -> vector<8x512xf32>
    %624 = arith.addf %621, %623 : vector<8x512xf32>
    %625 = vector.extract_strided_slice %624 {offsets = [0, 0], sizes = [8, 128], strides = [1, 1]} : vector<8x512xf32> to vector<8x128xf32>
    %626 = arith.negf %625 : vector<8x128xf32>
    %627 = math.exp %626 : vector<8x128xf32>
    %cst_465 = arith.constant 1.000000e+00 : f32
    %628 = vector.broadcast %cst_465 : f32 to vector<8x128xf32>
    %629 = arith.addf %628, %627 : vector<8x128xf32>
    %630 = arith.divf %628, %629 : vector<8x128xf32>
    %631 = vector.extract_strided_slice %624 {offsets = [0, 128], sizes = [8, 128], strides = [1, 1]} : vector<8x512xf32> to vector<8x128xf32>
    %632 = arith.negf %631 : vector<8x128xf32>
    %633 = math.exp %632 : vector<8x128xf32>
    %cst_466 = arith.constant 1.000000e+00 : f32
    %634 = vector.broadcast %cst_466 : f32 to vector<8x128xf32>
    %635 = arith.addf %634, %633 : vector<8x128xf32>
    %636 = arith.divf %634, %635 : vector<8x128xf32>
    %637 = vector.extract_strided_slice %624 {offsets = [0, 256], sizes = [8, 128], strides = [1, 1]} : vector<8x512xf32> to vector<8x128xf32>
    %638 = math.tanh %637 : vector<8x128xf32>
    %639 = vector.extract_strided_slice %624 {offsets = [0, 384], sizes = [8, 128], strides = [1, 1]} : vector<8x512xf32> to vector<8x128xf32>
    %640 = arith.negf %639 : vector<8x128xf32>
    %641 = math.exp %640 : vector<8x128xf32>
    %cst_467 = arith.constant 1.000000e+00 : f32
    %642 = vector.broadcast %cst_467 : f32 to vector<8x128xf32>
    %643 = arith.addf %642, %641 : vector<8x128xf32>
    %644 = arith.divf %642, %643 : vector<8x128xf32>
    %645 = arith.mulf %636, %618 : vector<8x128xf32>
    %646 = arith.mulf %630, %638 : vector<8x128xf32>
    %647 = arith.addf %645, %646 : vector<8x128xf32>
    %648 = math.tanh %647 : vector<8x128xf32>
    %649 = arith.mulf %644, %648 : vector<8x128xf32>
    %c24_468 = arith.constant 24 : index
    %c0_469 = arith.constant 0 : index
    %650 = vector.load %arg19[%c24_468, %c0_469] : memref<64x512xf32, #tpu.memory_space<vmem>>, vector<8x512xf32>
    %c0_470 = arith.constant 0 : index
    %c0_471 = arith.constant 0 : index
    %651 = vector.load %arg8[%c0_470, %c0_471] : memref<128x512xf32, #tpu.memory_space<vmem>>, vector<128x512xf32>
    %cst_472 = arith.constant dense<0.000000e+00> : vector<8x512xf32>
    %652 = tpu.matmul %649, %651, %cst_472 {dimension_numbers = #tpu.dot_dimension_numbers<[1], [0], [0], [1], [0, 0, 1, 1], [], []>} : vector<8x128xf32>, vector<128x512xf32>, vector<8x512xf32> -> vector<8x512xf32>
    %653 = arith.addf %650, %652 : vector<8x512xf32>
    %654 = vector.extract_strided_slice %653 {offsets = [0, 0], sizes = [8, 128], strides = [1, 1]} : vector<8x512xf32> to vector<8x128xf32>
    %655 = arith.negf %654 : vector<8x128xf32>
    %656 = math.exp %655 : vector<8x128xf32>
    %cst_473 = arith.constant 1.000000e+00 : f32
    %657 = vector.broadcast %cst_473 : f32 to vector<8x128xf32>
    %658 = arith.addf %657, %656 : vector<8x128xf32>
    %659 = arith.divf %657, %658 : vector<8x128xf32>
    %660 = vector.extract_strided_slice %653 {offsets = [0, 128], sizes = [8, 128], strides = [1, 1]} : vector<8x512xf32> to vector<8x128xf32>
    %661 = arith.negf %660 : vector<8x128xf32>
    %662 = math.exp %661 : vector<8x128xf32>
    %cst_474 = arith.constant 1.000000e+00 : f32
    %663 = vector.broadcast %cst_474 : f32 to vector<8x128xf32>
    %664 = arith.addf %663, %662 : vector<8x128xf32>
    %665 = arith.divf %663, %664 : vector<8x128xf32>
    %666 = vector.extract_strided_slice %653 {offsets = [0, 256], sizes = [8, 128], strides = [1, 1]} : vector<8x512xf32> to vector<8x128xf32>
    %667 = math.tanh %666 : vector<8x128xf32>
    %668 = vector.extract_strided_slice %653 {offsets = [0, 384], sizes = [8, 128], strides = [1, 1]} : vector<8x512xf32> to vector<8x128xf32>
    %669 = arith.negf %668 : vector<8x128xf32>
    %670 = math.exp %669 : vector<8x128xf32>
    %cst_475 = arith.constant 1.000000e+00 : f32
    %671 = vector.broadcast %cst_475 : f32 to vector<8x128xf32>
    %672 = arith.addf %671, %670 : vector<8x128xf32>
    %673 = arith.divf %671, %672 : vector<8x128xf32>
    %674 = arith.mulf %665, %647 : vector<8x128xf32>
    %675 = arith.mulf %659, %667 : vector<8x128xf32>
    %676 = arith.addf %674, %675 : vector<8x128xf32>
    %677 = math.tanh %676 : vector<8x128xf32>
    %678 = arith.mulf %673, %677 : vector<8x128xf32>
    %c32_476 = arith.constant 32 : index
    %c0_477 = arith.constant 0 : index
    %679 = vector.load %arg19[%c32_476, %c0_477] : memref<64x512xf32, #tpu.memory_space<vmem>>, vector<8x512xf32>
    %c0_478 = arith.constant 0 : index
    %c0_479 = arith.constant 0 : index
    %680 = vector.load %arg8[%c0_478, %c0_479] : memref<128x512xf32, #tpu.memory_space<vmem>>, vector<128x512xf32>
    %cst_480 = arith.constant dense<0.000000e+00> : vector<8x512xf32>
    %681 = tpu.matmul %678, %680, %cst_480 {dimension_numbers = #tpu.dot_dimension_numbers<[1], [0], [0], [1], [0, 0, 1, 1], [], []>} : vector<8x128xf32>, vector<128x512xf32>, vector<8x512xf32> -> vector<8x512xf32>
    %682 = arith.addf %679, %681 : vector<8x512xf32>
    %683 = vector.extract_strided_slice %682 {offsets = [0, 0], sizes = [8, 128], strides = [1, 1]} : vector<8x512xf32> to vector<8x128xf32>
    %684 = arith.negf %683 : vector<8x128xf32>
    %685 = math.exp %684 : vector<8x128xf32>
    %cst_481 = arith.constant 1.000000e+00 : f32
    %686 = vector.broadcast %cst_481 : f32 to vector<8x128xf32>
    %687 = arith.addf %686, %685 : vector<8x128xf32>
    %688 = arith.divf %686, %687 : vector<8x128xf32>
    %689 = vector.extract_strided_slice %682 {offsets = [0, 128], sizes = [8, 128], strides = [1, 1]} : vector<8x512xf32> to vector<8x128xf32>
    %690 = arith.negf %689 : vector<8x128xf32>
    %691 = math.exp %690 : vector<8x128xf32>
    %cst_482 = arith.constant 1.000000e+00 : f32
    %692 = vector.broadcast %cst_482 : f32 to vector<8x128xf32>
    %693 = arith.addf %692, %691 : vector<8x128xf32>
    %694 = arith.divf %692, %693 : vector<8x128xf32>
    %695 = vector.extract_strided_slice %682 {offsets = [0, 256], sizes = [8, 128], strides = [1, 1]} : vector<8x512xf32> to vector<8x128xf32>
    %696 = math.tanh %695 : vector<8x128xf32>
    %697 = vector.extract_strided_slice %682 {offsets = [0, 384], sizes = [8, 128], strides = [1, 1]} : vector<8x512xf32> to vector<8x128xf32>
    %698 = arith.negf %697 : vector<8x128xf32>
    %699 = math.exp %698 : vector<8x128xf32>
    %cst_483 = arith.constant 1.000000e+00 : f32
    %700 = vector.broadcast %cst_483 : f32 to vector<8x128xf32>
    %701 = arith.addf %700, %699 : vector<8x128xf32>
    %702 = arith.divf %700, %701 : vector<8x128xf32>
    %703 = arith.mulf %694, %676 : vector<8x128xf32>
    %704 = arith.mulf %688, %696 : vector<8x128xf32>
    %705 = arith.addf %703, %704 : vector<8x128xf32>
    %706 = math.tanh %705 : vector<8x128xf32>
    %707 = arith.mulf %702, %706 : vector<8x128xf32>
    %c40_484 = arith.constant 40 : index
    %c0_485 = arith.constant 0 : index
    %708 = vector.load %arg19[%c40_484, %c0_485] : memref<64x512xf32, #tpu.memory_space<vmem>>, vector<8x512xf32>
    %c0_486 = arith.constant 0 : index
    %c0_487 = arith.constant 0 : index
    %709 = vector.load %arg8[%c0_486, %c0_487] : memref<128x512xf32, #tpu.memory_space<vmem>>, vector<128x512xf32>
    %cst_488 = arith.constant dense<0.000000e+00> : vector<8x512xf32>
    %710 = tpu.matmul %707, %709, %cst_488 {dimension_numbers = #tpu.dot_dimension_numbers<[1], [0], [0], [1], [0, 0, 1, 1], [], []>} : vector<8x128xf32>, vector<128x512xf32>, vector<8x512xf32> -> vector<8x512xf32>
    %711 = arith.addf %708, %710 : vector<8x512xf32>
    %712 = vector.extract_strided_slice %711 {offsets = [0, 0], sizes = [8, 128], strides = [1, 1]} : vector<8x512xf32> to vector<8x128xf32>
    %713 = arith.negf %712 : vector<8x128xf32>
    %714 = math.exp %713 : vector<8x128xf32>
    %cst_489 = arith.constant 1.000000e+00 : f32
    %715 = vector.broadcast %cst_489 : f32 to vector<8x128xf32>
    %716 = arith.addf %715, %714 : vector<8x128xf32>
    %717 = arith.divf %715, %716 : vector<8x128xf32>
    %718 = vector.extract_strided_slice %711 {offsets = [0, 128], sizes = [8, 128], strides = [1, 1]} : vector<8x512xf32> to vector<8x128xf32>
    %719 = arith.negf %718 : vector<8x128xf32>
    %720 = math.exp %719 : vector<8x128xf32>
    %cst_490 = arith.constant 1.000000e+00 : f32
    %721 = vector.broadcast %cst_490 : f32 to vector<8x128xf32>
    %722 = arith.addf %721, %720 : vector<8x128xf32>
    %723 = arith.divf %721, %722 : vector<8x128xf32>
    %724 = vector.extract_strided_slice %711 {offsets = [0, 256], sizes = [8, 128], strides = [1, 1]} : vector<8x512xf32> to vector<8x128xf32>
    %725 = math.tanh %724 : vector<8x128xf32>
    %726 = vector.extract_strided_slice %711 {offsets = [0, 384], sizes = [8, 128], strides = [1, 1]} : vector<8x512xf32> to vector<8x128xf32>
    %727 = arith.negf %726 : vector<8x128xf32>
    %728 = math.exp %727 : vector<8x128xf32>
    %cst_491 = arith.constant 1.000000e+00 : f32
    %729 = vector.broadcast %cst_491 : f32 to vector<8x128xf32>
    %730 = arith.addf %729, %728 : vector<8x128xf32>
    %731 = arith.divf %729, %730 : vector<8x128xf32>
    %732 = arith.mulf %723, %705 : vector<8x128xf32>
    %733 = arith.mulf %717, %725 : vector<8x128xf32>
    %734 = arith.addf %732, %733 : vector<8x128xf32>
    %735 = math.tanh %734 : vector<8x128xf32>
    %736 = arith.mulf %731, %735 : vector<8x128xf32>
    %c48_492 = arith.constant 48 : index
    %c0_493 = arith.constant 0 : index
    %737 = vector.load %arg19[%c48_492, %c0_493] : memref<64x512xf32, #tpu.memory_space<vmem>>, vector<8x512xf32>
    %c0_494 = arith.constant 0 : index
    %c0_495 = arith.constant 0 : index
    %738 = vector.load %arg8[%c0_494, %c0_495] : memref<128x512xf32, #tpu.memory_space<vmem>>, vector<128x512xf32>
    %cst_496 = arith.constant dense<0.000000e+00> : vector<8x512xf32>
    %739 = tpu.matmul %736, %738, %cst_496 {dimension_numbers = #tpu.dot_dimension_numbers<[1], [0], [0], [1], [0, 0, 1, 1], [], []>} : vector<8x128xf32>, vector<128x512xf32>, vector<8x512xf32> -> vector<8x512xf32>
    %740 = arith.addf %737, %739 : vector<8x512xf32>
    %741 = vector.extract_strided_slice %740 {offsets = [0, 0], sizes = [8, 128], strides = [1, 1]} : vector<8x512xf32> to vector<8x128xf32>
    %742 = arith.negf %741 : vector<8x128xf32>
    %743 = math.exp %742 : vector<8x128xf32>
    %cst_497 = arith.constant 1.000000e+00 : f32
    %744 = vector.broadcast %cst_497 : f32 to vector<8x128xf32>
    %745 = arith.addf %744, %743 : vector<8x128xf32>
    %746 = arith.divf %744, %745 : vector<8x128xf32>
    %747 = vector.extract_strided_slice %740 {offsets = [0, 128], sizes = [8, 128], strides = [1, 1]} : vector<8x512xf32> to vector<8x128xf32>
    %748 = arith.negf %747 : vector<8x128xf32>
    %749 = math.exp %748 : vector<8x128xf32>
    %cst_498 = arith.constant 1.000000e+00 : f32
    %750 = vector.broadcast %cst_498 : f32 to vector<8x128xf32>
    %751 = arith.addf %750, %749 : vector<8x128xf32>
    %752 = arith.divf %750, %751 : vector<8x128xf32>
    %753 = vector.extract_strided_slice %740 {offsets = [0, 256], sizes = [8, 128], strides = [1, 1]} : vector<8x512xf32> to vector<8x128xf32>
    %754 = math.tanh %753 : vector<8x128xf32>
    %755 = vector.extract_strided_slice %740 {offsets = [0, 384], sizes = [8, 128], strides = [1, 1]} : vector<8x512xf32> to vector<8x128xf32>
    %756 = arith.negf %755 : vector<8x128xf32>
    %757 = math.exp %756 : vector<8x128xf32>
    %cst_499 = arith.constant 1.000000e+00 : f32
    %758 = vector.broadcast %cst_499 : f32 to vector<8x128xf32>
    %759 = arith.addf %758, %757 : vector<8x128xf32>
    %760 = arith.divf %758, %759 : vector<8x128xf32>
    %761 = arith.mulf %752, %734 : vector<8x128xf32>
    %762 = arith.mulf %746, %754 : vector<8x128xf32>
    %763 = arith.addf %761, %762 : vector<8x128xf32>
    %764 = math.tanh %763 : vector<8x128xf32>
    %765 = arith.mulf %760, %764 : vector<8x128xf32>
    %c56_500 = arith.constant 56 : index
    %c0_501 = arith.constant 0 : index
    %766 = vector.load %arg19[%c56_500, %c0_501] : memref<64x512xf32, #tpu.memory_space<vmem>>, vector<8x512xf32>
    %c0_502 = arith.constant 0 : index
    %c0_503 = arith.constant 0 : index
    %767 = vector.load %arg8[%c0_502, %c0_503] : memref<128x512xf32, #tpu.memory_space<vmem>>, vector<128x512xf32>
    %cst_504 = arith.constant dense<0.000000e+00> : vector<8x512xf32>
    %768 = tpu.matmul %765, %767, %cst_504 {dimension_numbers = #tpu.dot_dimension_numbers<[1], [0], [0], [1], [0, 0, 1, 1], [], []>} : vector<8x128xf32>, vector<128x512xf32>, vector<8x512xf32> -> vector<8x512xf32>
    %769 = arith.addf %766, %768 : vector<8x512xf32>
    %770 = vector.extract_strided_slice %769 {offsets = [0, 0], sizes = [8, 128], strides = [1, 1]} : vector<8x512xf32> to vector<8x128xf32>
    %771 = arith.negf %770 : vector<8x128xf32>
    %772 = math.exp %771 : vector<8x128xf32>
    %cst_505 = arith.constant 1.000000e+00 : f32
    %773 = vector.broadcast %cst_505 : f32 to vector<8x128xf32>
    %774 = arith.addf %773, %772 : vector<8x128xf32>
    %775 = arith.divf %773, %774 : vector<8x128xf32>
    %776 = vector.extract_strided_slice %769 {offsets = [0, 128], sizes = [8, 128], strides = [1, 1]} : vector<8x512xf32> to vector<8x128xf32>
    %777 = arith.negf %776 : vector<8x128xf32>
    %778 = math.exp %777 : vector<8x128xf32>
    %cst_506 = arith.constant 1.000000e+00 : f32
    %779 = vector.broadcast %cst_506 : f32 to vector<8x128xf32>
    %780 = arith.addf %779, %778 : vector<8x128xf32>
    %781 = arith.divf %779, %780 : vector<8x128xf32>
    %782 = vector.extract_strided_slice %769 {offsets = [0, 256], sizes = [8, 128], strides = [1, 1]} : vector<8x512xf32> to vector<8x128xf32>
    %783 = math.tanh %782 : vector<8x128xf32>
    %784 = vector.extract_strided_slice %769 {offsets = [0, 384], sizes = [8, 128], strides = [1, 1]} : vector<8x512xf32> to vector<8x128xf32>
    %785 = arith.negf %784 : vector<8x128xf32>
    %786 = math.exp %785 : vector<8x128xf32>
    %cst_507 = arith.constant 1.000000e+00 : f32
    %787 = vector.broadcast %cst_507 : f32 to vector<8x128xf32>
    %788 = arith.addf %787, %786 : vector<8x128xf32>
    %789 = arith.divf %787, %788 : vector<8x128xf32>
    %790 = arith.mulf %781, %763 : vector<8x128xf32>
    %791 = arith.mulf %775, %783 : vector<8x128xf32>
    %792 = arith.addf %790, %791 : vector<8x128xf32>
    %793 = math.tanh %792 : vector<8x128xf32>
    %794 = arith.mulf %789, %793 : vector<8x128xf32>
    %c0_508 = arith.constant 0 : index
    %c0_509 = arith.constant 0 : index
    %795 = vector.load %arg11[%c0_508, %c0_509] : memref<128x3xf32, #tpu.memory_space<vmem>>, vector<128x3xf32>
    %cst_510 = arith.constant dense<0.000000e+00> : vector<8x3xf32>
    %796 = tpu.matmul %794, %795, %cst_510 {dimension_numbers = #tpu.dot_dimension_numbers<[1], [0], [0], [1], [0, 0, 1, 1], [], []>} : vector<8x128xf32>, vector<128x3xf32>, vector<8x3xf32> -> vector<8x3xf32>
    %c0_511 = arith.constant 0 : index
    %c0_512 = arith.constant 0 : index
    %797 = vector.load %arg10[%c0_511, %c0_512] : memref<8x8xf32, #tpu.memory_space<vmem>>, vector<8x8xf32>
    %c0_513 = arith.constant 0 : index
    %c0_514 = arith.constant 0 : index
    %798 = vector.load %arg12[%c0_513, %c0_514] : memref<8x3xf32, #tpu.memory_space<vmem>>, vector<8x3xf32>
    %cst_515 = arith.constant dense<0.000000e+00> : vector<8x3xf32>
    %799 = tpu.matmul %797, %798, %cst_515 {dimension_numbers = #tpu.dot_dimension_numbers<[1], [0], [0], [1], [0, 0, 1, 1], [], []>} : vector<8x8xf32>, vector<8x3xf32>, vector<8x3xf32> -> vector<8x3xf32>
    %800 = arith.addf %796, %799 : vector<8x3xf32>
    %c0_516 = arith.constant 0 : index
    %c0_517 = arith.constant 0 : index
    %801 = vector.load %arg13[%c0_516, %c0_517] : memref<1x3xf32, #tpu.memory_space<vmem>>, vector<1x3xf32>
    %802 = vector.broadcast %801 : vector<1x3xf32> to vector<8x3xf32>
    %803 = arith.addf %800, %802 : vector<8x3xf32>
    %c0_518 = arith.constant 0 : index
    %c0_519 = arith.constant 0 : index
    %804 = vector.load %arg14[%c0_518, %c0_519] : memref<8x3xf32, #tpu.memory_space<vmem>>, vector<8x3xf32>
    tpu.vector_store %arg14[%c0_518, %c0_519], %803 {strides = array<i32>} : memref<8x3xf32, #tpu.memory_space<vmem>>, vector<8x3xf32>,
    return
  }
}

</mosaic_0001>

<bundles_post_ra>
// kernel: bilstm_sentiment_forward.1
= control target key start
LH: loop header
LB: loop body
LE: loop exit
PB: predicated region body
PF: predicated region fallthrough
CT: control target
= control target key end

     0   :  { %19 = vsyncpa [#allocation9], 0  ;;  %s11509_s0 = inlined_call_operand.vmem [shape: s32[64], index: 0, kind: input, shape index: {}]   ;;  %s11510_s1 = inlined_call_operand.vmem [shape: f32[50,32], index: 1, kind: input, shape index: {}]   ;;  %s11511_s2 = inlined_call_operand.vmem [shape: f32[32,512], index: 2, kind: input, shape index: {}]   ;;  %s11512_s3 = inlined_call_operand.vmem [shape: f32[32,512], index: 3, kind: input, shape index: {}]   ;;  %s11513_s4 = inlined_call_operand.vmem [shape: f32[128,512], index: 4, kind: input, shape index: {}]   ;;  %s11514_s5 = inlined_call_operand.vmem [shape: f32[1,512], index: 5, kind: input, shape index: {}]   ;;  %s11515_s6 = inlined_call_operand.vmem [shape: f32[128,512], index: 6, kind: input, shape index: {}]   ;;  %s11516_s7 = inlined_call_operand.vmem [shape: f32[128,512], index: 7, kind: input, shape index: {}]   ;;  %s11517_s8 = inlined_call_operand.vmem [shape: f32[128,512], index: 8, kind: input, shape index: {}]   ;;  %s11518_s9 = inlined_call_operand.vmem [shape: f32[1,512], index: 9, kind: input, shape index: {}]   ;;  %s11519_s10 = inlined_call_operand.vmem [shape: f32[8,8], index: 10, kind: input, shape index: {}]   ;;  %s11520_s11 = inlined_call_operand.vmem [shape: f32[128,3], index: 11, kind: input, shape index: {}]   ;;  %s11521_s12 = inlined_call_operand.vmem [shape: f32[8,3], index: 12, kind: input, shape index: {}]   ;;  %s11522_s13 = inlined_call_operand.vmem [shape: f32[1,3], index: 13, kind: input, shape index: {}]   ;;  %s11523_s14 = inlined_call_operand.vmem [shape: f32[8,3], index: 14, kind: output, shape index: {}]  }
   0x1   :  { %s26_s15 = sshll.u32 %s11509_s0, 4  ;;  %s27_s15 = int_to_ptr.vmem [resolvable:$true] %s26_s15 }
   0x2   :  { %s8952_s16 = scalar_lea.vmem %s27_s15, 16  ;;  %p8957_p1 = scmp.lt.s32.totalorder %s27_s15, %s27_s15 }
   0x3   :  { %p8953_p0 = scmp.ne.s32.totalorder %s27_s15, %s8952_s16  ;;  %p8958_p2 = scmp.lt.s32.totalorder %s8952_s16, %s8952_s16 }
   0x5   :  { %p8959_p3 = por %p8958_p2, %p8957_p1 }
   0x7   :  { %p8960_p4 = pnand %p8959_p3, %p8953_p0 }
   0x9   :  { %8963 = shalt.err (!%p8960_p4)
}
   0xa   :  { %s9030_s17 = smov [#allocation8]  }
   0xb   :  { %29 = dma.vmem_to_smem %s27_s15, 16, %s9030_s17, [#allocation9]  }
   0xc   :  { %8964 = dma.done.wait [#allocation9], 16  }
   0xd   :  { %8965 = vsyncadd [#allocation9], 4294967280 }
   0xe   :  { %57 = sfence }
   0xf   :  { %s58_s18 = sld [smem:[#allocation8]] }
  0x15   :  { %s59_s21 = scalar_lea.vmem %s11510_s1, %s58_s18 }
  0x16   :  { %v77_v0 = vld [vmem:[%s59_s21] sm:$0x1] }
  0x17   :  { %78 = vst [vmem:[#allocation2] sm:$0x1] %v77_v0 }
  0x18   :  { %103 = vsyncadd [#allocation7], 16  ;;  %v123_v1 = vld [vmem:[%s59_s21] sm:$0x1] }
  0x19   :  { %124 = vst [vmem:[#allocation3 + $0x38] sm:$0x1] %v123_v1 }
  0x1a   :  { %149 = vsyncadd [#allocation7 + $0x10], 16  ;;  %s7100_s0 = sld [smem:[#allocation8 + $0x1]] }
  0x20   :  { %s151_s24 = scalar_lea.vmem %s11510_s1, %s7100_s0 }
  0x21   :  { %v171_v2 = vld [vmem:[%s151_s24] sm:$0x1] }
  0x22   :  { %172 = vst [vmem:[#allocation2 + $0x1] sm:$0x1] %v171_v2 }
  0x23   :  { %197 = vsyncadd [#allocation7 + $0x1], 16  ;;  %v217_v3 = vld [vmem:[%s151_s24] sm:$0x1] }
  0x24   :  { %218 = vst [vmem:[#allocation3 + $0x39] sm:$0x1] %v217_v3 }
  0x25   :  { %243 = vsyncadd [#allocation7 + $0x11], 16  ;;  %s7101_s25 = sld [smem:[#allocation8 + $0x8]] }
  0x2b   :  { %s245_s28 = scalar_lea.vmem %s11510_s1, %s7101_s25 }
  0x2c   :  { %v265_v4 = vld [vmem:[%s245_s28] sm:$0x1] }
  0x2d   :  { %266 = vst [vmem:[#allocation2 + $0x8] sm:$0x1] %v265_v4 }
  0x2e   :  { %291 = vsyncadd [#allocation7 + $0x2], 16  ;;  %v311_v5 = vld [vmem:[%s245_s28] sm:$0x1] }
  0x2f   :  { %312 = vst [vmem:[#allocation3 + $0x30] sm:$0x1] %v311_v5 }
  0x30   :  { %337 = vsyncadd [#allocation7 + $0x12], 16  ;;  %s7102_s29 = sld [smem:[#allocation8 + $0x9]] }
  0x36   :  { %s339_s16 = scalar_lea.vmem %s11510_s1, %s7102_s29 }
  0x37   :  { %v359_v6 = vld [vmem:[%s339_s16] sm:$0x1] }
  0x38   :  { %360 = vst [vmem:[#allocation2 + $0x9] sm:$0x1] %v359_v6 }
  0x39   :  { %385 = vsyncadd [#allocation7 + $0x3], 16  ;;  %v405_v7 = vld [vmem:[%s339_s16] sm:$0x1] }
  0x3a   :  { %406 = vst [vmem:[#allocation3 + $0x31] sm:$0x1] %v405_v7 }
  0x3b   :  { %431 = vsyncadd [#allocation7 + $0x13], 16  ;;  %s7103_s17 = sld [smem:[#allocation8 + $0x10]] }
  0x41   :  { %s433_s20 = scalar_lea.vmem %s11510_s1, %s7103_s17 }
  0x42   :  { %v453_v8 = vld [vmem:[%s433_s20] sm:$0x1] }
  0x43   :  { %454 = vst [vmem:[#allocation2 + $0x10] sm:$0x1] %v453_v8 }
  0x44   :  { %479 = vsyncadd [#allocation7 + $0x4], 16  ;;  %v499_v9 = vld [vmem:[%s433_s20] sm:$0x1] }
  0x45   :  { %500 = vst [vmem:[#allocation3 + $0x28] sm:$0x1] %v499_v9 }
  0x46   :  { %525 = vsyncadd [#allocation7 + $0x14], 16  ;;  %s7104_s21 = sld [smem:[#allocation8 + $0x11]] }
  0x4c   :  { %s527_s23 = scalar_lea.vmem %s11510_s1, %s7104_s21 }
  0x4d   :  { %v547_v10 = vld [vmem:[%s527_s23] sm:$0x1] }
  0x4e   :  { %548 = vst [vmem:[#allocation2 + $0x11] sm:$0x1] %v547_v10 }
  0x4f   :  { %573 = vsyncadd [#allocation7 + $0x5], 16  ;;  %v593_v11 = vld [vmem:[%s527_s23] sm:$0x1] }
  0x50   :  { %594 = vst [vmem:[#allocation3 + $0x29] sm:$0x1] %v593_v11 }
  0x51   :  { %619 = vsyncadd [#allocation7 + $0x15], 16  ;;  %s7105_s24 = sld [smem:[#allocation8 + $0x18]] }
  0x57   :  { %s621_s27 = scalar_lea.vmem %s11510_s1, %s7105_s24 }
  0x58   :  { %v641_v12 = vld [vmem:[%s621_s27] sm:$0x1] }
  0x59   :  { %642 = vst [vmem:[#allocation2 + $0x18] sm:$0x1] %v641_v12 }
  0x5a   :  { %667 = vsyncadd [#allocation7 + $0x6], 16  ;;  %v687_v13 = vld [vmem:[%s621_s27] sm:$0x1] }
  0x5b   :  { %688 = vst [vmem:[#allocation3 + $0x20] sm:$0x1] %v687_v13 }
  0x5c   :  { %713 = vsyncadd [#allocation7 + $0x16], 16  ;;  %s7106_s28 = sld [smem:[#allocation8 + $0x19]] }
  0x62   :  { %s715_s15 = scalar_lea.vmem %s11510_s1, %s7106_s28 }
  0x63   :  { %v735_v14 = vld [vmem:[%s715_s15] sm:$0x1] }
  0x64   :  { %736 = vst [vmem:[#allocation2 + $0x19] sm:$0x1] %v735_v14 }
  0x65   :  { %761 = vsyncadd [#allocation7 + $0x7], 16  ;;  %v781_v15 = vld [vmem:[%s715_s15] sm:$0x1] }
  0x66   :  { %782 = vst [vmem:[#allocation3 + $0x21] sm:$0x1] %v781_v15 }
  0x67   :  { %807 = vsyncadd [#allocation7 + $0x17], 16  ;;  %s7107_s16 = sld [smem:[#allocation8 + $0x20]] }
  0x6d   :  { %s809_s19 = scalar_lea.vmem %s11510_s1, %s7107_s16 }
  0x6e   :  { %v829_v16 = vld [vmem:[%s809_s19] sm:$0x1] }
  0x6f   :  { %830 = vst [vmem:[#allocation2 + $0x20] sm:$0x1] %v829_v16 }
  0x70   :  { %855 = vsyncadd [#allocation7 + $0x8], 16  ;;  %v875_v17 = vld [vmem:[%s809_s19] sm:$0x1] }
  0x71   :  { %876 = vst [vmem:[#allocation3 + $0x18] sm:$0x1] %v875_v17 }
  0x72   :  { %901 = vsyncadd [#allocation7 + $0x18], 16  ;;  %s7108_s20 = sld [smem:[#allocation8 + $0x21]] }
  0x78   :  { %s903_s22 = scalar_lea.vmem %s11510_s1, %s7108_s20 }
  0x79   :  { %v923_v18 = vld [vmem:[%s903_s22] sm:$0x1] }
  0x7a   :  { %924 = vst [vmem:[#allocation2 + $0x21] sm:$0x1] %v923_v18 }
  0x7b   :  { %949 = vsyncadd [#allocation7 + $0x9], 16  ;;  %v969_v19 = vld [vmem:[%s903_s22] sm:$0x1] }
  0x7c   :  { %970 = vst [vmem:[#allocation3 + $0x19] sm:$0x1] %v969_v19 }
  0x7d   :  { %995 = vsyncadd [#allocation7 + $0x19], 16  ;;  %s7109_s23 = sld [smem:[#allocation8 + $0x28]] }
  0x83   :  { %s997_s26 = scalar_lea.vmem %s11510_s1, %s7109_s23 }
  0x84   :  { %v1017_v20 = vld [vmem:[%s997_s26] sm:$0x1] }
  0x85   :  { %1018 = vst [vmem:[#allocation2 + $0x28] sm:$0x1] %v1017_v20 }
  0x86   :  { %1043 = vsyncadd [#allocation7 + $0xa], 16  ;;  %v1063_v21 = vld [vmem:[%s997_s26] sm:$0x1] }
  0x87   :  { %1064 = vst [vmem:[#allocation3 + $0x10] sm:$0x1] %v1063_v21 }
  0x88   :  { %1089 = vsyncadd [#allocation7 + $0x1a], 16  ;;  %s7110_s27 = sld [smem:[#allocation8 + $0x29]] }
  0x8e   :  { %s1091_s30 = scalar_lea.vmem %s11510_s1, %s7110_s27 }
  0x8f   :  { %v1111_v22 = vld [vmem:[%s1091_s30] sm:$0x1] }
  0x90   :  { %1112 = vst [vmem:[#allocation2 + $0x29] sm:$0x1] %v1111_v22 }
  0x91   :  { %1137 = vsyncadd [#allocation7 + $0xb], 16  ;;  %v1157_v23 = vld [vmem:[%s1091_s30] sm:$0x1] }
  0x92   :  { %1158 = vst [vmem:[#allocation3 + $0x11] sm:$0x1] %v1157_v23 }
  0x93   :  { %1183 = vsyncadd [#allocation7 + $0x1b], 16  ;;  %s7111_s15 = sld [smem:[#allocation8 + $0x30]] }
  0x99   :  { %s1185_s18 = scalar_lea.vmem %s11510_s1, %s7111_s15 }
  0x9a   :  { %v1205_v24 = vld [vmem:[%s1185_s18] sm:$0x1] }
  0x9b   :  { %1206 = vst [vmem:[#allocation2 + $0x30] sm:$0x1] %v1205_v24 }
  0x9c   :  { %1231 = vsyncadd [#allocation7 + $0xc], 16  ;;  %v1251_v25 = vld [vmem:[%s1185_s18] sm:$0x1] }
  0x9d   :  { %1252 = vst [vmem:[#allocation3 + $0x8] sm:$0x1] %v1251_v25 }
  0x9e   :  { %1277 = vsyncadd [#allocation7 + $0x1c], 16  ;;  %s7112_s19 = sld [smem:[#allocation8 + $0x31]] }
  0xa4   :  { %s1279_s0 = scalar_lea.vmem %s11510_s1, %s7112_s19 }
  0xa5   :  { %v1299_v26 = vld [vmem:[%s1279_s0] sm:$0x1] }
  0xa6   :  { %1300 = vst [vmem:[#allocation2 + $0x31] sm:$0x1] %v1299_v26 }
  0xa7   :  { %1325 = vsyncadd [#allocation7 + $0xd], 16  ;;  %v1345_v27 = vld [vmem:[%s1279_s0] sm:$0x1] }
  0xa8   :  { %1346 = vst [vmem:[#allocation3 + $0x9] sm:$0x1] %v1345_v27 }
  0xa9   :  { %1371 = vsyncadd [#allocation7 + $0x1d], 16  ;;  %s7113_s22 = sld [smem:[#allocation8 + $0x38]] }
  0xaf   :  { %s1373_s25 = scalar_lea.vmem %s11510_s1, %s7113_s22 }
  0xb0   :  { %v1393_v28 = vld [vmem:[%s1373_s25] sm:$0x1] }
  0xb1   :  { %1394 = vst [vmem:[#allocation2 + $0x38] sm:$0x1] %v1393_v28 }
  0xb2   :  { %1419 = vsyncadd [#allocation7 + $0xe], 16  ;;  %v1438_v29 = vld [vmem:[%s1373_s25] sm:$0x1] }
  0xb3   :  { %1439 = vst [vmem:[#allocation3] sm:$0x1] %v1438_v29 }
  0xb4   :  { %1464 = vsyncadd [#allocation7 + $0x1e], 16  ;;  %s7114_s26 = sld [smem:[#allocation8 + $0x39]] }
  0xba   :  { %s1466_s29 = scalar_lea.vmem %s11510_s1, %s7114_s26 }
  0xbb   :  { %v1486_v30 = vld [vmem:[%s1466_s29] sm:$0x1] }
  0xbc   :  { %1487 = vst [vmem:[#allocation2 + $0x39] sm:$0x1] %v1486_v30 }
  0xbd   :  { %1512 = vsyncadd [#allocation7 + $0xf], 16  ;;  %v1532_v31 = vld [vmem:[%s1466_s29] sm:$0x1] }
  0xbe   :  { %1533 = vst [vmem:[#allocation3 + $0x1] sm:$0x1] %v1532_v31 }
  0xbf   :  { %1558 = vsyncadd [#allocation7 + $0x1f], 16  ;;  %vm1559_vm0 = vcmask 259072   ;;  %v9031_v32 = vmov 0.0  }
  0xc0   :  { %1560 = vst.msk [vmem:[#allocation2 + $0x2] sm:$0x3f] %vm1559_vm0, %v9031_v32  ;;  %1561 = vst.msk [vmem:[#allocation3 + $0x2] sm:$0x3f] %vm1559_vm0, %v9031_v32 }
  0xc1   :  { %1562 = vst.msk [vmem:[#allocation2 + $0xa] sm:$0x3f] %vm1559_vm0, %v9031_v32  ;;  %1563 = vst.msk [vmem:[#allocation3 + $0xa] sm:$0x3f] %vm1559_vm0, %v9031_v32 }
  0xc2   :  { %1564 = vst.msk [vmem:[#allocation2 + $0x12] sm:$0x3f] %vm1559_vm0, %v9031_v32  ;;  %1565 = vst.msk [vmem:[#allocation3 + $0x12] sm:$0x3f] %vm1559_vm0, %v9031_v32 }
  0xc3   :  { %1566 = vst.msk [vmem:[#allocation2 + $0x1a] sm:$0x3f] %vm1559_vm0, %v9031_v32  ;;  %1567 = vst.msk [vmem:[#allocation3 + $0x1a] sm:$0x3f] %vm1559_vm0, %v9031_v32 }
  0xc4   :  { %1568 = vst.msk [vmem:[#allocation2 + $0x22] sm:$0x3f] %vm1559_vm0, %v9031_v32  ;;  %1569 = vst.msk [vmem:[#allocation3 + $0x22] sm:$0x3f] %vm1559_vm0, %v9031_v32 }
  0xc5   :  { %1570 = vst.msk [vmem:[#allocation2 + $0x2a] sm:$0x3f] %vm1559_vm0, %v9031_v32  ;;  %1571 = vst.msk [vmem:[#allocation3 + $0x2a] sm:$0x3f] %vm1559_vm0, %v9031_v32 }
  0xc6   :  { %1572 = vst.msk [vmem:[#allocation2 + $0x32] sm:$0x3f] %vm1559_vm0, %v9031_v32  ;;  %1573 = vst.msk [vmem:[#allocation3 + $0x32] sm:$0x3f] %vm1559_vm0, %v9031_v32 }
  0xc7   :  { %1574 = vst.msk [vmem:[#allocation2 + $0x3a] sm:$0x3f] %vm1559_vm0, %v9031_v32  ;;  %1575 = vst.msk [vmem:[#allocation3 + $0x3a] sm:$0x3f] %vm1559_vm0, %v9031_v32 }
  0xc8   :  { %8966 = dma.done.wait [#allocation7], 16 }
  0xc9   :  { %8967 = vsyncadd [#allocation7], 4294967280 }
  0xca   :  { %8968 = dma.done.wait [#allocation7 + $0x10], 16 }
  0xcb   :  { %8969 = vsyncadd [#allocation7 + $0x10], 4294967280 }
  0xcc   :  { %8970 = dma.done.wait [#allocation7 + $0x1], 16 }
  0xcd   :  { %8971 = vsyncadd [#allocation7 + $0x1], 4294967280 }
  0xce   :  { %8972 = dma.done.wait [#allocation7 + $0x11], 16 }
  0xcf   :  { %8973 = vsyncadd [#allocation7 + $0x11], 4294967280 }
  0xd0   :  { %8974 = dma.done.wait [#allocation7 + $0x2], 16 }
  0xd1   :  { %8975 = vsyncadd [#allocation7 + $0x2], 4294967280 }
  0xd2   :  { %8976 = dma.done.wait [#allocation7 + $0x12], 16 }
  0xd3   :  { %8977 = vsyncadd [#allocation7 + $0x12], 4294967280 }
  0xd4   :  { %8978 = dma.done.wait [#allocation7 + $0x3], 16 }
  0xd5   :  { %8979 = vsyncadd [#allocation7 + $0x3], 4294967280 }
  0xd6   :  { %8980 = dma.done.wait [#allocation7 + $0x13], 16 }
  0xd7   :  { %8981 = vsyncadd [#allocation7 + $0x13], 4294967280 }
  0xd8   :  { %8982 = dma.done.wait [#allocation7 + $0x4], 16 }
  0xd9   :  { %8983 = vsyncadd [#allocation7 + $0x4], 4294967280 }
  0xda   :  { %8984 = dma.done.wait [#allocation7 + $0x14], 16 }
  0xdb   :  { %8985 = vsyncadd [#allocation7 + $0x14], 4294967280 }
  0xdc   :  { %8986 = dma.done.wait [#allocation7 + $0x5], 16 }
  0xdd   :  { %8987 = vsyncadd [#allocation7 + $0x5], 4294967280 }
  0xde   :  { %8988 = dma.done.wait [#allocation7 + $0x15], 16 }
  0xdf   :  { %8989 = vsyncadd [#allocation7 + $0x15], 4294967280 }
  0xe0   :  { %8990 = dma.done.wait [#allocation7 + $0x6], 16 }
  0xe1   :  { %8991 = vsyncadd [#allocation7 + $0x6], 4294967280 }
  0xe2   :  { %8992 = dma.done.wait [#allocation7 + $0x16], 16 }
  0xe3   :  { %8993 = vsyncadd [#allocation7 + $0x16], 4294967280 }
  0xe4   :  { %8994 = dma.done.wait [#allocation7 + $0x7], 16 }
  0xe5   :  { %8995 = vsyncadd [#allocation7 + $0x7], 4294967280 }
  0xe6   :  { %8996 = dma.done.wait [#allocation7 + $0x17], 16 }
  0xe7   :  { %8997 = vsyncadd [#allocation7 + $0x17], 4294967280 }
  0xe8   :  { %8998 = dma.done.wait [#allocation7 + $0x8], 16 }
  0xe9   :  { %8999 = vsyncadd [#allocation7 + $0x8], 4294967280 }
  0xea   :  { %9000 = dma.done.wait [#allocation7 + $0x18], 16 }
  0xeb   :  { %9001 = vsyncadd [#allocation7 + $0x18], 4294967280 }
  0xec   :  { %9002 = dma.done.wait [#allocation7 + $0x9], 16 }
  0xed   :  { %9003 = vsyncadd [#allocation7 + $0x9], 4294967280 }
  0xee   :  { %9004 = dma.done.wait [#allocation7 + $0x19], 16 }
  0xef   :  { %9005 = vsyncadd [#allocation7 + $0x19], 4294967280 }
  0xf0   :  { %9006 = dma.done.wait [#allocation7 + $0xa], 16 }
  0xf1   :  { %9007 = vsyncadd [#allocation7 + $0xa], 4294967280 }
  0xf2   :  { %9008 = dma.done.wait [#allocation7 + $0x1a], 16 }
  0xf3   :  { %9009 = vsyncadd [#allocation7 + $0x1a], 4294967280 }
  0xf4   :  { %9010 = dma.done.wait [#allocation7 + $0xb], 16 }
  0xf5   :  { %9011 = vsyncadd [#allocation7 + $0xb], 4294967280 }
  0xf6   :  { %9012 = dma.done.wait [#allocation7 + $0x1b], 16 }
  0xf7   :  { %9013 = vsyncadd [#allocation7 + $0x1b], 4294967280 }
  0xf8   :  { %9014 = dma.done.wait [#allocation7 + $0xc], 16 }
  0xf9   :  { %9015 = vsyncadd [#allocation7 + $0xc], 4294967280 }
  0xfa   :  { %9016 = dma.done.wait [#allocation7 + $0x1c], 16 }
  0xfb   :  { %9017 = vsyncadd [#allocation7 + $0x1c], 4294967280 }
  0xfc   :  { %9018 = dma.done.wait [#allocation7 + $0xd], 16 }
  0xfd   :  { %9019 = vsyncadd [#allocation7 + $0xd], 4294967280 }
  0xfe   :  { %9020 = dma.done.wait [#allocation7 + $0x1d], 16 }
  0xff   :  { %9021 = vsyncadd [#allocation7 + $0x1d], 4294967280 }
 0x100   :  { %9022 = dma.done.wait [#allocation7 + $0xe], 16 }
 0x101   :  { %9023 = vsyncadd [#allocation7 + $0xe], 4294967280 }
 0x102   :  { %9024 = dma.done.wait [#allocation7 + $0x1e], 16 }
 0x103   :  { %9025 = vsyncadd [#allocation7 + $0x1e], 4294967280 }
 0x104   :  { %9026 = dma.done.wait [#allocation7 + $0xf], 16 }
 0x105   :  { %9027 = vsyncadd [#allocation7 + $0xf], 4294967280 }
 0x106   :  { %9028 = dma.done.wait [#allocation7 + $0x1f], 16 }
 0x107   :  { %9029 = vsyncadd [#allocation7 + $0x1f], 4294967280  ;;  %1778 = vmatprep.mubr.f32.mxu0 %v9031_v32  ;;  %1909 = vmatprep.mubr.f32.mxu1 %v9031_v32  ;;  %v1674_v33 = vld [vmem:[%s11512_s3 + $0x8] sm:$0xff]  ;;  %v1676_v35 = vld [vmem:[%s11512_s3 + $0x18] sm:$0xff]  ;;  %vm1689_vm1 = vcmask 261120   ;;  %vm6352_vm2 = vcmask 64512  }
 0x108   :  { %v1678_v34 = vld [vmem:[%s11512_s3 + $0x28] sm:$0xff]  ;;  %v1680_v37 = vld [vmem:[%s11512_s3 + $0x38] sm:$0xff]  ;;  %v1673_v38 = vld [vmem:[%s11512_s3] sm:$0xff]  ;;  %vm9033_vm3 = vmmov 0   ;;  %vm6504_vm4 = vcmask 23552  }
 0x109   :  { %v7288_v36 = vpack.c.bf16 %v1678_v34, %v1674_v33  ;;  %v1677_v39 = vld [vmem:[%s11512_s3 + $0x20] sm:$0xff]  ;;  %v7296_v40 = vpack.c.bf16 %v1680_v37, %v1676_v35  ;;  %v1675_v42 = vld [vmem:[%s11512_s3 + $0x10] sm:$0xff]  ;;  %v1682_v44 = vld [vmem:[%s11512_s3 + $0x48] sm:$0xff] }
 0x10a   :  { %v7290_v41 = vpack.c.bf16 %v1677_v39, %v1673_v38  ;;  %v1679_v43 = vld [vmem:[%s11512_s3 + $0x30] sm:$0xff]  ;;  %v1686_v46 = vld [vmem:[%s11512_s3 + $0x68] sm:$0xff]  ;;  %v1684_v47 = vld [vmem:[%s11512_s3 + $0x58] sm:$0xff] }
 0x10b   :  { %7289 = vmatprep.subr.bf16.mxu0 %v7288_v36  ;;  %v7298_v45 = vpack.c.bf16 %v1679_v43, %v1675_v42  ;;  %v1688_v48 = vld [vmem:[%s11512_s3 + $0x78] sm:$0xff]  ;;  %8496 = vmatprep.subr.bf16.mxu1 %v7296_v40  ;;  %v7292_v49 = vpack.c.bf16 %v1686_v46, %v1682_v44  ;;  %v1681_v51 = vld [vmem:[%s11512_s3 + $0x40] sm:$0xff]  ;;  %v1683_v53 = vld [vmem:[%s11512_s3 + $0x50] sm:$0xff] }
 0x10c   :  { %7291 = vmatpush1.bf16.msra.mxu0 %v7290_v41  ;;  %v7300_v50 = vpack.c.bf16 %v1688_v48, %v1684_v47  ;;  %v1685_v52 = vld [vmem:[%s11512_s3 + $0x60] sm:$0xff]  ;;  %v1687_v55 = vld [vmem:[%s11512_s3 + $0x70] sm:$0xff]  ;;  %v1652_v58 = vld [vmem:[%s11511_s2 + $0x18] sm:$0xff] }
 0x10d   :  { %8498 = vmatpush1.bf16.msra.mxu1 %v7298_v45  ;;  %v7294_v54 = vpack.c.bf16 %v1685_v52, %v1681_v51  ;;  %7293 = vmatprep.subr.bf16.mxu0 %v7292_v49  ;;  %v7302_v56 = vpack.c.bf16 %v1687_v55, %v1683_v53  ;;  %v9242_v57 = vld [vmem:[#allocation3] sm:$0xff]  ;;  %v1656_v59 = vld [vmem:[%s11511_s2 + $0x38] sm:$0xff]  ;;  %v1651_v60 = vld [vmem:[%s11511_s2 + $0x10] sm:$0xff] }
 0x10e   :  { %8497 = vmatprep.subr.bf16.mxu1 %v7300_v50  ;;  %v1655_v61 = vld [vmem:[%s11511_s2 + $0x30] sm:$0xff]  ;;  %v1668_v62 = vld [vmem:[#allocation3 + $0x18] sm:$0xff]  ;;  %v7312_v63 = vpack.c.bf16 %v1656_v59, %v1652_v58  ;;  %v9271_v6 = vld [vmem:[#allocation3 + $0x8] sm:$0xff] }
 0x10f   :  { %v1660_v0 = vld [vmem:[%s11511_s2 + $0x58] sm:$0xff]  ;;  %v7314_v2 = vpack.c.bf16 %v1655_v61, %v1651_v60  ;;  %v1659_v4 = vld [vmem:[%s11511_s2 + $0x50] sm:$0xff]  ;;  %v1669_v9 = vld [vmem:[#allocation3 + $0x20] sm:$0xff] }
 0x110   :  { %7295 = vmatpush1.bf16.msra.mxu0 %v7294_v54  ;;  %v1664_v1 = vld [vmem:[%s11511_s2 + $0x78] sm:$0xff]  ;;  %v1663_v5 = vld [vmem:[%s11511_s2 + $0x70] sm:$0xff]  ;;  %v1650_v12 = vld [vmem:[%s11511_s2 + $0x8] sm:$0xff] }
 0x111   :  { %8499 = vmatpush1.bf16.msra.mxu1 %v7302_v56  ;;  %7297 = vmatprep.subr.bf16.mxu0 %v7296_v40  ;;  %v7316_v3 = vpack.c.bf16 %v1664_v1, %v1660_v0  ;;  %v2283_v7 = vld [vmem:[%s11513_s4 + $0x18] sm:$0xff]  ;;  %v7318_v10 = vpack.c.bf16 %v1663_v5, %v1659_v4  ;;  %v9290_v13 = vld [vmem:[#allocation3 + $0x10] sm:$0xff]  ;;  %v1654_v14 = vld [vmem:[%s11511_s2 + $0x28] sm:$0xff] }
 0x112   :  { %7313 = vmatprep.subr.bf16.mxu1 %v7312_v63  ;;  %v2287_v8 = vld [vmem:[%s11513_s4 + $0x38] sm:$0xff]  ;;  %v1670_v15 = vld [vmem:[#allocation3 + $0x28] sm:$0xff]  ;;  %v7304_v16 = vpack.c.bf16 %v1654_v14, %v1650_v12  ;;  %v1671_v17 = vld [vmem:[#allocation3 + $0x30] sm:$0xff] }
 0x113   :  { %7115 = vmatmul.mubr.msk.f32.vlgmr.msra.gmra.mrb[0].mxu0 %vm1689_vm1, %v9242_v57  ;;  %v9283_v11 = vpack.c.bf16 %v2287_v8, %v2283_v7  ;;  %v1672_v18 = vld [vmem:[#allocation3 + $0x38] sm:$0xff]  ;;  %v2282_v19 = vld [vmem:[%s11513_s4 + $0x10] sm:$0xff]  ;;  %v9322_v23 = vld [vmem:[#allocation2] sm:$0xff] }
 0x114   :  { %7126 = vmatmul.mubr.msk.f32.vlgmr.msra.gmra.mrb[0].mxu1 %vm1689_vm1, %v1668_v62  ;;  %7299 = vmatpush1.bf16.msra.mxu0 %v7298_v45  ;;  %v2286_v20 = vld [vmem:[%s11513_s4 + $0x30] sm:$0xff]  ;;  %v2291_v21 = vld [vmem:[%s11513_s4 + $0x58] sm:$0xff]  ;;  %v9346_v30 = vld [vmem:[#allocation2 + $0x8] sm:$0xff] }
 0x115   :  { %1784 = vmatprep.mubr.f32.mxu0 %v9031_v32  ;;  %1915 = vmatprep.mubr.f32.mxu1 %v9031_v32  ;;  %v2295_v22 = vld [vmem:[%s11513_s4 + $0x78] sm:$0xff]  ;;  %v9324_v24 = vpack.c.bf16 %v2286_v20, %v2282_v19  ;;  %v2290_v26 = vld [vmem:[%s11513_s4 + $0x50] sm:$0xff]  ;;  %v1649_v40 = vld [vmem:[%s11511_s2] sm:$0xff] }
 0x116   :  { %7315 = vmatpush1.bf16.msra.mxu1 %v7314_v2  ;;  %7301 = vmatprep.subr.bf16.mxu0 %v7300_v50  ;;  %v9326_v25 = vpack.c.bf16 %v2295_v22, %v2291_v21  ;;  %v2294_v27 = vld [vmem:[%s11513_s4 + $0x70] sm:$0xff]  ;;  %v2299_v28 = vld [vmem:[%s11513_s4 + $0x98] sm:$0xff]  ;;  %v1653_v41 = vld [vmem:[%s11511_s2 + $0x20] sm:$0xff] }
 0x117   :  { %7116 = vmatmul.mubr.msk.f32.gmra.mrb[2].mxu0 %vm1689_vm1, %v9271_v6  ;;  %7317 = vmatprep.subr.bf16.mxu1 %v7316_v3  ;;  %v2303_v29 = vld [vmem:[%s11513_s4 + $0xb8] sm:$0xff]  ;;  %v9348_v31 = vpack.c.bf16 %v2294_v27, %v2290_v26  ;;  %v2298_v34 = vld [vmem:[%s11513_s4 + $0x90] sm:$0xff]  ;;  %v7306_v47 = vpack.c.bf16 %v1653_v41, %v1649_v40  ;;  %v1658_v48 = vld [vmem:[%s11511_s2 + $0x48] sm:$0xff] }
 0x118   :  { %7127 = vmatmul.mubr.msk.f32.gmra.mrb[2].mxu1 %vm1689_vm1, %v1669_v9  ;;  %1790 = vmatprep.mubr.f32.mxu0 %v9031_v32  ;;  %v9351_v33 = vpack.c.bf16 %v2303_v29, %v2299_v28  ;;  %v2302_v35 = vld [vmem:[%s11513_s4 + $0xb0] sm:$0xff]  ;;  %v2307_v36 = vld [vmem:[%s11513_s4 + $0xd8] sm:$0xff]  ;;  %v1662_v49 = vld [vmem:[%s11511_s2 + $0x68] sm:$0xff] }
 0x119   :  { %1921 = vmatprep.mubr.f32.mxu1 %v9031_v32  ;;  %7303 = vmatpush1.bf16.msra.mxu0 %v7302_v56  ;;  %v2311_v37 = vld [vmem:[%s11513_s4 + $0xf8] sm:$0xff]  ;;  %v9371_v38 = vld [vmem:[#allocation2 + $0x10] sm:$0xff]  ;;  %v9373_v39 = vpack.c.bf16 %v2302_v35, %v2298_v34  ;;  %v1657_v55 = vld [vmem:[%s11511_s2 + $0x40] sm:$0xff]  ;;  %v7308_v58 = vpack.c.bf16 %v1662_v49, %v1658_v48 }
 0x11a   :  { %7319 = vmatpush1.bf16.msra.mxu1 %v7318_v10  ;;  %7305 = vmatprep.subr.bf16.mxu0 %v7304_v16  ;;  %v9382_v42 = vpack.c.bf16 %v2311_v37, %v2307_v36  ;;  %v2306_v43 = vld [vmem:[%s11513_s4 + $0xd0] sm:$0xff]  ;;  %v2315_v45 = vld [vmem:[%s11513_s4 + $0x118] sm:$0xff]  ;;  %v1661_v56 = vld [vmem:[%s11511_s2 + $0x60] sm:$0xff] }
 0x11b   :  { %7117 = vmatmul.mubr.msk.f32.gmra.mrb[4].mxu0 %vm1689_vm1, %v9290_v13  ;;  %7353 = vmatprep.subr.bf16.mxu1 %v9283_v11  ;;  %v2310_v44 = vld [vmem:[%s11513_s4 + $0xf0] sm:$0xff]  ;;  %v2319_v46 = vld [vmem:[%s11513_s4 + $0x138] sm:$0xff]  ;;  %v2281_v61 = vld [vmem:[%s11513_s4 + $0x8] sm:$0xff]  ;;  %v7310_v0 = vpack.c.bf16 %v1661_v56, %v1657_v55 }
 0x11c   :  { %7128 = vmatmul.mubr.msk.f32.gmra.mrb[4].mxu1 %vm1689_vm1, %v1670_v15  ;;  %1796 = vmatprep.mubr.f32.mxu0 %v9031_v32  ;;  %v9408_v50 = vld [vmem:[#allocation2 + $0x18] sm:$0xff]  ;;  %v9410_v51 = vpack.c.bf16 %v2310_v44, %v2306_v43  ;;  %v2314_v52 = vld [vmem:[%s11513_s4 + $0x110] sm:$0xff]  ;;  %v9416_v53 = vpack.c.bf16 %v2319_v46, %v2315_v45  ;;  %v2284_v10 = vld [vmem:[%s11513_s4 + $0x20] sm:$0xff] }
 0x11d   :  { %1927 = vmatprep.mubr.f32.mxu1 %v9031_v32  ;;  %v2318_v54 = vld [vmem:[%s11513_s4 + $0x130] sm:$0xff]  ;;  %v2323_v59 = vld [vmem:[%s11513_s4 + $0x158] sm:$0xff]  ;;  %v2289_v16 = vld [vmem:[%s11513_s4 + $0x48] sm:$0xff] }
 0x11e   :  { %v2327_v60 = vld [vmem:[%s11513_s4 + $0x178] sm:$0xff]  ;;  %v9447_v63 = vpack.c.bf16 %v2318_v54, %v2314_v52  ;;  %v2322_v2 = vld [vmem:[%s11513_s4 + $0x150] sm:$0xff]  ;;  %v2288_v22 = vld [vmem:[%s11513_s4 + $0x40] sm:$0xff] }
 0x11f   :  { %7118 = vmatmul.mubr.msk.f32.gmra.mrb[6].mxu0 %vm1689_vm1, %v1668_v62  ;;  %v9445_v62 = vld [vmem:[#allocation2 + $0x20] sm:$0xff]  ;;  %v9451_v1 = vpack.c.bf16 %v2327_v60, %v2323_v59  ;;  %v2326_v3 = vld [vmem:[%s11513_s4 + $0x170] sm:$0xff]  ;;  %v2331_v5 = vld [vmem:[%s11513_s4 + $0x198] sm:$0xff] }
 0x120   :  { %7129 = vmatmul.mubr.msk.f32.gmra.mrb[6].mxu1 %vm1689_vm1, %v1671_v17  ;;  %1802 = vmatprep.mubr.f32.mxu0 %v9031_v32  ;;  %v2335_v7 = vld [vmem:[%s11513_s4 + $0x1b8] sm:$0xff]  ;;  %v9475_v8 = vpack.c.bf16 %v2326_v3, %v2322_v2  ;;  %v2330_v14 = vld [vmem:[%s11513_s4 + $0x190] sm:$0xff]  ;;  %v2292_v26 = vld [vmem:[%s11513_s4 + $0x60] sm:$0xff] }
 0x121   :  { %1933 = vmatprep.mubr.f32.mxu1 %v9031_v32  ;;  %v9485_v12 = vpack.c.bf16 %v2335_v7, %v2331_v5  ;;  %v2343_v19 = vld [vmem:[%s11513_s4 + $0x1f8] sm:$0xff]  ;;  %v9515_v20 = vld [vmem:[#allocation2 + $0x30] sm:$0xff]  ;;  %v2297_v35 = vld [vmem:[%s11513_s4 + $0x88] sm:$0xff]  ;;  %v9547_v37 = vpack.c.bf16 %v2292_v26, %v2288_v22 }
 0x122   :  { %v2338_v28 = vld [vmem:[%s11513_s4 + $0x1d0] sm:$0xff]  ;;  %v2301_v36 = vld [vmem:[%s11513_s4 + $0xa8] sm:$0xff]  ;;  %v2296_v41 = vld [vmem:[%s11513_s4 + $0x80] sm:$0xff] }
 0x123   :  { %7119 = vmatmul.mubr.msk.f32.gmra.mrb[8].mxu0 %vm1689_vm1, %v1669_v9  ;;  %v2280_v9 = vld [vmem:[%s11513_s4] sm:$0xff]  ;;  %v2342_v29 = vld [vmem:[%s11513_s4 + $0x1f0] sm:$0xff]  ;;  %v9563_v44 = vpack.c.bf16 %v2301_v36, %v2297_v35  ;;  %v2305_v45 = vld [vmem:[%s11513_s4 + $0xc8] sm:$0xff] }
 0x124   :  { %7130 = vmatmul.mubr.msk.f32.gmra.mrb[8].mxu1 %vm1689_vm1, %v1672_v18  ;;  %1808 = vmatprep.mubr.f32.mxu0 %v9031_v32  ;;  %v9553_v40 = vpack.c.bf16 %v2342_v29, %v2338_v28  ;;  %v2300_v43 = vld [vmem:[%s11513_s4 + $0xa0] sm:$0xff]  ;;  %v2309_v46 = vld [vmem:[%s11513_s4 + $0xe8] sm:$0xff] }
 0x125   :  { %2141 = vmatprep.mubr.f32.mxu1 %v9031_v32  ;;  %v9581_v48 = vpack.c.bf16 %v2309_v46, %v2305_v45  ;;  %v2304_v49 = vld [vmem:[%s11513_s4 + $0xc0] sm:$0xff]  ;;  %v2313_v52 = vld [vmem:[%s11513_s4 + $0x108] sm:$0xff] }
 0x126   :  { %v2317_v54 = vld [vmem:[%s11513_s4 + $0x128] sm:$0xff] }
 0x127   :  { %7120 = vmatmul.mubr.msk.f32.gmra.mrb[10].mxu0 %vm1689_vm1, %v1670_v15  ;;  %v2334_v15 = vld [vmem:[%s11513_s4 + $0x1b0] sm:$0xff]  ;;  %v9606_v56 = vpack.c.bf16 %v2317_v54, %v2313_v52  ;;  %v2321_v59 = vld [vmem:[%s11513_s4 + $0x148] sm:$0xff] }
 0x128   :  { %7139 = vmatmul.mubr.msk.f32.vlgmr.msra.gmra.mrb[10].mxu1 %vm1689_vm1, %v9322_v23  ;;  %1814 = vmatprep.mubr.f32.mxu0 %v9031_v32  ;;  %v9517_v21 = vpack.c.bf16 %v2334_v15, %v2330_v14  ;;  %v2325_v60 = vld [vmem:[%s11513_s4 + $0x168] sm:$0xff] }
 0x129   :  { %7355 = vmatpush1.bf16.msra.mxu1 %v9324_v24  ;;  %2147 = vmatprep.mubr.f32.mxu1 %v9031_v32  ;;  %v2329_v2 = vld [vmem:[%s11513_s4 + $0x188] sm:$0xff] }
 0x12a   :  { %7357 = vmatprep.subr.bf16.mxu1 %v9326_v25  ;;  %v2333_v3 = vld [vmem:[%s11513_s4 + $0x1a8] sm:$0xff] }
 0x12b   :  { %7121 = vmatmul.mubr.msk.f32.gmra.mrb[12].mxu0 %vm1689_vm1, %v1671_v17  ;;  %v2293_v17 = vld [vmem:[%s11513_s4 + $0x68] sm:$0xff]  ;;  %v9653_v7 = vpack.c.bf16 %v2333_v3, %v2329_v2 }
 0x12c   :  { %7140 = vmatmul.mubr.msk.f32.gmra.mrb[12].mxu1 %vm1689_vm1, %v9346_v30  ;;  %1820 = vmatprep.mubr.f32.mxu0 %v9031_v32  ;;  %v9526_v27 = vpack.c.bf16 %v2293_v17, %v2289_v16  ;;  %v2341_v14 = vld [vmem:[%s11513_s4 + $0x1e8] sm:$0xff]  ;;  %v2336_v17 = vld [vmem:[%s11513_s4 + $0x1c0] sm:$0xff] }
 0x12d   :  { %7359 = vmatpush1.bf16.msra.mxu1 %v9348_v31  ;;  %2153 = vmatprep.mubr.f32.mxu1 %v9031_v32 }
 0x12e   :  { %7361 = vmatprep.subr.bf16.mxu1 %v9351_v33 }
 0x12f   :  { %7122 = vmatmul.mubr.msk.f32.gmra.mrb[14].mxu0 %vm1689_vm1, %v1672_v18  ;;  %v9505_v18 = vpack.c.bf16 %v2284_v10, %v2280_v9  ;;  %v2328_v9 = vld [vmem:[%s11513_s4 + $0x180] sm:$0xff]  ;;  %v2337_v10 = vld [vmem:[%s11513_s4 + $0x1c8] sm:$0xff] }
 0x130   :  { %7141 = vmatmul.mubr.msk.f32.gmra.mrb[14].mxu1 %vm1689_vm1, %v9371_v38  ;;  %1891 = vmatprep.mubr.f32.mxu0 %v9031_v32  ;;  %v9676_v16 = vpack.c.bf16 %v2341_v14, %v2337_v10 }
 0x131   :  { %7363 = vmatpush1.bf16.msra.mxu1 %v9373_v39  ;;  %2159 = vmatprep.mubr.f32.mxu1 %v9031_v32 }
 0x132   :  { %7365 = vmatprep.subr.bf16.mxu1 %v9382_v42 }
 0x133   :  { %7123 = vmatmul.mubr.msk.f32.vlgmr.msra.gmra.mrb[16].mxu0 %vm1689_vm1, %v9242_v57  ;;  %v2285_v57 = vld [vmem:[%s11513_s4 + $0x28] sm:$0xff] }
 0x134   :  { %7142 = vmatmul.mubr.msk.f32.gmra.mrb[0].mxu1 %vm1689_vm1, %v9408_v50  ;;  %7307 = vmatpush1.bf16.msra.mxu0 %v7306_v47  ;;  %v9461_v4 = vpack.c.bf16 %v2285_v57, %v2281_v61  ;;  %v9577_v47 = vpack.c.bf16 %v2300_v43, %v2296_v41  ;;  %v9630_v57 = vpack.c.bf16 %v2325_v60, %v2321_v59 }
 0x135   :  { %7367 = vmatpush1.bf16.msra.mxu1 %v9410_v51  ;;  %1897 = vmatprep.mubr.f32.mxu0 %v9031_v32 }
 0x136   :  { %2165 = vmatprep.mubr.f32.mxu1 %v9031_v32  ;;  %7369 = vmatprep.subr.bf16.mxu1 %v9416_v53 }
 0x137   :  { %7124 = vmatmul.mubr.msk.f32.gmra.mrb[18].mxu0 %vm1689_vm1, %v9271_v6  ;;  %7309 = vmatprep.subr.bf16.mxu0 %v7308_v58  ;;  %v9473_v6 = vld [vmem:[#allocation2 + $0x28] sm:$0xff]  ;;  %v2312_v58 = vld [vmem:[%s11513_s4 + $0x100] sm:$0xff] }
 0x138   :  { %7143 = vmatmul.mubr.msk.f32.gmra.mrb[2].mxu1 %vm1689_vm1, %v9445_v62  ;;  %1903 = vmatprep.mubr.f32.mxu0 %v9031_v32 }
 0x139   :  { %7371 = vmatpush1.bf16.msra.mxu1 %v9447_v63  ;;  %7311 = vmatpush1.bf16.msra.mxu0 %v7310_v0  ;;  %v2320_v0 = vld [vmem:[%s11513_s4 + $0x140] sm:$0xff] }
 0x13a   :  { %2171 = vmatprep.mubr.f32.mxu1 %v9031_v32  ;;  %7373 = vmatprep.subr.bf16.mxu1 %v9451_v1 }
 0x13b   :  { %7125 = vmatmul.mubr.msk.f32.gmra.mrb[20].mxu0 %vm1689_vm1, %v9290_v13  ;;  %7321 = vmatprep.subr.bf16.mxu0 %v9461_v4  ;;  %v2339_v13 = vld [vmem:[%s11513_s4 + $0x1d8] sm:$0xff] }
 0x13c   :  { %7144 = vmatmul.mubr.msk.f32.gmra.mrb[4].mxu1 %vm1689_vm1, %v9473_v6  ;;  %2028 = vmatprep.mubr.f32.mxu0 %v9031_v32  ;;  %v9536_v34 = vpack.c.bf16 %v2343_v19, %v2339_v13 }
 0x13d   :  { %7375 = vmatpush1.bf16.msra.mxu1 %v9475_v8  ;;  %2177 = vmatprep.mubr.f32.mxu1 %v9031_v32 }
 0x13e   :  { %7377 = vmatprep.subr.bf16.mxu1 %v9485_v12 }
 0x13f   :  { %7131 = vmatmul.mubr.msk.f32.vlgmr.msra.gmra.mrb[0].mxu0 %vm1689_vm1, %v9322_v23  ;;  %v9551_v23 = vld [vmem:[#allocation2 + $0x38] sm:$0xff] }
 0x140   :  { %7145 = vmatmul.mubr.msk.f32.gmra.mrb[6].mxu1 %vm1689_vm1, %v9515_v20  ;;  %7323 = vmatpush1.bf16.msra.mxu0 %v9505_v18 }
 0x141   :  { %7379 = vmatpush1.bf16.msra.mxu1 %v9517_v21  ;;  %2034 = vmatprep.mubr.f32.mxu0 %v9031_v32 }
 0x142   :  { %2183 = vmatprep.mubr.f32.mxu1 %v9031_v32  ;;  %7325 = vmatprep.subr.bf16.mxu0 %v9526_v27 }
 0x143   :  { %7132 = vmatmul.mubr.msk.f32.gmra.mrb[2].mxu0 %vm1689_vm1, %v9346_v30  ;;  %7381 = vmatprep.subr.bf16.mxu1 %v9536_v34  ;;  %v2308_v30 = vld [vmem:[%s11513_s4 + $0xe0] sm:$0xff] }
 0x144   :  { %7146 = vmatmul.mubr.msk.f32.gmra.mrb[8].mxu1 %vm1689_vm1, %v9551_v23  ;;  %7327 = vmatpush1.bf16.msra.mxu0 %v9547_v37  ;;  %v9602_v55 = vpack.c.bf16 %v2308_v30, %v2304_v49 }
 0x145   :  { %7383 = vmatpush1.bf16.msra.mxu1 %v9553_v40  ;;  %2040 = vmatprep.mubr.f32.mxu0 %v9031_v32 }
 0x146   :  { %2479 = vmatprep.mubr.f32.mxu1 %v9031_v32  ;;  %7329 = vmatprep.subr.bf16.mxu0 %v9563_v44 }
 0x147   :  { %7133 = vmatmul.mubr.msk.f32.gmra.mrb[4].mxu0 %vm1689_vm1, %v9371_v38  ;;  %7417 = vmatprep.subr.bf16.mxu1 %v9283_v11  ;;  %v2316_v38 = vld [vmem:[%s11513_s4 + $0x120] sm:$0xff] }
 0x148   :  { %2480 = vmatmul.mubr.f32.vlgmr.msra.gmra.mrb[10].mxu1 %v9031_v32  ;;  %7331 = vmatpush1.bf16.msra.mxu0 %v9577_v47  ;;  %v9627_v61 = vpack.c.bf16 %v2316_v38, %v2312_v58 }
 0x149   :  { %2046 = vmatprep.mubr.f32.mxu0 %v9031_v32  ;;  %7333 = vmatprep.subr.bf16.mxu0 %v9581_v48 }
 0x14a   :  { %7419 = vmatpush1.bf16.msra.mxu1 %v9324_v24  ;;  %2719 = vmatprep.mubr.f32.mxu1 %v9031_v32 }
 0x14b   :  { %7134 = vmatmul.mubr.msk.f32.gmra.mrb[6].mxu0 %vm1689_vm1, %v9408_v50  ;;  %7421 = vmatprep.subr.bf16.mxu1 %v9326_v25  ;;  %v2324_v50 = vld [vmem:[%s11513_s4 + $0x160] sm:$0xff] }
 0x14c   :  { %7335 = vmatpush1.bf16.msra.mxu0 %v9602_v55  ;;  %2052 = vmatprep.mubr.f32.mxu0 %v9031_v32  ;;  %v9650_v5 = vpack.c.bf16 %v2324_v50, %v2320_v0 }
 0x14d   :  { %7337 = vmatprep.subr.bf16.mxu0 %v9606_v56 }
 0x14e   :  { %7423 = vmatpush1.bf16.msra.mxu1 %v9348_v31 }
 0x14f   :  { %7135 = vmatmul.mubr.msk.f32.gmra.mrb[8].mxu0 %vm1689_vm1, %v9445_v62  ;;  %7425 = vmatprep.subr.bf16.mxu1 %v9351_v33  ;;  %v2332_v62 = vld [vmem:[%s11513_s4 + $0x1a0] sm:$0xff] }
 0x150   :  { %7339 = vmatpush1.bf16.msra.mxu0 %v9627_v61  ;;  %2058 = vmatprep.mubr.f32.mxu0 %v9031_v32  ;;  %v9673_v15 = vpack.c.bf16 %v2332_v62, %v2328_v9 }
 0x151   :  { %7341 = vmatprep.subr.bf16.mxu0 %v9630_v57 }
 0x152   :  { %7427 = vmatpush1.bf16.msra.mxu1 %v9373_v39 }
 0x153   :  { %7136 = vmatmul.mubr.msk.f32.gmra.mrb[10].mxu0 %vm1689_vm1, %v9473_v6  ;;  %7429 = vmatprep.subr.bf16.mxu1 %v9382_v42  ;;  %v2340_v6 = vld [vmem:[%s11513_s4 + $0x1e0] sm:$0xff] }
 0x154   :  { %7343 = vmatpush1.bf16.msra.mxu0 %v9650_v5  ;;  %2064 = vmatprep.mubr.f32.mxu0 %v9031_v32  ;;  %v9690_v13 = vpack.c.bf16 %v2340_v6, %v2336_v17 }
 0x155   :  { %7345 = vmatprep.subr.bf16.mxu0 %v9653_v7 }
 0x156   :  { %7431 = vmatpush1.bf16.msra.mxu1 %v9410_v51 }
 0x157   :  { %7137 = vmatmul.mubr.msk.f32.gmra.mrb[12].mxu0 %vm1689_vm1, %v9515_v20  ;;  %7433 = vmatprep.subr.bf16.mxu1 %v9416_v53  ;;  %v2192_v20 = vlaneseq }
 0x158   :  { %7347 = vmatpush1.bf16.msra.mxu0 %v9673_v15  ;;  %2070 = vmatprep.mubr.f32.mxu0 %v9031_v32 }
 0x159   :  { %7349 = vmatprep.subr.bf16.mxu0 %v9676_v16  ;;  %v9728_v28 = vshrl.u32 %v2192_v20, 7 }
 0x15a   :  { %7435 = vmatpush1.bf16.msra.mxu1 %v9447_v63 }
 0x15b   :  { %7138 = vmatmul.mubr.msk.f32.gmra.mrb[14].mxu0 %vm1689_vm1, %v9551_v23  ;;  %7437 = vmatprep.subr.bf16.mxu1 %v9451_v1  ;;  %v2202_v36 = vsub.s32 2, %v9728_v28  ;;  %v2190_v23 = vld [vmem:[%s11514_s5] sm:$0xf]  ;;  %v2206_v41 = vsub.s32 3, %v9728_v28  ;;  %v2194_v38 = vsub.s32 0, %v9728_v28  ;;  %v2198_v59 = vsub.s32 1, %v9728_v28 }
 0x15c   :  { %7351 = vmatpush1.bf16.msra.mxu0 %v9690_v13  ;;  %2408 = vmatprep.mubr.f32.mxu0 %v9031_v32 }
 0x15d   :  { %7385 = vmatprep.subr.bf16.mxu0 %v9461_v4  ;;  %v9741_v43 = vrot.slane %v2190_v23, %v2202_v36  ;;  %v9745_v45 = vrot.slane %v2190_v23, %v2206_v41  ;;  %v9753_v60 = vrot.slane %v2190_v23, %v2194_v38  ;;  %v9757_v0 = vrot.slane %v2190_v23, %v2198_v59 }
 0x15e   :  { %7439 = vmatpush1.bf16.msra.mxu1 %v9475_v8 }
 0x15f   :  { %2409 = vmatmul.mubr.f32.vlgmr.msra.gmra.mrb[0].mxu0 %v9031_v32  ;;  %7441 = vmatprep.subr.bf16.mxu1 %v9485_v12 }
 0x160   :  { %7387 = vmatpush1.bf16.msra.mxu0 %v9505_v18  ;;  %2648 = vmatprep.mubr.f32.mxu0 %v9031_v32 }
 0x161   :  { %7389 = vmatprep.subr.bf16.mxu0 %v9526_v27 }
 0x162   :  { %7443 = vmatpush1.bf16.msra.mxu1 %v9517_v21 }
 0x163   :  { %7445 = vmatprep.subr.bf16.mxu1 %v9536_v34 }
 0x164   :  { %7391 = vmatpush1.bf16.msra.mxu0 %v9547_v37 }
 0x165   :  { %7393 = vmatprep.subr.bf16.mxu0 %v9563_v44 }
 0x166   :  { %7447 = vmatpush1.bf16.msra.mxu1 %v9553_v40 }
 0x167   :  { %7481 = vmatprep.subr.bf16.mxu1 %v9283_v11 }
 0x168   :  { %7395 = vmatpush1.bf16.msra.mxu0 %v9577_v47 }
 0x169   :  { %7397 = vmatprep.subr.bf16.mxu0 %v9581_v48 }
 0x16c   :  { %7399 = vmatpush1.bf16.msra.mxu0 %v9602_v55 }
 0x16d   :  { %7401 = vmatprep.subr.bf16.mxu0 %v9606_v56 }
 0x170   :  { %7403 = vmatpush1.bf16.msra.mxu0 %v9627_v61 }
 0x171   :  { %7405 = vmatprep.subr.bf16.mxu0 %v9630_v57 }
 0x174   :  { %7407 = vmatpush1.bf16.msra.mxu0 %v9650_v5 }
 0x175   :  { %7409 = vmatprep.subr.bf16.mxu0 %v9653_v7 }
 0x178   :  { %7411 = vmatpush1.bf16.msra.mxu0 %v9673_v15 }
 0x179   :  { %7413 = vmatprep.subr.bf16.mxu0 %v9676_v16 }
 0x17c   :  { %7415 = vmatpush1.bf16.msra.mxu0 %v9690_v13 }
 0x17d   :  { %7449 = vmatprep.subr.bf16.mxu0 %v9461_v4 }
 0x206   :  { %v1893_v11 = vpop.f32.mrb[16].mxu0 }
 0x207   :  { %v1895_v19 = vpop.f32.mrb[17].mxu0  ;;  %v8516_v46 = vadd.f32 %v9741_v43, %v1893_v11 }
 0x208   :  { %v8518_v49 = vadd.f32 %v9745_v45, %v1895_v19 }
 0x20a   :  { %v9724_v22 = vpop.f32.mrb[18].mxu0 }
 0x20b   :  { %v9726_v26 = vpop.f32.mrb[19].mxu0 }
 0x20e   :  { %v9730_v29 = vpop.f32.mrb[20].mxu0 }
 0x20f   :  { %v9732_v35 = vpop.f32.mrb[21].mxu0 }
 0x21b   :  { %v2481_v30 = vpop.f32.mrb[10].mxu1 }
 0x21c   :  { %v8517_v52 = vadd.f32 %v8516_v46, %v2481_v30  ;;  %v2483_v54 = vpop.f32.mrb[11].mxu1 }
 0x21d   :  { %v8519_v58 = vadd.f32 %v8518_v49, %v2483_v54 }
 0x21f   :  { %v7149_v14 = vmul.f32 -1.442695, %v8519_v58 }
 0x232   :  { %v2410_v50 = vpop.f32.mrb[0].mxu0 }
 0x233   :  { %v8500_v2 = vadd.f32 %v2410_v50, %v9753_v60  ;;  %v2412_v3 = vpop.f32.mrb[1].mxu0 }
 0x234   :  { %v8501_v9 = vadd.f32 %v2412_v3, %v9757_v0 }
 0x235   :  { %v7147_v62 = vmul.f32 -1.442695, %v8500_v2 }
 0x236   :  { %v7148_v10 = vmul.f32 -1.442695, %v8501_v9 }
 0x237   :  { %8696 = vpow2.f32 %v7147_v62 }
 0x238   :  { %8698 = vpow2.f32 %v7148_v10 }
 0x239   :  { %8700 = vpow2.f32 %v7149_v14 }
 0x23a   :  { %8702 = vtanh.f32 %v8517_v52 }
 0x241   :  { %v8697_v17 = vpop.eup %8696 }
 0x242   :  { %v8699_v6 = vpop.eup %8698  ;;  %v2493_v11 = vadd.f32 1.0, %v8697_v17 }
 0x243   :  { %v2499_v19 = vadd.f32 1.0, %v8699_v6  ;;  %v8701_v20 = vpop.eup %8700 }
 0x244   :  { %8704 = vrcp.f32 %v2493_v11  ;;  %v8703_v23 = vpop.eup %8702  ;;  %v2506_v30 = vadd.f32 1.0, %v8701_v20 }
 0x245   :  { %8706 = vrcp.f32 %v2499_v19 }
 0x246   :  { %8708 = vrcp.f32 %v2506_v30 }
 0x24e   :  { %v8705_v46 = vpop.eup %8704 }
 0x24f   :  { %v8707_v49 = vpop.eup %8706  ;;  %v2510_v54 = vmul.f32 %v8705_v46, %v8703_v23  ;;  %v3018_v46 = vld [vmem:[%s11513_s4 + $0x90] sm:$0xff] }
 0x250   :  { %v2509_v50 = vmul.f32 0.0, %v8707_v49  ;;  %v8709_v58 = vpop.eup %8708  ;;  %v3022_v49 = vld [vmem:[%s11513_s4 + $0xb0] sm:$0xff] }
 0x251   :  { %v9882_v30 = vpack.c.bf16 %v3022_v49, %v3018_v46 }
 0x252   :  { %v9761_v2 = vadd.f32 %v2510_v54, %v2509_v50  ;;  %v3027_v54 = vld [vmem:[%s11513_s4 + $0xd8] sm:$0xff] }
 0x253   :  { %v3031_v50 = vld [vmem:[%s11513_s4 + $0xf8] sm:$0xff] }
 0x254   :  { %8710 = vtanh.f32 %v9761_v2 }
 0x25e   :  { %v8711_v3 = vpop.eup %8710 }
 0x25f   :  { %v9764_v9 = vmul.f32 %v8711_v3, %v8709_v58  ;;  %v3026_v58 = vld [vmem:[%s11513_s4 + $0xd0] sm:$0xff] }
 0x260   :  { %v3030_v3 = vld [vmem:[%s11513_s4 + $0xf0] sm:$0xff] }
 0x261   :  { %2649 = vmatmul.mubr.f32.vlgmr.msra.gmra.mrb[2].mxu0 %v9764_v9  ;;  %2720 = vmatmul.mubr.f32.vlgmr.msra.gmra.mrb[12].mxu1 %v9764_v9 }
 0x262   :  { %7451 = vmatpush1.bf16.msra.mxu0 %v9505_v18  ;;  %7483 = vmatpush1.bf16.msra.mxu1 %v9324_v24  ;;  %v8520_v24 = vadd.f32 %v9741_v43, %v9724_v22 }
 0x263   :  { %7453 = vmatprep.subr.bf16.mxu0 %v9526_v27  ;;  %7485 = vmatprep.subr.bf16.mxu1 %v9326_v25  ;;  %v8522_v25 = vadd.f32 %v9745_v45, %v9726_v26 }
 0x264   :  { %2888 = vmatprep.mubr.f32.mxu0 %v9031_v32  ;;  %2959 = vmatprep.mubr.f32.mxu1 %v9031_v32 }
 0x266   :  { %7455 = vmatpush1.bf16.msra.mxu0 %v9547_v37  ;;  %7487 = vmatpush1.bf16.msra.mxu1 %v9348_v31 }
 0x267   :  { %7457 = vmatprep.subr.bf16.mxu0 %v9563_v44  ;;  %7489 = vmatprep.subr.bf16.mxu1 %v9351_v33 }
 0x26a   :  { %7459 = vmatpush1.bf16.msra.mxu0 %v9577_v47  ;;  %7491 = vmatpush1.bf16.msra.mxu1 %v9373_v39 }
 0x26b   :  { %7461 = vmatprep.subr.bf16.mxu0 %v9581_v48  ;;  %7493 = vmatprep.subr.bf16.mxu1 %v9382_v42 }
 0x26e   :  { %7463 = vmatpush1.bf16.msra.mxu0 %v9602_v55  ;;  %7495 = vmatpush1.bf16.msra.mxu1 %v9410_v51 }
 0x26f   :  { %7465 = vmatprep.subr.bf16.mxu0 %v9606_v56  ;;  %7497 = vmatprep.subr.bf16.mxu1 %v9416_v53 }
 0x272   :  { %7467 = vmatpush1.bf16.msra.mxu0 %v9627_v61  ;;  %7499 = vmatpush1.bf16.msra.mxu1 %v9447_v63 }
 0x273   :  { %7469 = vmatprep.subr.bf16.mxu0 %v9630_v57  ;;  %7501 = vmatprep.subr.bf16.mxu1 %v9451_v1 }
 0x276   :  { %7471 = vmatpush1.bf16.msra.mxu0 %v9650_v5  ;;  %7503 = vmatpush1.bf16.msra.mxu1 %v9475_v8 }
 0x277   :  { %7473 = vmatprep.subr.bf16.mxu0 %v9653_v7  ;;  %7505 = vmatprep.subr.bf16.mxu1 %v9485_v12 }
 0x27a   :  { %7475 = vmatpush1.bf16.msra.mxu0 %v9673_v15  ;;  %7507 = vmatpush1.bf16.msra.mxu1 %v9517_v21 }
 0x27b   :  { %7477 = vmatprep.subr.bf16.mxu0 %v9676_v16  ;;  %7509 = vmatprep.subr.bf16.mxu1 %v9536_v34 }
 0x27e   :  { %7479 = vmatpush1.bf16.msra.mxu0 %v9690_v13  ;;  %7511 = vmatpush1.bf16.msra.mxu1 %v9553_v40 }
 0x27f   :  { %7513 = vmatprep.subr.bf16.mxu0 %v9461_v4 }
 0x334   :  { %v2650_v31 = vpop.f32.mrb[2].mxu0  ;;  %v2721_v33 = vpop.f32.mrb[12].mxu1 }
 0x335   :  { %v8502_v39 = vadd.f32 %v2650_v31, %v9753_v60  ;;  %v8521_v42 = vadd.f32 %v8520_v24, %v2721_v33  ;;  %v2652_v51 = vpop.f32.mrb[3].mxu0  ;;  %v2723_v53 = vpop.f32.mrb[13].mxu1  ;;  %v9900_v24 = vpack.c.bf16 %v3030_v3, %v3026_v58  ;;  %v3039_v31 = vld [vmem:[%s11513_s4 + $0x138] sm:$0xff] }
 0x336   :  { %v8503_v63 = vadd.f32 %v2652_v51, %v9757_v0  ;;  %v8523_v1 = vadd.f32 %v8522_v25, %v2723_v53  ;;  %v3035_v25 = vld [vmem:[%s11513_s4 + $0x118] sm:$0xff] }
 0x337   :  { %v7150_v8 = vmul.f32 -1.442695, %v8502_v39  ;;  %v9910_v33 = vpack.c.bf16 %v3039_v31, %v3035_v25  ;;  %v3034_v39 = vld [vmem:[%s11513_s4 + $0x110] sm:$0xff]  ;;  %v3043_v53 = vld [vmem:[%s11513_s4 + $0x158] sm:$0xff] }
 0x338   :  { %v7151_v12 = vmul.f32 -1.442695, %v8503_v63  ;;  %v7152_v4 = vmul.f32 -1.442695, %v8523_v1  ;;  %v3047_v63 = vld [vmem:[%s11513_s4 + $0x178] sm:$0xff] }
 0x339   :  { %8712 = vpow2.f32 %v7150_v8  ;;  %v9928_v1 = vpack.c.bf16 %v3047_v63, %v3043_v53  ;;  %v3042_v8 = vld [vmem:[%s11513_s4 + $0x150] sm:$0xff] }
 0x33a   :  { %8714 = vpow2.f32 %v7151_v12  ;;  %v3046_v12 = vld [vmem:[%s11513_s4 + $0x170] sm:$0xff] }
 0x33b   :  { %8716 = vpow2.f32 %v7152_v4  ;;  %v9936_v4 = vpack.c.bf16 %v3046_v12, %v3042_v8 }
 0x33c   :  { %8718 = vtanh.f32 %v8521_v42  ;;  %v3038_v42 = vld [vmem:[%s11513_s4 + $0x130] sm:$0xff] }
 0x33d   :  { %v9918_v51 = vpack.c.bf16 %v3038_v42, %v3034_v39 }
 0x343   :  { %v8713_v21 = vpop.eup %8712 }
 0x344   :  { %v8715_v34 = vpop.eup %8714  ;;  %v2733_v40 = vadd.f32 1.0, %v8713_v21  ;;  %v3051_v21 = vld [vmem:[%s11513_s4 + $0x198] sm:$0xff] }
 0x345   :  { %v2739_v22 = vadd.f32 1.0, %v8715_v34  ;;  %v8717_v26 = vpop.eup %8716  ;;  %v3055_v34 = vld [vmem:[%s11513_s4 + $0x1b8] sm:$0xff] }
 0x346   :  { %8720 = vrcp.f32 %v2733_v40  ;;  %v8719_v52 = vpop.eup %8718  ;;  %v2746_v17 = vadd.f32 1.0, %v8717_v26  ;;  %v9946_v40 = vpack.c.bf16 %v3055_v34, %v3051_v21  ;;  %v3054_v26 = vld [vmem:[%s11513_s4 + $0x1b0] sm:$0xff]  ;;  %v3245_v34 = vld [vmem:[%s11513_s4 + $0x28] sm:$0xff] }
 0x347   :  { %8722 = vrcp.f32 %v2739_v22  ;;  %v3050_v22 = vld [vmem:[%s11513_s4 + $0x190] sm:$0xff] }
 0x348   :  { %8724 = vrcp.f32 %v2746_v17  ;;  %v3058_v17 = vld [vmem:[%s11513_s4 + $0x1d0] sm:$0xff] }
 0x350   :  { %v8721_v62 = vpop.eup %8720 }
 0x351   :  { %v8723_v10 = vpop.eup %8722  ;;  %v2750_v14 = vmul.f32 %v8721_v62, %v8719_v52  ;;  %v9954_v52 = vpack.c.bf16 %v3054_v26, %v3050_v22  ;;  %v3059_v62 = vld [vmem:[%s11513_s4 + $0x1d8] sm:$0xff]  ;;  %v3240_v26 = vld [vmem:[%s11513_s4] sm:$0xff] }
 0x352   :  { %v2749_v6 = vmul.f32 %v8723_v10, %v9761_v2  ;;  %v8725_v19 = vpop.eup %8724  ;;  %v9892_v2 = vpack.c.bf16 %v3031_v50, %v3027_v54  ;;  %v3063_v10 = vld [vmem:[%s11513_s4 + $0x1f8] sm:$0xff] }
 0x354   :  { %v9808_v11 = vadd.f32 %v2750_v14, %v2749_v6  ;;  %v9964_v14 = vpack.c.bf16 %v3063_v10, %v3059_v62  ;;  %v3062_v6 = vld [vmem:[%s11513_s4 + $0x1f0] sm:$0xff]  ;;  %v3244_v62 = vld [vmem:[%s11513_s4 + $0x20] sm:$0xff] }
 0x355   :  { %v10023_v10 = vpack.c.bf16 %v3244_v62, %v3240_v26  ;;  %v3289_v26 = vld [vmem:[%s11513_s4 + $0x188] sm:$0xff] }
 0x356   :  { %8726 = vtanh.f32 %v9808_v11  ;;  %v3293_v62 = vld [vmem:[%s11513_s4 + $0x1a8] sm:$0xff] }
 0x360   :  { %v8727_v20 = vpop.eup %8726 }
 0x361   :  { %v9811_v23 = vmul.f32 %v8727_v20, %v8725_v19  ;;  %v9972_v19 = vpack.c.bf16 %v3062_v6, %v3058_v17  ;;  %v8524_v20 = vadd.f32 %v9741_v43, %v9730_v29  ;;  %v3249_v17 = vld [vmem:[%s11513_s4 + $0x48] sm:$0xff] }
 0x362   :  { %v3253_v6 = vld [vmem:[%s11513_s4 + $0x68] sm:$0xff] }
 0x363   :  { %2889 = vmatmul.mubr.f32.vlgmr.msra.gmra.mrb[4].mxu0 %v9811_v23  ;;  %2960 = vmatmul.mubr.f32.vlgmr.msra.gmra.mrb[14].mxu1 %v9811_v23 }
 0x364   :  { %7515 = vmatpush1.bf16.msra.mxu0 %v9505_v18  ;;  %3128 = vmatprep.mubr.f32.mxu0 %v9031_v32  ;;  %v3003_v18 = vld [vmem:[%s11513_s4 + $0x18] sm:$0xff] }
 0x365   :  { %7517 = vmatprep.subr.bf16.mxu0 %v9526_v27  ;;  %3199 = vmatprep.mubr.f32.mxu1 %v9031_v32  ;;  %v3007_v27 = vld [vmem:[%s11513_s4 + $0x38] sm:$0xff] }
 0x368   :  { %7519 = vmatpush1.bf16.msra.mxu0 %v9547_v37  ;;  %v9838_v37 = vpack.c.bf16 %v3007_v27, %v3003_v18  ;;  %v8526_v18 = vadd.f32 %v9745_v45, %v9732_v35 }
 0x369   :  { %7521 = vmatprep.subr.bf16.mxu0 %v9563_v44  ;;  %v3002_v44 = vld [vmem:[%s11513_s4 + $0x10] sm:$0xff] }
 0x36a   :  { %7545 = vmatprep.subr.bf16.mxu1 %v9838_v37 }
 0x36c   :  { %7523 = vmatpush1.bf16.msra.mxu0 %v9577_v47  ;;  %v3006_v47 = vld [vmem:[%s11513_s4 + $0x30] sm:$0xff] }
 0x36d   :  { %7525 = vmatprep.subr.bf16.mxu0 %v9581_v48  ;;  %v9846_v48 = vpack.c.bf16 %v3006_v47, %v3002_v44 }
 0x36f   :  { %7547 = vmatpush1.bf16.msra.mxu1 %v9846_v48 }
 0x370   :  { %7527 = vmatpush1.bf16.msra.mxu0 %v9602_v55  ;;  %v3011_v55 = vld [vmem:[%s11513_s4 + $0x58] sm:$0xff] }
 0x371   :  { %7529 = vmatprep.subr.bf16.mxu0 %v9606_v56  ;;  %v3015_v56 = vld [vmem:[%s11513_s4 + $0x78] sm:$0xff] }
 0x374   :  { %7531 = vmatpush1.bf16.msra.mxu0 %v9627_v61  ;;  %v9856_v61 = vpack.c.bf16 %v3015_v56, %v3011_v55 }
 0x375   :  { %7533 = vmatprep.subr.bf16.mxu0 %v9630_v57  ;;  %v3010_v57 = vld [vmem:[%s11513_s4 + $0x50] sm:$0xff] }
 0x376   :  { %7549 = vmatprep.subr.bf16.mxu1 %v9856_v61 }
 0x378   :  { %7535 = vmatpush1.bf16.msra.mxu0 %v9650_v5  ;;  %v3014_v5 = vld [vmem:[%s11513_s4 + $0x70] sm:$0xff] }
 0x379   :  { %7537 = vmatprep.subr.bf16.mxu0 %v9653_v7  ;;  %v9864_v7 = vpack.c.bf16 %v3014_v5, %v3010_v57 }
 0x37b   :  { %7551 = vmatpush1.bf16.msra.mxu1 %v9864_v7 }
 0x37c   :  { %7539 = vmatpush1.bf16.msra.mxu0 %v9673_v15  ;;  %v3019_v15 = vld [vmem:[%s11513_s4 + $0x98] sm:$0xff] }
 0x37d   :  { %7541 = vmatprep.subr.bf16.mxu0 %v9676_v16  ;;  %v3023_v16 = vld [vmem:[%s11513_s4 + $0xb8] sm:$0xff] }
 0x380   :  { %7543 = vmatpush1.bf16.msra.mxu0 %v9690_v13  ;;  %v9874_v13 = vpack.c.bf16 %v3023_v16, %v3019_v15 }
 0x382   :  { %7553 = vmatprep.subr.bf16.mxu1 %v9874_v13 }
 0x383   :  { %7555 = vmatpush1.bf16.msra.mxu1 %v9882_v30 }
 0x384   :  { %7557 = vmatprep.subr.bf16.mxu1 %v9892_v2 }
 0x387   :  { %7559 = vmatpush1.bf16.msra.mxu1 %v9900_v24 }
 0x388   :  { %7561 = vmatprep.subr.bf16.mxu1 %v9910_v33 }
 0x38b   :  { %7563 = vmatpush1.bf16.msra.mxu1 %v9918_v51 }
 0x38c   :  { %7565 = vmatprep.subr.bf16.mxu1 %v9928_v1 }
 0x38f   :  { %7567 = vmatpush1.bf16.msra.mxu1 %v9936_v4 }
 0x390   :  { %7569 = vmatprep.subr.bf16.mxu1 %v9946_v40 }
 0x393   :  { %7571 = vmatpush1.bf16.msra.mxu1 %v9954_v52 }
 0x394   :  { %7573 = vmatprep.subr.bf16.mxu1 %v9964_v14 }
 0x397   :  { %7575 = vmatpush1.bf16.msra.mxu1 %v9972_v19 }
 0x398   :  { %7609 = vmatprep.subr.bf16.mxu1 %v9838_v37 }
 0x436   :  { %v2890_v27 = vpop.f32.mrb[4].mxu0  ;;  %v2961_v44 = vpop.f32.mrb[14].mxu1 }
 0x437   :  { %v8504_v47 = vadd.f32 %v2890_v27, %v9753_v60  ;;  %v8525_v55 = vadd.f32 %v8524_v20, %v2961_v44  ;;  %v2892_v56 = vpop.f32.mrb[5].mxu0  ;;  %v2963_v57 = vpop.f32.mrb[15].mxu1  ;;  %v10033_v20 = vpack.c.bf16 %v3253_v6, %v3249_v17  ;;  %v3252_v27 = vld [vmem:[%s11513_s4 + $0x60] sm:$0xff]  ;;  %v10123_v17 = vpack.c.bf16 %v3293_v62, %v3289_v26 }
 0x438   :  { %v8505_v5 = vadd.f32 %v2892_v56, %v9757_v0  ;;  %v8527_v15 = vadd.f32 %v8526_v18, %v2963_v57  ;;  %v3248_v18 = vld [vmem:[%s11513_s4 + $0x40] sm:$0xff] }
 0x439   :  { %v7153_v16 = vmul.f32 -1.442695, %v8504_v47  ;;  %v10041_v44 = vpack.c.bf16 %v3252_v27, %v3248_v18  ;;  %v3257_v47 = vld [vmem:[%s11513_s4 + $0x88] sm:$0xff]  ;;  %v3256_v57 = vld [vmem:[%s11513_s4 + $0x80] sm:$0xff] }
 0x43a   :  { %v7154_v46 = vmul.f32 -1.442695, %v8505_v5  ;;  %v7155_v49 = vmul.f32 -1.442695, %v8527_v15  ;;  %v3260_v5 = vld [vmem:[%s11513_s4 + $0xa0] sm:$0xff] }
 0x43b   :  { %8728 = vpow2.f32 %v7153_v16  ;;  %v10059_v15 = vpack.c.bf16 %v3260_v5, %v3256_v57  ;;  %v3265_v16 = vld [vmem:[%s11513_s4 + $0xc8] sm:$0xff]  ;;  %v3288_v6 = vld [vmem:[%s11513_s4 + $0x180] sm:$0xff] }
 0x43c   :  { %8730 = vpow2.f32 %v7154_v46  ;;  %v3269_v46 = vld [vmem:[%s11513_s4 + $0xe8] sm:$0xff]  ;;  %v3292_v18 = vld [vmem:[%s11513_s4 + $0x1a0] sm:$0xff] }
 0x43d   :  { %8732 = vpow2.f32 %v7155_v49  ;;  %v10069_v49 = vpack.c.bf16 %v3269_v46, %v3265_v16  ;;  %v10131_v27 = vpack.c.bf16 %v3292_v18, %v3288_v6  ;;  %v3296_v5 = vld [vmem:[%s11513_s4 + $0x1c0] sm:$0xff] }
 0x43e   :  { %8734 = vtanh.f32 %v8525_v55  ;;  %v3261_v55 = vld [vmem:[%s11513_s4 + $0xa8] sm:$0xff]  ;;  %v3300_v16 = vld [vmem:[%s11513_s4 + $0x1e0] sm:$0xff] }
 0x43f   :  { %v10051_v56 = vpack.c.bf16 %v3261_v55, %v3257_v47  ;;  %v3297_v47 = vld [vmem:[%s11513_s4 + $0x1c8] sm:$0xff]  ;;  %v10149_v46 = vpack.c.bf16 %v3300_v16, %v3296_v5 }
 0x440   :  { %v3301_v55 = vld [vmem:[%s11513_s4 + $0x1e8] sm:$0xff] }
 0x441   :  { %v10141_v57 = vpack.c.bf16 %v3301_v55, %v3297_v47 }
 0x445   :  { %v8729_v54 = vpop.eup %8728 }
 0x446   :  { %v8731_v29 = vpop.eup %8730  ;;  %v2973_v50 = vadd.f32 1.0, %v8729_v54  ;;  %v3264_v54 = vld [vmem:[%s11513_s4 + $0xc0] sm:$0xff] }
 0x447   :  { %v2979_v35 = vadd.f32 1.0, %v8731_v29  ;;  %v8733_v58 = vpop.eup %8732  ;;  %v3268_v29 = vld [vmem:[%s11513_s4 + $0xe0] sm:$0xff] }
 0x448   :  { %8736 = vrcp.f32 %v2973_v50  ;;  %v8735_v3 = vpop.eup %8734  ;;  %v2986_v42 = vadd.f32 1.0, %v8733_v58  ;;  %v10077_v50 = vpack.c.bf16 %v3268_v29, %v3264_v54  ;;  %v3277_v58 = vld [vmem:[%s11513_s4 + $0x128] sm:$0xff] }
 0x449   :  { %8738 = vrcp.f32 %v2979_v35  ;;  %v3273_v35 = vld [vmem:[%s11513_s4 + $0x108] sm:$0xff] }
 0x44a   :  { %8740 = vrcp.f32 %v2986_v42  ;;  %v3281_v42 = vld [vmem:[%s11513_s4 + $0x148] sm:$0xff] }
 0x452   :  { %v8737_v25 = vpop.eup %8736 }
 0x453   :  { %v8739_v31 = vpop.eup %8738  ;;  %v2990_v39 = vmul.f32 %v8737_v25, %v8735_v3  ;;  %v10087_v3 = vpack.c.bf16 %v3277_v58, %v3273_v35  ;;  %v3272_v25 = vld [vmem:[%s11513_s4 + $0x100] sm:$0xff] }
 0x454   :  { %v2989_v53 = vmul.f32 %v8739_v31, %v9808_v11  ;;  %v8741_v8 = vpop.eup %8740  ;;  %v3241_v11 = vld [vmem:[%s11513_s4 + $0x8] sm:$0xff]  ;;  %v3276_v31 = vld [vmem:[%s11513_s4 + $0x120] sm:$0xff] }
 0x455   :  { %v10015_v22 = vpack.c.bf16 %v3245_v34, %v3241_v11  ;;  %v3284_v11 = vld [vmem:[%s11513_s4 + $0x160] sm:$0xff] }
 0x456   :  { %v9984_v63 = vadd.f32 %v2990_v39, %v2989_v53  ;;  %v10095_v39 = vpack.c.bf16 %v3276_v31, %v3272_v25  ;;  %v3285_v53 = vld [vmem:[%s11513_s4 + $0x168] sm:$0xff] }
 0x457   :  { %7577 = vmatprep.subr.bf16.mxu0 %v10015_v22 }
 0x458   :  { %8742 = vtanh.f32 %v9984_v63 }
 0x462   :  { %v8743_v12 = vpop.eup %8742 }
 0x463   :  { %v9987_v21 = vmul.f32 %v8743_v12, %v8741_v8  ;;  %v10105_v8 = vpack.c.bf16 %v3285_v53, %v3281_v42  ;;  %v3280_v12 = vld [vmem:[%s11513_s4 + $0x140] sm:$0xff] }
 0x464   :  { %v10113_v34 = vpack.c.bf16 %v3284_v11, %v3280_v12 }
 0x465   :  { %3129 = vmatmul.mubr.f32.vlgmr.msra.gmra.mrb[6].mxu0 %v9987_v21  ;;  %3200 = vmatmul.mubr.f32.vlgmr.msra.gmra.mrb[0].mxu1 %v9987_v21 }
 0x466   :  { %7611 = vmatpush1.bf16.msra.mxu1 %v9846_v48  ;;  %3368 = vmatprep.mubr.f32.mxu0 %v9031_v32 }
 0x467   :  { %7613 = vmatprep.subr.bf16.mxu1 %v9856_v61  ;;  %3439 = vmatprep.mubr.f32.mxu1 %v9031_v32 }
 0x468   :  { %7579 = vmatpush1.bf16.msra.mxu0 %v10023_v10 }
 0x469   :  { %7581 = vmatprep.subr.bf16.mxu0 %v10033_v20 }
 0x46a   :  { %7615 = vmatpush1.bf16.msra.mxu1 %v9864_v7 }
 0x46b   :  { %7617 = vmatprep.subr.bf16.mxu1 %v9874_v13 }
 0x46c   :  { %7583 = vmatpush1.bf16.msra.mxu0 %v10041_v44 }
 0x46d   :  { %7585 = vmatprep.subr.bf16.mxu0 %v10051_v56 }
 0x46e   :  { %7619 = vmatpush1.bf16.msra.mxu1 %v9882_v30 }
 0x46f   :  { %7621 = vmatprep.subr.bf16.mxu1 %v9892_v2 }
 0x470   :  { %7587 = vmatpush1.bf16.msra.mxu0 %v10059_v15 }
 0x471   :  { %7589 = vmatprep.subr.bf16.mxu0 %v10069_v49 }
 0x472   :  { %7623 = vmatpush1.bf16.msra.mxu1 %v9900_v24 }
 0x473   :  { %7625 = vmatprep.subr.bf16.mxu1 %v9910_v33 }
 0x474   :  { %7591 = vmatpush1.bf16.msra.mxu0 %v10077_v50 }
 0x475   :  { %7593 = vmatprep.subr.bf16.mxu0 %v10087_v3 }
 0x476   :  { %7627 = vmatpush1.bf16.msra.mxu1 %v9918_v51 }
 0x477   :  { %7629 = vmatprep.subr.bf16.mxu1 %v9928_v1 }
 0x478   :  { %7595 = vmatpush1.bf16.msra.mxu0 %v10095_v39 }
 0x479   :  { %7597 = vmatprep.subr.bf16.mxu0 %v10105_v8 }
 0x47a   :  { %7631 = vmatpush1.bf16.msra.mxu1 %v9936_v4 }
 0x47b   :  { %7633 = vmatprep.subr.bf16.mxu1 %v9946_v40 }
 0x47c   :  { %7599 = vmatpush1.bf16.msra.mxu0 %v10113_v34 }
 0x47d   :  { %7601 = vmatprep.subr.bf16.mxu0 %v10123_v17 }
 0x47e   :  { %7635 = vmatpush1.bf16.msra.mxu1 %v9954_v52 }
 0x47f   :  { %7637 = vmatprep.subr.bf16.mxu1 %v9964_v14 }
 0x480   :  { %7603 = vmatpush1.bf16.msra.mxu0 %v10131_v27 }
 0x481   :  { %7605 = vmatprep.subr.bf16.mxu0 %v10141_v57 }
 0x482   :  { %7639 = vmatpush1.bf16.msra.mxu1 %v9972_v19 }
 0x483   :  { %7673 = vmatprep.subr.bf16.mxu1 %v9838_v37 }
 0x484   :  { %7607 = vmatpush1.bf16.msra.mxu0 %v10149_v46 }
 0x485   :  { %7641 = vmatprep.subr.bf16.mxu0 %v10015_v22 }
 0x538   :  { %v3130_v54 = vpop.f32.mrb[6].mxu0  ;;  %v3201_v29 = vpop.f32.mrb[0].mxu1 }
 0x539   :  { %v8506_v35 = vadd.f32 %v3130_v54, %v9753_v60  ;;  %v3132_v58 = vpop.f32.mrb[7].mxu0  ;;  %v3203_v25 = vpop.f32.mrb[1].mxu1  ;;  %v8528_v26 = vadd.f32 %v3201_v29, %v9741_v43 }
 0x53a   :  { %v8507_v31 = vadd.f32 %v3132_v58, %v9757_v0  ;;  %v8529_v12 = vadd.f32 %v3203_v25, %v9745_v45 }
 0x53b   :  { %v7156_v42 = vmul.f32 -1.442695, %v8506_v35 }
 0x53c   :  { %v7157_v53 = vmul.f32 -1.442695, %v8507_v31  ;;  %v7158_v11 = vmul.f32 -1.442695, %v8529_v12 }
 0x53d   :  { %8744 = vpow2.f32 %v7156_v42 }
 0x53e   :  { %8746 = vpow2.f32 %v7157_v53 }
 0x53f   :  { %8748 = vpow2.f32 %v7158_v11 }
 0x540   :  { %8750 = vtanh.f32 %v8528_v26 }
 0x547   :  { %v8745_v62 = vpop.eup %8744 }
 0x548   :  { %v8747_v6 = vpop.eup %8746  ;;  %v3213_v18 = vadd.f32 1.0, %v8745_v62 }
 0x549   :  { %v3219_v47 = vadd.f32 1.0, %v8747_v6  ;;  %v8749_v55 = vpop.eup %8748 }
 0x54a   :  { %8752 = vrcp.f32 %v3213_v18  ;;  %v8751_v5 = vpop.eup %8750  ;;  %v3226_v58 = vadd.f32 1.0, %v8749_v55 }
 0x54b   :  { %8754 = vrcp.f32 %v3219_v47 }
 0x54c   :  { %8756 = vrcp.f32 %v3226_v58 }
 0x554   :  { %v8753_v16 = vpop.eup %8752 }
 0x555   :  { %v8755_v54 = vpop.eup %8754  ;;  %v3230_v35 = vmul.f32 %v8753_v16, %v8751_v5 }
 0x556   :  { %v3229_v31 = vmul.f32 %v8755_v54, %v9984_v63  ;;  %v8757_v29 = vpop.eup %8756 }
 0x558   :  { %v10159_v25 = vadd.f32 %v3230_v35, %v3229_v31 }
 0x55a   :  { %8758 = vtanh.f32 %v10159_v25 }
 0x564   :  { %v8759_v42 = vpop.eup %8758 }
 0x565   :  { %v10162_v53 = vmul.f32 %v8759_v42, %v8757_v29 }
 0x567   :  { %3369 = vmatmul.mubr.f32.vlgmr.msra.gmra.mrb[8].mxu0 %v10162_v53  ;;  %3440 = vmatmul.mubr.f32.vlgmr.msra.gmra.mrb[2].mxu1 %v10162_v53 }
 0x568   :  { %7643 = vmatpush1.bf16.msra.mxu0 %v10023_v10  ;;  %7675 = vmatpush1.bf16.msra.mxu1 %v9846_v48 }
 0x569   :  { %7645 = vmatprep.subr.bf16.mxu0 %v10033_v20  ;;  %7677 = vmatprep.subr.bf16.mxu1 %v9856_v61 }
 0x56a   :  { %3608 = vmatprep.mubr.f32.mxu0 %v9031_v32  ;;  %3679 = vmatprep.mubr.f32.mxu1 %v9031_v32 }
 0x56c   :  { %7647 = vmatpush1.bf16.msra.mxu0 %v10041_v44  ;;  %7679 = vmatpush1.bf16.msra.mxu1 %v9864_v7 }
 0x56d   :  { %7649 = vmatprep.subr.bf16.mxu0 %v10051_v56  ;;  %7681 = vmatprep.subr.bf16.mxu1 %v9874_v13 }
 0x570   :  { %7651 = vmatpush1.bf16.msra.mxu0 %v10059_v15  ;;  %7683 = vmatpush1.bf16.msra.mxu1 %v9882_v30 }
 0x571   :  { %7653 = vmatprep.subr.bf16.mxu0 %v10069_v49  ;;  %7685 = vmatprep.subr.bf16.mxu1 %v9892_v2 }
 0x574   :  { %7655 = vmatpush1.bf16.msra.mxu0 %v10077_v50  ;;  %7687 = vmatpush1.bf16.msra.mxu1 %v9900_v24 }
 0x575   :  { %7657 = vmatprep.subr.bf16.mxu0 %v10087_v3  ;;  %7689 = vmatprep.subr.bf16.mxu1 %v9910_v33 }
 0x578   :  { %7659 = vmatpush1.bf16.msra.mxu0 %v10095_v39  ;;  %7691 = vmatpush1.bf16.msra.mxu1 %v9918_v51 }
 0x579   :  { %7661 = vmatprep.subr.bf16.mxu0 %v10105_v8  ;;  %7693 = vmatprep.subr.bf16.mxu1 %v9928_v1 }
 0x57c   :  { %7663 = vmatpush1.bf16.msra.mxu0 %v10113_v34  ;;  %7695 = vmatpush1.bf16.msra.mxu1 %v9936_v4 }
 0x57d   :  { %7665 = vmatprep.subr.bf16.mxu0 %v10123_v17  ;;  %7697 = vmatprep.subr.bf16.mxu1 %v9946_v40 }
 0x580   :  { %7667 = vmatpush1.bf16.msra.mxu0 %v10131_v27  ;;  %7699 = vmatpush1.bf16.msra.mxu1 %v9954_v52 }
 0x581   :  { %7669 = vmatprep.subr.bf16.mxu0 %v10141_v57  ;;  %7701 = vmatprep.subr.bf16.mxu1 %v9964_v14 }
 0x584   :  { %7671 = vmatpush1.bf16.msra.mxu0 %v10149_v46  ;;  %7703 = vmatpush1.bf16.msra.mxu1 %v9972_v19 }
 0x585   :  { %7705 = vmatprep.subr.bf16.mxu0 %v10015_v22  ;;  %7737 = vmatprep.subr.bf16.mxu1 %v9838_v37 }
 0x63a   :  { %v3370_v63 = vpop.f32.mrb[8].mxu0  ;;  %v3441_v12 = vpop.f32.mrb[2].mxu1 }
 0x63b   :  { %v8508_v11 = vadd.f32 %v3370_v63, %v9753_v60  ;;  %v3372_v26 = vpop.f32.mrb[9].mxu0  ;;  %v3443_v62 = vpop.f32.mrb[3].mxu1  ;;  %v8530_v16 = vadd.f32 %v3441_v12, %v9741_v43 }
 0x63c   :  { %v8509_v6 = vadd.f32 %v3372_v26, %v9757_v0  ;;  %v8531_v55 = vadd.f32 %v3443_v62, %v9745_v45 }
 0x63d   :  { %v7159_v18 = vmul.f32 -1.442695, %v8508_v11 }
 0x63e   :  { %v7160_v47 = vmul.f32 -1.442695, %v8509_v6  ;;  %v7161_v5 = vmul.f32 -1.442695, %v8531_v55 }
 0x63f   :  { %8760 = vpow2.f32 %v7159_v18 }
 0x640   :  { %8762 = vpow2.f32 %v7160_v47 }
 0x641   :  { %8764 = vpow2.f32 %v7161_v5 }
 0x642   :  { %8766 = vtanh.f32 %v8530_v16 }
 0x649   :  { %v8761_v54 = vpop.eup %8760 }
 0x64a   :  { %v8763_v35 = vpop.eup %8762  ;;  %v3453_v37 = vadd.f32 1.0, %v8761_v54 }
 0x64b   :  { %v3459_v58 = vadd.f32 1.0, %v8763_v35  ;;  %v8765_v31 = vpop.eup %8764 }
 0x64c   :  { %8768 = vrcp.f32 %v3453_v37  ;;  %v8767_v29 = vpop.eup %8766  ;;  %v3466_v26 = vadd.f32 1.0, %v8765_v31 }
 0x64d   :  { %8770 = vrcp.f32 %v3459_v58 }
 0x64e   :  { %8772 = vrcp.f32 %v3466_v26  ;;  %v3987_v26 = vld [vmem:[%s11513_s4 + $0xd8] sm:$0xff] }
 0x656   :  { %v8769_v42 = vpop.eup %8768 }
 0x657   :  { %v8771_v63 = vpop.eup %8770  ;;  %v3470_v11 = vmul.f32 %v8769_v42, %v8767_v29  ;;  %v3978_v42 = vld [vmem:[%s11513_s4 + $0x90] sm:$0xff] }
 0x658   :  { %v3469_v6 = vmul.f32 %v8771_v63, %v10159_v25  ;;  %v8773_v12 = vpop.eup %8772  ;;  %v3982_v63 = vld [vmem:[%s11513_s4 + $0xb0] sm:$0xff] }
 0x65a   :  { %v10205_v62 = vadd.f32 %v3470_v11, %v3469_v6  ;;  %v7810_v11 = vpack.c.bf16 %v3982_v63, %v3978_v42  ;;  %v3991_v6 = vld [vmem:[%s11513_s4 + $0xf8] sm:$0xff] }
 0x65c   :  { %8774 = vtanh.f32 %v10205_v62 }
 0x666   :  { %v8775_v18 = vpop.eup %8774 }
 0x667   :  { %v10208_v47 = vmul.f32 %v8775_v18, %v8773_v12  ;;  %v3986_v12 = vld [vmem:[%s11513_s4 + $0xd0] sm:$0xff] }
 0x668   :  { %v3990_v18 = vld [vmem:[%s11513_s4 + $0xf0] sm:$0xff] }
 0x669   :  { %3609 = vmatmul.mubr.f32.vlgmr.msra.gmra.mrb[10].mxu0 %v10208_v47  ;;  %3680 = vmatmul.mubr.f32.vlgmr.msra.gmra.mrb[4].mxu1 %v10208_v47 }
 0x66a   :  { %7707 = vmatpush1.bf16.msra.mxu0 %v10023_v10  ;;  %7739 = vmatpush1.bf16.msra.mxu1 %v9846_v48 }
 0x66b   :  { %7709 = vmatprep.subr.bf16.mxu0 %v10033_v20  ;;  %7741 = vmatprep.subr.bf16.mxu1 %v9856_v61 }
 0x66c   :  { %3848 = vmatprep.mubr.f32.mxu0 %v9031_v32  ;;  %3919 = vmatprep.mubr.f32.mxu1 %v9031_v32 }
 0x66e   :  { %7711 = vmatpush1.bf16.msra.mxu0 %v10041_v44  ;;  %7743 = vmatpush1.bf16.msra.mxu1 %v9864_v7 }
 0x66f   :  { %7713 = vmatprep.subr.bf16.mxu0 %v10051_v56  ;;  %7745 = vmatprep.subr.bf16.mxu1 %v9874_v13 }
 0x672   :  { %7715 = vmatpush1.bf16.msra.mxu0 %v10059_v15  ;;  %7747 = vmatpush1.bf16.msra.mxu1 %v9882_v30 }
 0x673   :  { %7717 = vmatprep.subr.bf16.mxu0 %v10069_v49  ;;  %7749 = vmatprep.subr.bf16.mxu1 %v9892_v2 }
 0x676   :  { %7719 = vmatpush1.bf16.msra.mxu0 %v10077_v50  ;;  %7751 = vmatpush1.bf16.msra.mxu1 %v9900_v24 }
 0x677   :  { %7721 = vmatprep.subr.bf16.mxu0 %v10087_v3  ;;  %7753 = vmatprep.subr.bf16.mxu1 %v9910_v33 }
 0x67a   :  { %7723 = vmatpush1.bf16.msra.mxu0 %v10095_v39  ;;  %7755 = vmatpush1.bf16.msra.mxu1 %v9918_v51 }
 0x67b   :  { %7725 = vmatprep.subr.bf16.mxu0 %v10105_v8  ;;  %7757 = vmatprep.subr.bf16.mxu1 %v9928_v1 }
 0x67e   :  { %7727 = vmatpush1.bf16.msra.mxu0 %v10113_v34  ;;  %7759 = vmatpush1.bf16.msra.mxu1 %v9936_v4 }
 0x67f   :  { %7729 = vmatprep.subr.bf16.mxu0 %v10123_v17  ;;  %7761 = vmatprep.subr.bf16.mxu1 %v9946_v40 }
 0x682   :  { %7731 = vmatpush1.bf16.msra.mxu0 %v10131_v27  ;;  %7763 = vmatpush1.bf16.msra.mxu1 %v9954_v52 }
 0x683   :  { %7733 = vmatprep.subr.bf16.mxu0 %v10141_v57  ;;  %7765 = vmatprep.subr.bf16.mxu1 %v9964_v14 }
 0x686   :  { %7735 = vmatpush1.bf16.msra.mxu0 %v10149_v46  ;;  %7767 = vmatpush1.bf16.msra.mxu1 %v9972_v19 }
 0x687   :  { %7769 = vmatprep.subr.bf16.mxu0 %v10015_v22 }
 0x73c   :  { %v3610_v48 = vpop.f32.mrb[10].mxu0  ;;  %v3681_v61 = vpop.f32.mrb[4].mxu1 }
 0x73d   :  { %v8510_v7 = vadd.f32 %v3610_v48, %v9753_v60  ;;  %v3612_v13 = vpop.f32.mrb[11].mxu0  ;;  %v3683_v30 = vpop.f32.mrb[5].mxu1  ;;  %v8532_v4 = vadd.f32 %v3681_v61, %v9741_v43  ;;  %v7814_v48 = vpack.c.bf16 %v3990_v18, %v3986_v12  ;;  %v3995_v61 = vld [vmem:[%s11513_s4 + $0x118] sm:$0xff] }
 0x73e   :  { %v8511_v2 = vadd.f32 %v3612_v13, %v9757_v0  ;;  %v8533_v51 = vadd.f32 %v3683_v30, %v9745_v45  ;;  %v3994_v30 = vld [vmem:[%s11513_s4 + $0x110] sm:$0xff] }
 0x73f   :  { %v7162_v24 = vmul.f32 -1.442695, %v8510_v7  ;;  %v3999_v7 = vld [vmem:[%s11513_s4 + $0x138] sm:$0xff] }
 0x740   :  { %v7163_v33 = vmul.f32 -1.442695, %v8511_v2  ;;  %v7164_v1 = vmul.f32 -1.442695, %v8533_v51  ;;  %v7816_v13 = vpack.c.bf16 %v3999_v7, %v3995_v61  ;;  %v3998_v2 = vld [vmem:[%s11513_s4 + $0x130] sm:$0xff]  ;;  %v4007_v51 = vld [vmem:[%s11513_s4 + $0x178] sm:$0xff] }
 0x741   :  { %8776 = vpow2.f32 %v7162_v24  ;;  %v7818_v24 = vpack.c.bf16 %v3998_v2, %v3994_v30  ;;  %v4281_v30 = vld [vmem:[%s11516_s7 + $0x28] sm:$0xff]  ;;  %v4279_v2 = vld [vmem:[%s11516_s7 + $0x18] sm:$0xff] }
 0x742   :  { %8778 = vpow2.f32 %v7163_v33  ;;  %v4003_v33 = vld [vmem:[%s11513_s4 + $0x158] sm:$0xff] }
 0x743   :  { %8780 = vpow2.f32 %v7164_v1  ;;  %v7820_v1 = vpack.c.bf16 %v4007_v51, %v4003_v33  ;;  %v4283_v33 = vld [vmem:[%s11516_s7 + $0x38] sm:$0xff]  ;;  %v4276_v51 = vld [vmem:[%s11516_s7] sm:$0xff] }
 0x744   :  { %8782 = vtanh.f32 %v8532_v4  ;;  %v4002_v4 = vld [vmem:[%s11513_s4 + $0x150] sm:$0xff] }
 0x74b   :  { %v8777_v40 = vpop.eup %8776 }
 0x74c   :  { %v8779_v52 = vpop.eup %8778  ;;  %v3693_v14 = vadd.f32 1.0, %v8777_v40  ;;  %v4006_v40 = vld [vmem:[%s11513_s4 + $0x170] sm:$0xff] }
 0x74d   :  { %v3699_v19 = vadd.f32 1.0, %v8779_v52  ;;  %v8781_v22 = vpop.eup %8780  ;;  %v7822_v52 = vpack.c.bf16 %v4006_v40, %v4002_v4  ;;  %v7864_v4 = vpack.c.bf16 %v4283_v33, %v4279_v2  ;;  %v4309_v2 = vld [vmem:[%s11516_s7 + $0x108] sm:$0xff]  ;;  %v4311_v33 = vld [vmem:[%s11516_s7 + $0x118] sm:$0xff] }
 0x74e   :  { %8784 = vrcp.f32 %v3693_v14  ;;  %v8783_v25 = vpop.eup %8782  ;;  %v3706_v54 = vadd.f32 1.0, %v8781_v22  ;;  %v4011_v14 = vld [vmem:[%s11513_s4 + $0x198] sm:$0xff] }
 0x74f   :  { %8786 = vrcp.f32 %v3699_v19  ;;  %v4015_v19 = vld [vmem:[%s11513_s4 + $0x1b8] sm:$0xff] }
 0x750   :  { %8788 = vrcp.f32 %v3706_v54  ;;  %v7824_v22 = vpack.c.bf16 %v4015_v19, %v4011_v14  ;;  %v4023_v54 = vld [vmem:[%s11513_s4 + $0x1f8] sm:$0xff]  ;;  %v4282_v14 = vld [vmem:[%s11516_s7 + $0x30] sm:$0xff] }
 0x758   :  { %v8785_v55 = vpop.eup %8784 }
 0x759   :  { %v8787_v5 = vpop.eup %8786  ;;  %v3710_v16 = vmul.f32 %v8785_v55, %v8783_v25  ;;  %v4010_v25 = vld [vmem:[%s11513_s4 + $0x190] sm:$0xff] }
 0x75a   :  { %v3709_v35 = vmul.f32 %v8787_v5, %v10205_v62  ;;  %v8789_v58 = vpop.eup %8788  ;;  %v7812_v62 = vpack.c.bf16 %v3991_v6, %v3987_v26  ;;  %v4014_v55 = vld [vmem:[%s11513_s4 + $0x1b0] sm:$0xff] }
 0x75b   :  { %v7826_v5 = vpack.c.bf16 %v4014_v55, %v4010_v25  ;;  %v4289_v25 = vld [vmem:[%s11516_s7 + $0x68] sm:$0xff]  ;;  %v4287_v55 = vld [vmem:[%s11516_s7 + $0x58] sm:$0xff] }
 0x75c   :  { %v10250_v37 = vadd.f32 %v3710_v16, %v3709_v35  ;;  %v4019_v16 = vld [vmem:[%s11513_s4 + $0x1d8] sm:$0xff] }
 0x75d   :  { %v7828_v35 = vpack.c.bf16 %v4023_v54, %v4019_v16  ;;  %v4291_v16 = vld [vmem:[%s11516_s7 + $0x78] sm:$0xff]  ;;  %v4284_v54 = vld [vmem:[%s11516_s7 + $0x40] sm:$0xff] }
 0x75e   :  { %8790 = vtanh.f32 %v10250_v37 }
 0x768   :  { %v8791_v31 = vpop.eup %8790 }
 0x769   :  { %v10253_v29 = vmul.f32 %v8791_v31, %v8789_v58  ;;  %v4018_v58 = vld [vmem:[%s11513_s4 + $0x1d0] sm:$0xff] }
 0x76a   :  { %v4022_v31 = vld [vmem:[%s11513_s4 + $0x1f0] sm:$0xff] }
 0x76b   :  { %3849 = vmatmul.mubr.f32.vlgmr.msra.gmra.mrb[12].mxu0 %v10253_v29  ;;  %3920 = vmatmul.mubr.f32.vlgmr.msra.gmra.mrb[6].mxu1 %v10253_v29 }
 0x76c   :  { %7771 = vmatpush1.bf16.msra.mxu0 %v10023_v10  ;;  %4088 = vmatprep.mubr.f32.mxu0 %v9031_v32  ;;  %v3963_v10 = vld [vmem:[%s11513_s4 + $0x18] sm:$0xff] }
 0x76d   :  { %7773 = vmatprep.subr.bf16.mxu0 %v10033_v20  ;;  %4159 = vmatprep.mubr.f32.mxu1 %v9031_v32  ;;  %v3967_v20 = vld [vmem:[%s11513_s4 + $0x38] sm:$0xff] }
 0x770   :  { %7775 = vmatpush1.bf16.msra.mxu0 %v10041_v44  ;;  %v7800_v44 = vpack.c.bf16 %v3967_v20, %v3963_v10  ;;  %v7830_v10 = vpack.c.bf16 %v4022_v31, %v4018_v58  ;;  %v7868_v58 = vpack.c.bf16 %v4291_v16, %v4287_v55  ;;  %v4317_v55 = vld [vmem:[%s11516_s7 + $0x148] sm:$0xff]  ;;  %v4319_v16 = vld [vmem:[%s11516_s7 + $0x158] sm:$0xff] }
 0x771   :  { %7777 = vmatprep.subr.bf16.mxu0 %v10051_v56  ;;  %v3962_v56 = vld [vmem:[%s11513_s4 + $0x10] sm:$0xff] }
 0x772   :  { %7801 = vmatprep.subr.bf16.mxu1 %v7800_v44 }
 0x774   :  { %7779 = vmatpush1.bf16.msra.mxu0 %v10059_v15  ;;  %v3966_v15 = vld [vmem:[%s11513_s4 + $0x30] sm:$0xff] }
 0x775   :  { %7781 = vmatprep.subr.bf16.mxu0 %v10069_v49  ;;  %v7802_v49 = vpack.c.bf16 %v3966_v15, %v3962_v56 }
 0x777   :  { %7803 = vmatpush1.bf16.msra.mxu1 %v7802_v49 }
 0x778   :  { %7783 = vmatpush1.bf16.msra.mxu0 %v10077_v50  ;;  %v3971_v50 = vld [vmem:[%s11513_s4 + $0x58] sm:$0xff] }
 0x779   :  { %7785 = vmatprep.subr.bf16.mxu0 %v10087_v3  ;;  %v3975_v3 = vld [vmem:[%s11513_s4 + $0x78] sm:$0xff] }
 0x77c   :  { %7787 = vmatpush1.bf16.msra.mxu0 %v10095_v39  ;;  %v7804_v39 = vpack.c.bf16 %v3975_v3, %v3971_v50 }
 0x77d   :  { %7789 = vmatprep.subr.bf16.mxu0 %v10105_v8  ;;  %v3970_v8 = vld [vmem:[%s11513_s4 + $0x50] sm:$0xff] }
 0x77e   :  { %7805 = vmatprep.subr.bf16.mxu1 %v7804_v39 }
 0x780   :  { %7791 = vmatpush1.bf16.msra.mxu0 %v10113_v34  ;;  %v3974_v34 = vld [vmem:[%s11513_s4 + $0x70] sm:$0xff] }
 0x781   :  { %7793 = vmatprep.subr.bf16.mxu0 %v10123_v17  ;;  %v7806_v17 = vpack.c.bf16 %v3974_v34, %v3970_v8 }
 0x783   :  { %7807 = vmatpush1.bf16.msra.mxu1 %v7806_v17 }
 0x784   :  { %7795 = vmatpush1.bf16.msra.mxu0 %v10131_v27  ;;  %v3979_v27 = vld [vmem:[%s11513_s4 + $0x98] sm:$0xff] }
 0x785   :  { %7797 = vmatprep.subr.bf16.mxu0 %v10141_v57  ;;  %v3983_v57 = vld [vmem:[%s11513_s4 + $0xb8] sm:$0xff] }
 0x788   :  { %7799 = vmatpush1.bf16.msra.mxu0 %v10149_v46  ;;  %v7808_v46 = vpack.c.bf16 %v3983_v57, %v3979_v27 }
 0x78a   :  { %7809 = vmatprep.subr.bf16.mxu1 %v7808_v46 }
 0x78b   :  { %7811 = vmatpush1.bf16.msra.mxu1 %v7810_v11 }
 0x78c   :  { %7813 = vmatprep.subr.bf16.mxu1 %v7812_v62 }
 0x78f   :  { %7815 = vmatpush1.bf16.msra.mxu1 %v7814_v48 }
 0x790   :  { %7817 = vmatprep.subr.bf16.mxu1 %v7816_v13 }
 0x793   :  { %7819 = vmatpush1.bf16.msra.mxu1 %v7818_v24 }
 0x794   :  { %7821 = vmatprep.subr.bf16.mxu1 %v7820_v1  ;;  %v4280_v1 = vld [vmem:[%s11516_s7 + $0x20] sm:$0xff] }
 0x795   :  { %v7834_v40 = vpack.c.bf16 %v4280_v1, %v4276_v51  ;;  %v4315_v1 = vld [vmem:[%s11516_s7 + $0x138] sm:$0xff] }
 0x797   :  { %7823 = vmatpush1.bf16.msra.mxu1 %v7822_v52  ;;  %v4278_v52 = vld [vmem:[%s11516_s7 + $0x10] sm:$0xff] }
 0x798   :  { %7825 = vmatprep.subr.bf16.mxu1 %v7824_v22  ;;  %v7866_v19 = vpack.c.bf16 %v4282_v14, %v4278_v52  ;;  %v4285_v22 = vld [vmem:[%s11516_s7 + $0x48] sm:$0xff]  ;;  %v7880_v52 = vpack.c.bf16 %v4315_v1, %v4311_v33  ;;  %v4207_v1 = vld [vmem:[%s11515_s6 + $0x18] sm:$0xff] }
 0x799   :  { %v4205_v33 = vld [vmem:[%s11515_s6 + $0x8] sm:$0xff] }
 0x79b   :  { %7827 = vmatpush1.bf16.msra.mxu1 %v7826_v5  ;;  %v7836_v5 = vpack.c.bf16 %v4289_v25, %v4285_v22  ;;  %v4314_v22 = vld [vmem:[%s11516_s7 + $0x130] sm:$0xff] }
 0x79c   :  { %7829 = vmatprep.subr.bf16.mxu1 %v7828_v35  ;;  %v4288_v35 = vld [vmem:[%s11516_s7 + $0x60] sm:$0xff] }
 0x79d   :  { %v7838_v31 = vpack.c.bf16 %v4288_v35, %v4284_v54  ;;  %v4323_v35 = vld [vmem:[%s11516_s7 + $0x178] sm:$0xff] }
 0x79f   :  { %7831 = vmatpush1.bf16.msra.mxu1 %v7830_v10  ;;  %v4286_v10 = vld [vmem:[%s11516_s7 + $0x50] sm:$0xff] }
 0x7a0   :  { %7865 = vmatprep.subr.bf16.mxu1 %v7864_v4  ;;  %v4308_v4 = vld [vmem:[%s11516_s7 + $0x100] sm:$0xff] }
 0x83e   :  { %v3850_v20 = vpop.f32.mrb[12].mxu0  ;;  %v3921_v44 = vpop.f32.mrb[6].mxu1 }
 0x83f   :  { %v8512_v56 = vadd.f32 %v3850_v20, %v9753_v60  ;;  %v3852_v15 = vpop.f32.mrb[13].mxu0  ;;  %v3923_v49 = vpop.f32.mrb[7].mxu1  ;;  %v8534_v17 = vadd.f32 %v3921_v44, %v9741_v43  ;;  %v4290_v20 = vld [vmem:[%s11516_s7 + $0x70] sm:$0xff] }
 0x840   :  { %v8513_v50 = vadd.f32 %v3852_v15, %v9757_v0  ;;  %v8535_v8 = vadd.f32 %v3923_v49, %v9745_v45  ;;  %v7870_v44 = vpack.c.bf16 %v4290_v20, %v4286_v10  ;;  %v4297_v15 = vld [vmem:[%s11516_s7 + $0xa8] sm:$0xff]  ;;  %v4295_v49 = vld [vmem:[%s11516_s7 + $0x98] sm:$0xff]  ;;  %v7884_v10 = vpack.c.bf16 %v4323_v35, %v4319_v16 }
 0x841   :  { %v7165_v3 = vmul.f32 -1.442695, %v8512_v56  ;;  %v4293_v56 = vld [vmem:[%s11516_s7 + $0x88] sm:$0xff] }
 0x842   :  { %v7166_v39 = vmul.f32 -1.442695, %v8513_v50  ;;  %v7167_v34 = vmul.f32 -1.442695, %v8535_v8  ;;  %v7840_v50 = vpack.c.bf16 %v4297_v15, %v4293_v56  ;;  %v4296_v8 = vld [vmem:[%s11516_s7 + $0xa0] sm:$0xff]  ;;  %v4322_v56 = vld [vmem:[%s11516_s7 + $0x170] sm:$0xff] }
 0x843   :  { %8792 = vpow2.f32 %v7165_v3  ;;  %v4299_v3 = vld [vmem:[%s11516_s7 + $0xb8] sm:$0xff]  ;;  %v4325_v15 = vld [vmem:[%s11516_s7 + $0x188] sm:$0xff] }
 0x844   :  { %8794 = vpow2.f32 %v7166_v39  ;;  %v4292_v39 = vld [vmem:[%s11516_s7 + $0x80] sm:$0xff] }
 0x845   :  { %8796 = vpow2.f32 %v7167_v34  ;;  %v7872_v34 = vpack.c.bf16 %v4299_v3, %v4295_v49  ;;  %v4327_v3 = vld [vmem:[%s11516_s7 + $0x198] sm:$0xff] }
 0x846   :  { %8798 = vtanh.f32 %v8534_v17  ;;  %v7842_v17 = vpack.c.bf16 %v4296_v8, %v4292_v39  ;;  %v4331_v39 = vld [vmem:[%s11516_s7 + $0x1b8] sm:$0xff] }
 0x84d   :  { %v8793_v27 = vpop.eup %8792 }
 0x84e   :  { %v8795_v57 = vpop.eup %8794  ;;  %v3933_v46 = vadd.f32 1.0, %v8793_v27  ;;  %v4294_v27 = vld [vmem:[%s11516_s7 + $0x90] sm:$0xff] }
 0x84f   :  { %v3939_v42 = vadd.f32 1.0, %v8795_v57  ;;  %v8797_v63 = vpop.eup %8796  ;;  %v4298_v57 = vld [vmem:[%s11516_s7 + $0xb0] sm:$0xff] }
 0x850   :  { %8800 = vrcp.f32 %v3933_v46  ;;  %v8799_v11 = vpop.eup %8798  ;;  %v3946_v12 = vadd.f32 1.0, %v8797_v63  ;;  %v7874_v46 = vpack.c.bf16 %v4298_v57, %v4294_v27  ;;  %v4305_v63 = vld [vmem:[%s11516_s7 + $0xe8] sm:$0xff]  ;;  %v4328_v27 = vld [vmem:[%s11516_s7 + $0x1a0] sm:$0xff]  ;;  %v4326_v57 = vld [vmem:[%s11516_s7 + $0x190] sm:$0xff] }
 0x851   :  { %8802 = vrcp.f32 %v3939_v42  ;;  %v4301_v42 = vld [vmem:[%s11516_s7 + $0xc8] sm:$0xff] }
 0x852   :  { %8804 = vrcp.f32 %v3946_v12  ;;  %v4304_v12 = vld [vmem:[%s11516_s7 + $0xe0] sm:$0xff] }
 0x85a   :  { %v8801_v26 = vpop.eup %8800 }
 0x85b   :  { %v8803_v6 = vpop.eup %8802  ;;  %v3950_v62 = vmul.f32 %v8801_v26, %v8799_v11  ;;  %v4303_v11 = vld [vmem:[%s11516_s7 + $0xd8] sm:$0xff]  ;;  %v7844_v26 = vpack.c.bf16 %v4305_v63, %v4301_v42  ;;  %v4330_v42 = vld [vmem:[%s11516_s7 + $0x1b0] sm:$0xff]  ;;  %v4333_v63 = vld [vmem:[%s11516_s7 + $0x1c8] sm:$0xff] }
 0x85c   :  { %v3949_v18 = vmul.f32 %v8803_v6, %v10250_v37  ;;  %v8805_v61 = vpop.eup %8804  ;;  %v4277_v37 = vld [vmem:[%s11516_s7 + $0x8] sm:$0xff]  ;;  %v4307_v6 = vld [vmem:[%s11516_s7 + $0xf8] sm:$0xff] }
 0x85d   :  { %v7832_v24 = vpack.c.bf16 %v4281_v30, %v4277_v37  ;;  %v4306_v37 = vld [vmem:[%s11516_s7 + $0xf0] sm:$0xff] }
 0x85e   :  { %v10375_v48 = vadd.f32 %v3950_v62, %v3949_v18  ;;  %v4300_v62 = vld [vmem:[%s11516_s7 + $0xc0] sm:$0xff]  ;;  %v7876_v18 = vpack.c.bf16 %v4307_v6, %v4303_v11  ;;  %v4337_v11 = vld [vmem:[%s11516_s7 + $0x1e8] sm:$0xff] }
 0x85f   :  { %7833 = vmatprep.subr.bf16.mxu0 %v7832_v24  ;;  %v4313_v24 = vld [vmem:[%s11516_s7 + $0x128] sm:$0xff]  ;;  %v7860_v6 = vpack.c.bf16 %v4337_v11, %v4333_v63 }
 0x860   :  { %8806 = vtanh.f32 %v10375_v48  ;;  %v7848_v51 = vpack.c.bf16 %v4313_v24, %v4309_v2 }
 0x86a   :  { %v8807_v7 = vpop.eup %8806 }
 0x86b   :  { %v10378_v13 = vmul.f32 %v8807_v7, %v8805_v61  ;;  %v7846_v61 = vpack.c.bf16 %v4304_v12, %v4300_v62  ;;  %v4302_v7 = vld [vmem:[%s11516_s7 + $0xd0] sm:$0xff]  ;;  %v4335_v62 = vld [vmem:[%s11516_s7 + $0x1d8] sm:$0xff] }
 0x86c   :  { %v7878_v30 = vpack.c.bf16 %v4306_v37, %v4302_v7  ;;  %v4339_v12 = vld [vmem:[%s11516_s7 + $0x1f8] sm:$0xff]  ;;  %v4336_v7 = vld [vmem:[%s11516_s7 + $0x1e0] sm:$0xff]  ;;  %v4334_v37 = vld [vmem:[%s11516_s7 + $0x1d0] sm:$0xff] }
 0x86d   :  { %4089 = vmatmul.mubr.f32.vlgmr.msra.gmra.mrb[14].mxu0 %v10378_v13  ;;  %4160 = vmatmul.mubr.f32.vlgmr.msra.gmra.mrb[8].mxu1 %v10378_v13 }
 0x86e   :  { %4404 = vmatprep.mubr.f32.mxu0 %v9031_v32  ;;  %4517 = vmatprep.mubr.f32.mxu1 %v9031_v32 }
 0x86f   :  { %7835 = vmatpush1.bf16.msra.mxu0 %v7834_v40  ;;  %7867 = vmatpush1.bf16.msra.mxu1 %v7866_v19  ;;  %v4312_v40 = vld [vmem:[%s11516_s7 + $0x120] sm:$0xff]  ;;  %v4310_v19 = vld [vmem:[%s11516_s7 + $0x110] sm:$0xff] }
 0x870   :  { %7837 = vmatprep.subr.bf16.mxu0 %v7836_v5  ;;  %7869 = vmatprep.subr.bf16.mxu1 %v7868_v58  ;;  %v7850_v14 = vpack.c.bf16 %v4312_v40, %v4308_v4  ;;  %v7882_v25 = vpack.c.bf16 %v4314_v22, %v4310_v19  ;;  %v4321_v5 = vld [vmem:[%s11516_s7 + $0x168] sm:$0xff]  ;;  %v4316_v58 = vld [vmem:[%s11516_s7 + $0x140] sm:$0xff]  ;;  %v4211_v40 = vld [vmem:[%s11515_s6 + $0x38] sm:$0xff] }
 0x871   :  { %v7852_v54 = vpack.c.bf16 %v4321_v5, %v4317_v55 }
 0x873   :  { %7839 = vmatpush1.bf16.msra.mxu0 %v7838_v31  ;;  %7871 = vmatpush1.bf16.msra.mxu1 %v7870_v44  ;;  %v4320_v31 = vld [vmem:[%s11516_s7 + $0x160] sm:$0xff]  ;;  %v4318_v44 = vld [vmem:[%s11516_s7 + $0x150] sm:$0xff] }
 0x874   :  { %7841 = vmatprep.subr.bf16.mxu0 %v7840_v50  ;;  %7873 = vmatprep.subr.bf16.mxu1 %v7872_v34  ;;  %v7854_v20 = vpack.c.bf16 %v4320_v31, %v4316_v58  ;;  %v7886_v49 = vpack.c.bf16 %v4322_v56, %v4318_v44  ;;  %v4329_v50 = vld [vmem:[%s11516_s7 + $0x1a8] sm:$0xff]  ;;  %v7888_v34 = vpack.c.bf16 %v4331_v39, %v4327_v3 }
 0x875   :  { %v7856_v8 = vpack.c.bf16 %v4329_v50, %v4325_v15 }
 0x877   :  { %7843 = vmatpush1.bf16.msra.mxu0 %v7842_v17  ;;  %7875 = vmatpush1.bf16.msra.mxu1 %v7874_v46  ;;  %v4324_v17 = vld [vmem:[%s11516_s7 + $0x180] sm:$0xff] }
 0x878   :  { %7845 = vmatprep.subr.bf16.mxu0 %v7844_v26  ;;  %7877 = vmatprep.subr.bf16.mxu1 %v7876_v18  ;;  %v7858_v46 = vpack.c.bf16 %v4328_v27, %v4324_v17  ;;  %v7890_v26 = vpack.c.bf16 %v4330_v42, %v4326_v57  ;;  %v4332_v18 = vld [vmem:[%s11516_s7 + $0x1c0] sm:$0xff]  ;;  %v4210_v17 = vld [vmem:[%s11515_s6 + $0x30] sm:$0xff]  ;;  %v4217_v57 = vld [vmem:[%s11515_s6 + $0x68] sm:$0xff] }
 0x879   :  { %v7862_v2 = vpack.c.bf16 %v4336_v7, %v4332_v18  ;;  %v4219_v42 = vld [vmem:[%s11515_s6 + $0x78] sm:$0xff]  ;;  %v4214_v18 = vld [vmem:[%s11515_s6 + $0x50] sm:$0xff] }
 0x87b   :  { %7847 = vmatpush1.bf16.msra.mxu0 %v7846_v61  ;;  %7879 = vmatpush1.bf16.msra.mxu1 %v7878_v30  ;;  %v7892_v61 = vpack.c.bf16 %v4339_v12, %v4335_v62  ;;  %v4338_v30 = vld [vmem:[%s11516_s7 + $0x1f0] sm:$0xff]  ;;  %v4216_v12 = vld [vmem:[%s11515_s6 + $0x60] sm:$0xff] }
 0x87c   :  { %7849 = vmatprep.subr.bf16.mxu0 %v7848_v51  ;;  %7881 = vmatprep.subr.bf16.mxu1 %v7880_v52  ;;  %v7894_v24 = vpack.c.bf16 %v4338_v30, %v4334_v37  ;;  %v4209_v51 = vld [vmem:[%s11515_s6 + $0x28] sm:$0xff]  ;;  %v7928_v52 = vpack.c.bf16 %v4211_v40, %v4207_v1  ;;  %v4224_v40 = vld [vmem:[%s11515_s6 + $0xa0] sm:$0xff] }
 0x87d   :  { %v7896_v4 = vpack.c.bf16 %v4209_v51, %v4205_v33  ;;  %v4221_v30 = vld [vmem:[%s11515_s6 + $0x88] sm:$0xff]  ;;  %v4227_v33 = vld [vmem:[%s11515_s6 + $0xb8] sm:$0xff] }
 0x87f   :  { %7851 = vmatpush1.bf16.msra.mxu0 %v7850_v14  ;;  %7883 = vmatpush1.bf16.msra.mxu1 %v7882_v25 }
 0x880   :  { %7853 = vmatprep.subr.bf16.mxu0 %v7852_v54  ;;  %7885 = vmatprep.subr.bf16.mxu1 %v7884_v10 }
 0x883   :  { %7855 = vmatpush1.bf16.msra.mxu0 %v7854_v20  ;;  %7887 = vmatpush1.bf16.msra.mxu1 %v7886_v49 }
 0x884   :  { %7857 = vmatprep.subr.bf16.mxu0 %v7856_v8  ;;  %7889 = vmatprep.subr.bf16.mxu1 %v7888_v34  ;;  %v4208_v8 = vld [vmem:[%s11515_s6 + $0x20] sm:$0xff]  ;;  %v4206_v34 = vld [vmem:[%s11515_s6 + $0x10] sm:$0xff] }
 0x887   :  { %7859 = vmatpush1.bf16.msra.mxu0 %v7858_v46  ;;  %7891 = vmatpush1.bf16.msra.mxu1 %v7890_v26  ;;  %v4215_v46 = vld [vmem:[%s11515_s6 + $0x58] sm:$0xff]  ;;  %v7930_v26 = vpack.c.bf16 %v4210_v17, %v4206_v34 }
 0x888   :  { %7861 = vmatprep.subr.bf16.mxu0 %v7860_v6  ;;  %7893 = vmatprep.subr.bf16.mxu1 %v7892_v61  ;;  %v4212_v6 = vld [vmem:[%s11515_s6 + $0x40] sm:$0xff]  ;;  %v4218_v61 = vld [vmem:[%s11515_s6 + $0x70] sm:$0xff]  ;;  %v7932_v37 = vpack.c.bf16 %v4219_v42, %v4215_v46  ;;  %v4251_v46 = vld [vmem:[%s11515_s6 + $0x178] sm:$0xff] }
 0x889   :  { %v7902_v51 = vpack.c.bf16 %v4216_v12, %v4212_v6  ;;  %v7934_v1 = vpack.c.bf16 %v4218_v61, %v4214_v18  ;;  %v4246_v6 = vld [vmem:[%s11515_s6 + $0x150] sm:$0xff] }
 0x88a   :  { %v4250_v12 = vld [vmem:[%s11515_s6 + $0x170] sm:$0xff] }
 0x88b   :  { %7863 = vmatpush1.bf16.msra.mxu0 %v7862_v2  ;;  %7895 = vmatpush1.bf16.msra.mxu1 %v7894_v24  ;;  %v4225_v2 = vld [vmem:[%s11515_s6 + $0xa8] sm:$0xff]  ;;  %v4223_v24 = vld [vmem:[%s11515_s6 + $0x98] sm:$0xff] }
 0x88c   :  { %7897 = vmatprep.subr.bf16.mxu0 %v7896_v4  ;;  %7929 = vmatprep.subr.bf16.mxu1 %v7928_v52  ;;  %v4220_v4 = vld [vmem:[%s11515_s6 + $0x80] sm:$0xff]  ;;  %v4222_v52 = vld [vmem:[%s11515_s6 + $0x90] sm:$0xff] }
 0x940   :  { %v4090_v14 = vpop.f32.mrb[14].mxu0  ;;  %v4161_v19 = vpop.f32.mrb[8].mxu1 }
 0x941   :  { %v8514_v22 = vadd.f32 %v4090_v14, %v9753_v60  ;;  %v4092_v25 = vpop.f32.mrb[15].mxu0  ;;  %v4163_v55 = vpop.f32.mrb[9].mxu1  ;;  %v8536_v31 = vadd.f32 %v4161_v19, %v9741_v43  ;;  %v4204_v43 = vld [vmem:[%s11515_s6] sm:$0xff]  ;;  %v4226_v14 = vld [vmem:[%s11515_s6 + $0xb0] sm:$0xff]  ;;  %v7904_v19 = vpack.c.bf16 %v4225_v2, %v4221_v30  ;;  %v4255_v30 = vld [vmem:[%s11515_s6 + $0x198] sm:$0xff] }
 0x942   :  { %v8515_v5 = vadd.f32 %v4092_v25, %v9757_v0  ;;  %v8537_v35 = vadd.f32 %v4163_v55, %v9745_v45  ;;  %v7898_v11 = vpack.c.bf16 %v4208_v8, %v4204_v43  ;;  %v4229_v25 = vld [vmem:[%s11515_s6 + $0xc8] sm:$0xff]  ;;  %v4238_v43 = vld [vmem:[%s11515_s6 + $0x110] sm:$0xff]  ;;  %v4259_v2 = vld [vmem:[%s11515_s6 + $0x1b8] sm:$0xff] }
 0x943   :  { %v7168_v16 = vmul.f32 -1.442695, %v8514_v22  ;;  %v7936_v22 = vpack.c.bf16 %v4227_v33, %v4223_v24  ;;  %v4233_v55 = vld [vmem:[%s11515_s6 + $0xe8] sm:$0xff]  ;;  %v4242_v8 = vld [vmem:[%s11515_s6 + $0x130] sm:$0xff]  ;;  %v7950_v33 = vpack.c.bf16 %v4250_v12, %v4246_v6 }
 0x944   :  { %v7169_v54 = vmul.f32 -1.442695, %v8515_v5  ;;  %v7170_v58 = vmul.f32 -1.442695, %v8537_v35  ;;  %v4231_v5 = vld [vmem:[%s11515_s6 + $0xd8] sm:$0xff]  ;;  %v7938_v35 = vpack.c.bf16 %v4226_v14, %v4222_v52  ;;  %v7952_v14 = vpack.c.bf16 %v4259_v2, %v4255_v30 }
 0x945   :  { %8808 = vpow2.f32 %v7168_v16  ;;  %v4235_v16 = vld [vmem:[%s11515_s6 + $0xf8] sm:$0xff] }
 0x946   :  { %8810 = vpow2.f32 %v7169_v54  ;;  %v7906_v54 = vpack.c.bf16 %v4224_v40, %v4220_v4  ;;  %v4254_v4 = vld [vmem:[%s11515_s6 + $0x190] sm:$0xff] }
 0x947   :  { %8812 = vpow2.f32 %v7170_v58  ;;  %v4228_v58 = vld [vmem:[%s11515_s6 + $0xc0] sm:$0xff]  ;;  %v4258_v40 = vld [vmem:[%s11515_s6 + $0x1b0] sm:$0xff] }
 0x948   :  { %8814 = vtanh.f32 %v8536_v31  ;;  %v4232_v31 = vld [vmem:[%s11515_s6 + $0xe0] sm:$0xff] }
 0x94f   :  { %v8809_v10 = vpop.eup %8808 }
 0x950   :  { %v8811_v20 = vpop.eup %8810  ;;  %v4173_v44 = vadd.f32 1.0, %v8809_v10  ;;  %v4230_v10 = vld [vmem:[%s11515_s6 + $0xd0] sm:$0xff] }
 0x951   :  { %v4179_v56 = vadd.f32 1.0, %v8811_v20  ;;  %v8813_v60 = vpop.eup %8812  ;;  %v4234_v20 = vld [vmem:[%s11515_s6 + $0xf0] sm:$0xff] }
 0x952   :  { %8816 = vrcp.f32 %v4173_v44  ;;  %v8815_v15 = vpop.eup %8814  ;;  %v4186_v3 = vadd.f32 1.0, %v8813_v60  ;;  %v7908_v44 = vpack.c.bf16 %v4233_v55, %v4229_v25  ;;  %v4237_v60 = vld [vmem:[%s11515_s6 + $0x108] sm:$0xff]  ;;  %v4263_v25 = vld [vmem:[%s11515_s6 + $0x1d8] sm:$0xff] }
 0x953   :  { %8818 = vrcp.f32 %v4179_v56  ;;  %v7940_v56 = vpack.c.bf16 %v4235_v16, %v4231_v5  ;;  %v4267_v55 = vld [vmem:[%s11515_s6 + $0x1f8] sm:$0xff]  ;;  %v7954_v16 = vpack.c.bf16 %v4258_v40, %v4254_v4  ;;  %v4907_v40 = vld [vmem:[%s11517_s8 + $0xc8] sm:$0xff] }
 0x954   :  { %8820 = vrcp.f32 %v4186_v3  ;;  %v7942_v3 = vpack.c.bf16 %v4234_v20, %v4230_v10  ;;  %v7956_v20 = vpack.c.bf16 %v4267_v55, %v4263_v25  ;;  %v4910_v55 = vld [vmem:[%s11517_s8 + $0xe0] sm:$0xff] }
 0x95c   :  { %v8817_v0 = vpop.eup %8816 }
 0x95d   :  { %v8819_v49 = vpop.eup %8818  ;;  %v4190_v50 = vmul.f32 %v8817_v0, %v8815_v15  ;;  %v4241_v15 = vld [vmem:[%s11515_s6 + $0x128] sm:$0xff]  ;;  %v4239_v0 = vld [vmem:[%s11515_s6 + $0x118] sm:$0xff] }
 0x95e   :  { %v4189_v39 = vmul.f32 %v8819_v49, %v10375_v48  ;;  %v4213_v48 = vld [vmem:[%s11515_s6 + $0x48] sm:$0xff]  ;;  %v8821_v27 = vpop.eup %8820  ;;  %v4243_v49 = vld [vmem:[%s11515_s6 + $0x138] sm:$0xff]  ;;  %v7912_v34 = vpack.c.bf16 %v4241_v15, %v4237_v60 }
 0x95f   :  { %v7900_v7 = vpack.c.bf16 %v4217_v57, %v4213_v48  ;;  %v7944_v17 = vpack.c.bf16 %v4243_v49, %v4239_v0  ;;  %v4245_v48 = vld [vmem:[%s11515_s6 + $0x148] sm:$0xff]  ;;  %v4247_v57 = vld [vmem:[%s11515_s6 + $0x158] sm:$0xff] }
 0x960   :  { %v4191_v45 = vadd.f32 %v4190_v50, %v4189_v39  ;;  %v7910_v50 = vpack.c.bf16 %v4232_v31, %v4228_v58  ;;  %v4236_v39 = vld [vmem:[%s11515_s6 + $0x100] sm:$0xff]  ;;  %v7948_v61 = vpack.c.bf16 %v4251_v46, %v4247_v57  ;;  %v4262_v58 = vld [vmem:[%s11515_s6 + $0x1d0] sm:$0xff]  ;;  %v4885_v60 = vld [vmem:[%s11517_s8 + $0x18] sm:$0xff] }
 0x961   :  { %v4266_v31 = vld [vmem:[%s11515_s6 + $0x1f0] sm:$0xff]  ;;  %v4889_v15 = vld [vmem:[%s11517_s8 + $0x38] sm:$0xff] }
 0x962   :  { %8822 = vtanh.f32 %v4191_v45  ;;  %v4240_v45 = vld [vmem:[%s11515_s6 + $0x120] sm:$0xff]  ;;  %v7958_v49 = vpack.c.bf16 %v4266_v31, %v4262_v58  ;;  %v4915_v58 = vld [vmem:[%s11517_s8 + $0x108] sm:$0xff] }
 0x963   :  { %v7914_v42 = vpack.c.bf16 %v4240_v45, %v4236_v39  ;;  %v4884_v39 = vld [vmem:[%s11517_s8 + $0x10] sm:$0xff]  ;;  %v4919_v31 = vld [vmem:[%s11517_s8 + $0x128] sm:$0xff] }
 0x964   :  { %v4888_v45 = vld [vmem:[%s11517_s8 + $0x30] sm:$0xff] }
 0x965   :  { %v10847_v46 = vpack.c.bf16 %v4888_v45, %v4884_v39  ;;  %v4927_v39 = vld [vmem:[%s11517_s8 + $0x168] sm:$0xff]  ;;  %v4925_v45 = vld [vmem:[%s11517_s8 + $0x158] sm:$0xff] }
 0x96c   :  { %v8823_v63 = vpop.eup %8822 }
 0x96d   :  { %v10620_v62 = vmul.f32 %v8823_v63, %v8821_v27  ;;  %v4249_v27 = vld [vmem:[%s11515_s6 + $0x168] sm:$0xff]  ;;  %v7946_v63 = vpack.c.bf16 %v4242_v8, %v4238_v43  ;;  %v10829_v8 = vpack.c.bf16 %v4889_v15, %v4885_v60  ;;  %v4918_v60 = vld [vmem:[%s11517_s8 + $0x120] sm:$0xff]  ;;  %v4916_v15 = vld [vmem:[%s11517_s8 + $0x110] sm:$0xff] }
 0x96e   :  { %v7916_v18 = vpack.c.bf16 %v4249_v27, %v4245_v48  ;;  %v4893_v48 = vld [vmem:[%s11517_s8 + $0x58] sm:$0xff] }
 0x96f   :  { %4405 = vmatmul.mubr.f32.vlgmr.msra.gmra.mrb[22].mxu0 %v10620_v62  ;;  %4518 = vmatmul.mubr.f32.vlgmr.msra.gmra.mrb[16].mxu1 %v10620_v62  ;;  %v4897_v27 = vld [vmem:[%s11517_s8 + $0x78] sm:$0xff] }
 0x970   :  { %7899 = vmatpush1.bf16.msra.mxu0 %v7898_v11  ;;  %7931 = vmatpush1.bf16.msra.mxu1 %v7930_v26  ;;  %v4244_v11 = vld [vmem:[%s11515_s6 + $0x140] sm:$0xff]  ;;  %v10867_v12 = vpack.c.bf16 %v4897_v27, %v4893_v48 }
 0x971   :  { %4410 = vmatprep.mubr.f32.mxu0 %v9031_v32  ;;  %4523 = vmatprep.mubr.f32.mxu1 %v9031_v32  ;;  %v4248_v26 = vld [vmem:[%s11515_s6 + $0x160] sm:$0xff] }
 0x972   :  { %7901 = vmatprep.subr.bf16.mxu0 %v7900_v7  ;;  %7933 = vmatprep.subr.bf16.mxu1 %v7932_v37  ;;  %v4253_v7 = vld [vmem:[%s11515_s6 + $0x188] sm:$0xff]  ;;  %v7918_v24 = vpack.c.bf16 %v4248_v26, %v4244_v11  ;;  %v4892_v11 = vld [vmem:[%s11517_s8 + $0x50] sm:$0xff]  ;;  %v4926_v27 = vld [vmem:[%s11517_s8 + $0x160] sm:$0xff] }
 0x973   :  { %4411 = vmatmul.mubr.f32.gmra.mrb[24].mxu0 %v10378_v13  ;;  %4524 = vmatmul.mubr.f32.gmra.mrb[18].mxu1 %v10378_v13  ;;  %v4257_v37 = vld [vmem:[%s11515_s6 + $0x1a8] sm:$0xff]  ;;  %v4896_v26 = vld [vmem:[%s11517_s8 + $0x70] sm:$0xff] }
 0x974   :  { %7903 = vmatpush1.bf16.msra.mxu0 %v7902_v51  ;;  %7935 = vmatpush1.bf16.msra.mxu1 %v7934_v1  ;;  %v4252_v51 = vld [vmem:[%s11515_s6 + $0x180] sm:$0xff]  ;;  %v7920_v52 = vpack.c.bf16 %v4257_v37, %v4253_v7  ;;  %v4901_v7 = vld [vmem:[%s11517_s8 + $0x98] sm:$0xff]  ;;  %v10887_v2 = vpack.c.bf16 %v4896_v26, %v4892_v11 }
 0x975   :  { %4416 = vmatprep.mubr.f32.mxu0 %v9031_v32  ;;  %4529 = vmatprep.mubr.f32.mxu1 %v9031_v32  ;;  %v4256_v1 = vld [vmem:[%s11515_s6 + $0x1a0] sm:$0xff]  ;;  %v4905_v37 = vld [vmem:[%s11517_s8 + $0xb8] sm:$0xff] }
 0x976   :  { %7905 = vmatprep.subr.bf16.mxu0 %v7904_v19  ;;  %7937 = vmatprep.subr.bf16.mxu1 %v7936_v22  ;;  %v4261_v19 = vld [vmem:[%s11515_s6 + $0x1c8] sm:$0xff]  ;;  %v7922_v5 = vpack.c.bf16 %v4256_v1, %v4252_v51  ;;  %v4904_v51 = vld [vmem:[%s11517_s8 + $0xb0] sm:$0xff]  ;;  %v10907_v4 = vpack.c.bf16 %v4905_v37, %v4901_v7  ;;  %v4933_v7 = vld [vmem:[%s11517_s8 + $0x198] sm:$0xff] }
 0x977   :  { %4417 = vmatmul.mubr.f32.gmra.mrb[26].mxu0 %v10253_v29  ;;  %4530 = vmatmul.mubr.f32.gmra.mrb[20].mxu1 %v10253_v29  ;;  %v4265_v22 = vld [vmem:[%s11515_s6 + $0x1e8] sm:$0xff]  ;;  %v4937_v37 = vld [vmem:[%s11517_s8 + $0x1b8] sm:$0xff] }
 0x978   :  { %7907 = vmatpush1.bf16.msra.mxu0 %v7906_v54  ;;  %7939 = vmatpush1.bf16.msra.mxu1 %v7938_v35  ;;  %v4260_v54 = vld [vmem:[%s11515_s6 + $0x1c0] sm:$0xff]  ;;  %v7924_v10 = vpack.c.bf16 %v4265_v22, %v4261_v19  ;;  %v4913_v19 = vld [vmem:[%s11517_s8 + $0xf8] sm:$0xff] }
 0x979   :  { %4422 = vmatprep.mubr.f32.mxu0 %v9031_v32  ;;  %4535 = vmatprep.mubr.f32.mxu1 %v9031_v32  ;;  %v4264_v35 = vld [vmem:[%s11515_s6 + $0x1e0] sm:$0xff] }
 0x97a   :  { %7909 = vmatprep.subr.bf16.mxu0 %v7908_v44  ;;  %7941 = vmatprep.subr.bf16.mxu1 %v7940_v56  ;;  %v4883_v44 = vld [vmem:[%s11517_s8 + $0x8] sm:$0xff]  ;;  %v7926_v0 = vpack.c.bf16 %v4264_v35, %v4260_v54 }
 0x97b   :  { %4423 = vmatmul.mubr.f32.gmra.mrb[28].mxu0 %v10208_v47  ;;  %4536 = vmatmul.mubr.f32.gmra.mrb[22].mxu1 %v10208_v47  ;;  %v4887_v56 = vld [vmem:[%s11517_s8 + $0x28] sm:$0xff] }
 0x97c   :  { %7911 = vmatpush1.bf16.msra.mxu0 %v7910_v50  ;;  %7943 = vmatpush1.bf16.msra.mxu1 %v7942_v3  ;;  %v4882_v50 = vld [vmem:[%s11517_s8] sm:$0xff]  ;;  %v10827_v43 = vpack.c.bf16 %v4887_v56, %v4883_v44 }
 0x97d   :  { %4428 = vmatprep.mubr.f32.mxu0 %v9031_v32  ;;  %4541 = vmatprep.mubr.f32.mxu1 %v9031_v32  ;;  %v4886_v3 = vld [vmem:[%s11517_s8 + $0x20] sm:$0xff] }
 0x97e   :  { %7913 = vmatprep.subr.bf16.mxu0 %v7912_v34  ;;  %7945 = vmatprep.subr.bf16.mxu1 %v7944_v17  ;;  %v4891_v34 = vld [vmem:[%s11517_s8 + $0x48] sm:$0xff]  ;;  %v10845_v57 = vpack.c.bf16 %v4886_v3, %v4882_v50 }
 0x97f   :  { %4429 = vmatmul.mubr.f32.gmra.mrb[30].mxu0 %v10162_v53  ;;  %4542 = vmatmul.mubr.f32.gmra.mrb[24].mxu1 %v10162_v53  ;;  %v4895_v17 = vld [vmem:[%s11517_s8 + $0x68] sm:$0xff] }
 0x980   :  { %7915 = vmatpush1.bf16.msra.mxu0 %v7914_v42  ;;  %7947 = vmatpush1.bf16.msra.mxu1 %v7946_v63  ;;  %v4890_v42 = vld [vmem:[%s11517_s8 + $0x40] sm:$0xff]  ;;  %v10865_v6 = vpack.c.bf16 %v4895_v17, %v4891_v34  ;;  %v4923_v3 = vld [vmem:[%s11517_s8 + $0x148] sm:$0xff]  ;;  %v4929_v34 = vld [vmem:[%s11517_s8 + $0x178] sm:$0xff] }
 0x981   :  { %4434 = vmatprep.mubr.f32.mxu0 %v9031_v32  ;;  %4547 = vmatprep.mubr.f32.mxu1 %v9031_v32  ;;  %v4894_v63 = vld [vmem:[%s11517_s8 + $0x60] sm:$0xff]  ;;  %v11025_v11 = vpack.c.bf16 %v4927_v39, %v4923_v3  ;;  %v11027_v26 = vpack.c.bf16 %v4929_v34, %v4925_v45 }
 0x982   :  { %7917 = vmatprep.subr.bf16.mxu0 %v7916_v18  ;;  %7949 = vmatprep.subr.bf16.mxu1 %v7948_v61  ;;  %v4899_v18 = vld [vmem:[%s11517_s8 + $0x88] sm:$0xff]  ;;  %v10885_v30 = vpack.c.bf16 %v4894_v63, %v4890_v42  ;;  %v4924_v42 = vld [vmem:[%s11517_s8 + $0x150] sm:$0xff] }
 0x983   :  { %4435 = vmatmul.mubr.f32.gmra.mrb[32].mxu0 %v9987_v21  ;;  %4548 = vmatmul.mubr.f32.gmra.mrb[26].mxu1 %v9987_v21  ;;  %v4903_v61 = vld [vmem:[%s11517_s8 + $0xa8] sm:$0xff]  ;;  %v4928_v63 = vld [vmem:[%s11517_s8 + $0x170] sm:$0xff] }
 0x984   :  { %7919 = vmatpush1.bf16.msra.mxu0 %v7918_v24  ;;  %7951 = vmatpush1.bf16.msra.mxu1 %v7950_v33  ;;  %v4902_v24 = vld [vmem:[%s11517_s8 + $0xa0] sm:$0xff]  ;;  %v4900_v33 = vld [vmem:[%s11517_s8 + $0x90] sm:$0xff]  ;;  %v10905_v1 = vpack.c.bf16 %v4903_v61, %v4899_v18  ;;  %v4931_v18 = vld [vmem:[%s11517_s8 + $0x188] sm:$0xff] }
 0x985   :  { %4440 = vmatprep.mubr.f32.mxu0 %v9031_v32  ;;  %4553 = vmatprep.mubr.f32.mxu1 %v9031_v32  ;;  %v10927_v25 = vpack.c.bf16 %v4904_v51, %v4900_v33  ;;  %v4935_v61 = vld [vmem:[%s11517_s8 + $0x1a8] sm:$0xff]  ;;  %v4934_v33 = vld [vmem:[%s11517_s8 + $0x1a0] sm:$0xff]  ;;  %v4932_v51 = vld [vmem:[%s11517_s8 + $0x190] sm:$0xff] }
 0x986   :  { %7921 = vmatprep.subr.bf16.mxu0 %v7920_v52  ;;  %7953 = vmatprep.subr.bf16.mxu1 %v7952_v14  ;;  %v4911_v52 = vld [vmem:[%s11517_s8 + $0xe8] sm:$0xff]  ;;  %v4909_v14 = vld [vmem:[%s11517_s8 + $0xd8] sm:$0xff] }
 0x987   :  { %4441 = vmatmul.mubr.f32.gmra.mrb[34].mxu0 %v9811_v23  ;;  %4554 = vmatmul.mubr.f32.gmra.mrb[28].mxu1 %v9811_v23  ;;  %v10945_v54 = vpack.c.bf16 %v4911_v52, %v4907_v40  ;;  %v10947_v35 = vpack.c.bf16 %v4913_v19, %v4909_v14  ;;  %v4936_v40 = vld [vmem:[%s11517_s8 + $0x1b0] sm:$0xff]  ;;  %v11065_v52 = vpack.c.bf16 %v4935_v61, %v4931_v18  ;;  %v4939_v19 = vld [vmem:[%s11517_s8 + $0x1c8] sm:$0xff] }
 0x988   :  { %7923 = vmatpush1.bf16.msra.mxu0 %v7922_v5  ;;  %7955 = vmatpush1.bf16.msra.mxu1 %v7954_v16  ;;  %v4908_v5 = vld [vmem:[%s11517_s8 + $0xd0] sm:$0xff]  ;;  %v11067_v14 = vpack.c.bf16 %v4937_v37, %v4933_v7 }
 0x989   :  { %4446 = vmatprep.mubr.f32.mxu0 %v9031_v32  ;;  %4559 = vmatprep.mubr.f32.mxu1 %v9031_v32  ;;  %v4912_v16 = vld [vmem:[%s11517_s8 + $0xf0] sm:$0xff] }
 0x98a   :  { %7925 = vmatprep.subr.bf16.mxu0 %v7924_v10  ;;  %7957 = vmatprep.subr.bf16.mxu1 %v7956_v20  ;;  %v4917_v10 = vld [vmem:[%s11517_s8 + $0x118] sm:$0xff]  ;;  %v10967_v56 = vpack.c.bf16 %v4912_v16, %v4908_v5 }
 0x98b   :  { %4447 = vmatmul.mubr.f32.gmra.mrb[36].mxu0 %v9764_v9  ;;  %4560 = vmatmul.mubr.f32.gmra.mrb[30].mxu1 %v9764_v9  ;;  %v4921_v20 = vld [vmem:[%s11517_s8 + $0x138] sm:$0xff] }
 0x98c   :  { %7927 = vmatpush1.bf16.msra.mxu0 %v7926_v0  ;;  %7959 = vmatpush1.bf16.msra.mxu1 %v7958_v49  ;;  %v4920_v0 = vld [vmem:[%s11517_s8 + $0x130] sm:$0xff]  ;;  %v10985_v49 = vpack.c.bf16 %v4919_v31, %v4915_v58  ;;  %v10987_v50 = vpack.c.bf16 %v4921_v20, %v4917_v10  ;;  %v4945_v5 = vld [vmem:[%s11517_s8 + $0x1f8] sm:$0xff]  ;;  %v11087_v58 = vpack.c.bf16 %v4936_v40, %v4932_v51  ;;  %v4942_v31 = vld [vmem:[%s11517_s8 + $0x1e0] sm:$0xff] }
 0x98d   :  { %4630 = vmatprep.mubr.f32.mxu0 %v9031_v32  ;;  %4743 = vmatprep.mubr.f32.mxu1 %v9031_v32  ;;  %v11007_v48 = vpack.c.bf16 %v4920_v0, %v4916_v15  ;;  %v4940_v10 = vld [vmem:[%s11517_s8 + $0x1d0] sm:$0xff] }
 0x98e   :  { %7961 = vmatprep.subr.bf16.mxu0 %v10827_v43  ;;  %7993 = vmatprep.subr.bf16.mxu1 %v10829_v8  ;;  %v4944_v20 = vld [vmem:[%s11517_s8 + $0x1f0] sm:$0xff] }
 0x98f   :  { %4631 = vmatmul.mubr.f32.vlgmr.msra.gmra.mrb[22].mxu0 %v9764_v9  ;;  %4744 = vmatmul.mubr.f32.vlgmr.msra.gmra.mrb[16].mxu1 %v9764_v9  ;;  %v4898_v9 = vld [vmem:[%s11517_s8 + $0x80] sm:$0xff]  ;;  %v11115_v0 = vpack.c.bf16 %v4944_v20, %v4940_v10 }
 0x990   :  { %7963 = vmatpush1.bf16.msra.mxu0 %v10845_v57  ;;  %7995 = vmatpush1.bf16.msra.mxu1 %v10847_v46  ;;  %v10925_v22 = vpack.c.bf16 %v4902_v24, %v4898_v9  ;;  %v11047_v24 = vpack.c.bf16 %v4928_v63, %v4924_v42 }
 0x991   :  { %4636 = vmatprep.mubr.f32.mxu0 %v9031_v32  ;;  %4749 = vmatprep.mubr.f32.mxu1 %v9031_v32 }
 0x992   :  { %7965 = vmatprep.subr.bf16.mxu0 %v10865_v6  ;;  %7997 = vmatprep.subr.bf16.mxu1 %v10867_v12 }
 0x993   :  { %4637 = vmatmul.mubr.f32.gmra.mrb[24].mxu0 %v9811_v23  ;;  %4750 = vmatmul.mubr.f32.gmra.mrb[18].mxu1 %v9811_v23  ;;  %v4906_v23 = vld [vmem:[%s11517_s8 + $0xc0] sm:$0xff] }
 0x994   :  { %7967 = vmatpush1.bf16.msra.mxu0 %v10885_v30  ;;  %7999 = vmatpush1.bf16.msra.mxu1 %v10887_v2  ;;  %v10965_v44 = vpack.c.bf16 %v4910_v55, %v4906_v23  ;;  %v4943_v23 = vld [vmem:[%s11517_s8 + $0x1e8] sm:$0xff]  ;;  %v4941_v55 = vld [vmem:[%s11517_s8 + $0x1d8] sm:$0xff] }
 0x995   :  { %4642 = vmatprep.mubr.f32.mxu0 %v9031_v32  ;;  %4755 = vmatprep.mubr.f32.mxu1 %v9031_v32 }
 0x996   :  { %7969 = vmatprep.subr.bf16.mxu0 %v10905_v1  ;;  %8001 = vmatprep.subr.bf16.mxu1 %v10907_v4 }
 0x997   :  { %4643 = vmatmul.mubr.f32.gmra.mrb[26].mxu0 %v9987_v21  ;;  %4756 = vmatmul.mubr.f32.gmra.mrb[20].mxu1 %v9987_v21  ;;  %v4914_v21 = vld [vmem:[%s11517_s8 + $0x100] sm:$0xff] }
 0x998   :  { %7971 = vmatpush1.bf16.msra.mxu0 %v10925_v22  ;;  %8003 = vmatpush1.bf16.msra.mxu1 %v10927_v25  ;;  %v11005_v17 = vpack.c.bf16 %v4918_v60, %v4914_v21  ;;  %v11105_v21 = vpack.c.bf16 %v4943_v23, %v4939_v19  ;;  %v11107_v60 = vpack.c.bf16 %v4945_v5, %v4941_v55 }
 0x999   :  { %4648 = vmatprep.mubr.f32.mxu0 %v9031_v32  ;;  %4761 = vmatprep.mubr.f32.mxu1 %v9031_v32 }
 0x99a   :  { %7973 = vmatprep.subr.bf16.mxu0 %v10945_v54  ;;  %8005 = vmatprep.subr.bf16.mxu1 %v10947_v35 }
 0x99b   :  { %4649 = vmatmul.mubr.f32.gmra.mrb[28].mxu0 %v10162_v53  ;;  %4762 = vmatmul.mubr.f32.gmra.mrb[22].mxu1 %v10162_v53  ;;  %v4922_v53 = vld [vmem:[%s11517_s8 + $0x140] sm:$0xff] }
 0x99c   :  { %7975 = vmatpush1.bf16.msra.mxu0 %v10965_v44  ;;  %8007 = vmatpush1.bf16.msra.mxu1 %v10967_v56  ;;  %v11045_v9 = vpack.c.bf16 %v4926_v27, %v4922_v53 }
 0x99d   :  { %4654 = vmatprep.mubr.f32.mxu0 %v9031_v32  ;;  %4767 = vmatprep.mubr.f32.mxu1 %v9031_v32 }
 0x99e   :  { %7977 = vmatprep.subr.bf16.mxu0 %v10985_v49  ;;  %8009 = vmatprep.subr.bf16.mxu1 %v10987_v50 }
 0x99f   :  { %4655 = vmatmul.mubr.f32.gmra.mrb[30].mxu0 %v10208_v47  ;;  %4768 = vmatmul.mubr.f32.gmra.mrb[24].mxu1 %v10208_v47  ;;  %v4930_v47 = vld [vmem:[%s11517_s8 + $0x180] sm:$0xff] }
 0x9a0   :  { %7979 = vmatpush1.bf16.msra.mxu0 %v11005_v17  ;;  %8011 = vmatpush1.bf16.msra.mxu1 %v11007_v48  ;;  %v11085_v16 = vpack.c.bf16 %v4934_v33, %v4930_v47 }
 0x9a1   :  { %4660 = vmatprep.mubr.f32.mxu0 %v9031_v32  ;;  %4773 = vmatprep.mubr.f32.mxu1 %v9031_v32 }
 0x9a2   :  { %7981 = vmatprep.subr.bf16.mxu0 %v11025_v11  ;;  %8013 = vmatprep.subr.bf16.mxu1 %v11027_v26 }
 0x9a3   :  { %4661 = vmatmul.mubr.f32.gmra.mrb[32].mxu0 %v10253_v29  ;;  %4774 = vmatmul.mubr.f32.gmra.mrb[26].mxu1 %v10253_v29  ;;  %v4938_v29 = vld [vmem:[%s11517_s8 + $0x1c0] sm:$0xff] }
 0x9a4   :  { %7983 = vmatpush1.bf16.msra.mxu0 %v11045_v9  ;;  %8015 = vmatpush1.bf16.msra.mxu1 %v11047_v24  ;;  %v11113_v15 = vpack.c.bf16 %v4942_v31, %v4938_v29 }
 0x9a5   :  { %4666 = vmatprep.mubr.f32.mxu0 %v9031_v32  ;;  %4779 = vmatprep.mubr.f32.mxu1 %v9031_v32 }
 0x9a6   :  { %7985 = vmatprep.subr.bf16.mxu0 %v11065_v52  ;;  %8017 = vmatprep.subr.bf16.mxu1 %v11067_v14 }
 0x9a7   :  { %4667 = vmatmul.mubr.f32.gmra.mrb[34].mxu0 %v10378_v13  ;;  %4780 = vmatmul.mubr.f32.gmra.mrb[28].mxu1 %v10378_v13  ;;  %v4792_v13 = vld [vmem:[%s11518_s9] sm:$0xf] }
 0x9a8   :  { %7987 = vmatpush1.bf16.msra.mxu0 %v11085_v16  ;;  %8019 = vmatpush1.bf16.msra.mxu1 %v11087_v58  ;;  %v11174_v3 = vrot.slane %v4792_v13, %v2198_v59  ;;  %v11180_v61 = vrot.slane %v4792_v13, %v2206_v41  ;;  %v11185_v59 = vrot.slane %v4792_v13, %v2202_v36 }
 0x9a9   :  { %4672 = vmatprep.mubr.f32.mxu0 %v9031_v32  ;;  %4785 = vmatprep.mubr.f32.mxu1 %v9031_v32 }
 0x9aa   :  { %7989 = vmatprep.subr.bf16.mxu0 %v11105_v21  ;;  %8021 = vmatprep.subr.bf16.mxu1 %v11107_v60 }
 0x9ab   :  { %4673 = vmatmul.mubr.f32.gmra.mrb[36].mxu0 %v10620_v62  ;;  %4786 = vmatmul.mubr.f32.gmra.mrb[30].mxu1 %v10620_v62  ;;  %v11170_v62 = vrot.slane %v4792_v13, %v2194_v38 }
 0x9ac   :  { %7991 = vmatpush1.bf16.msra.mxu0 %v11113_v15  ;;  %8023 = vmatpush1.bf16.msra.mxu1 %v11115_v0 }
 0x9ad   :  { %5010 = vmatprep.mubr.f32.mxu0 %v9031_v32  ;;  %5081 = vmatprep.mubr.f32.mxu1 %v9031_v32 }
 0x9ae   :  { %8025 = vmatprep.subr.bf16.mxu0 %v10827_v43  ;;  %8057 = vmatprep.subr.bf16.mxu1 %v10829_v8 }
 0x9af   :  { %5011 = vmatmul.mubr.f32.vlgmr.msra.gmra.mrb[22].mxu0 %v9031_v32  ;;  %5082 = vmatmul.mubr.f32.vlgmr.msra.gmra.mrb[16].mxu1 %v9031_v32 }
 0x9b0   :  { %8027 = vmatpush1.bf16.msra.mxu0 %v10845_v57  ;;  %8059 = vmatpush1.bf16.msra.mxu1 %v10847_v46 }
 0x9b1   :  { %8029 = vmatprep.subr.bf16.mxu0 %v10865_v6  ;;  %8061 = vmatprep.subr.bf16.mxu1 %v10867_v12 }
 0x9b2   :  { %5184 = vmatprep.mubr.f32.mxu0 %v9031_v32  ;;  %5255 = vmatprep.mubr.f32.mxu1 %v9031_v32 }
 0x9b4   :  { %8031 = vmatpush1.bf16.msra.mxu0 %v10885_v30  ;;  %8063 = vmatpush1.bf16.msra.mxu1 %v10887_v2 }
 0x9b5   :  { %8033 = vmatprep.subr.bf16.mxu0 %v10905_v1  ;;  %8065 = vmatprep.subr.bf16.mxu1 %v10907_v4 }
 0x9b8   :  { %8035 = vmatpush1.bf16.msra.mxu0 %v10925_v22  ;;  %8067 = vmatpush1.bf16.msra.mxu1 %v10927_v25 }
 0x9b9   :  { %8037 = vmatprep.subr.bf16.mxu0 %v10945_v54  ;;  %8069 = vmatprep.subr.bf16.mxu1 %v10947_v35 }
 0x9bc   :  { %8039 = vmatpush1.bf16.msra.mxu0 %v10965_v44  ;;  %8071 = vmatpush1.bf16.msra.mxu1 %v10967_v56 }
 0x9bd   :  { %8041 = vmatprep.subr.bf16.mxu0 %v10985_v49  ;;  %8073 = vmatprep.subr.bf16.mxu1 %v10987_v50 }
 0x9c0   :  { %8043 = vmatpush1.bf16.msra.mxu0 %v11005_v17  ;;  %8075 = vmatpush1.bf16.msra.mxu1 %v11007_v48 }
 0x9c1   :  { %8045 = vmatprep.subr.bf16.mxu0 %v11025_v11  ;;  %8077 = vmatprep.subr.bf16.mxu1 %v11027_v26 }
 0x9c4   :  { %8047 = vmatpush1.bf16.msra.mxu0 %v11045_v9  ;;  %8079 = vmatpush1.bf16.msra.mxu1 %v11047_v24 }
 0x9c5   :  { %8049 = vmatprep.subr.bf16.mxu0 %v11065_v52  ;;  %8081 = vmatprep.subr.bf16.mxu1 %v11067_v14 }
 0x9c8   :  { %8051 = vmatpush1.bf16.msra.mxu0 %v11085_v16  ;;  %8083 = vmatpush1.bf16.msra.mxu1 %v11087_v58 }
 0x9c9   :  { %8053 = vmatprep.subr.bf16.mxu0 %v11105_v21  ;;  %8085 = vmatprep.subr.bf16.mxu1 %v11107_v60 }
 0x9cc   :  { %8055 = vmatpush1.bf16.msra.mxu0 %v11113_v15  ;;  %8087 = vmatpush1.bf16.msra.mxu1 %v11115_v0 }
 0x9cd   :  { %8089 = vmatprep.subr.bf16.mxu0 %v10827_v43  ;;  %8121 = vmatprep.subr.bf16.mxu1 %v10829_v8 }
 0xa82   :  { %v5012_v39 = vpop.f32.mrb[22].mxu0  ;;  %v5083_v45 = vpop.f32.mrb[16].mxu1 }
 0xa83   :  { %v8538_v34 = vadd.f32 %v5012_v39, %v11170_v62  ;;  %v5014_v53 = vpop.f32.mrb[23].mxu0  ;;  %v5085_v27 = vpop.f32.mrb[17].mxu1  ;;  %v8554_v37 = vadd.f32 %v5083_v45, %v11185_v59 }
 0xa84   :  { %v8539_v42 = vadd.f32 %v5014_v53, %v11174_v3  ;;  %v8555_v38 = vadd.f32 %v5085_v27, %v11180_v61 }
 0xa85   :  { %v7171_v63 = vmul.f32 -1.442695, %v8538_v34 }
 0xa86   :  { %v7172_v18 = vmul.f32 -1.442695, %v8539_v42  ;;  %v7173_v7 = vmul.f32 -1.442695, %v8555_v38 }
 0xa87   :  { %8824 = vpow2.f32 %v7171_v63 }
 0xa88   :  { %8826 = vpow2.f32 %v7172_v18 }
 0xa89   :  { %8828 = vpow2.f32 %v7173_v7 }
 0xa8a   :  { %8830 = vtanh.f32 %v8554_v37 }
 0xa91   :  { %v8825_v47 = vpop.eup %8824 }
 0xa92   :  { %v8827_v33 = vpop.eup %8826  ;;  %v5095_v51 = vadd.f32 1.0, %v8825_v47 }
 0xa93   :  { %v5101_v40 = vadd.f32 1.0, %v8827_v33  ;;  %v8829_v41 = vpop.eup %8828 }
 0xa94   :  { %8832 = vrcp.f32 %v5095_v51  ;;  %v8831_v19 = vpop.eup %8830  ;;  %v5108_v29 = vadd.f32 1.0, %v8829_v41 }
 0xa95   :  { %8834 = vrcp.f32 %v5101_v40 }
 0xa96   :  { %8836 = vrcp.f32 %v5108_v29 }
 0xa9e   :  { %v8833_v23 = vpop.eup %8832 }
 0xa9f   :  { %v8835_v55 = vpop.eup %8834  ;;  %v5112_v5 = vmul.f32 %v8833_v23, %v8831_v19 }
 0xaa0   :  { %v5111_v28 = vmul.f32 0.0, %v8835_v55  ;;  %v8837_v31 = vpop.eup %8836 }
 0xaa2   :  { %v11188_v36 = vadd.f32 %v5112_v5, %v5111_v28 }
 0xaa4   :  { %8838 = vtanh.f32 %v11188_v36 }
 0xaae   :  { %v8839_v10 = vpop.eup %8838 }
 0xaaf   :  { %v5115_v20 = vmul.f32 %v8839_v10, %v8837_v31 }
 0xab1   :  { %5185 = vmatmul.mubr.f32.vlgmr.msra.gmra.mrb[24].mxu0 %v5115_v20  ;;  %5256 = vmatmul.mubr.f32.vlgmr.msra.gmra.mrb[18].mxu1 %v5115_v20 }
 0xab2   :  { %8091 = vmatpush1.bf16.msra.mxu0 %v10845_v57  ;;  %8123 = vmatpush1.bf16.msra.mxu1 %v10847_v46 }
 0xab3   :  { %8093 = vmatprep.subr.bf16.mxu0 %v10865_v6  ;;  %8125 = vmatprep.subr.bf16.mxu1 %v10867_v12 }
 0xab4   :  { %5358 = vmatprep.mubr.f32.mxu0 %v9031_v32  ;;  %5429 = vmatprep.mubr.f32.mxu1 %v9031_v32 }
 0xab6   :  { %8095 = vmatpush1.bf16.msra.mxu0 %v10885_v30  ;;  %8127 = vmatpush1.bf16.msra.mxu1 %v10887_v2 }
 0xab7   :  { %8097 = vmatprep.subr.bf16.mxu0 %v10905_v1  ;;  %8129 = vmatprep.subr.bf16.mxu1 %v10907_v4 }
 0xaba   :  { %8099 = vmatpush1.bf16.msra.mxu0 %v10925_v22  ;;  %8131 = vmatpush1.bf16.msra.mxu1 %v10927_v25 }
 0xabb   :  { %8101 = vmatprep.subr.bf16.mxu0 %v10945_v54  ;;  %8133 = vmatprep.subr.bf16.mxu1 %v10947_v35 }
 0xabe   :  { %8103 = vmatpush1.bf16.msra.mxu0 %v10965_v44  ;;  %8135 = vmatpush1.bf16.msra.mxu1 %v10967_v56 }
 0xabf   :  { %8105 = vmatprep.subr.bf16.mxu0 %v10985_v49  ;;  %8137 = vmatprep.subr.bf16.mxu1 %v10987_v50 }
 0xac2   :  { %8107 = vmatpush1.bf16.msra.mxu0 %v11005_v17  ;;  %8139 = vmatpush1.bf16.msra.mxu1 %v11007_v48 }
 0xac3   :  { %8109 = vmatprep.subr.bf16.mxu0 %v11025_v11  ;;  %8141 = vmatprep.subr.bf16.mxu1 %v11027_v26 }
 0xac6   :  { %8111 = vmatpush1.bf16.msra.mxu0 %v11045_v9  ;;  %8143 = vmatpush1.bf16.msra.mxu1 %v11047_v24 }
 0xac7   :  { %8113 = vmatprep.subr.bf16.mxu0 %v11065_v52  ;;  %8145 = vmatprep.subr.bf16.mxu1 %v11067_v14 }
 0xaca   :  { %8115 = vmatpush1.bf16.msra.mxu0 %v11085_v16  ;;  %8147 = vmatpush1.bf16.msra.mxu1 %v11087_v58 }
 0xacb   :  { %8117 = vmatprep.subr.bf16.mxu0 %v11105_v21  ;;  %8149 = vmatprep.subr.bf16.mxu1 %v11107_v60 }
 0xace   :  { %8119 = vmatpush1.bf16.msra.mxu0 %v11113_v15  ;;  %8151 = vmatpush1.bf16.msra.mxu1 %v11115_v0 }
 0xacf   :  { %8153 = vmatprep.subr.bf16.mxu0 %v10827_v43  ;;  %8185 = vmatprep.subr.bf16.mxu1 %v10829_v8 }
 0xb84   :  { %v5186_v13 = vpop.f32.mrb[24].mxu0  ;;  %v5257_v39 = vpop.f32.mrb[18].mxu1 }
 0xb85   :  { %v8540_v45 = vadd.f32 %v5186_v13, %v11170_v62  ;;  %v5188_v34 = vpop.f32.mrb[25].mxu0  ;;  %v5259_v53 = vpop.f32.mrb[19].mxu1  ;;  %v8556_v7 = vadd.f32 %v5257_v39, %v11185_v59 }
 0xb86   :  { %v8541_v27 = vadd.f32 %v5188_v34, %v11174_v3  ;;  %v8557_v18 = vadd.f32 %v5259_v53, %v11180_v61 }
 0xb87   :  { %v7174_v42 = vmul.f32 -1.442695, %v8540_v45 }
 0xb88   :  { %v7175_v63 = vmul.f32 -1.442695, %v8541_v27  ;;  %v7176_v38 = vmul.f32 -1.442695, %v8557_v18 }
 0xb89   :  { %8840 = vpow2.f32 %v7174_v42 }
 0xb8a   :  { %8842 = vpow2.f32 %v7175_v63 }
 0xb8b   :  { %8844 = vpow2.f32 %v7176_v38 }
 0xb8c   :  { %8846 = vtanh.f32 %v8556_v7 }
 0xb93   :  { %v8841_v37 = vpop.eup %8840 }
 0xb94   :  { %v8843_v47 = vpop.eup %8842  ;;  %v5269_v33 = vadd.f32 1.0, %v8841_v37 }
 0xb95   :  { %v5275_v51 = vadd.f32 1.0, %v8843_v47  ;;  %v8845_v40 = vpop.eup %8844 }
 0xb96   :  { %8848 = vrcp.f32 %v5269_v33  ;;  %v8847_v41 = vpop.eup %8846  ;;  %v5282_v5 = vadd.f32 1.0, %v8845_v40 }
 0xb97   :  { %8850 = vrcp.f32 %v5275_v51 }
 0xb98   :  { %8852 = vrcp.f32 %v5282_v5 }
 0xba0   :  { %v8849_v19 = vpop.eup %8848 }
 0xba1   :  { %v8851_v23 = vpop.eup %8850  ;;  %v5286_v55 = vmul.f32 %v8849_v19, %v8847_v41 }
 0xba2   :  { %v5285_v29 = vmul.f32 %v8851_v23, %v11188_v36  ;;  %v8853_v31 = vpop.eup %8852 }
 0xba4   :  { %v11230_v28 = vadd.f32 %v5286_v55, %v5285_v29 }
 0xba6   :  { %8854 = vtanh.f32 %v11230_v28 }
 0xbb0   :  { %v8855_v10 = vpop.eup %8854 }
 0xbb1   :  { %v5289_v20 = vmul.f32 %v8855_v10, %v8853_v31 }
 0xbb3   :  { %5359 = vmatmul.mubr.f32.vlgmr.msra.gmra.mrb[26].mxu0 %v5289_v20  ;;  %5430 = vmatmul.mubr.f32.vlgmr.msra.gmra.mrb[20].mxu1 %v5289_v20 }
 0xbb4   :  { %8155 = vmatpush1.bf16.msra.mxu0 %v10845_v57  ;;  %8187 = vmatpush1.bf16.msra.mxu1 %v10847_v46 }
 0xbb5   :  { %8157 = vmatprep.subr.bf16.mxu0 %v10865_v6  ;;  %8189 = vmatprep.subr.bf16.mxu1 %v10867_v12 }
 0xbb6   :  { %5532 = vmatprep.mubr.f32.mxu0 %v9031_v32  ;;  %5603 = vmatprep.mubr.f32.mxu1 %v9031_v32 }
 0xbb8   :  { %8159 = vmatpush1.bf16.msra.mxu0 %v10885_v30  ;;  %8191 = vmatpush1.bf16.msra.mxu1 %v10887_v2 }
 0xbb9   :  { %8161 = vmatprep.subr.bf16.mxu0 %v10905_v1  ;;  %8193 = vmatprep.subr.bf16.mxu1 %v10907_v4 }
 0xbbc   :  { %8163 = vmatpush1.bf16.msra.mxu0 %v10925_v22  ;;  %8195 = vmatpush1.bf16.msra.mxu1 %v10927_v25 }
 0xbbd   :  { %8165 = vmatprep.subr.bf16.mxu0 %v10945_v54  ;;  %8197 = vmatprep.subr.bf16.mxu1 %v10947_v35 }
 0xbc0   :  { %8167 = vmatpush1.bf16.msra.mxu0 %v10965_v44  ;;  %8199 = vmatpush1.bf16.msra.mxu1 %v10967_v56 }
 0xbc1   :  { %8169 = vmatprep.subr.bf16.mxu0 %v10985_v49  ;;  %8201 = vmatprep.subr.bf16.mxu1 %v10987_v50 }
 0xbc4   :  { %8171 = vmatpush1.bf16.msra.mxu0 %v11005_v17  ;;  %8203 = vmatpush1.bf16.msra.mxu1 %v11007_v48 }
 0xbc5   :  { %8173 = vmatprep.subr.bf16.mxu0 %v11025_v11  ;;  %8205 = vmatprep.subr.bf16.mxu1 %v11027_v26 }
 0xbc8   :  { %8175 = vmatpush1.bf16.msra.mxu0 %v11045_v9  ;;  %8207 = vmatpush1.bf16.msra.mxu1 %v11047_v24 }
 0xbc9   :  { %8177 = vmatprep.subr.bf16.mxu0 %v11065_v52  ;;  %8209 = vmatprep.subr.bf16.mxu1 %v11067_v14 }
 0xbcc   :  { %8179 = vmatpush1.bf16.msra.mxu0 %v11085_v16  ;;  %8211 = vmatpush1.bf16.msra.mxu1 %v11087_v58 }
 0xbcd   :  { %8181 = vmatprep.subr.bf16.mxu0 %v11105_v21  ;;  %8213 = vmatprep.subr.bf16.mxu1 %v11107_v60 }
 0xbd0   :  { %8183 = vmatpush1.bf16.msra.mxu0 %v11113_v15  ;;  %8215 = vmatpush1.bf16.msra.mxu1 %v11115_v0 }
 0xbd1   :  { %8217 = vmatprep.subr.bf16.mxu0 %v10827_v43  ;;  %8249 = vmatprep.subr.bf16.mxu1 %v10829_v8 }
 0xc86   :  { %v5360_v36 = vpop.f32.mrb[26].mxu0  ;;  %v5431_v13 = vpop.f32.mrb[20].mxu1 }
 0xc87   :  { %v8542_v39 = vadd.f32 %v5360_v36, %v11170_v62  ;;  %v5362_v45 = vpop.f32.mrb[27].mxu0  ;;  %v5433_v34 = vpop.f32.mrb[21].mxu1  ;;  %v8558_v38 = vadd.f32 %v5431_v13, %v11185_v59 }
 0xc88   :  { %v8543_v53 = vadd.f32 %v5362_v45, %v11174_v3  ;;  %v8559_v63 = vadd.f32 %v5433_v34, %v11180_v61 }
 0xc89   :  { %v7177_v27 = vmul.f32 -1.442695, %v8542_v39 }
 0xc8a   :  { %v7178_v42 = vmul.f32 -1.442695, %v8543_v53  ;;  %v7179_v18 = vmul.f32 -1.442695, %v8559_v63 }
 0xc8b   :  { %8856 = vpow2.f32 %v7177_v27 }
 0xc8c   :  { %8858 = vpow2.f32 %v7178_v42 }
 0xc8d   :  { %8860 = vpow2.f32 %v7179_v18 }
 0xc8e   :  { %8862 = vtanh.f32 %v8558_v38 }
 0xc95   :  { %v8857_v7 = vpop.eup %8856 }
 0xc96   :  { %v8859_v37 = vpop.eup %8858  ;;  %v5443_v47 = vadd.f32 1.0, %v8857_v7 }
 0xc97   :  { %v5449_v33 = vadd.f32 1.0, %v8859_v37  ;;  %v8861_v51 = vpop.eup %8860 }
 0xc98   :  { %8864 = vrcp.f32 %v5443_v47  ;;  %v8863_v40 = vpop.eup %8862  ;;  %v5456_v55 = vadd.f32 1.0, %v8861_v51 }
 0xc99   :  { %8866 = vrcp.f32 %v5449_v33 }
 0xc9a   :  { %8868 = vrcp.f32 %v5456_v55 }
 0xca2   :  { %v8865_v41 = vpop.eup %8864 }
 0xca3   :  { %v8867_v19 = vpop.eup %8866  ;;  %v5460_v23 = vmul.f32 %v8865_v41, %v8863_v40 }
 0xca4   :  { %v5459_v5 = vmul.f32 %v8867_v19, %v11230_v28  ;;  %v8869_v31 = vpop.eup %8868 }
 0xca6   :  { %v11272_v29 = vadd.f32 %v5460_v23, %v5459_v5 }
 0xca8   :  { %8870 = vtanh.f32 %v11272_v29 }
 0xcb2   :  { %v8871_v10 = vpop.eup %8870 }
 0xcb3   :  { %v5463_v20 = vmul.f32 %v8871_v10, %v8869_v31 }
 0xcb5   :  { %5533 = vmatmul.mubr.f32.vlgmr.msra.gmra.mrb[28].mxu0 %v5463_v20  ;;  %5604 = vmatmul.mubr.f32.vlgmr.msra.gmra.mrb[22].mxu1 %v5463_v20 }
 0xcb6   :  { %8219 = vmatpush1.bf16.msra.mxu0 %v10845_v57  ;;  %8251 = vmatpush1.bf16.msra.mxu1 %v10847_v46 }
 0xcb7   :  { %8221 = vmatprep.subr.bf16.mxu0 %v10865_v6  ;;  %8253 = vmatprep.subr.bf16.mxu1 %v10867_v12 }
 0xcb8   :  { %5706 = vmatprep.mubr.f32.mxu0 %v9031_v32  ;;  %5777 = vmatprep.mubr.f32.mxu1 %v9031_v32 }
 0xcba   :  { %8223 = vmatpush1.bf16.msra.mxu0 %v10885_v30  ;;  %8255 = vmatpush1.bf16.msra.mxu1 %v10887_v2 }
 0xcbb   :  { %8225 = vmatprep.subr.bf16.mxu0 %v10905_v1  ;;  %8257 = vmatprep.subr.bf16.mxu1 %v10907_v4 }
 0xcbe   :  { %8227 = vmatpush1.bf16.msra.mxu0 %v10925_v22  ;;  %8259 = vmatpush1.bf16.msra.mxu1 %v10927_v25 }
 0xcbf   :  { %8229 = vmatprep.subr.bf16.mxu0 %v10945_v54  ;;  %8261 = vmatprep.subr.bf16.mxu1 %v10947_v35 }
 0xcc2   :  { %8231 = vmatpush1.bf16.msra.mxu0 %v10965_v44  ;;  %8263 = vmatpush1.bf16.msra.mxu1 %v10967_v56 }
 0xcc3   :  { %8233 = vmatprep.subr.bf16.mxu0 %v10985_v49  ;;  %8265 = vmatprep.subr.bf16.mxu1 %v10987_v50 }
 0xcc6   :  { %8235 = vmatpush1.bf16.msra.mxu0 %v11005_v17  ;;  %8267 = vmatpush1.bf16.msra.mxu1 %v11007_v48 }
 0xcc7   :  { %8237 = vmatprep.subr.bf16.mxu0 %v11025_v11  ;;  %8269 = vmatprep.subr.bf16.mxu1 %v11027_v26 }
 0xcca   :  { %8239 = vmatpush1.bf16.msra.mxu0 %v11045_v9  ;;  %8271 = vmatpush1.bf16.msra.mxu1 %v11047_v24 }
 0xccb   :  { %8241 = vmatprep.subr.bf16.mxu0 %v11065_v52  ;;  %8273 = vmatprep.subr.bf16.mxu1 %v11067_v14 }
 0xcce   :  { %8243 = vmatpush1.bf16.msra.mxu0 %v11085_v16  ;;  %8275 = vmatpush1.bf16.msra.mxu1 %v11087_v58 }
 0xccf   :  { %8245 = vmatprep.subr.bf16.mxu0 %v11105_v21  ;;  %8277 = vmatprep.subr.bf16.mxu1 %v11107_v60 }
 0xcd2   :  { %8247 = vmatpush1.bf16.msra.mxu0 %v11113_v15  ;;  %8279 = vmatpush1.bf16.msra.mxu1 %v11115_v0 }
 0xcd3   :  { %8281 = vmatprep.subr.bf16.mxu0 %v10827_v43  ;;  %8313 = vmatprep.subr.bf16.mxu1 %v10829_v8 }
 0xd88   :  { %v5534_v28 = vpop.f32.mrb[28].mxu0  ;;  %v5605_v36 = vpop.f32.mrb[22].mxu1 }
 0xd89   :  { %v8544_v13 = vadd.f32 %v5534_v28, %v11170_v62  ;;  %v5536_v39 = vpop.f32.mrb[29].mxu0  ;;  %v5607_v45 = vpop.f32.mrb[23].mxu1  ;;  %v8560_v18 = vadd.f32 %v5605_v36, %v11185_v59 }
 0xd8a   :  { %v8545_v34 = vadd.f32 %v5536_v39, %v11174_v3  ;;  %v8561_v42 = vadd.f32 %v5607_v45, %v11180_v61 }
 0xd8b   :  { %v7180_v53 = vmul.f32 -1.442695, %v8544_v13 }
 0xd8c   :  { %v7181_v27 = vmul.f32 -1.442695, %v8545_v34  ;;  %v7182_v63 = vmul.f32 -1.442695, %v8561_v42 }
 0xd8d   :  { %8872 = vpow2.f32 %v7180_v53 }
 0xd8e   :  { %8874 = vpow2.f32 %v7181_v27 }
 0xd8f   :  { %8876 = vpow2.f32 %v7182_v63 }
 0xd90   :  { %8878 = vtanh.f32 %v8560_v18 }
 0xd97   :  { %v8873_v38 = vpop.eup %8872 }
 0xd98   :  { %v8875_v7 = vpop.eup %8874  ;;  %v5617_v37 = vadd.f32 1.0, %v8873_v38 }
 0xd99   :  { %v5623_v47 = vadd.f32 1.0, %v8875_v7  ;;  %v8877_v33 = vpop.eup %8876 }
 0xd9a   :  { %8880 = vrcp.f32 %v5617_v37  ;;  %v8879_v51 = vpop.eup %8878  ;;  %v5630_v23 = vadd.f32 1.0, %v8877_v33 }
 0xd9b   :  { %8882 = vrcp.f32 %v5623_v47 }
 0xd9c   :  { %8884 = vrcp.f32 %v5630_v23 }
 0xda4   :  { %v8881_v40 = vpop.eup %8880 }
 0xda5   :  { %v8883_v41 = vpop.eup %8882  ;;  %v5634_v19 = vmul.f32 %v8881_v40, %v8879_v51 }
 0xda6   :  { %v5633_v55 = vmul.f32 %v8883_v41, %v11272_v29  ;;  %v8885_v31 = vpop.eup %8884 }
 0xda8   :  { %v11314_v5 = vadd.f32 %v5634_v19, %v5633_v55 }
 0xdaa   :  { %8886 = vtanh.f32 %v11314_v5 }
 0xdb4   :  { %v8887_v10 = vpop.eup %8886 }
 0xdb5   :  { %v5637_v20 = vmul.f32 %v8887_v10, %v8885_v31 }
 0xdb7   :  { %5707 = vmatmul.mubr.f32.vlgmr.msra.gmra.mrb[30].mxu0 %v5637_v20  ;;  %5778 = vmatmul.mubr.f32.vlgmr.msra.gmra.mrb[24].mxu1 %v5637_v20 }
 0xdb8   :  { %8283 = vmatpush1.bf16.msra.mxu0 %v10845_v57  ;;  %8315 = vmatpush1.bf16.msra.mxu1 %v10847_v46 }
 0xdb9   :  { %8285 = vmatprep.subr.bf16.mxu0 %v10865_v6  ;;  %8317 = vmatprep.subr.bf16.mxu1 %v10867_v12 }
 0xdba   :  { %5880 = vmatprep.mubr.f32.mxu0 %v9031_v32  ;;  %5951 = vmatprep.mubr.f32.mxu1 %v9031_v32 }
 0xdbc   :  { %8287 = vmatpush1.bf16.msra.mxu0 %v10885_v30  ;;  %8319 = vmatpush1.bf16.msra.mxu1 %v10887_v2 }
 0xdbd   :  { %8289 = vmatprep.subr.bf16.mxu0 %v10905_v1  ;;  %8321 = vmatprep.subr.bf16.mxu1 %v10907_v4 }
 0xdc0   :  { %8291 = vmatpush1.bf16.msra.mxu0 %v10925_v22  ;;  %8323 = vmatpush1.bf16.msra.mxu1 %v10927_v25 }
 0xdc1   :  { %8293 = vmatprep.subr.bf16.mxu0 %v10945_v54  ;;  %8325 = vmatprep.subr.bf16.mxu1 %v10947_v35 }
 0xdc4   :  { %8295 = vmatpush1.bf16.msra.mxu0 %v10965_v44  ;;  %8327 = vmatpush1.bf16.msra.mxu1 %v10967_v56 }
 0xdc5   :  { %8297 = vmatprep.subr.bf16.mxu0 %v10985_v49  ;;  %8329 = vmatprep.subr.bf16.mxu1 %v10987_v50 }
 0xdc8   :  { %8299 = vmatpush1.bf16.msra.mxu0 %v11005_v17  ;;  %8331 = vmatpush1.bf16.msra.mxu1 %v11007_v48 }
 0xdc9   :  { %8301 = vmatprep.subr.bf16.mxu0 %v11025_v11  ;;  %8333 = vmatprep.subr.bf16.mxu1 %v11027_v26 }
 0xdcc   :  { %8303 = vmatpush1.bf16.msra.mxu0 %v11045_v9  ;;  %8335 = vmatpush1.bf16.msra.mxu1 %v11047_v24 }
 0xdcd   :  { %8305 = vmatprep.subr.bf16.mxu0 %v11065_v52  ;;  %8337 = vmatprep.subr.bf16.mxu1 %v11067_v14 }
 0xdd0   :  { %8307 = vmatpush1.bf16.msra.mxu0 %v11085_v16  ;;  %8339 = vmatpush1.bf16.msra.mxu1 %v11087_v58 }
 0xdd1   :  { %8309 = vmatprep.subr.bf16.mxu0 %v11105_v21  ;;  %8341 = vmatprep.subr.bf16.mxu1 %v11107_v60 }
 0xdd4   :  { %8311 = vmatpush1.bf16.msra.mxu0 %v11113_v15  ;;  %8343 = vmatpush1.bf16.msra.mxu1 %v11115_v0 }
 0xdd5   :  { %8345 = vmatprep.subr.bf16.mxu0 %v10827_v43  ;;  %8377 = vmatprep.subr.bf16.mxu1 %v10829_v8 }
 0xe8a   :  { %v5708_v29 = vpop.f32.mrb[30].mxu0  ;;  %v5779_v28 = vpop.f32.mrb[24].mxu1 }
 0xe8b   :  { %v8546_v36 = vadd.f32 %v5708_v29, %v11170_v62  ;;  %v5710_v13 = vpop.f32.mrb[31].mxu0  ;;  %v5781_v39 = vpop.f32.mrb[25].mxu1  ;;  %v8562_v63 = vadd.f32 %v5779_v28, %v11185_v59 }
 0xe8c   :  { %v8547_v45 = vadd.f32 %v5710_v13, %v11174_v3  ;;  %v8563_v27 = vadd.f32 %v5781_v39, %v11180_v61 }
 0xe8d   :  { %v7183_v34 = vmul.f32 -1.442695, %v8546_v36 }
 0xe8e   :  { %v7184_v53 = vmul.f32 -1.442695, %v8547_v45  ;;  %v7185_v42 = vmul.f32 -1.442695, %v8563_v27 }
 0xe8f   :  { %8888 = vpow2.f32 %v7183_v34 }
 0xe90   :  { %8890 = vpow2.f32 %v7184_v53 }
 0xe91   :  { %8892 = vpow2.f32 %v7185_v42 }
 0xe92   :  { %8894 = vtanh.f32 %v8562_v63 }
 0xe99   :  { %v8889_v18 = vpop.eup %8888 }
 0xe9a   :  { %v8891_v38 = vpop.eup %8890  ;;  %v5791_v7 = vadd.f32 1.0, %v8889_v18 }
 0xe9b   :  { %v5797_v37 = vadd.f32 1.0, %v8891_v38  ;;  %v8893_v47 = vpop.eup %8892 }
 0xe9c   :  { %8896 = vrcp.f32 %v5791_v7  ;;  %v8895_v33 = vpop.eup %8894  ;;  %v5804_v19 = vadd.f32 1.0, %v8893_v47 }
 0xe9d   :  { %8898 = vrcp.f32 %v5797_v37 }
 0xe9e   :  { %8900 = vrcp.f32 %v5804_v19 }
 0xea6   :  { %v8897_v51 = vpop.eup %8896 }
 0xea7   :  { %v8899_v40 = vpop.eup %8898  ;;  %v5808_v41 = vmul.f32 %v8897_v51, %v8895_v33 }
 0xea8   :  { %v5807_v23 = vmul.f32 %v8899_v40, %v11314_v5  ;;  %v8901_v31 = vpop.eup %8900 }
 0xeaa   :  { %v11356_v55 = vadd.f32 %v5808_v41, %v5807_v23 }
 0xeac   :  { %8902 = vtanh.f32 %v11356_v55 }
 0xeb6   :  { %v8903_v10 = vpop.eup %8902 }
 0xeb7   :  { %v5811_v20 = vmul.f32 %v8903_v10, %v8901_v31  ;;  %v6337_v10 = vld [vmem:[%s11520_s11 + $0x18] sm:$0xff] }
 0xeb9   :  { %5881 = vmatmul.mubr.f32.vlgmr.msra.gmra.mrb[32].mxu0 %v5811_v20  ;;  %5952 = vmatmul.mubr.f32.vlgmr.msra.gmra.mrb[26].mxu1 %v5811_v20 }
 0xeba   :  { %8347 = vmatpush1.bf16.msra.mxu0 %v10845_v57  ;;  %8379 = vmatpush1.bf16.msra.mxu1 %v10847_v46 }
 0xebb   :  { %8349 = vmatprep.subr.bf16.mxu0 %v10865_v6  ;;  %8381 = vmatprep.subr.bf16.mxu1 %v10867_v12 }
 0xebc   :  { %6054 = vmatprep.mubr.f32.mxu0 %v9031_v32  ;;  %6125 = vmatprep.mubr.f32.mxu1 %v9031_v32 }
 0xebe   :  { %8351 = vmatpush1.bf16.msra.mxu0 %v10885_v30  ;;  %8383 = vmatpush1.bf16.msra.mxu1 %v10887_v2 }
 0xebf   :  { %8353 = vmatprep.subr.bf16.mxu0 %v10905_v1  ;;  %8385 = vmatprep.subr.bf16.mxu1 %v10907_v4 }
 0xec2   :  { %8355 = vmatpush1.bf16.msra.mxu0 %v10925_v22  ;;  %8387 = vmatpush1.bf16.msra.mxu1 %v10927_v25 }
 0xec3   :  { %8357 = vmatprep.subr.bf16.mxu0 %v10945_v54  ;;  %8389 = vmatprep.subr.bf16.mxu1 %v10947_v35 }
 0xec6   :  { %8359 = vmatpush1.bf16.msra.mxu0 %v10965_v44  ;;  %8391 = vmatpush1.bf16.msra.mxu1 %v10967_v56 }
 0xec7   :  { %8361 = vmatprep.subr.bf16.mxu0 %v10985_v49  ;;  %8393 = vmatprep.subr.bf16.mxu1 %v10987_v50 }
 0xeca   :  { %8363 = vmatpush1.bf16.msra.mxu0 %v11005_v17  ;;  %8395 = vmatpush1.bf16.msra.mxu1 %v11007_v48 }
 0xecb   :  { %8365 = vmatprep.subr.bf16.mxu0 %v11025_v11  ;;  %8397 = vmatprep.subr.bf16.mxu1 %v11027_v26 }
 0xece   :  { %8367 = vmatpush1.bf16.msra.mxu0 %v11045_v9  ;;  %8399 = vmatpush1.bf16.msra.mxu1 %v11047_v24 }
 0xecf   :  { %8369 = vmatprep.subr.bf16.mxu0 %v11065_v52  ;;  %8401 = vmatprep.subr.bf16.mxu1 %v11067_v14 }
 0xed2   :  { %8371 = vmatpush1.bf16.msra.mxu0 %v11085_v16  ;;  %8403 = vmatpush1.bf16.msra.mxu1 %v11087_v58 }
 0xed3   :  { %8373 = vmatprep.subr.bf16.mxu0 %v11105_v21  ;;  %8405 = vmatprep.subr.bf16.mxu1 %v11107_v60 }
 0xed6   :  { %8375 = vmatpush1.bf16.msra.mxu0 %v11113_v15  ;;  %8407 = vmatpush1.bf16.msra.mxu1 %v11115_v0 }
 0xed7   :  { %8409 = vmatprep.subr.bf16.mxu0 %v10827_v43  ;;  %8441 = vmatprep.subr.bf16.mxu1 %v10829_v8 }
 0xf8c   :  { %v5882_v5 = vpop.f32.mrb[32].mxu0  ;;  %v5953_v29 = vpop.f32.mrb[26].mxu1 }
 0xf8d   :  { %v8548_v28 = vadd.f32 %v5882_v5, %v11170_v62  ;;  %v5884_v36 = vpop.f32.mrb[33].mxu0  ;;  %v5955_v13 = vpop.f32.mrb[27].mxu1  ;;  %v8564_v42 = vadd.f32 %v5953_v29, %v11185_v59  ;;  %v6338_v5 = vld [vmem:[%s11520_s11 + $0x20] sm:$0xff]  ;;  %v6339_v29 = vld [vmem:[%s11520_s11 + $0x28] sm:$0xff] }
 0xf8e   :  { %v8549_v39 = vadd.f32 %v5884_v36, %v11174_v3  ;;  %v8565_v53 = vadd.f32 %v5955_v13, %v11180_v61  ;;  %v6340_v36 = vld [vmem:[%s11520_s11 + $0x30] sm:$0xff]  ;;  %v6341_v13 = vld [vmem:[%s11520_s11 + $0x38] sm:$0xff] }
 0xf8f   :  { %v7186_v45 = vmul.f32 -1.442695, %v8548_v28  ;;  %v8479_v28 = vpack.c.bf16 %v6339_v29, %v6338_v5 }
 0xf90   :  { %v7187_v34 = vmul.f32 -1.442695, %v8549_v39  ;;  %v7188_v27 = vmul.f32 -1.442695, %v8565_v53  ;;  %v8482_v39 = vpack.c.bf16 %v6341_v13, %v6340_v36 }
 0xf91   :  { %8904 = vpow2.f32 %v7186_v45  ;;  %v6342_v45 = vld [vmem:[%s11520_s11 + $0x40] sm:$0xff] }
 0xf92   :  { %8906 = vpow2.f32 %v7187_v34  ;;  %v6343_v34 = vld [vmem:[%s11520_s11 + $0x48] sm:$0xff] }
 0xf93   :  { %8908 = vpow2.f32 %v7188_v27  ;;  %v8485_v53 = vpack.c.bf16 %v6343_v34, %v6342_v45  ;;  %v6344_v27 = vld [vmem:[%s11520_s11 + $0x50] sm:$0xff] }
 0xf94   :  { %8910 = vtanh.f32 %v8564_v42  ;;  %v6345_v42 = vld [vmem:[%s11520_s11 + $0x58] sm:$0xff] }
 0xf9b   :  { %v8905_v43 = vpop.eup %8904 }
 0xf9c   :  { %v8907_v63 = vpop.eup %8906  ;;  %v5965_v8 = vadd.f32 1.0, %v8905_v43  ;;  %v6346_v43 = vld [vmem:[%s11520_s11 + $0x60] sm:$0xff] }
 0xf9d   :  { %v5971_v18 = vadd.f32 1.0, %v8907_v63  ;;  %v8909_v38 = vpop.eup %8908  ;;  %v8488_v63 = vpack.c.bf16 %v6345_v42, %v6344_v27 }
 0xf9e   :  { %8912 = vrcp.f32 %v5965_v8  ;;  %v8911_v7 = vpop.eup %8910  ;;  %v5978_v51 = vadd.f32 1.0, %v8909_v38  ;;  %v6347_v8 = vld [vmem:[%s11520_s11 + $0x68] sm:$0xff]  ;;  %v6350_v38 = vld [vmem:[%s11519_s10] sm:$0xff] }
 0xf9f   :  { %8914 = vrcp.f32 %v5971_v18  ;;  %v6351_v18 = vld [vmem:[%s11521_s12] sm:$0xff] }
 0xfa0   :  { %8916 = vrcp.f32 %v5978_v51 }
 0xfa8   :  { %v8913_v37 = vpop.eup %8912 }
 0xfa9   :  { %v8915_v47 = vpop.eup %8914  ;;  %v5982_v33 = vmul.f32 %v8913_v37, %v8911_v7  ;;  %v8491_v7 = vpack.c.bf16 %v6347_v8, %v6346_v43  ;;  %v6348_v37 = vld [vmem:[%s11520_s11 + $0x70] sm:$0xff] }
 0xfaa   :  { %v5981_v40 = vmul.f32 %v8915_v47, %v11356_v55  ;;  %v8917_v19 = vpop.eup %8916  ;;  %v6336_v55 = vld [vmem:[%s11520_s11 + $0x10] sm:$0xff]  ;;  %v6349_v47 = vld [vmem:[%s11520_s11 + $0x78] sm:$0xff] }
 0xfab   :  { %v8476_v20 = vpack.c.bf16 %v6337_v10, %v6336_v55 }
 0xfac   :  { %v11398_v41 = vadd.f32 %v5982_v33, %v5981_v40  ;;  %v8494_v33 = vpack.c.bf16 %v6349_v47, %v6348_v37 }
 0xfae   :  { %8918 = vtanh.f32 %v11398_v41 }
 0xfb8   :  { %v8919_v23 = vpop.eup %8918 }
 0xfb9   :  { %v5985_v31 = vmul.f32 %v8919_v23, %v8917_v19 }
 0xfbb   :  { %6055 = vmatmul.mubr.f32.vlgmr.msra.gmra.mrb[34].mxu0 %v5985_v31  ;;  %6126 = vmatmul.mubr.f32.vlgmr.msra.gmra.mrb[28].mxu1 %v5985_v31 }
 0xfbc   :  { %8411 = vmatpush1.bf16.msra.mxu0 %v10845_v57  ;;  %8443 = vmatpush1.bf16.msra.mxu1 %v10847_v46 }
 0xfbd   :  { %8413 = vmatprep.subr.bf16.mxu0 %v10865_v6  ;;  %8445 = vmatprep.subr.bf16.mxu1 %v10867_v12 }
 0xfbe   :  { %6228 = vmatprep.mubr.f32.mxu0 %v9031_v32  ;;  %6299 = vmatprep.mubr.f32.mxu1 %v9031_v32 }
 0xfc0   :  { %8415 = vmatpush1.bf16.msra.mxu0 %v10885_v30  ;;  %8447 = vmatpush1.bf16.msra.mxu1 %v10887_v2 }
 0xfc1   :  { %8417 = vmatprep.subr.bf16.mxu0 %v10905_v1  ;;  %8449 = vmatprep.subr.bf16.mxu1 %v10907_v4 }
 0xfc4   :  { %8419 = vmatpush1.bf16.msra.mxu0 %v10925_v22  ;;  %8451 = vmatpush1.bf16.msra.mxu1 %v10927_v25 }
 0xfc5   :  { %8421 = vmatprep.subr.bf16.mxu0 %v10945_v54  ;;  %8453 = vmatprep.subr.bf16.mxu1 %v10947_v35 }
 0xfc8   :  { %8423 = vmatpush1.bf16.msra.mxu0 %v10965_v44  ;;  %8455 = vmatpush1.bf16.msra.mxu1 %v10967_v56 }
 0xfc9   :  { %8425 = vmatprep.subr.bf16.mxu0 %v10985_v49  ;;  %8457 = vmatprep.subr.bf16.mxu1 %v10987_v50 }
 0xfcc   :  { %8427 = vmatpush1.bf16.msra.mxu0 %v11005_v17  ;;  %8459 = vmatpush1.bf16.msra.mxu1 %v11007_v48 }
 0xfcd   :  { %8429 = vmatprep.subr.bf16.mxu0 %v11025_v11  ;;  %8461 = vmatprep.subr.bf16.mxu1 %v11027_v26 }
 0xfd0   :  { %8431 = vmatpush1.bf16.msra.mxu0 %v11045_v9  ;;  %8463 = vmatpush1.bf16.msra.mxu1 %v11047_v24 }
 0xfd1   :  { %8433 = vmatprep.subr.bf16.mxu0 %v11065_v52  ;;  %8465 = vmatprep.subr.bf16.mxu1 %v11067_v14 }
 0xfd4   :  { %8435 = vmatpush1.bf16.msra.mxu0 %v11085_v16  ;;  %8467 = vmatpush1.bf16.msra.mxu1 %v11087_v58 }
 0xfd5   :  { %8437 = vmatprep.subr.bf16.mxu0 %v11105_v21  ;;  %8469 = vmatprep.subr.bf16.mxu1 %v11107_v60  ;;  %v6334_v21 = vld [vmem:[%s11520_s11] sm:$0xff]  ;;  %v6335_v60 = vld [vmem:[%s11520_s11 + $0x8] sm:$0xff] }
 0xfd8   :  { %8439 = vmatpush1.bf16.msra.mxu0 %v11113_v15  ;;  %8471 = vmatpush1.bf16.msra.mxu1 %v11115_v0  ;;  %v8473_v15 = vpack.c.bf16 %v6335_v60, %v6334_v21  ;;  %v9032_v0 = vmov 0.0|0.0  }
 0xfd9   :  { %7248 = vmatprep.subr.mxu0 %v9031_v32  ;;  %8472 = vmatprep.subr.bf16.mxu1 %v9032_v0 }
0x108e   :  { %v6056_v57 = vpop.f32.mrb[34].mxu0  ;;  %v6127_v46 = vpop.f32.mrb[28].mxu1 }
0x108f   :  { %v8550_v6 = vadd.f32 %v6056_v57, %v11170_v62  ;;  %v6058_v12 = vpop.f32.mrb[35].mxu0  ;;  %v6129_v30 = vpop.f32.mrb[29].mxu1  ;;  %v8566_v54 = vadd.f32 %v6127_v46, %v11185_v59 }
0x1090   :  { %v8551_v2 = vadd.f32 %v6058_v12, %v11174_v3  ;;  %v8567_v22 = vadd.f32 %v6129_v30, %v11180_v61 }
0x1091   :  { %v7189_v1 = vmul.f32 -1.442695, %v8550_v6 }
0x1092   :  { %v7190_v4 = vmul.f32 -1.442695, %v8551_v2  ;;  %v7191_v25 = vmul.f32 -1.442695, %v8567_v22 }
0x1093   :  { %8920 = vpow2.f32 %v7189_v1 }
0x1094   :  { %8922 = vpow2.f32 %v7190_v4 }
0x1095   :  { %8924 = vpow2.f32 %v7191_v25 }
0x1096   :  { %8926 = vtanh.f32 %v8566_v54 }
0x109d   :  { %v8921_v35 = vpop.eup %8920 }
0x109e   :  { %v8923_v44 = vpop.eup %8922  ;;  %v6139_v56 = vadd.f32 1.0, %v8921_v35 }
0x109f   :  { %v6145_v49 = vadd.f32 1.0, %v8923_v44  ;;  %v8925_v50 = vpop.eup %8924 }
0x10a0   :  { %8928 = vrcp.f32 %v6139_v56  ;;  %v8927_v17 = vpop.eup %8926  ;;  %v6152_v9 = vadd.f32 1.0, %v8925_v50 }
0x10a1   :  { %8930 = vrcp.f32 %v6145_v49 }
0x10a2   :  { %8932 = vrcp.f32 %v6152_v9 }
0x10aa   :  { %v8929_v48 = vpop.eup %8928 }
0x10ab   :  { %v8931_v11 = vpop.eup %8930  ;;  %v6156_v26 = vmul.f32 %v8929_v48, %v8927_v17 }
0x10ac   :  { %v6155_v24 = vmul.f32 %v8931_v11, %v11398_v41  ;;  %v8933_v14 = vpop.eup %8932  ;;  %v7196_v11 = vld [vmem:[%s11522_s13] ss:$0 sm:$0xff] }
0x10ae   :  { %v11439_v52 = vadd.f32 %v6156_v26, %v6155_v24 }
0x10b0   :  { %8934 = vtanh.f32 %v11439_v52 }
0x10ba   :  { %v8935_v16 = vpop.eup %8934 }
0x10bb   :  { %v6159_v58 = vmul.f32 %v8935_v16, %v8933_v14 }
0x10bd   :  { %6229 = vmatmul.mubr.f32.vlgmr.msra.gmra.mrb[36].mxu0 %v6159_v58  ;;  %6300 = vmatmul.mubr.f32.vlgmr.msra.gmra.mrb[30].mxu1 %v6159_v58 }
0x10be   :  { %8474 = vmatpush3.bf16.msra.mxu1 %v8473_v15  ;;  %7250 = vmatprep.mubr.msk.f32.mxu0 %vm9033_vm3, %v9031_v32 }
0x10bf   :  { %8475 = vmatprep.subr.bf16.mxu1 %v9032_v0  ;;  %7285 = vmatprep.mubr.msk.f32.mxu1 %vm9033_vm3, %v9031_v32 }
0x10c0   :  { %7249 = vmatpush3.msra.mxu0 %v6351_v18 }
0x10c1   :  { %7251 = vmatmul.mubr.msk.f32.vlgmr.msra.gmra.mrb[38].mxu0 %vm6352_vm2, %v6350_v38 }
0x10c2   :  { %8477 = vmatpush3.bf16.msra.mxu1 %v8476_v20 }
0x10c3   :  { %8478 = vmatprep.subr.bf16.mxu1 %v9032_v0 }
0x10c6   :  { %8480 = vmatpush3.bf16.msra.mxu1 %v8479_v28 }
0x10c7   :  { %8481 = vmatprep.subr.bf16.mxu1 %v9032_v0 }
0x10ca   :  { %8483 = vmatpush3.bf16.msra.mxu1 %v8482_v39 }
0x10cb   :  { %8484 = vmatprep.subr.bf16.mxu1 %v9032_v0 }
0x10ce   :  { %8486 = vmatpush3.bf16.msra.mxu1 %v8485_v53 }
0x10cf   :  { %8487 = vmatprep.subr.bf16.mxu1 %v9032_v0 }
0x10d2   :  { %8489 = vmatpush3.bf16.msra.mxu1 %v8488_v63 }
0x10d3   :  { %8490 = vmatprep.subr.bf16.mxu1 %v9032_v0 }
0x10d6   :  { %8492 = vmatpush3.bf16.msra.mxu1 %v8491_v7 }
0x10d7   :  { %8493 = vmatprep.subr.bf16.mxu1 %v9032_v0 }
0x10da   :  { %8495 = vmatpush3.bf16.msra.mxu1 %v8494_v33 }
0x1190   :  { %v6230_v32 = vpop.f32.mrb[36].mxu0  ;;  %v6301_v51 = vpop.f32.mrb[30].mxu1 }
0x1191   :  { %v8552_v40 = vadd.f32 %v6230_v32, %v11170_v62  ;;  %v6232_v41 = vpop.f32.mrb[37].mxu0  ;;  %v6303_v19 = vpop.f32.mrb[31].mxu1  ;;  %v8568_v12 = vadd.f32 %v6301_v51, %v11185_v59 }
0x1192   :  { %v8553_v23 = vadd.f32 %v6232_v41, %v11174_v3  ;;  %v8569_v46 = vadd.f32 %v6303_v19, %v11180_v61 }
0x1193   :  { %v7192_v31 = vmul.f32 -1.442695, %v8552_v40 }
0x1194   :  { %v7193_v57 = vmul.f32 -1.442695, %v8553_v23  ;;  %v7194_v6 = vmul.f32 -1.442695, %v8569_v46  ;;  %v6422_v50 = vpop.f32.mrb[38].mxu0 }
0x1195   :  { %8936 = vpow2.f32 %v7192_v31  ;;  %v7252_v17 = vpop.f32.mrb[39].mxu0 }
0x1196   :  { %8938 = vpow2.f32 %v7193_v57 }
0x1197   :  { %8940 = vpow2.f32 %v7194_v6 }
0x1198   :  { %8942 = vtanh.f32 %v8568_v12 }
0x119f   :  { %v8937_v30 = vpop.eup %8936 }
0x11a0   :  { %v8939_v2 = vpop.eup %8938  ;;  %v6313_v1 = vadd.f32 1.0, %v8937_v30 }
0x11a1   :  { %v6319_v4 = vadd.f32 1.0, %v8939_v2  ;;  %v8941_v62 = vpop.eup %8940 }
0x11a2   :  { %8944 = vrcp.f32 %v6313_v1  ;;  %v8943_v22 = vpop.eup %8942  ;;  %v6326_v35 = vadd.f32 1.0, %v8941_v62 }
0x11a3   :  { %8946 = vrcp.f32 %v6319_v4 }
0x11a4   :  { %8948 = vrcp.f32 %v6326_v35 }
0x11ac   :  { %v8945_v3 = vpop.eup %8944 }
0x11ad   :  { %v8947_v25 = vpop.eup %8946  ;;  %v6330_v54 = vmul.f32 %v8945_v3, %v8943_v22 }
0x11ae   :  { %v6329_v44 = vmul.f32 %v8947_v25, %v11439_v52  ;;  %v8949_v59 = vpop.eup %8948 }
0x11b0   :  { %v6331_v61 = vadd.f32 %v6330_v54, %v6329_v44 }
0x11b2   :  { %8950 = vtanh.f32 %v6331_v61 }
0x11bc   :  { %v8951_v56 = vpop.eup %8950 }
0x11bd   :  { %v6333_v49 = vmul.f32 %v8951_v56, %v8949_v59 }
0x11bf   :  { %7286 = vmatmul.mubr.f32.vlgmr.msra.gmra.mrb[32].mxu1 %v6333_v49 }
0x1292   :  { %v6492_v48 = vpop.f32.mrb[32].mxu1 }
0x1293   :  { %v6493_v26 = vadd.f32 %v6492_v48, %v6422_v50  ;;  %v7287_v9 = vpop.f32.mrb[33].mxu1 }
0x1295   :  { %v6503_v24 = vadd.f32 %v7196_v11, %v6493_v26 }
0x1297   :  { %6505 = vst.msk [vmem:[%s11523_s14] sm:$0xff] %vm6504_vm4, %v6503_v24 }
0x1298   :  { %6510 = vsyncpa [#allocation9], 1 }
0x1299   :  { %6511 = vsyncmov [#allocation7] }
0x129c   :  { %s6512_s17 = vpop.sfrf %6511 }
0x129d   :  { %p7197_p5 = scmp.ne.s32.totalorder %s6512_s17, 0 }
0x129f   :  { %6516 = shalt.err (%p7197_p5)  }
0x12a0   :  { %6518 = vsyncmov [#allocation7 + $0x1] }
0x12a3   :  { %s6519_s18 = vpop.sfrf %6518 }
0x12a4   :  { %p7198_p6 = scmp.ne.s32.totalorder %s6519_s18, 0 }
0x12a6   :  { %6523 = shalt.err (%p7198_p6)  }
0x12a7   :  { %6525 = vsyncmov [#allocation7 + $0x2] }
0x12aa   :  { %s6526_s19 = vpop.sfrf %6525 }
0x12ab   :  { %p7199_p7 = scmp.ne.s32.totalorder %s6526_s19, 0 }
0x12ad   :  { %6530 = shalt.err (%p7199_p7)  }
0x12ae   :  { %6532 = vsyncmov [#allocation7 + $0x3] }
0x12b1   :  { %s6533_s13 = vpop.sfrf %6532 }
0x12b2   :  { %p7200_p8 = scmp.ne.s32.totalorder %s6533_s13, 0 }
0x12b4   :  { %6537 = shalt.err (%p7200_p8)  }
0x12b5   :  { %6539 = vsyncmov [#allocation7 + $0x4] }
0x12b8   :  { %s6540_s20 = vpop.sfrf %6539 }
0x12b9   :  { %p7201_p9 = scmp.ne.s32.totalorder %s6540_s20, 0 }
0x12bb   :  { %6544 = shalt.err (%p7201_p9)  }
0x12bc   :  { %6546 = vsyncmov [#allocation7 + $0x5] }
0x12bf   :  { %s6547_s14 = vpop.sfrf %6546 }
0x12c0   :  { %p7202_p10 = scmp.ne.s32.totalorder %s6547_s14, 0 }
0x12c2   :  { %6551 = shalt.err (%p7202_p10)  }
0x12c3   :  { %6553 = vsyncmov [#allocation7 + $0x6] }
0x12c6   :  { %s6554_s21 = vpop.sfrf %6553 }
0x12c7   :  { %p7203_p11 = scmp.ne.s32.totalorder %s6554_s21, 0 }
0x12c9   :  { %6558 = shalt.err (%p7203_p11)  }
0x12ca   :  { %6560 = vsyncmov [#allocation7 + $0x7] }
0x12cd   :  { %s6561_s0 = vpop.sfrf %6560 }
0x12ce   :  { %p7204_p12 = scmp.ne.s32.totalorder %s6561_s0, 0 }
0x12d0   :  { %6565 = shalt.err (%p7204_p12)  }
0x12d1   :  { %6567 = vsyncmov [#allocation7 + $0x8] }
0x12d4   :  { %s6568_s22 = vpop.sfrf %6567 }
0x12d5   :  { %p7205_p13 = scmp.ne.s32.totalorder %s6568_s22, 0 }
0x12d7   :  { %6572 = shalt.err (%p7205_p13)  }
0x12d8   :  { %6574 = vsyncmov [#allocation7 + $0x9] }
0x12db   :  { %s6575_s23 = vpop.sfrf %6574 }
0x12dc   :  { %p7206_p0 = scmp.ne.s32.totalorder %s6575_s23, 0 }
0x12de   :  { %6579 = shalt.err (%p7206_p0)  }
0x12df   :  { %6581 = vsyncmov [#allocation7 + $0xa] }
0x12e2   :  { %s6582_s24 = vpop.sfrf %6581 }
0x12e3   :  { %p7207_p1 = scmp.ne.s32.totalorder %s6582_s24, 0 }
0x12e5   :  { %6586 = shalt.err (%p7207_p1)  }
0x12e6   :  { %6588 = vsyncmov [#allocation7 + $0xb] }
0x12e9   :  { %s6589_s25 = vpop.sfrf %6588 }
0x12ea   :  { %p7208_p2 = scmp.ne.s32.totalorder %s6589_s25, 0 }
0x12ec   :  { %6593 = shalt.err (%p7208_p2)  }
0x12ed   :  { %6595 = vsyncmov [#allocation7 + $0xc] }
0x12f0   :  { %s6596_s26 = vpop.sfrf %6595 }
0x12f1   :  { %p7209_p3 = scmp.ne.s32.totalorder %s6596_s26, 0 }
0x12f3   :  { %6600 = shalt.err (%p7209_p3)  }
0x12f4   :  { %6602 = vsyncmov [#allocation7 + $0xd] }
0x12f7   :  { %s6603_s6 = vpop.sfrf %6602 }
0x12f8   :  { %p7210_p4 = scmp.ne.s32.totalorder %s6603_s6, 0 }
0x12fa   :  { %6607 = shalt.err (%p7210_p4)  }
0x12fb   :  { %6609 = vsyncmov [#allocation7 + $0xe] }
0x12fe   :  { %s6610_s27 = vpop.sfrf %6609 }
0x12ff   :  { %p7211_p5 = scmp.ne.s32.totalorder %s6610_s27, 0 }
0x1301   :  { %6614 = shalt.err (%p7211_p5)  }
0x1302   :  { %6616 = vsyncmov [#allocation7 + $0xf] }
0x1305   :  { %s6617_s8 = vpop.sfrf %6616 }
0x1306   :  { %p7212_p6 = scmp.ne.s32.totalorder %s6617_s8, 0 }
0x1308   :  { %6621 = shalt.err (%p7212_p6)  }
0x1309   :  { %6623 = vsyncmov [#allocation7 + $0x10] }
0x130c   :  { %s6624_s2 = vpop.sfrf %6623 }
0x130d   :  { %p7213_p7 = scmp.ne.s32.totalorder %s6624_s2, 0 }
0x130f   :  { %6628 = shalt.err (%p7213_p7)  }
0x1310   :  { %6630 = vsyncmov [#allocation7 + $0x11] }
0x1313   :  { %s6631_s9 = vpop.sfrf %6630 }
0x1314   :  { %p7214_p8 = scmp.ne.s32.totalorder %s6631_s9, 0 }
0x1316   :  { %6635 = shalt.err (%p7214_p8)  }
0x1317   :  { %6637 = vsyncmov [#allocation7 + $0x12] }
0x131a   :  { %s6638_s28 = vpop.sfrf %6637 }
0x131b   :  { %p7215_p9 = scmp.ne.s32.totalorder %s6638_s28, 0 }
0x131d   :  { %6642 = shalt.err (%p7215_p9)  }
0x131e   :  { %6644 = vsyncmov [#allocation7 + $0x13] }
0x1321   :  { %s6645_s29 = vpop.sfrf %6644 }
0x1322   :  { %p7216_p10 = scmp.ne.s32.totalorder %s6645_s29, 0 }
0x1324   :  { %6649 = shalt.err (%p7216_p10)  }
0x1325   :  { %6651 = vsyncmov [#allocation7 + $0x14] }
0x1328   :  { %s6652_s1 = vpop.sfrf %6651 }
0x1329   :  { %p7217_p11 = scmp.ne.s32.totalorder %s6652_s1, 0 }
0x132b   :  { %6656 = shalt.err (%p7217_p11)  }
0x132c   :  { %6658 = vsyncmov [#allocation7 + $0x15] }
0x132f   :  { %s6659_s5 = vpop.sfrf %6658 }
0x1330   :  { %p7218_p12 = scmp.ne.s32.totalorder %s6659_s5, 0 }
0x1332   :  { %6663 = shalt.err (%p7218_p12)  }
0x1333   :  { %6665 = vsyncmov [#allocation7 + $0x16] }
0x1336   :  { %s6666_s30 = vpop.sfrf %6665 }
0x1337   :  { %p7219_p13 = scmp.ne.s32.totalorder %s6666_s30, 0 }
0x1339   :  { %6670 = shalt.err (%p7219_p13)  }
0x133a   :  { %6672 = vsyncmov [#allocation7 + $0x17] }
0x133d   :  { %s6673_s3 = vpop.sfrf %6672 }
0x133e   :  { %p7220_p0 = scmp.ne.s32.totalorder %s6673_s3, 0 }
0x1340   :  { %6677 = shalt.err (%p7220_p0)  }
0x1341   :  { %6679 = vsyncmov [#allocation7 + $0x18] }
0x1344   :  { %s6680_s4 = vpop.sfrf %6679 }
0x1345   :  { %p7221_p1 = scmp.ne.s32.totalorder %s6680_s4, 0 }
0x1347   :  { %6684 = shalt.err (%p7221_p1)  }
0x1348   :  { %6686 = vsyncmov [#allocation7 + $0x19] }
0x134b   :  { %s6687_s15 = vpop.sfrf %6686 }
0x134c   :  { %p7222_p2 = scmp.ne.s32.totalorder %s6687_s15, 0 }
0x134e   :  { %6691 = shalt.err (%p7222_p2)  }
0x134f   :  { %6693 = vsyncmov [#allocation7 + $0x1a] }
0x1352   :  { %s6694_s12 = vpop.sfrf %6693 }
0x1353   :  { %p7223_p3 = scmp.ne.s32.totalorder %s6694_s12, 0 }
0x1355   :  { %6698 = shalt.err (%p7223_p3)  }
0x1356   :  { %6700 = vsyncmov [#allocation7 + $0x1b] }
0x1359   :  { %s6701_s10 = vpop.sfrf %6700 }
0x135a   :  { %p7224_p4 = scmp.ne.s32.totalorder %s6701_s10, 0 }
0x135c   :  { %6705 = shalt.err (%p7224_p4)  }
0x135d   :  { %6707 = vsyncmov [#allocation7 + $0x1c] }
0x1360   :  { %s6708_s11 = vpop.sfrf %6707 }
0x1361   :  { %p7225_p5 = scmp.ne.s32.totalorder %s6708_s11, 0 }
0x1363   :  { %6712 = shalt.err (%p7225_p5)  }
0x1364   :  { %6714 = vsyncmov [#allocation7 + $0x1d] }
0x1367   :  { %s6715_s7 = vpop.sfrf %6714 }
0x1368   :  { %p7226_p6 = scmp.ne.s32.totalorder %s6715_s7, 0 }
0x136a   :  { %6719 = shalt.err (%p7226_p6)  }
0x136b   :  { %6721 = vsyncmov [#allocation7 + $0x1e] }
0x136e   :  { %s6722_s16 = vpop.sfrf %6721 }
0x136f   :  { %p7227_p7 = scmp.ne.s32.totalorder %s6722_s16, 0 }
0x1371   :  { %6726 = shalt.err (%p7227_p7)  }
0x1372   :  { %6728 = vsyncmov [#allocation7 + $0x1f] }
0x1375   :  { %s6729_s17 = vpop.sfrf %6728 }
0x1376   :  { %p7228_p8 = scmp.ne.s32.totalorder %s6729_s17, 0 }
0x1378   :  { %6733 = shalt.err (%p7228_p8)  }

</bundles_post_ra>
